<compile_context>
chip_gen: v6e
topology: v6e:2x2x1
jax: 0.10.0
libtpu: 0.0.40
codegen_flags: <defaults>
</compile_context>

<pallas_src>
import functools

import jax
import jax.numpy as jnp
from jax.experimental import pallas as pl
from jax.experimental.pallas import tpu as pltpu

BN_EPS = 1e-5
LRELU_SLOPE = 0.2


# ---------------------------------------------------------------------------
# Pallas kernel: conv-as-matmul + fused BatchNorm(batch stats) + LeakyReLU
# ---------------------------------------------------------------------------
def conv_bn_lrelu_kernel(p_ref, w_ref, g_ref, b_ref, o_ref, sum_ref, ssq_ref,
                         *, m_true):
    """One M-tile of W(Cout,K) @ patchesT(K,TM); lane-dense (Cout, TM) result.

    The full (nsteps, Cout, TM) output slab is VMEM-resident across the grid
    (constant out index_map). Per-channel sum / sum-of-squares accumulate in
    f32 scratch. On the last grid step the BN + LeakyReLU epilogue normalizes
    the whole resident slab in place (per-channel scale/shift precomputed, so
    the elementwise pass is one FMA + one select per element).
    """
    i = pl.program_id(0)
    nsteps = pl.num_programs(0)

    @pl.when(i == 0)
    def _init():
        sum_ref[...] = jnp.zeros_like(sum_ref)
        ssq_ref[...] = jnp.zeros_like(ssq_ref)

    # bf16 x bf16 -> f32 accumulate on the MXU; output lanes = TM (dense).
    acc = jnp.dot(w_ref[...], p_ref[...], preferred_element_type=jnp.float32)
    sum_ref[...] += jnp.sum(acc, axis=1, keepdims=True)        # XLU lane reduce
    ssq_ref[...] += jnp.sum(acc * acc, axis=1, keepdims=True)
    o_ref[i] = acc.astype(o_ref.dtype)

    @pl.when(i == nsteps - 1)
    def _epilogue():
        inv_m = 1.0 / m_true
        mean = sum_ref[...] * inv_m                            # (Cout, 1)
        # Clamp: E[x^2] - E[x]^2 in f32 can go slightly negative.
        var = jnp.maximum(ssq_ref[...] * inv_m - mean * mean, 0.0)
        scale = g_ref[...] * jax.lax.rsqrt(var + BN_EPS)       # (Cout, 1)
        shift = b_ref[...] - mean * scale
        x = o_ref[...].astype(jnp.float32)                     # (nsteps, Cout, TM)
        y = x * scale[None] + shift[None]
        o_ref[...] = jnp.where(y > 0, y, LRELU_SLOPE * y).astype(o_ref.dtype)


# ---------------------------------------------------------------------------
# Glue: transposed im2col (CNHW layout, no big transposes), tiling, driver
# ---------------------------------------------------------------------------
def im2col_T(x_cnhw, kh, kw, stride, pad):
    """(C,B,H,W) -> patchesT (C*kh*kw, B*Ho*Wo); K-order is (cin, kh, kw).

    Keeping activations in CNHW makes this a pad + strided-slice + stack +
    reshape with the minor (spatial) dims untouched, i.e. no costly XLA
    transpose of the 16x-expanded patches tensor.
    """
    C, B, H, W = x_cnhw.shape
    Ho = (H + 2 * pad - kh) // stride + 1
    Wo = (W + 2 * pad - kw) // stride + 1
    xp = jnp.pad(x_cnhw, ((0, 0), (0, 0), (pad, pad), (pad, pad)))
    cols = []
    for i in range(kh):
        for j in range(kw):
            cols.append(xp[:, :, i:i + stride * Ho:stride, j:j + stride * Wo:stride])
    p = jnp.stack(cols, axis=1)                       # (C, kh*kw, B, Ho, Wo)
    return p.reshape(C * kh * kw, B * Ho * Wo), Ho, Wo


def pick_tile(m, k):
    """Largest M-tile (multiple of 128, <=2048) dividing padded M, with the
    double-buffered bf16 patches tile kept well under v5e's 16 MiB scoped-VMEM
    default."""
    mp = pl.cdiv(m, 128) * 128
    budget = 8 * 1024 * 1024          # 2 buffers * bf16 bytes <= budget
    for cand in (2048, 1024, 512, 256, 128):
        if mp % cand == 0 and k * cand * 2 * 2 <= budget:
            return cand, mp
    return 128, mp


def conv_bn_lrelu(x_cnhw, w, gamma, beta, *, stride, pad):
    """Conv2d(bias=False) + BatchNorm2d (training stats) + LeakyReLU(0.2).

    Input/output activations are bf16 CNHW; one pallas_call per layer.
    """
    Cin, B, H, W = x_cnhw.shape
    Cout, _, kh, kw = w.shape
    pT, Ho, Wo = im2col_T(x_cnhw, kh, kw, stride, pad)    # bf16 (K, M)
    K, M = pT.shape
    tm, Mp = pick_tile(M, K)
    nsteps = Mp // tm
    if Mp != M:
        # Padded (zero) patch columns contribute exactly 0 to sum/ssq (no conv
        # bias), and mean/var divide by the true element count M.
        pT = jnp.pad(pT, ((0, 0), (0, Mp - M)))
    wmat = w.reshape(Cout, K).astype(jnp.bfloat16)

    kern = functools.partial(conv_bn_lrelu_kernel, m_true=float(M))
    # TODO(synk): on v7x the fully-"arbitrary" grid forgoes a 2-TC megacore
    # split of the M axis; we trade that for the fused BN epilogue (one HBM
    # round trip) — revisit if M grows large.
    out = pl.pallas_call(
        kern,
        out_shape=jax.ShapeDtypeStruct((nsteps, Cout, tm), jnp.bfloat16),
        grid=(nsteps,),
        in_specs=[
            pl.BlockSpec((K, tm), lambda i: (0, i)),          # patchesT tile
            pl.BlockSpec((Cout, K), lambda i: (0, 0)),        # weight (resident)
            pl.BlockSpec((Cout, 1), lambda i: (0, 0)),        # gamma
            pl.BlockSpec((Cout, 1), lambda i: (0, 0)),        # beta
        ],
        out_specs=pl.BlockSpec((nsteps, Cout, tm), lambda i: (0, 0, 0)),
        scratch_shapes=[
            pltpu.VMEM((Cout, 1), jnp.float32),               # per-channel sum
            pltpu.VMEM((Cout, 1), jnp.float32),               # per-channel sum sq
        ],
        compiler_params=pltpu.CompilerParams(
            dimension_semantics=("arbitrary",)),
    )(pT, wmat, gamma.reshape(Cout, 1), beta.reshape(Cout, 1))

    # (nsteps, Cout, tm) -> (Cout, M) -> CNHW for the next layer. For
    # single-step layers this is a free reshape; for the first layer it is a
    # cheap major-dim transpose (minor dim preserved).
    out = out.transpose(1, 0, 2).reshape(Cout, Mp)[:, :M]
    return out.reshape(Cout, B, Ho, Wo)


# ---------------------------------------------------------------------------
# Full discriminator forward
# ---------------------------------------------------------------------------
@jax.jit
def discriminator_forward(img, label, params):
    B, C, H, W = img.shape
    n_classes = label.shape[1]
    # labels.view(B,-1,1,1).repeat(1,1,H,W); concat on channel axis — built
    # directly in CNHW (channel-major) layout.
    img_c = jnp.transpose(img, (1, 0, 2, 3))                       # (C, B, H, W)
    lab_c = jnp.broadcast_to(jnp.transpose(label)[:, :, None, None],
                             (n_classes, B, H, W)).astype(img.dtype)
    x = jnp.concatenate([img_c, lab_c], axis=0).astype(jnp.bfloat16)

    for (w, g, b) in params["blocks"]:
        x = conv_bn_lrelu(x, w, g, b, stride=2, pad=1)

    # Final Conv2d(ndf*8 -> 1, k=4, s=1, p=0, bias=False): output is 1x1 and
    # M = B (tiny), so a Pallas launch is pure overhead -> plain JAX contraction.
    assert x.shape[2] == 4 and x.shape[3] == 4
    logits = jnp.einsum("cbhw,ochw->bo", x.astype(jnp.float32),
                        params["w_last"])                          # (B, 1)
    return jax.nn.sigmoid(logits)                                  # Flatten+Sigmoid


def init_params(key, channel, n_classes, ndf):
    nc = channel
    chans = [nc + n_classes, ndf * 2, ndf * 2, ndf * 4, ndf * 4, ndf * 8]
    keys = jax.random.split(key, 3 * (len(chans) - 1) + 1)
    blocks = []
    ki = 0
    for li in range(len(chans) - 1):
        cin, cout = chans[li], chans[li + 1]
        w = 0.05 * jax.random.normal(keys[ki], (cout, cin, 4, 4), jnp.float32); ki += 1
        g = 1.0 + 0.1 * jax.random.normal(keys[ki], (cout,), jnp.float32); ki += 1
        b = 0.1 * jax.random.normal(keys[ki], (cout,), jnp.float32); ki += 1
        blocks.append((w, g, b))
    w_last = 0.05 * jax.random.normal(keys[ki], (1, ndf * 8, 4, 4), jnp.float32)
    return {"blocks": blocks, "w_last": w_last}


if __name__ == "__main__":
    # Small but architecturally consistent config: the five stride-2 convs plus
    # the final 4x4 valid conv require a 128x128 input to reach a 1x1 output.
    B, C, H, W = 2, 1, 128, 128
    n_classes = 8
    ndf = 8

    key = jax.random.PRNGKey(0)
    k_img, k_lab, k_par = jax.random.split(key, 3)
    img = jax.random.normal(k_img, (B, C, H, W), jnp.float32)
    label_idx = jax.random.randint(k_lab, (B,), 0, n_classes)
    label = jax.nn.one_hot(label_idx, n_classes, dtype=jnp.float32)  # (B, n_classes)

    params = init_params(k_par, C, n_classes, ndf)

    score = discriminator_forward(img, label, params)
    score = jax.block_until_ready(score)
    assert score.shape == (B, 1)
    assert bool(jnp.all(jnp.isfinite(score)))
    print("KERNEL_OK")
</pallas_src>

<mosaic_0001>
module attributes {stable_mosaic.version = 11 : i64} {
  func.func @conv_bn_lrelu_kernel(%arg0: i32, %arg1: memref<144x2048xbf16, #tpu.memory_space<vmem>>, %arg2: memref<16x144xbf16, #tpu.memory_space<vmem>>, %arg3: memref<16x1xf32, #tpu.memory_space<vmem>>, %arg4: memref<16x1xf32, #tpu.memory_space<vmem>>, %arg5: memref<4x16x2048xbf16, #tpu.memory_space<vmem>>, %arg6: memref<16x1xf32, #tpu.memory_space<vmem>>, %arg7: memref<16x1xf32, #tpu.memory_space<vmem>>) attributes {dimension_semantics = [#tpu.dimension_semantics<arbitrary>], iteration_bounds = array<i64: 4>, scalar_prefetch = 0 : i64, scratch_operands = 2 : i64, tpu.core_type = #tpu.core_type<tc>, window_params = [{transform_indices = @transform_0, window_bounds = array<i64: 144, 2048>}, {pipeline_mode = #tpu.pipeline_mode<synchronous>, transform_indices = @transform_1, window_bounds = array<i64: 16, 144>}, {pipeline_mode = #tpu.pipeline_mode<synchronous>, transform_indices = @transform_2, window_bounds = array<i64: 16, 1>}, {pipeline_mode = #tpu.pipeline_mode<synchronous>, transform_indices = @transform_3, window_bounds = array<i64: 16, 1>}, {pipeline_mode = #tpu.pipeline_mode<synchronous>, transform_indices = @transform_4, window_bounds = array<i64: 4, 16, 2048>}]} {
    %c0_i32 = arith.constant 0 : i32
    %0 = arith.cmpi eq, %arg0, %c0_i32 : i32
    %1 = arith.extui %0 : i1 to i32
    %c0_i32_0 = arith.constant 0 : i32
    %2 = arith.cmpi ne, %1, %c0_i32_0 : i32
    scf.if %2 {
      %cst_17 = arith.constant 0.000000e+00 : f32
      %25 = vector.broadcast %cst_17 : f32 to vector<16x1xf32>
      %c0_18 = arith.constant 0 : index
      %c0_19 = arith.constant 0 : index
      %26 = vector.load %arg6[%c0_18, %c0_19] : memref<16x1xf32, #tpu.memory_space<vmem>>, vector<16x1xf32>
      tpu.vector_store %arg6[%c0_18, %c0_19], %25 {strides = array<i32>} : memref<16x1xf32, #tpu.memory_space<vmem>>, vector<16x1xf32>,
      %cst_20 = arith.constant 0.000000e+00 : f32
      %27 = vector.broadcast %cst_20 : f32 to vector<16x1xf32>
      %c0_21 = arith.constant 0 : index
      %c0_22 = arith.constant 0 : index
      %28 = vector.load %arg7[%c0_21, %c0_22] : memref<16x1xf32, #tpu.memory_space<vmem>>, vector<16x1xf32>
      tpu.vector_store %arg7[%c0_21, %c0_22], %27 {strides = array<i32>} : memref<16x1xf32, #tpu.memory_space<vmem>>, vector<16x1xf32>,
    } else {
    }
    %c0 = arith.constant 0 : index
    %c0_1 = arith.constant 0 : index
    %3 = vector.load %arg2[%c0, %c0_1] : memref<16x144xbf16, #tpu.memory_space<vmem>>, vector<16x144xbf16>
    %c0_2 = arith.constant 0 : index
    %c0_3 = arith.constant 0 : index
    %4 = vector.load %arg1[%c0_2, %c0_3] : memref<144x2048xbf16, #tpu.memory_space<vmem>>, vector<144x2048xbf16>
    %cst = arith.constant dense<0.000000e+00> : vector<16x2048xf32>
    %5 = tpu.matmul %3, %4, %cst {dimension_numbers = #tpu.dot_dimension_numbers<[1], [0], [0], [1], [0, 0, 1, 1], [], []>} : vector<16x144xbf16>, vector<144x2048xbf16>, vector<16x2048xf32> -> vector<16x2048xf32>
    %c0_4 = arith.constant 0 : index
    %c0_5 = arith.constant 0 : index
    %6 = vector.load %arg6[%c0_4, %c0_5] : memref<16x1xf32, #tpu.memory_space<vmem>>, vector<16x1xf32>
    %cst_6 = arith.constant dense<0.000000e+00> : vector<16xf32>
    %7 = vector.multi_reduction <add>, %5, %cst_6 [1] : vector<16x2048xf32> to vector<16xf32>
    %8 = vector.shape_cast %7 : vector<16xf32> to vector<16x1xf32>
    %9 = arith.addf %6, %8 : vector<16x1xf32>
    %c0_7 = arith.constant 0 : index
    %c0_8 = arith.constant 0 : index
    %10 = vector.load %arg6[%c0_7, %c0_8] : memref<16x1xf32, #tpu.memory_space<vmem>>, vector<16x1xf32>
    tpu.vector_store %arg6[%c0_7, %c0_8], %9 {strides = array<i32>} : memref<16x1xf32, #tpu.memory_space<vmem>>, vector<16x1xf32>,
    %c0_9 = arith.constant 0 : index
    %c0_10 = arith.constant 0 : index
    %11 = vector.load %arg7[%c0_9, %c0_10] : memref<16x1xf32, #tpu.memory_space<vmem>>, vector<16x1xf32>
    %12 = arith.mulf %5, %5 : vector<16x2048xf32>
    %cst_11 = arith.constant dense<0.000000e+00> : vector<16xf32>
    %13 = vector.multi_reduction <add>, %12, %cst_11 [1] : vector<16x2048xf32> to vector<16xf32>
    %14 = vector.shape_cast %13 : vector<16xf32> to vector<16x1xf32>
    %15 = arith.addf %11, %14 : vector<16x1xf32>
    %c0_12 = arith.constant 0 : index
    %c0_13 = arith.constant 0 : index
    %16 = vector.load %arg7[%c0_12, %c0_13] : memref<16x1xf32, #tpu.memory_space<vmem>>, vector<16x1xf32>
    tpu.vector_store %arg7[%c0_12, %c0_13], %15 {strides = array<i32>} : memref<16x1xf32, #tpu.memory_space<vmem>>, vector<16x1xf32>,
    %17 = arith.truncf %5 : vector<16x2048xf32> to vector<16x2048xbf16>
    %18 = arith.index_cast %arg0 : i32 to index
    %c0_14 = arith.constant 0 : index
    %c0_15 = arith.constant 0 : index
    %19 = vector.load %arg5[%18, %c0_14, %c0_15] : memref<4x16x2048xbf16, #tpu.memory_space<vmem>>, vector<1x16x2048xbf16>
    %20 = vector.shape_cast %19 : vector<1x16x2048xbf16> to vector<16x2048xbf16>
    %21 = vector.shape_cast %17 : vector<16x2048xbf16> to vector<1x16x2048xbf16>
    tpu.vector_store %arg5[%18, %c0_14, %c0_15], %21 {strides = array<i32>} : memref<4x16x2048xbf16, #tpu.memory_space<vmem>>, vector<1x16x2048xbf16>,
    %c3_i32 = arith.constant 3 : i32
    %22 = arith.cmpi eq, %arg0, %c3_i32 : i32
    %23 = arith.extui %22 : i1 to i32
    %c0_i32_16 = arith.constant 0 : i32
    %24 = arith.cmpi ne, %23, %c0_i32_16 : i32
    scf.if %24 {
      %c0_17 = arith.constant 0 : index
      %c0_18 = arith.constant 0 : index
      %25 = vector.load %arg6[%c0_17, %c0_18] : memref<16x1xf32, #tpu.memory_space<vmem>>, vector<16x1xf32>
      %cst_19 = arith.constant 1.22070313E-4 : f32
      %26 = vector.broadcast %cst_19 : f32 to vector<16x1xf32>
      %27 = arith.mulf %25, %26 : vector<16x1xf32>
      %c0_20 = arith.constant 0 : index
      %c0_21 = arith.constant 0 : index
      %28 = vector.load %arg7[%c0_20, %c0_21] : memref<16x1xf32, #tpu.memory_space<vmem>>, vector<16x1xf32>
      %cst_22 = arith.constant 1.22070313E-4 : f32
      %29 = vector.broadcast %cst_22 : f32 to vector<16x1xf32>
      %30 = arith.mulf %28, %29 : vector<16x1xf32>
      %31 = arith.mulf %27, %27 : vector<16x1xf32>
      %32 = arith.subf %30, %31 : vector<16x1xf32>
      %cst_23 = arith.constant 0.000000e+00 : f32
      %33 = vector.broadcast %cst_23 : f32 to vector<16x1xf32>
      %34 = arith.maximumf %32, %33 : vector<16x1xf32>
      %c0_24 = arith.constant 0 : index
      %c0_25 = arith.constant 0 : index
      %35 = vector.load %arg3[%c0_24, %c0_25] : memref<16x1xf32, #tpu.memory_space<vmem>>, vector<16x1xf32>
      %cst_26 = arith.constant 9.99999974E-6 : f32
      %36 = vector.broadcast %cst_26 : f32 to vector<16x1xf32>
      %37 = arith.addf %34, %36 : vector<16x1xf32>
      %38 = math.rsqrt %37 : vector<16x1xf32>
      %39 = arith.mulf %35, %38 : vector<16x1xf32>
      %c0_27 = arith.constant 0 : index
      %c0_28 = arith.constant 0 : index
      %40 = vector.load %arg4[%c0_27, %c0_28] : memref<16x1xf32, #tpu.memory_space<vmem>>, vector<16x1xf32>
      %41 = arith.mulf %27, %39 : vector<16x1xf32>
      %42 = arith.subf %40, %41 : vector<16x1xf32>
      %c0_29 = arith.constant 0 : index
      %c0_30 = arith.constant 0 : index
      %c0_31 = arith.constant 0 : index
      %43 = vector.load %arg5[%c0_29, %c0_30, %c0_31] : memref<4x16x2048xbf16, #tpu.memory_space<vmem>>, vector<4x16x2048xbf16>
      %44 = arith.extf %43 : vector<4x16x2048xbf16> to vector<4x16x2048xf32>
      %45 = vector.shape_cast %39 : vector<16x1xf32> to vector<1x16x1xf32>
      %46 = vector.broadcast %45 : vector<1x16x1xf32> to vector<4x16x2048xf32>
      %47 = arith.mulf %44, %46 : vector<4x16x2048xf32>
      %48 = vector.shape_cast %42 : vector<16x1xf32> to vector<1x16x1xf32>
      %49 = vector.broadcast %48 : vector<1x16x1xf32> to vector<4x16x2048xf32>
      %50 = arith.addf %47, %49 : vector<4x16x2048xf32>
      %cst_32 = arith.constant 0.000000e+00 : f32
      %51 = vector.broadcast %cst_32 : f32 to vector<4x16x2048xf32>
      %52 = arith.cmpf ogt, %50, %51 : vector<4x16x2048xf32>
      %cst_33 = arith.constant 2.000000e-01 : f32
      %53 = vector.broadcast %cst_33 : f32 to vector<4x16x2048xf32>
      %54 = arith.mulf %53, %50 : vector<4x16x2048xf32>
      %55 = arith.select %52, %50, %54 : vector<4x16x2048xi1>, vector<4x16x2048xf32>
      %56 = arith.truncf %55 : vector<4x16x2048xf32> to vector<4x16x2048xbf16>
      %c0_34 = arith.constant 0 : index
      %c0_35 = arith.constant 0 : index
      %c0_36 = arith.constant 0 : index
      %57 = vector.load %arg5[%c0_34, %c0_35, %c0_36] : memref<4x16x2048xbf16, #tpu.memory_space<vmem>>, vector<4x16x2048xbf16>
      tpu.vector_store %arg5[%c0_34, %c0_35, %c0_36], %56 {strides = array<i32>} : memref<4x16x2048xbf16, #tpu.memory_space<vmem>>, vector<4x16x2048xbf16>,
    } else {
    }
    return
  }
  func.func @transform_0(%arg0: i32) -> (i32, i32) {
    %c0_i32 = arith.constant 0 : i32
    %c0_i32_0 = arith.constant 0 : i32
    return %c0_i32, %arg0 : i32, i32
  }
  func.func @transform_1(%arg0: i32) -> (i32, i32) {
    %c0_i32 = arith.constant 0 : i32
    %c0_i32_0 = arith.constant 0 : i32
    %c0_i32_1 = arith.constant 0 : i32
    return %c0_i32, %c0_i32_0 : i32, i32
  }
  func.func @transform_2(%arg0: i32) -> (i32, i32) {
    %c0_i32 = arith.constant 0 : i32
    %c0_i32_0 = arith.constant 0 : i32
    %c0_i32_1 = arith.constant 0 : i32
    return %c0_i32, %c0_i32_0 : i32, i32
  }
  func.func @transform_3(%arg0: i32) -> (i32, i32) {
    %c0_i32 = arith.constant 0 : i32
    %c0_i32_0 = arith.constant 0 : i32
    %c0_i32_1 = arith.constant 0 : i32
    return %c0_i32, %c0_i32_0 : i32, i32
  }
  func.func @transform_4(%arg0: i32) -> (i32, i32, i32) {
    %c0_i32 = arith.constant 0 : i32
    %c0_i32_0 = arith.constant 0 : i32
    %c0_i32_1 = arith.constant 0 : i32
    %c0_i32_2 = arith.constant 0 : i32
    return %c0_i32, %c0_i32_0, %c0_i32_1 : i32, i32, i32
  }
}

module attributes {stable_mosaic.version = 11 : i64} {
  func.func @conv_bn_lrelu_kernel(%arg0: i32, %arg1: memref<256x2048xbf16, #tpu.memory_space<vmem>>, %arg2: memref<16x256xbf16, #tpu.memory_space<vmem>>, %arg3: memref<16x1xf32, #tpu.memory_space<vmem>>, %arg4: memref<16x1xf32, #tpu.memory_space<vmem>>, %arg5: memref<1x16x2048xbf16, #tpu.memory_space<vmem>>, %arg6: memref<16x1xf32, #tpu.memory_space<vmem>>, %arg7: memref<16x1xf32, #tpu.memory_space<vmem>>) attributes {dimension_semantics = [#tpu.dimension_semantics<arbitrary>], iteration_bounds = array<i64: 1>, scalar_prefetch = 0 : i64, scratch_operands = 2 : i64, tpu.core_type = #tpu.core_type<tc>, window_params = [{transform_indices = @transform_0, window_bounds = array<i64: 256, 2048>}, {pipeline_mode = #tpu.pipeline_mode<synchronous>, transform_indices = @transform_1, window_bounds = array<i64: 16, 256>}, {pipeline_mode = #tpu.pipeline_mode<synchronous>, transform_indices = @transform_2, window_bounds = array<i64: 16, 1>}, {pipeline_mode = #tpu.pipeline_mode<synchronous>, transform_indices = @transform_3, window_bounds = array<i64: 16, 1>}, {pipeline_mode = #tpu.pipeline_mode<synchronous>, transform_indices = @transform_4, window_bounds = array<i64: 1, 16, 2048>}]} {
    %c0_i32 = arith.constant 0 : i32
    %0 = arith.cmpi eq, %arg0, %c0_i32 : i32
    %1 = arith.extui %0 : i1 to i32
    %c0_i32_0 = arith.constant 0 : i32
    %2 = arith.cmpi ne, %1, %c0_i32_0 : i32
    scf.if %2 {
      %cst_18 = arith.constant 0.000000e+00 : f32
      %25 = vector.broadcast %cst_18 : f32 to vector<16x1xf32>
      %c0_19 = arith.constant 0 : index
      %c0_20 = arith.constant 0 : index
      %26 = vector.load %arg6[%c0_19, %c0_20] : memref<16x1xf32, #tpu.memory_space<vmem>>, vector<16x1xf32>
      tpu.vector_store %arg6[%c0_19, %c0_20], %25 {strides = array<i32>} : memref<16x1xf32, #tpu.memory_space<vmem>>, vector<16x1xf32>,
      %cst_21 = arith.constant 0.000000e+00 : f32
      %27 = vector.broadcast %cst_21 : f32 to vector<16x1xf32>
      %c0_22 = arith.constant 0 : index
      %c0_23 = arith.constant 0 : index
      %28 = vector.load %arg7[%c0_22, %c0_23] : memref<16x1xf32, #tpu.memory_space<vmem>>, vector<16x1xf32>
      tpu.vector_store %arg7[%c0_22, %c0_23], %27 {strides = array<i32>} : memref<16x1xf32, #tpu.memory_space<vmem>>, vector<16x1xf32>,
    } else {
    }
    %c0 = arith.constant 0 : index
    %c0_1 = arith.constant 0 : index
    %3 = vector.load %arg2[%c0, %c0_1] : memref<16x256xbf16, #tpu.memory_space<vmem>>, vector<16x256xbf16>
    %c0_2 = arith.constant 0 : index
    %c0_3 = arith.constant 0 : index
    %4 = vector.load %arg1[%c0_2, %c0_3] : memref<256x2048xbf16, #tpu.memory_space<vmem>>, vector<256x2048xbf16>
    %cst = arith.constant dense<0.000000e+00> : vector<16x2048xf32>
    %5 = tpu.matmul %3, %4, %cst {dimension_numbers = #tpu.dot_dimension_numbers<[1], [0], [0], [1], [0, 0, 1, 1], [], []>} : vector<16x256xbf16>, vector<256x2048xbf16>, vector<16x2048xf32> -> vector<16x2048xf32>
    %c0_4 = arith.constant 0 : index
    %c0_5 = arith.constant 0 : index
    %6 = vector.load %arg6[%c0_4, %c0_5] : memref<16x1xf32, #tpu.memory_space<vmem>>, vector<16x1xf32>
    %cst_6 = arith.constant dense<0.000000e+00> : vector<16xf32>
    %7 = vector.multi_reduction <add>, %5, %cst_6 [1] : vector<16x2048xf32> to vector<16xf32>
    %8 = vector.shape_cast %7 : vector<16xf32> to vector<16x1xf32>
    %9 = arith.addf %6, %8 : vector<16x1xf32>
    %c0_7 = arith.constant 0 : index
    %c0_8 = arith.constant 0 : index
    %10 = vector.load %arg6[%c0_7, %c0_8] : memref<16x1xf32, #tpu.memory_space<vmem>>, vector<16x1xf32>
    tpu.vector_store %arg6[%c0_7, %c0_8], %9 {strides = array<i32>} : memref<16x1xf32, #tpu.memory_space<vmem>>, vector<16x1xf32>,
    %c0_9 = arith.constant 0 : index
    %c0_10 = arith.constant 0 : index
    %11 = vector.load %arg7[%c0_9, %c0_10] : memref<16x1xf32, #tpu.memory_space<vmem>>, vector<16x1xf32>
    %12 = arith.mulf %5, %5 : vector<16x2048xf32>
    %cst_11 = arith.constant dense<0.000000e+00> : vector<16xf32>
    %13 = vector.multi_reduction <add>, %12, %cst_11 [1] : vector<16x2048xf32> to vector<16xf32>
    %14 = vector.shape_cast %13 : vector<16xf32> to vector<16x1xf32>
    %15 = arith.addf %11, %14 : vector<16x1xf32>
    %c0_12 = arith.constant 0 : index
    %c0_13 = arith.constant 0 : index
    %16 = vector.load %arg7[%c0_12, %c0_13] : memref<16x1xf32, #tpu.memory_space<vmem>>, vector<16x1xf32>
    tpu.vector_store %arg7[%c0_12, %c0_13], %15 {strides = array<i32>} : memref<16x1xf32, #tpu.memory_space<vmem>>, vector<16x1xf32>,
    %17 = arith.truncf %5 : vector<16x2048xf32> to vector<16x2048xbf16>
    %18 = arith.index_cast %arg0 : i32 to index
    %c0_14 = arith.constant 0 : index
    %c0_15 = arith.constant 0 : index
    %19 = vector.load %arg5[%18, %c0_14, %c0_15] : memref<1x16x2048xbf16, #tpu.memory_space<vmem>>, vector<1x16x2048xbf16>
    %20 = vector.shape_cast %19 : vector<1x16x2048xbf16> to vector<16x2048xbf16>
    %21 = vector.shape_cast %17 : vector<16x2048xbf16> to vector<1x16x2048xbf16>
    tpu.vector_store %arg5[%18, %c0_14, %c0_15], %21 {strides = array<i32>} : memref<1x16x2048xbf16, #tpu.memory_space<vmem>>, vector<1x16x2048xbf16>,
    %c0_i32_16 = arith.constant 0 : i32
    %22 = arith.cmpi eq, %arg0, %c0_i32_16 : i32
    %23 = arith.extui %22 : i1 to i32
    %c0_i32_17 = arith.constant 0 : i32
    %24 = arith.cmpi ne, %23, %c0_i32_17 : i32
    scf.if %24 {
      %c0_18 = arith.constant 0 : index
      %c0_19 = arith.constant 0 : index
      %25 = vector.load %arg6[%c0_18, %c0_19] : memref<16x1xf32, #tpu.memory_space<vmem>>, vector<16x1xf32>
      %cst_20 = arith.constant 4.8828125E-4 : f32
      %26 = vector.broadcast %cst_20 : f32 to vector<16x1xf32>
      %27 = arith.mulf %25, %26 : vector<16x1xf32>
      %c0_21 = arith.constant 0 : index
      %c0_22 = arith.constant 0 : index
      %28 = vector.load %arg7[%c0_21, %c0_22] : memref<16x1xf32, #tpu.memory_space<vmem>>, vector<16x1xf32>
      %cst_23 = arith.constant 4.8828125E-4 : f32
      %29 = vector.broadcast %cst_23 : f32 to vector<16x1xf32>
      %30 = arith.mulf %28, %29 : vector<16x1xf32>
      %31 = arith.mulf %27, %27 : vector<16x1xf32>
      %32 = arith.subf %30, %31 : vector<16x1xf32>
      %cst_24 = arith.constant 0.000000e+00 : f32
      %33 = vector.broadcast %cst_24 : f32 to vector<16x1xf32>
      %34 = arith.maximumf %32, %33 : vector<16x1xf32>
      %c0_25 = arith.constant 0 : index
      %c0_26 = arith.constant 0 : index
      %35 = vector.load %arg3[%c0_25, %c0_26] : memref<16x1xf32, #tpu.memory_space<vmem>>, vector<16x1xf32>
      %cst_27 = arith.constant 9.99999974E-6 : f32
      %36 = vector.broadcast %cst_27 : f32 to vector<16x1xf32>
      %37 = arith.addf %34, %36 : vector<16x1xf32>
      %38 = math.rsqrt %37 : vector<16x1xf32>
      %39 = arith.mulf %35, %38 : vector<16x1xf32>
      %c0_28 = arith.constant 0 : index
      %c0_29 = arith.constant 0 : index
      %40 = vector.load %arg4[%c0_28, %c0_29] : memref<16x1xf32, #tpu.memory_space<vmem>>, vector<16x1xf32>
      %41 = arith.mulf %27, %39 : vector<16x1xf32>
      %42 = arith.subf %40, %41 : vector<16x1xf32>
      %c0_30 = arith.constant 0 : index
      %c0_31 = arith.constant 0 : index
      %c0_32 = arith.constant 0 : index
      %43 = vector.load %arg5[%c0_30, %c0_31, %c0_32] : memref<1x16x2048xbf16, #tpu.memory_space<vmem>>, vector<1x16x2048xbf16>
      %44 = arith.extf %43 : vector<1x16x2048xbf16> to vector<1x16x2048xf32>
      %45 = vector.shape_cast %39 : vector<16x1xf32> to vector<1x16x1xf32>
      %46 = vector.broadcast %45 : vector<1x16x1xf32> to vector<1x16x2048xf32>
      %47 = arith.mulf %44, %46 : vector<1x16x2048xf32>
      %48 = vector.shape_cast %42 : vector<16x1xf32> to vector<1x16x1xf32>
      %49 = vector.broadcast %48 : vector<1x16x1xf32> to vector<1x16x2048xf32>
      %50 = arith.addf %47, %49 : vector<1x16x2048xf32>
      %cst_33 = arith.constant 0.000000e+00 : f32
      %51 = vector.broadcast %cst_33 : f32 to vector<1x16x2048xf32>
      %52 = arith.cmpf ogt, %50, %51 : vector<1x16x2048xf32>
      %cst_34 = arith.constant 2.000000e-01 : f32
      %53 = vector.broadcast %cst_34 : f32 to vector<1x16x2048xf32>
      %54 = arith.mulf %53, %50 : vector<1x16x2048xf32>
      %55 = arith.select %52, %50, %54 : vector<1x16x2048xi1>, vector<1x16x2048xf32>
      %56 = arith.truncf %55 : vector<1x16x2048xf32> to vector<1x16x2048xbf16>
      %c0_35 = arith.constant 0 : index
      %c0_36 = arith.constant 0 : index
      %c0_37 = arith.constant 0 : index
      %57 = vector.load %arg5[%c0_35, %c0_36, %c0_37] : memref<1x16x2048xbf16, #tpu.memory_space<vmem>>, vector<1x16x2048xbf16>
      tpu.vector_store %arg5[%c0_35, %c0_36, %c0_37], %56 {strides = array<i32>} : memref<1x16x2048xbf16, #tpu.memory_space<vmem>>, vector<1x16x2048xbf16>,
    } else {
    }
    return
  }
  func.func @transform_0(%arg0: i32) -> (i32, i32) {
    %c0_i32 = arith.constant 0 : i32
    %c0_i32_0 = arith.constant 0 : i32
    return %c0_i32, %arg0 : i32, i32
  }
  func.func @transform_1(%arg0: i32) -> (i32, i32) {
    %c0_i32 = arith.constant 0 : i32
    %c0_i32_0 = arith.constant 0 : i32
    %c0_i32_1 = arith.constant 0 : i32
    return %c0_i32, %c0_i32_0 : i32, i32
  }
  func.func @transform_2(%arg0: i32) -> (i32, i32) {
    %c0_i32 = arith.constant 0 : i32
    %c0_i32_0 = arith.constant 0 : i32
    %c0_i32_1 = arith.constant 0 : i32
    return %c0_i32, %c0_i32_0 : i32, i32
  }
  func.func @transform_3(%arg0: i32) -> (i32, i32) {
    %c0_i32 = arith.constant 0 : i32
    %c0_i32_0 = arith.constant 0 : i32
    %c0_i32_1 = arith.constant 0 : i32
    return %c0_i32, %c0_i32_0 : i32, i32
  }
  func.func @transform_4(%arg0: i32) -> (i32, i32, i32) {
    %c0_i32 = arith.constant 0 : i32
    %c0_i32_0 = arith.constant 0 : i32
    %c0_i32_1 = arith.constant 0 : i32
    %c0_i32_2 = arith.constant 0 : i32
    return %c0_i32, %c0_i32_0, %c0_i32_1 : i32, i32, i32
  }
}

module attributes {stable_mosaic.version = 11 : i64} {
  func.func @conv_bn_lrelu_kernel(%arg0: i32, %arg1: memref<256x512xbf16, #tpu.memory_space<vmem>>, %arg2: memref<32x256xbf16, #tpu.memory_space<vmem>>, %arg3: memref<32x1xf32, #tpu.memory_space<vmem>>, %arg4: memref<32x1xf32, #tpu.memory_space<vmem>>, %arg5: memref<1x32x512xbf16, #tpu.memory_space<vmem>>, %arg6: memref<32x1xf32, #tpu.memory_space<vmem>>, %arg7: memref<32x1xf32, #tpu.memory_space<vmem>>) attributes {dimension_semantics = [#tpu.dimension_semantics<arbitrary>], iteration_bounds = array<i64: 1>, scalar_prefetch = 0 : i64, scratch_operands = 2 : i64, tpu.core_type = #tpu.core_type<tc>, window_params = [{transform_indices = @transform_0, window_bounds = array<i64: 256, 512>}, {pipeline_mode = #tpu.pipeline_mode<synchronous>, transform_indices = @transform_1, window_bounds = array<i64: 32, 256>}, {pipeline_mode = #tpu.pipeline_mode<synchronous>, transform_indices = @transform_2, window_bounds = array<i64: 32, 1>}, {pipeline_mode = #tpu.pipeline_mode<synchronous>, transform_indices = @transform_3, window_bounds = array<i64: 32, 1>}, {pipeline_mode = #tpu.pipeline_mode<synchronous>, transform_indices = @transform_4, window_bounds = array<i64: 1, 32, 512>}]} {
    %c0_i32 = arith.constant 0 : i32
    %0 = arith.cmpi eq, %arg0, %c0_i32 : i32
    %1 = arith.extui %0 : i1 to i32
    %c0_i32_0 = arith.constant 0 : i32
    %2 = arith.cmpi ne, %1, %c0_i32_0 : i32
    scf.if %2 {
      %cst_18 = arith.constant 0.000000e+00 : f32
      %25 = vector.broadcast %cst_18 : f32 to vector<32x1xf32>
      %c0_19 = arith.constant 0 : index
      %c0_20 = arith.constant 0 : index
      %26 = vector.load %arg6[%c0_19, %c0_20] : memref<32x1xf32, #tpu.memory_space<vmem>>, vector<32x1xf32>
      tpu.vector_store %arg6[%c0_19, %c0_20], %25 {strides = array<i32>} : memref<32x1xf32, #tpu.memory_space<vmem>>, vector<32x1xf32>,
      %cst_21 = arith.constant 0.000000e+00 : f32
      %27 = vector.broadcast %cst_21 : f32 to vector<32x1xf32>
      %c0_22 = arith.constant 0 : index
      %c0_23 = arith.constant 0 : index
      %28 = vector.load %arg7[%c0_22, %c0_23] : memref<32x1xf32, #tpu.memory_space<vmem>>, vector<32x1xf32>
      tpu.vector_store %arg7[%c0_22, %c0_23], %27 {strides = array<i32>} : memref<32x1xf32, #tpu.memory_space<vmem>>, vector<32x1xf32>,
    } else {
    }
    %c0 = arith.constant 0 : index
    %c0_1 = arith.constant 0 : index
    %3 = vector.load %arg2[%c0, %c0_1] : memref<32x256xbf16, #tpu.memory_space<vmem>>, vector<32x256xbf16>
    %c0_2 = arith.constant 0 : index
    %c0_3 = arith.constant 0 : index
    %4 = vector.load %arg1[%c0_2, %c0_3] : memref<256x512xbf16, #tpu.memory_space<vmem>>, vector<256x512xbf16>
    %cst = arith.constant dense<0.000000e+00> : vector<32x512xf32>
    %5 = tpu.matmul %3, %4, %cst {dimension_numbers = #tpu.dot_dimension_numbers<[1], [0], [0], [1], [0, 0, 1, 1], [], []>} : vector<32x256xbf16>, vector<256x512xbf16>, vector<32x512xf32> -> vector<32x512xf32>
    %c0_4 = arith.constant 0 : index
    %c0_5 = arith.constant 0 : index
    %6 = vector.load %arg6[%c0_4, %c0_5] : memref<32x1xf32, #tpu.memory_space<vmem>>, vector<32x1xf32>
    %cst_6 = arith.constant dense<0.000000e+00> : vector<32xf32>
    %7 = vector.multi_reduction <add>, %5, %cst_6 [1] : vector<32x512xf32> to vector<32xf32>
    %8 = vector.shape_cast %7 : vector<32xf32> to vector<32x1xf32>
    %9 = arith.addf %6, %8 : vector<32x1xf32>
    %c0_7 = arith.constant 0 : index
    %c0_8 = arith.constant 0 : index
    %10 = vector.load %arg6[%c0_7, %c0_8] : memref<32x1xf32, #tpu.memory_space<vmem>>, vector<32x1xf32>
    tpu.vector_store %arg6[%c0_7, %c0_8], %9 {strides = array<i32>} : memref<32x1xf32, #tpu.memory_space<vmem>>, vector<32x1xf32>,
    %c0_9 = arith.constant 0 : index
    %c0_10 = arith.constant 0 : index
    %11 = vector.load %arg7[%c0_9, %c0_10] : memref<32x1xf32, #tpu.memory_space<vmem>>, vector<32x1xf32>
    %12 = arith.mulf %5, %5 : vector<32x512xf32>
    %cst_11 = arith.constant dense<0.000000e+00> : vector<32xf32>
    %13 = vector.multi_reduction <add>, %12, %cst_11 [1] : vector<32x512xf32> to vector<32xf32>
    %14 = vector.shape_cast %13 : vector<32xf32> to vector<32x1xf32>
    %15 = arith.addf %11, %14 : vector<32x1xf32>
    %c0_12 = arith.constant 0 : index
    %c0_13 = arith.constant 0 : index
    %16 = vector.load %arg7[%c0_12, %c0_13] : memref<32x1xf32, #tpu.memory_space<vmem>>, vector<32x1xf32>
    tpu.vector_store %arg7[%c0_12, %c0_13], %15 {strides = array<i32>} : memref<32x1xf32, #tpu.memory_space<vmem>>, vector<32x1xf32>,
    %17 = arith.truncf %5 : vector<32x512xf32> to vector<32x512xbf16>
    %18 = arith.index_cast %arg0 : i32 to index
    %c0_14 = arith.constant 0 : index
    %c0_15 = arith.constant 0 : index
    %19 = vector.load %arg5[%18, %c0_14, %c0_15] : memref<1x32x512xbf16, #tpu.memory_space<vmem>>, vector<1x32x512xbf16>
    %20 = vector.shape_cast %19 : vector<1x32x512xbf16> to vector<32x512xbf16>
    %21 = vector.shape_cast %17 : vector<32x512xbf16> to vector<1x32x512xbf16>
    tpu.vector_store %arg5[%18, %c0_14, %c0_15], %21 {strides = array<i32>} : memref<1x32x512xbf16, #tpu.memory_space<vmem>>, vector<1x32x512xbf16>,
    %c0_i32_16 = arith.constant 0 : i32
    %22 = arith.cmpi eq, %arg0, %c0_i32_16 : i32
    %23 = arith.extui %22 : i1 to i32
    %c0_i32_17 = arith.constant 0 : i32
    %24 = arith.cmpi ne, %23, %c0_i32_17 : i32
    scf.if %24 {
      %c0_18 = arith.constant 0 : index
      %c0_19 = arith.constant 0 : index
      %25 = vector.load %arg6[%c0_18, %c0_19] : memref<32x1xf32, #tpu.memory_space<vmem>>, vector<32x1xf32>
      %cst_20 = arith.constant 0.001953125 : f32
      %26 = vector.broadcast %cst_20 : f32 to vector<32x1xf32>
      %27 = arith.mulf %25, %26 : vector<32x1xf32>
      %c0_21 = arith.constant 0 : index
      %c0_22 = arith.constant 0 : index
      %28 = vector.load %arg7[%c0_21, %c0_22] : memref<32x1xf32, #tpu.memory_space<vmem>>, vector<32x1xf32>
      %cst_23 = arith.constant 0.001953125 : f32
      %29 = vector.broadcast %cst_23 : f32 to vector<32x1xf32>
      %30 = arith.mulf %28, %29 : vector<32x1xf32>
      %31 = arith.mulf %27, %27 : vector<32x1xf32>
      %32 = arith.subf %30, %31 : vector<32x1xf32>
      %cst_24 = arith.constant 0.000000e+00 : f32
      %33 = vector.broadcast %cst_24 : f32 to vector<32x1xf32>
      %34 = arith.maximumf %32, %33 : vector<32x1xf32>
      %c0_25 = arith.constant 0 : index
      %c0_26 = arith.constant 0 : index
      %35 = vector.load %arg3[%c0_25, %c0_26] : memref<32x1xf32, #tpu.memory_space<vmem>>, vector<32x1xf32>
      %cst_27 = arith.constant 9.99999974E-6 : f32
      %36 = vector.broadcast %cst_27 : f32 to vector<32x1xf32>
      %37 = arith.addf %34, %36 : vector<32x1xf32>
      %38 = math.rsqrt %37 : vector<32x1xf32>
      %39 = arith.mulf %35, %38 : vector<32x1xf32>
      %c0_28 = arith.constant 0 : index
      %c0_29 = arith.constant 0 : index
      %40 = vector.load %arg4[%c0_28, %c0_29] : memref<32x1xf32, #tpu.memory_space<vmem>>, vector<32x1xf32>
      %41 = arith.mulf %27, %39 : vector<32x1xf32>
      %42 = arith.subf %40, %41 : vector<32x1xf32>
      %c0_30 = arith.constant 0 : index
      %c0_31 = arith.constant 0 : index
      %c0_32 = arith.constant 0 : index
      %43 = vector.load %arg5[%c0_30, %c0_31, %c0_32] : memref<1x32x512xbf16, #tpu.memory_space<vmem>>, vector<1x32x512xbf16>
      %44 = arith.extf %43 : vector<1x32x512xbf16> to vector<1x32x512xf32>
      %45 = vector.shape_cast %39 : vector<32x1xf32> to vector<1x32x1xf32>
      %46 = vector.broadcast %45 : vector<1x32x1xf32> to vector<1x32x512xf32>
      %47 = arith.mulf %44, %46 : vector<1x32x512xf32>
      %48 = vector.shape_cast %42 : vector<32x1xf32> to vector<1x32x1xf32>
      %49 = vector.broadcast %48 : vector<1x32x1xf32> to vector<1x32x512xf32>
      %50 = arith.addf %47, %49 : vector<1x32x512xf32>
      %cst_33 = arith.constant 0.000000e+00 : f32
      %51 = vector.broadcast %cst_33 : f32 to vector<1x32x512xf32>
      %52 = arith.cmpf ogt, %50, %51 : vector<1x32x512xf32>
      %cst_34 = arith.constant 2.000000e-01 : f32
      %53 = vector.broadcast %cst_34 : f32 to vector<1x32x512xf32>
      %54 = arith.mulf %53, %50 : vector<1x32x512xf32>
      %55 = arith.select %52, %50, %54 : vector<1x32x512xi1>, vector<1x32x512xf32>
      %56 = arith.truncf %55 : vector<1x32x512xf32> to vector<1x32x512xbf16>
      %c0_35 = arith.constant 0 : index
      %c0_36 = arith.constant 0 : index
      %c0_37 = arith.constant 0 : index
      %57 = vector.load %arg5[%c0_35, %c0_36, %c0_37] : memref<1x32x512xbf16, #tpu.memory_space<vmem>>, vector<1x32x512xbf16>
      tpu.vector_store %arg5[%c0_35, %c0_36, %c0_37], %56 {strides = array<i32>} : memref<1x32x512xbf16, #tpu.memory_space<vmem>>, vector<1x32x512xbf16>,
    } else {
    }
    return
  }
  func.func @transform_0(%arg0: i32) -> (i32, i32) {
    %c0_i32 = arith.constant 0 : i32
    %c0_i32_0 = arith.constant 0 : i32
    return %c0_i32, %arg0 : i32, i32
  }
  func.func @transform_1(%arg0: i32) -> (i32, i32) {
    %c0_i32 = arith.constant 0 : i32
    %c0_i32_0 = arith.constant 0 : i32
    %c0_i32_1 = arith.constant 0 : i32
    return %c0_i32, %c0_i32_0 : i32, i32
  }
  func.func @transform_2(%arg0: i32) -> (i32, i32) {
    %c0_i32 = arith.constant 0 : i32
    %c0_i32_0 = arith.constant 0 : i32
    %c0_i32_1 = arith.constant 0 : i32
    return %c0_i32, %c0_i32_0 : i32, i32
  }
  func.func @transform_3(%arg0: i32) -> (i32, i32) {
    %c0_i32 = arith.constant 0 : i32
    %c0_i32_0 = arith.constant 0 : i32
    %c0_i32_1 = arith.constant 0 : i32
    return %c0_i32, %c0_i32_0 : i32, i32
  }
  func.func @transform_4(%arg0: i32) -> (i32, i32, i32) {
    %c0_i32 = arith.constant 0 : i32
    %c0_i32_0 = arith.constant 0 : i32
    %c0_i32_1 = arith.constant 0 : i32
    %c0_i32_2 = arith.constant 0 : i32
    return %c0_i32, %c0_i32_0, %c0_i32_1 : i32, i32, i32
  }
}

module attributes {stable_mosaic.version = 11 : i64} {
  func.func @conv_bn_lrelu_kernel(%arg0: i32, %arg1: memref<512x128xbf16, #tpu.memory_space<vmem>>, %arg2: memref<32x512xbf16, #tpu.memory_space<vmem>>, %arg3: memref<32x1xf32, #tpu.memory_space<vmem>>, %arg4: memref<32x1xf32, #tpu.memory_space<vmem>>, %arg5: memref<1x32x128xbf16, #tpu.memory_space<vmem>>, %arg6: memref<32x1xf32, #tpu.memory_space<vmem>>, %arg7: memref<32x1xf32, #tpu.memory_space<vmem>>) attributes {dimension_semantics = [#tpu.dimension_semantics<arbitrary>], iteration_bounds = array<i64: 1>, scalar_prefetch = 0 : i64, scratch_operands = 2 : i64, tpu.core_type = #tpu.core_type<tc>, window_params = [{transform_indices = @transform_0, window_bounds = array<i64: 512, 128>}, {pipeline_mode = #tpu.pipeline_mode<synchronous>, transform_indices = @transform_1, window_bounds = array<i64: 32, 512>}, {pipeline_mode = #tpu.pipeline_mode<synchronous>, transform_indices = @transform_2, window_bounds = array<i64: 32, 1>}, {pipeline_mode = #tpu.pipeline_mode<synchronous>, transform_indices = @transform_3, window_bounds = array<i64: 32, 1>}, {pipeline_mode = #tpu.pipeline_mode<synchronous>, transform_indices = @transform_4, window_bounds = array<i64: 1, 32, 128>}]} {
    %c0_i32 = arith.constant 0 : i32
    %0 = arith.cmpi eq, %arg0, %c0_i32 : i32
    %1 = arith.extui %0 : i1 to i32
    %c0_i32_0 = arith.constant 0 : i32
    %2 = arith.cmpi ne, %1, %c0_i32_0 : i32
    scf.if %2 {
      %cst_18 = arith.constant 0.000000e+00 : f32
      %25 = vector.broadcast %cst_18 : f32 to vector<32x1xf32>
      %c0_19 = arith.constant 0 : index
      %c0_20 = arith.constant 0 : index
      %26 = vector.load %arg6[%c0_19, %c0_20] : memref<32x1xf32, #tpu.memory_space<vmem>>, vector<32x1xf32>
      tpu.vector_store %arg6[%c0_19, %c0_20], %25 {strides = array<i32>} : memref<32x1xf32, #tpu.memory_space<vmem>>, vector<32x1xf32>,
      %cst_21 = arith.constant 0.000000e+00 : f32
      %27 = vector.broadcast %cst_21 : f32 to vector<32x1xf32>
      %c0_22 = arith.constant 0 : index
      %c0_23 = arith.constant 0 : index
      %28 = vector.load %arg7[%c0_22, %c0_23] : memref<32x1xf32, #tpu.memory_space<vmem>>, vector<32x1xf32>
      tpu.vector_store %arg7[%c0_22, %c0_23], %27 {strides = array<i32>} : memref<32x1xf32, #tpu.memory_space<vmem>>, vector<32x1xf32>,
    } else {
    }
    %c0 = arith.constant 0 : index
    %c0_1 = arith.constant 0 : index
    %3 = vector.load %arg2[%c0, %c0_1] : memref<32x512xbf16, #tpu.memory_space<vmem>>, vector<32x512xbf16>
    %c0_2 = arith.constant 0 : index
    %c0_3 = arith.constant 0 : index
    %4 = vector.load %arg1[%c0_2, %c0_3] : memref<512x128xbf16, #tpu.memory_space<vmem>>, vector<512x128xbf16>
    %cst = arith.constant dense<0.000000e+00> : vector<32x128xf32>
    %5 = tpu.matmul %3, %4, %cst {dimension_numbers = #tpu.dot_dimension_numbers<[1], [0], [0], [1], [0, 0, 1, 1], [], []>} : vector<32x512xbf16>, vector<512x128xbf16>, vector<32x128xf32> -> vector<32x128xf32>
    %c0_4 = arith.constant 0 : index
    %c0_5 = arith.constant 0 : index
    %6 = vector.load %arg6[%c0_4, %c0_5] : memref<32x1xf32, #tpu.memory_space<vmem>>, vector<32x1xf32>
    %cst_6 = arith.constant dense<0.000000e+00> : vector<32xf32>
    %7 = vector.multi_reduction <add>, %5, %cst_6 [1] : vector<32x128xf32> to vector<32xf32>
    %8 = vector.shape_cast %7 : vector<32xf32> to vector<32x1xf32>
    %9 = arith.addf %6, %8 : vector<32x1xf32>
    %c0_7 = arith.constant 0 : index
    %c0_8 = arith.constant 0 : index
    %10 = vector.load %arg6[%c0_7, %c0_8] : memref<32x1xf32, #tpu.memory_space<vmem>>, vector<32x1xf32>
    tpu.vector_store %arg6[%c0_7, %c0_8], %9 {strides = array<i32>} : memref<32x1xf32, #tpu.memory_space<vmem>>, vector<32x1xf32>,
    %c0_9 = arith.constant 0 : index
    %c0_10 = arith.constant 0 : index
    %11 = vector.load %arg7[%c0_9, %c0_10] : memref<32x1xf32, #tpu.memory_space<vmem>>, vector<32x1xf32>
    %12 = arith.mulf %5, %5 : vector<32x128xf32>
    %cst_11 = arith.constant dense<0.000000e+00> : vector<32xf32>
    %13 = vector.multi_reduction <add>, %12, %cst_11 [1] : vector<32x128xf32> to vector<32xf32>
    %14 = vector.shape_cast %13 : vector<32xf32> to vector<32x1xf32>
    %15 = arith.addf %11, %14 : vector<32x1xf32>
    %c0_12 = arith.constant 0 : index
    %c0_13 = arith.constant 0 : index
    %16 = vector.load %arg7[%c0_12, %c0_13] : memref<32x1xf32, #tpu.memory_space<vmem>>, vector<32x1xf32>
    tpu.vector_store %arg7[%c0_12, %c0_13], %15 {strides = array<i32>} : memref<32x1xf32, #tpu.memory_space<vmem>>, vector<32x1xf32>,
    %17 = arith.truncf %5 : vector<32x128xf32> to vector<32x128xbf16>
    %18 = arith.index_cast %arg0 : i32 to index
    %c0_14 = arith.constant 0 : index
    %c0_15 = arith.constant 0 : index
    %19 = vector.load %arg5[%18, %c0_14, %c0_15] : memref<1x32x128xbf16, #tpu.memory_space<vmem>>, vector<1x32x128xbf16>
    %20 = vector.shape_cast %19 : vector<1x32x128xbf16> to vector<32x128xbf16>
    %21 = vector.shape_cast %17 : vector<32x128xbf16> to vector<1x32x128xbf16>
    tpu.vector_store %arg5[%18, %c0_14, %c0_15], %21 {strides = array<i32>} : memref<1x32x128xbf16, #tpu.memory_space<vmem>>, vector<1x32x128xbf16>,
    %c0_i32_16 = arith.constant 0 : i32
    %22 = arith.cmpi eq, %arg0, %c0_i32_16 : i32
    %23 = arith.extui %22 : i1 to i32
    %c0_i32_17 = arith.constant 0 : i32
    %24 = arith.cmpi ne, %23, %c0_i32_17 : i32
    scf.if %24 {
      %c0_18 = arith.constant 0 : index
      %c0_19 = arith.constant 0 : index
      %25 = vector.load %arg6[%c0_18, %c0_19] : memref<32x1xf32, #tpu.memory_space<vmem>>, vector<32x1xf32>
      %cst_20 = arith.constant 7.812500e-03 : f32
      %26 = vector.broadcast %cst_20 : f32 to vector<32x1xf32>
      %27 = arith.mulf %25, %26 : vector<32x1xf32>
      %c0_21 = arith.constant 0 : index
      %c0_22 = arith.constant 0 : index
      %28 = vector.load %arg7[%c0_21, %c0_22] : memref<32x1xf32, #tpu.memory_space<vmem>>, vector<32x1xf32>
      %cst_23 = arith.constant 7.812500e-03 : f32
      %29 = vector.broadcast %cst_23 : f32 to vector<32x1xf32>
      %30 = arith.mulf %28, %29 : vector<32x1xf32>
      %31 = arith.mulf %27, %27 : vector<32x1xf32>
      %32 = arith.subf %30, %31 : vector<32x1xf32>
      %cst_24 = arith.constant 0.000000e+00 : f32
      %33 = vector.broadcast %cst_24 : f32 to vector<32x1xf32>
      %34 = arith.maximumf %32, %33 : vector<32x1xf32>
      %c0_25 = arith.constant 0 : index
      %c0_26 = arith.constant 0 : index
      %35 = vector.load %arg3[%c0_25, %c0_26] : memref<32x1xf32, #tpu.memory_space<vmem>>, vector<32x1xf32>
      %cst_27 = arith.constant 9.99999974E-6 : f32
      %36 = vector.broadcast %cst_27 : f32 to vector<32x1xf32>
      %37 = arith.addf %34, %36 : vector<32x1xf32>
      %38 = math.rsqrt %37 : vector<32x1xf32>
      %39 = arith.mulf %35, %38 : vector<32x1xf32>
      %c0_28 = arith.constant 0 : index
      %c0_29 = arith.constant 0 : index
      %40 = vector.load %arg4[%c0_28, %c0_29] : memref<32x1xf32, #tpu.memory_space<vmem>>, vector<32x1xf32>
      %41 = arith.mulf %27, %39 : vector<32x1xf32>
      %42 = arith.subf %40, %41 : vector<32x1xf32>
      %c0_30 = arith.constant 0 : index
      %c0_31 = arith.constant 0 : index
      %c0_32 = arith.constant 0 : index
      %43 = vector.load %arg5[%c0_30, %c0_31, %c0_32] : memref<1x32x128xbf16, #tpu.memory_space<vmem>>, vector<1x32x128xbf16>
      %44 = arith.extf %43 : vector<1x32x128xbf16> to vector<1x32x128xf32>
      %45 = vector.shape_cast %39 : vector<32x1xf32> to vector<1x32x1xf32>
      %46 = vector.broadcast %45 : vector<1x32x1xf32> to vector<1x32x128xf32>
      %47 = arith.mulf %44, %46 : vector<1x32x128xf32>
      %48 = vector.shape_cast %42 : vector<32x1xf32> to vector<1x32x1xf32>
      %49 = vector.broadcast %48 : vector<1x32x1xf32> to vector<1x32x128xf32>
      %50 = arith.addf %47, %49 : vector<1x32x128xf32>
      %cst_33 = arith.constant 0.000000e+00 : f32
      %51 = vector.broadcast %cst_33 : f32 to vector<1x32x128xf32>
      %52 = arith.cmpf ogt, %50, %51 : vector<1x32x128xf32>
      %cst_34 = arith.constant 2.000000e-01 : f32
      %53 = vector.broadcast %cst_34 : f32 to vector<1x32x128xf32>
      %54 = arith.mulf %53, %50 : vector<1x32x128xf32>
      %55 = arith.select %52, %50, %54 : vector<1x32x128xi1>, vector<1x32x128xf32>
      %56 = arith.truncf %55 : vector<1x32x128xf32> to vector<1x32x128xbf16>
      %c0_35 = arith.constant 0 : index
      %c0_36 = arith.constant 0 : index
      %c0_37 = arith.constant 0 : index
      %57 = vector.load %arg5[%c0_35, %c0_36, %c0_37] : memref<1x32x128xbf16, #tpu.memory_space<vmem>>, vector<1x32x128xbf16>
      tpu.vector_store %arg5[%c0_35, %c0_36, %c0_37], %56 {strides = array<i32>} : memref<1x32x128xbf16, #tpu.memory_space<vmem>>, vector<1x32x128xbf16>,
    } else {
    }
    return
  }
  func.func @transform_0(%arg0: i32) -> (i32, i32) {
    %c0_i32 = arith.constant 0 : i32
    %c0_i32_0 = arith.constant 0 : i32
    return %c0_i32, %arg0 : i32, i32
  }
  func.func @transform_1(%arg0: i32) -> (i32, i32) {
    %c0_i32 = arith.constant 0 : i32
    %c0_i32_0 = arith.constant 0 : i32
    %c0_i32_1 = arith.constant 0 : i32
    return %c0_i32, %c0_i32_0 : i32, i32
  }
  func.func @transform_2(%arg0: i32) -> (i32, i32) {
    %c0_i32 = arith.constant 0 : i32
    %c0_i32_0 = arith.constant 0 : i32
    %c0_i32_1 = arith.constant 0 : i32
    return %c0_i32, %c0_i32_0 : i32, i32
  }
  func.func @transform_3(%arg0: i32) -> (i32, i32) {
    %c0_i32 = arith.constant 0 : i32
    %c0_i32_0 = arith.constant 0 : i32
    %c0_i32_1 = arith.constant 0 : i32
    return %c0_i32, %c0_i32_0 : i32, i32
  }
  func.func @transform_4(%arg0: i32) -> (i32, i32, i32) {
    %c0_i32 = arith.constant 0 : i32
    %c0_i32_0 = arith.constant 0 : i32
    %c0_i32_1 = arith.constant 0 : i32
    %c0_i32_2 = arith.constant 0 : i32
    return %c0_i32, %c0_i32_0, %c0_i32_1 : i32, i32, i32
  }
}

module attributes {stable_mosaic.version = 11 : i64} {
  func.func @conv_bn_lrelu_kernel(%arg0: i32, %arg1: memref<512x128xbf16, #tpu.memory_space<vmem>>, %arg2: memref<64x512xbf16, #tpu.memory_space<vmem>>, %arg3: memref<64x1xf32, #tpu.memory_space<vmem>>, %arg4: memref<64x1xf32, #tpu.memory_space<vmem>>, %arg5: memref<1x64x128xbf16, #tpu.memory_space<vmem>>, %arg6: memref<64x1xf32, #tpu.memory_space<vmem>>, %arg7: memref<64x1xf32, #tpu.memory_space<vmem>>) attributes {dimension_semantics = [#tpu.dimension_semantics<arbitrary>], iteration_bounds = array<i64: 1>, scalar_prefetch = 0 : i64, scratch_operands = 2 : i64, tpu.core_type = #tpu.core_type<tc>, window_params = [{transform_indices = @transform_0, window_bounds = array<i64: 512, 128>}, {pipeline_mode = #tpu.pipeline_mode<synchronous>, transform_indices = @transform_1, window_bounds = array<i64: 64, 512>}, {pipeline_mode = #tpu.pipeline_mode<synchronous>, transform_indices = @transform_2, window_bounds = array<i64: 64, 1>}, {pipeline_mode = #tpu.pipeline_mode<synchronous>, transform_indices = @transform_3, window_bounds = array<i64: 64, 1>}, {pipeline_mode = #tpu.pipeline_mode<synchronous>, transform_indices = @transform_4, window_bounds = array<i64: 1, 64, 128>}]} {
    %c0_i32 = arith.constant 0 : i32
    %0 = arith.cmpi eq, %arg0, %c0_i32 : i32
    %1 = arith.extui %0 : i1 to i32
    %c0_i32_0 = arith.constant 0 : i32
    %2 = arith.cmpi ne, %1, %c0_i32_0 : i32
    scf.if %2 {
      %cst_18 = arith.constant 0.000000e+00 : f32
      %25 = vector.broadcast %cst_18 : f32 to vector<64x1xf32>
      %c0_19 = arith.constant 0 : index
      %c0_20 = arith.constant 0 : index
      %26 = vector.load %arg6[%c0_19, %c0_20] : memref<64x1xf32, #tpu.memory_space<vmem>>, vector<64x1xf32>
      tpu.vector_store %arg6[%c0_19, %c0_20], %25 {strides = array<i32>} : memref<64x1xf32, #tpu.memory_space<vmem>>, vector<64x1xf32>,
      %cst_21 = arith.constant 0.000000e+00 : f32
      %27 = vector.broadcast %cst_21 : f32 to vector<64x1xf32>
      %c0_22 = arith.constant 0 : index
      %c0_23 = arith.constant 0 : index
      %28 = vector.load %arg7[%c0_22, %c0_23] : memref<64x1xf32, #tpu.memory_space<vmem>>, vector<64x1xf32>
      tpu.vector_store %arg7[%c0_22, %c0_23], %27 {strides = array<i32>} : memref<64x1xf32, #tpu.memory_space<vmem>>, vector<64x1xf32>,
    } else {
    }
    %c0 = arith.constant 0 : index
    %c0_1 = arith.constant 0 : index
    %3 = vector.load %arg2[%c0, %c0_1] : memref<64x512xbf16, #tpu.memory_space<vmem>>, vector<64x512xbf16>
    %c0_2 = arith.constant 0 : index
    %c0_3 = arith.constant 0 : index
    %4 = vector.load %arg1[%c0_2, %c0_3] : memref<512x128xbf16, #tpu.memory_space<vmem>>, vector<512x128xbf16>
    %cst = arith.constant dense<0.000000e+00> : vector<64x128xf32>
    %5 = tpu.matmul %3, %4, %cst {dimension_numbers = #tpu.dot_dimension_numbers<[1], [0], [0], [1], [0, 0, 1, 1], [], []>} : vector<64x512xbf16>, vector<512x128xbf16>, vector<64x128xf32> -> vector<64x128xf32>
    %c0_4 = arith.constant 0 : index
    %c0_5 = arith.constant 0 : index
    %6 = vector.load %arg6[%c0_4, %c0_5] : memref<64x1xf32, #tpu.memory_space<vmem>>, vector<64x1xf32>
    %cst_6 = arith.constant dense<0.000000e+00> : vector<64xf32>
    %7 = vector.multi_reduction <add>, %5, %cst_6 [1] : vector<64x128xf32> to vector<64xf32>
    %8 = vector.shape_cast %7 : vector<64xf32> to vector<64x1xf32>
    %9 = arith.addf %6, %8 : vector<64x1xf32>
    %c0_7 = arith.constant 0 : index
    %c0_8 = arith.constant 0 : index
    %10 = vector.load %arg6[%c0_7, %c0_8] : memref<64x1xf32, #tpu.memory_space<vmem>>, vector<64x1xf32>
    tpu.vector_store %arg6[%c0_7, %c0_8], %9 {strides = array<i32>} : memref<64x1xf32, #tpu.memory_space<vmem>>, vector<64x1xf32>,
    %c0_9 = arith.constant 0 : index
    %c0_10 = arith.constant 0 : index
    %11 = vector.load %arg7[%c0_9, %c0_10] : memref<64x1xf32, #tpu.memory_space<vmem>>, vector<64x1xf32>
    %12 = arith.mulf %5, %5 : vector<64x128xf32>
    %cst_11 = arith.constant dense<0.000000e+00> : vector<64xf32>
    %13 = vector.multi_reduction <add>, %12, %cst_11 [1] : vector<64x128xf32> to vector<64xf32>
    %14 = vector.shape_cast %13 : vector<64xf32> to vector<64x1xf32>
    %15 = arith.addf %11, %14 : vector<64x1xf32>
    %c0_12 = arith.constant 0 : index
    %c0_13 = arith.constant 0 : index
    %16 = vector.load %arg7[%c0_12, %c0_13] : memref<64x1xf32, #tpu.memory_space<vmem>>, vector<64x1xf32>
    tpu.vector_store %arg7[%c0_12, %c0_13], %15 {strides = array<i32>} : memref<64x1xf32, #tpu.memory_space<vmem>>, vector<64x1xf32>,
    %17 = arith.truncf %5 : vector<64x128xf32> to vector<64x128xbf16>
    %18 = arith.index_cast %arg0 : i32 to index
    %c0_14 = arith.constant 0 : index
    %c0_15 = arith.constant 0 : index
    %19 = vector.load %arg5[%18, %c0_14, %c0_15] : memref<1x64x128xbf16, #tpu.memory_space<vmem>>, vector<1x64x128xbf16>
    %20 = vector.shape_cast %19 : vector<1x64x128xbf16> to vector<64x128xbf16>
    %21 = vector.shape_cast %17 : vector<64x128xbf16> to vector<1x64x128xbf16>
    tpu.vector_store %arg5[%18, %c0_14, %c0_15], %21 {strides = array<i32>} : memref<1x64x128xbf16, #tpu.memory_space<vmem>>, vector<1x64x128xbf16>,
    %c0_i32_16 = arith.constant 0 : i32
    %22 = arith.cmpi eq, %arg0, %c0_i32_16 : i32
    %23 = arith.extui %22 : i1 to i32
    %c0_i32_17 = arith.constant 0 : i32
    %24 = arith.cmpi ne, %23, %c0_i32_17 : i32
    scf.if %24 {
      %c0_18 = arith.constant 0 : index
      %c0_19 = arith.constant 0 : index
      %25 = vector.load %arg6[%c0_18, %c0_19] : memref<64x1xf32, #tpu.memory_space<vmem>>, vector<64x1xf32>
      %cst_20 = arith.constant 3.125000e-02 : f32
      %26 = vector.broadcast %cst_20 : f32 to vector<64x1xf32>
      %27 = arith.mulf %25, %26 : vector<64x1xf32>
      %c0_21 = arith.constant 0 : index
      %c0_22 = arith.constant 0 : index
      %28 = vector.load %arg7[%c0_21, %c0_22] : memref<64x1xf32, #tpu.memory_space<vmem>>, vector<64x1xf32>
      %cst_23 = arith.constant 3.125000e-02 : f32
      %29 = vector.broadcast %cst_23 : f32 to vector<64x1xf32>
      %30 = arith.mulf %28, %29 : vector<64x1xf32>
      %31 = arith.mulf %27, %27 : vector<64x1xf32>
      %32 = arith.subf %30, %31 : vector<64x1xf32>
      %cst_24 = arith.constant 0.000000e+00 : f32
      %33 = vector.broadcast %cst_24 : f32 to vector<64x1xf32>
      %34 = arith.maximumf %32, %33 : vector<64x1xf32>
      %c0_25 = arith.constant 0 : index
      %c0_26 = arith.constant 0 : index
      %35 = vector.load %arg3[%c0_25, %c0_26] : memref<64x1xf32, #tpu.memory_space<vmem>>, vector<64x1xf32>
      %cst_27 = arith.constant 9.99999974E-6 : f32
      %36 = vector.broadcast %cst_27 : f32 to vector<64x1xf32>
      %37 = arith.addf %34, %36 : vector<64x1xf32>
      %38 = math.rsqrt %37 : vector<64x1xf32>
      %39 = arith.mulf %35, %38 : vector<64x1xf32>
      %c0_28 = arith.constant 0 : index
      %c0_29 = arith.constant 0 : index
      %40 = vector.load %arg4[%c0_28, %c0_29] : memref<64x1xf32, #tpu.memory_space<vmem>>, vector<64x1xf32>
      %41 = arith.mulf %27, %39 : vector<64x1xf32>
      %42 = arith.subf %40, %41 : vector<64x1xf32>
      %c0_30 = arith.constant 0 : index
      %c0_31 = arith.constant 0 : index
      %c0_32 = arith.constant 0 : index
      %43 = vector.load %arg5[%c0_30, %c0_31, %c0_32] : memref<1x64x128xbf16, #tpu.memory_space<vmem>>, vector<1x64x128xbf16>
      %44 = arith.extf %43 : vector<1x64x128xbf16> to vector<1x64x128xf32>
      %45 = vector.shape_cast %39 : vector<64x1xf32> to vector<1x64x1xf32>
      %46 = vector.broadcast %45 : vector<1x64x1xf32> to vector<1x64x128xf32>
      %47 = arith.mulf %44, %46 : vector<1x64x128xf32>
      %48 = vector.shape_cast %42 : vector<64x1xf32> to vector<1x64x1xf32>
      %49 = vector.broadcast %48 : vector<1x64x1xf32> to vector<1x64x128xf32>
      %50 = arith.addf %47, %49 : vector<1x64x128xf32>
      %cst_33 = arith.constant 0.000000e+00 : f32
      %51 = vector.broadcast %cst_33 : f32 to vector<1x64x128xf32>
      %52 = arith.cmpf ogt, %50, %51 : vector<1x64x128xf32>
      %cst_34 = arith.constant 2.000000e-01 : f32
      %53 = vector.broadcast %cst_34 : f32 to vector<1x64x128xf32>
      %54 = arith.mulf %53, %50 : vector<1x64x128xf32>
      %55 = arith.select %52, %50, %54 : vector<1x64x128xi1>, vector<1x64x128xf32>
      %56 = arith.truncf %55 : vector<1x64x128xf32> to vector<1x64x128xbf16>
      %c0_35 = arith.constant 0 : index
      %c0_36 = arith.constant 0 : index
      %c0_37 = arith.constant 0 : index
      %57 = vector.load %arg5[%c0_35, %c0_36, %c0_37] : memref<1x64x128xbf16, #tpu.memory_space<vmem>>, vector<1x64x128xbf16>
      tpu.vector_store %arg5[%c0_35, %c0_36, %c0_37], %56 {strides = array<i32>} : memref<1x64x128xbf16, #tpu.memory_space<vmem>>, vector<1x64x128xbf16>,
    } else {
    }
    return
  }
  func.func @transform_0(%arg0: i32) -> (i32, i32) {
    %c0_i32 = arith.constant 0 : i32
    %c0_i32_0 = arith.constant 0 : i32
    return %c0_i32, %arg0 : i32, i32
  }
  func.func @transform_1(%arg0: i32) -> (i32, i32) {
    %c0_i32 = arith.constant 0 : i32
    %c0_i32_0 = arith.constant 0 : i32
    %c0_i32_1 = arith.constant 0 : i32
    return %c0_i32, %c0_i32_0 : i32, i32
  }
  func.func @transform_2(%arg0: i32) -> (i32, i32) {
    %c0_i32 = arith.constant 0 : i32
    %c0_i32_0 = arith.constant 0 : i32
    %c0_i32_1 = arith.constant 0 : i32
    return %c0_i32, %c0_i32_0 : i32, i32
  }
  func.func @transform_3(%arg0: i32) -> (i32, i32) {
    %c0_i32 = arith.constant 0 : i32
    %c0_i32_0 = arith.constant 0 : i32
    %c0_i32_1 = arith.constant 0 : i32
    return %c0_i32, %c0_i32_0 : i32, i32
  }
  func.func @transform_4(%arg0: i32) -> (i32, i32, i32) {
    %c0_i32 = arith.constant 0 : i32
    %c0_i32_0 = arith.constant 0 : i32
    %c0_i32_1 = arith.constant 0 : i32
    %c0_i32_2 = arith.constant 0 : i32
    return %c0_i32, %c0_i32_0, %c0_i32_1 : i32, i32, i32
  }
}

</mosaic_0001>

<bundles_post_ra>
// kernel: discriminator_forward.5
= control target key start
LH: loop header
LB: loop body
LE: loop exit
PB: predicated region body
PF: predicated region fallthrough
CT: control target
= control target key end

     0   :  { %s3735_s15 = smov 0   ;;  %s3737_s16 = smov 0   ;;  %s7455_s0 = inlined_call_operand.vmem [shape: bf16[144,8192], index: 0, kind: input, shape index: {}]   ;;  %s7456_s1 = inlined_call_operand.vmem [shape: bf16[16,144], index: 1, kind: input, shape index: {}]   ;;  %s7457_s2 = inlined_call_operand.vmem [shape: f32[16,1], index: 2, kind: input, shape index: {}]   ;;  %s7458_s3 = inlined_call_operand.vmem [shape: f32[16,1], index: 3, kind: input, shape index: {}]   ;;  %s7459_s4 = inlined_call_operand.vmem [shape: bf16[4,16,2048], index: 4, kind: output, shape index: {}]  }
   0x1   :  { %s3739_s17 = smov 0  }
   0x2 LB: > { %s3751_s18 = sadd.s32 4294967295, %s3706_s17   ;;  %s3754_s19 = sadd.s32 1, %s3706_s17   ;;  %s3706_s17 = sphi %s3739_s17, %s8557_s17   ;;  %s3702_s16 = sphi %s3737_s16, %s8556_s16   ;;  %s3698_s15 = sphi %s3735_s15, %s8555_s15  }
   0x3   : > { %s18_s20 = ssub.s32 %s3706_s17, %s3754_s19  ;;  %s21_s21 = sadd.s32 1, %s3702_s16 }
   0x4   : > { %p19_p0 = scmp.eq.s32.totalorder %s18_s20, 0  ;;  %p28_p1 = scmp.ne.s32.totalorder %s3702_s16, %s3698_s15 }
   0x5   : > { %p29_p2 = scmp.eq.s32.totalorder %s3706_s17, 0  ;;  %p3321_p4 = scmp.ge.s32.totalorder %s3706_s17, 4 }
   0x6   : > { %s3763_s22 = scalar_select %p19_p0, %s3702_s16, %s21_s21  }
   0x7   : > { %p30_p3 = por %p29_p2, %p28_p1  ;;  %147 = sbr.rel (%p3321_p4) target bundleno = 89 (0x59), region = 28 }
   0xc   : > { %150 = sbr.rel (!%p30_p3) target bundleno = 89 (0x59), region = 32  ;;  %s152_s23 = sand.u32 (%p30_p3), 1, %s3702_s16  }
   0xd   : > { %s3565_s24 = sshll.u32 (%p30_p3), %s3706_s17, 6  ;;  %s3647_s25 = smul.u32 (%p30_p3), 1152, %s152_s23 }
   0xe   : > { %s3771_s28 = scalar_lea.vmem (%p30_p3), %s7455_s0, %s3565_s24 }
   0xf   : > { %v170_v0 = vld [vmem:[%s3771_s28] sm:$0xff] (%p30_p3)  ;;  %v172_v1 = vld [vmem:[%s3771_s28 + $0x8] sm:$0xff] (%p30_p3)  ;;  %v174_v2 = vld [vmem:[%s3771_s28 + $0x10] sm:$0xff] (%p30_p3)  ;;  %s3779_s29 = scalar_lea.vmem (%p30_p3), [#allocation4], %s3647_s25 }
  0x10   : > { %v176_v3 = vld [vmem:[%s3771_s28 + $0x18] sm:$0xff] (%p30_p3)  ;;  %v178_v4 = vld [vmem:[%s3771_s28 + $0x20] sm:$0xff] (%p30_p3)  ;;  %v180_v5 = vld [vmem:[%s3771_s28 + $0x28] sm:$0xff] (%p30_p3)  ;;  %171 = vst [vmem:[%s3779_s29] sm:$0xff] (%p30_p3), %v170_v0 }
  0x11   : > { %173 = vst [vmem:[%s3779_s29 + $0x8] sm:$0xff] %v172_v1  ;;  %175 = vst [vmem:[%s3779_s29 + $0x10] sm:$0xff] %v174_v2  ;;  %v182_v6 = vld [vmem:[%s3771_s28 + $0x30] sm:$0xff]  ;;  %v184_v7 = vld [vmem:[%s3771_s28 + $0x38] sm:$0xff] }
  0x12   : > { %177 = vst [vmem:[%s3779_s29 + $0x18] sm:$0xff] %v176_v3  ;;  %179 = vst [vmem:[%s3779_s29 + $0x20] sm:$0xff] %v178_v4  ;;  %v186_v8 = vld [vmem:[%s3771_s28 + $0x100] sm:$0xff]  ;;  %v188_v9 = vld [vmem:[%s3771_s28 + $0x108] sm:$0xff] }
  0x13   : > { %181 = vst [vmem:[%s3779_s29 + $0x28] sm:$0xff] %v180_v5  ;;  %183 = vst [vmem:[%s3779_s29 + $0x30] sm:$0xff] %v182_v6  ;;  %v190_v10 = vld [vmem:[%s3771_s28 + $0x110] sm:$0xff]  ;;  %v192_v11 = vld [vmem:[%s3771_s28 + $0x118] sm:$0xff] }
  0x14   : > { %185 = vst [vmem:[%s3779_s29 + $0x38] sm:$0xff] %v184_v7  ;;  %187 = vst [vmem:[%s3779_s29 + $0x40] sm:$0xff] %v186_v8  ;;  %v194_v12 = vld [vmem:[%s3771_s28 + $0x120] sm:$0xff]  ;;  %v196_v13 = vld [vmem:[%s3771_s28 + $0x128] sm:$0xff] }
  0x15   : > { %189 = vst [vmem:[%s3779_s29 + $0x48] sm:$0xff] %v188_v9  ;;  %191 = vst [vmem:[%s3779_s29 + $0x50] sm:$0xff] %v190_v10  ;;  %v198_v14 = vld [vmem:[%s3771_s28 + $0x130] sm:$0xff]  ;;  %v200_v15 = vld [vmem:[%s3771_s28 + $0x138] sm:$0xff] }
  0x16   : > { %193 = vst [vmem:[%s3779_s29 + $0x58] sm:$0xff] %v192_v11  ;;  %195 = vst [vmem:[%s3779_s29 + $0x60] sm:$0xff] %v194_v12  ;;  %v202_v16 = vld [vmem:[%s3771_s28 + $0x200] sm:$0xff]  ;;  %v204_v17 = vld [vmem:[%s3771_s28 + $0x208] sm:$0xff] }
  0x17   : > { %197 = vst [vmem:[%s3779_s29 + $0x68] sm:$0xff] %v196_v13  ;;  %199 = vst [vmem:[%s3779_s29 + $0x70] sm:$0xff] %v198_v14  ;;  %v206_v18 = vld [vmem:[%s3771_s28 + $0x210] sm:$0xff]  ;;  %v208_v19 = vld [vmem:[%s3771_s28 + $0x218] sm:$0xff] }
  0x18   : > { %201 = vst [vmem:[%s3779_s29 + $0x78] sm:$0xff] %v200_v15  ;;  %203 = vst [vmem:[%s3779_s29 + $0x80] sm:$0xff] %v202_v16  ;;  %v210_v20 = vld [vmem:[%s3771_s28 + $0x220] sm:$0xff]  ;;  %v212_v21 = vld [vmem:[%s3771_s28 + $0x228] sm:$0xff] }
  0x19   : > { %205 = vst [vmem:[%s3779_s29 + $0x88] sm:$0xff] %v204_v17  ;;  %207 = vst [vmem:[%s3779_s29 + $0x90] sm:$0xff] %v206_v18  ;;  %v214_v22 = vld [vmem:[%s3771_s28 + $0x230] sm:$0xff]  ;;  %v216_v23 = vld [vmem:[%s3771_s28 + $0x238] sm:$0xff] }
  0x1a   : > { %209 = vst [vmem:[%s3779_s29 + $0x98] sm:$0xff] %v208_v19  ;;  %211 = vst [vmem:[%s3779_s29 + $0xa0] sm:$0xff] %v210_v20  ;;  %v218_v24 = vld [vmem:[%s3771_s28 + $0x300] sm:$0xff]  ;;  %v220_v25 = vld [vmem:[%s3771_s28 + $0x308] sm:$0xff] }
  0x1b   : > { %213 = vst [vmem:[%s3779_s29 + $0xa8] sm:$0xff] %v212_v21  ;;  %215 = vst [vmem:[%s3779_s29 + $0xb0] sm:$0xff] %v214_v22  ;;  %v222_v26 = vld [vmem:[%s3771_s28 + $0x310] sm:$0xff]  ;;  %v224_v27 = vld [vmem:[%s3771_s28 + $0x318] sm:$0xff] }
  0x1c   : > { %217 = vst [vmem:[%s3779_s29 + $0xb8] sm:$0xff] %v216_v23  ;;  %219 = vst [vmem:[%s3779_s29 + $0xc0] sm:$0xff] %v218_v24  ;;  %v226_v28 = vld [vmem:[%s3771_s28 + $0x320] sm:$0xff]  ;;  %v228_v29 = vld [vmem:[%s3771_s28 + $0x328] sm:$0xff] }
  0x1d   : > { %221 = vst [vmem:[%s3779_s29 + $0xc8] sm:$0xff] %v220_v25  ;;  %223 = vst [vmem:[%s3779_s29 + $0xd0] sm:$0xff] %v222_v26  ;;  %v230_v30 = vld [vmem:[%s3771_s28 + $0x330] sm:$0xff]  ;;  %v232_v31 = vld [vmem:[%s3771_s28 + $0x338] sm:$0xff] }
  0x1e   : > { %225 = vst [vmem:[%s3779_s29 + $0xd8] sm:$0xff] %v224_v27  ;;  %227 = vst [vmem:[%s3779_s29 + $0xe0] sm:$0xff] %v226_v28  ;;  %v234_v32 = vld [vmem:[%s3771_s28 + $0x400] sm:$0xff]  ;;  %v236_v33 = vld [vmem:[%s3771_s28 + $0x408] sm:$0xff] }
  0x1f   : > { %229 = vst [vmem:[%s3779_s29 + $0xe8] sm:$0xff] %v228_v29  ;;  %231 = vst [vmem:[%s3779_s29 + $0xf0] sm:$0xff] %v230_v30  ;;  %v238_v34 = vld [vmem:[%s3771_s28 + $0x410] sm:$0xff]  ;;  %v240_v35 = vld [vmem:[%s3771_s28 + $0x418] sm:$0xff] }
  0x20   : > { %233 = vst [vmem:[%s3779_s29 + $0xf8] sm:$0xff] %v232_v31  ;;  %235 = vst [vmem:[%s3779_s29 + $0x100] sm:$0xff] %v234_v32  ;;  %v242_v36 = vld [vmem:[%s3771_s28 + $0x420] sm:$0xff]  ;;  %v244_v37 = vld [vmem:[%s3771_s28 + $0x428] sm:$0xff] }
  0x21   : > { %237 = vst [vmem:[%s3779_s29 + $0x108] sm:$0xff] %v236_v33  ;;  %239 = vst [vmem:[%s3779_s29 + $0x110] sm:$0xff] %v238_v34  ;;  %v246_v38 = vld [vmem:[%s3771_s28 + $0x430] sm:$0xff]  ;;  %v248_v39 = vld [vmem:[%s3771_s28 + $0x438] sm:$0xff] }
  0x22   : > { %241 = vst [vmem:[%s3779_s29 + $0x118] sm:$0xff] %v240_v35  ;;  %243 = vst [vmem:[%s3779_s29 + $0x120] sm:$0xff] %v242_v36  ;;  %v250_v40 = vld [vmem:[%s3771_s28 + $0x500] sm:$0xff]  ;;  %v252_v41 = vld [vmem:[%s3771_s28 + $0x508] sm:$0xff] }
  0x23   : > { %245 = vst [vmem:[%s3779_s29 + $0x128] sm:$0xff] %v244_v37  ;;  %247 = vst [vmem:[%s3779_s29 + $0x130] sm:$0xff] %v246_v38  ;;  %v254_v42 = vld [vmem:[%s3771_s28 + $0x510] sm:$0xff]  ;;  %v256_v43 = vld [vmem:[%s3771_s28 + $0x518] sm:$0xff] }
  0x24   : > { %249 = vst [vmem:[%s3779_s29 + $0x138] sm:$0xff] %v248_v39  ;;  %251 = vst [vmem:[%s3779_s29 + $0x140] sm:$0xff] %v250_v40  ;;  %v258_v44 = vld [vmem:[%s3771_s28 + $0x520] sm:$0xff]  ;;  %v260_v45 = vld [vmem:[%s3771_s28 + $0x528] sm:$0xff] }
  0x25   : > { %253 = vst [vmem:[%s3779_s29 + $0x148] sm:$0xff] %v252_v41  ;;  %255 = vst [vmem:[%s3779_s29 + $0x150] sm:$0xff] %v254_v42  ;;  %v262_v46 = vld [vmem:[%s3771_s28 + $0x530] sm:$0xff]  ;;  %v264_v47 = vld [vmem:[%s3771_s28 + $0x538] sm:$0xff] }
  0x26   : > { %257 = vst [vmem:[%s3779_s29 + $0x158] sm:$0xff] %v256_v43  ;;  %259 = vst [vmem:[%s3779_s29 + $0x160] sm:$0xff] %v258_v44  ;;  %v266_v48 = vld [vmem:[%s3771_s28 + $0x600] sm:$0xff]  ;;  %v268_v49 = vld [vmem:[%s3771_s28 + $0x608] sm:$0xff] }
  0x27   : > { %261 = vst [vmem:[%s3779_s29 + $0x168] sm:$0xff] %v260_v45  ;;  %263 = vst [vmem:[%s3779_s29 + $0x170] sm:$0xff] %v262_v46  ;;  %v270_v50 = vld [vmem:[%s3771_s28 + $0x610] sm:$0xff]  ;;  %v272_v51 = vld [vmem:[%s3771_s28 + $0x618] sm:$0xff] }
  0x28   : > { %265 = vst [vmem:[%s3779_s29 + $0x178] sm:$0xff] %v264_v47  ;;  %267 = vst [vmem:[%s3779_s29 + $0x180] sm:$0xff] %v266_v48  ;;  %v274_v52 = vld [vmem:[%s3771_s28 + $0x620] sm:$0xff]  ;;  %v276_v53 = vld [vmem:[%s3771_s28 + $0x628] sm:$0xff] }
  0x29   : > { %269 = vst [vmem:[%s3779_s29 + $0x188] sm:$0xff] %v268_v49  ;;  %271 = vst [vmem:[%s3779_s29 + $0x190] sm:$0xff] %v270_v50  ;;  %v278_v54 = vld [vmem:[%s3771_s28 + $0x630] sm:$0xff]  ;;  %v280_v55 = vld [vmem:[%s3771_s28 + $0x638] sm:$0xff] }
  0x2a   : > { %273 = vst [vmem:[%s3779_s29 + $0x198] sm:$0xff] %v272_v51  ;;  %275 = vst [vmem:[%s3779_s29 + $0x1a0] sm:$0xff] %v274_v52  ;;  %v282_v56 = vld [vmem:[%s3771_s28 + $0x700] sm:$0xff]  ;;  %v284_v57 = vld [vmem:[%s3771_s28 + $0x708] sm:$0xff] }
  0x2b   : > { %277 = vst [vmem:[%s3779_s29 + $0x1a8] sm:$0xff] %v276_v53  ;;  %279 = vst [vmem:[%s3779_s29 + $0x1b0] sm:$0xff] %v278_v54  ;;  %v286_v58 = vld [vmem:[%s3771_s28 + $0x710] sm:$0xff]  ;;  %v288_v59 = vld [vmem:[%s3771_s28 + $0x718] sm:$0xff] }
  0x2c   : > { %281 = vst [vmem:[%s3779_s29 + $0x1b8] sm:$0xff] %v280_v55  ;;  %283 = vst [vmem:[%s3779_s29 + $0x1c0] sm:$0xff] %v282_v56  ;;  %v290_v60 = vld [vmem:[%s3771_s28 + $0x720] sm:$0xff]  ;;  %v292_v61 = vld [vmem:[%s3771_s28 + $0x728] sm:$0xff] }
  0x2d   : > { %285 = vst [vmem:[%s3779_s29 + $0x1c8] sm:$0xff] %v284_v57  ;;  %287 = vst [vmem:[%s3779_s29 + $0x1d0] sm:$0xff] %v286_v58  ;;  %v294_v62 = vld [vmem:[%s3771_s28 + $0x730] sm:$0xff]  ;;  %v296_v63 = vld [vmem:[%s3771_s28 + $0x738] sm:$0xff] }
  0x2e   : > { %289 = vst [vmem:[%s3779_s29 + $0x1d8] sm:$0xff] %v288_v59  ;;  %291 = vst [vmem:[%s3779_s29 + $0x1e0] sm:$0xff] %v290_v60  ;;  %v298_v0 = vld [vmem:[%s3771_s28 + $0x800] sm:$0xff]  ;;  %v300_v1 = vld [vmem:[%s3771_s28 + $0x808] sm:$0xff] }
  0x2f   : > { %293 = vst [vmem:[%s3779_s29 + $0x1e8] sm:$0xff] %v292_v61  ;;  %295 = vst [vmem:[%s3779_s29 + $0x1f0] sm:$0xff] %v294_v62  ;;  %v302_v2 = vld [vmem:[%s3771_s28 + $0x810] sm:$0xff]  ;;  %v304_v3 = vld [vmem:[%s3771_s28 + $0x818] sm:$0xff] }
  0x30   : > { %297 = vst [vmem:[%s3779_s29 + $0x1f8] sm:$0xff] %v296_v63  ;;  %299 = vst [vmem:[%s3779_s29 + $0x200] sm:$0xff] %v298_v0  ;;  %v306_v4 = vld [vmem:[%s3771_s28 + $0x820] sm:$0xff]  ;;  %v308_v5 = vld [vmem:[%s3771_s28 + $0x828] sm:$0xff] }
  0x31   : > { %301 = vst [vmem:[%s3779_s29 + $0x208] sm:$0xff] %v300_v1  ;;  %303 = vst [vmem:[%s3779_s29 + $0x210] sm:$0xff] %v302_v2  ;;  %v310_v6 = vld [vmem:[%s3771_s28 + $0x830] sm:$0xff]  ;;  %v312_v7 = vld [vmem:[%s3771_s28 + $0x838] sm:$0xff] }
  0x32   : > { %305 = vst [vmem:[%s3779_s29 + $0x218] sm:$0xff] %v304_v3  ;;  %307 = vst [vmem:[%s3779_s29 + $0x220] sm:$0xff] %v306_v4  ;;  %v314_v8 = vld [vmem:[%s3771_s28 + $0x900] sm:$0xff]  ;;  %v316_v9 = vld [vmem:[%s3771_s28 + $0x908] sm:$0xff] }
  0x33   : > { %309 = vst [vmem:[%s3779_s29 + $0x228] sm:$0xff] %v308_v5  ;;  %311 = vst [vmem:[%s3779_s29 + $0x230] sm:$0xff] %v310_v6  ;;  %v318_v10 = vld [vmem:[%s3771_s28 + $0x910] sm:$0xff]  ;;  %v320_v11 = vld [vmem:[%s3771_s28 + $0x918] sm:$0xff] }
  0x34   : > { %313 = vst [vmem:[%s3779_s29 + $0x238] sm:$0xff] %v312_v7  ;;  %315 = vst [vmem:[%s3779_s29 + $0x240] sm:$0xff] %v314_v8  ;;  %v322_v12 = vld [vmem:[%s3771_s28 + $0x920] sm:$0xff]  ;;  %v324_v13 = vld [vmem:[%s3771_s28 + $0x928] sm:$0xff] }
  0x35   : > { %317 = vst [vmem:[%s3779_s29 + $0x248] sm:$0xff] %v316_v9  ;;  %319 = vst [vmem:[%s3779_s29 + $0x250] sm:$0xff] %v318_v10  ;;  %v326_v14 = vld [vmem:[%s3771_s28 + $0x930] sm:$0xff]  ;;  %v328_v15 = vld [vmem:[%s3771_s28 + $0x938] sm:$0xff] }
  0x36   : > { %321 = vst [vmem:[%s3779_s29 + $0x258] sm:$0xff] %v320_v11  ;;  %323 = vst [vmem:[%s3779_s29 + $0x260] sm:$0xff] %v322_v12  ;;  %v330_v16 = vld [vmem:[%s3771_s28 + $0xa00] sm:$0xff]  ;;  %v332_v17 = vld [vmem:[%s3771_s28 + $0xa08] sm:$0xff] }
  0x37   : > { %325 = vst [vmem:[%s3779_s29 + $0x268] sm:$0xff] %v324_v13  ;;  %327 = vst [vmem:[%s3779_s29 + $0x270] sm:$0xff] %v326_v14  ;;  %v334_v18 = vld [vmem:[%s3771_s28 + $0xa10] sm:$0xff]  ;;  %v336_v19 = vld [vmem:[%s3771_s28 + $0xa18] sm:$0xff] }
  0x38   : > { %329 = vst [vmem:[%s3779_s29 + $0x278] sm:$0xff] %v328_v15  ;;  %331 = vst [vmem:[%s3779_s29 + $0x280] sm:$0xff] %v330_v16  ;;  %v338_v20 = vld [vmem:[%s3771_s28 + $0xa20] sm:$0xff]  ;;  %v340_v21 = vld [vmem:[%s3771_s28 + $0xa28] sm:$0xff] }
  0x39   : > { %333 = vst [vmem:[%s3779_s29 + $0x288] sm:$0xff] %v332_v17  ;;  %335 = vst [vmem:[%s3779_s29 + $0x290] sm:$0xff] %v334_v18  ;;  %v342_v22 = vld [vmem:[%s3771_s28 + $0xa30] sm:$0xff]  ;;  %v344_v23 = vld [vmem:[%s3771_s28 + $0xa38] sm:$0xff] }
  0x3a   : > { %337 = vst [vmem:[%s3779_s29 + $0x298] sm:$0xff] %v336_v19  ;;  %339 = vst [vmem:[%s3779_s29 + $0x2a0] sm:$0xff] %v338_v20  ;;  %v346_v24 = vld [vmem:[%s3771_s28 + $0xb00] sm:$0xff]  ;;  %v348_v25 = vld [vmem:[%s3771_s28 + $0xb08] sm:$0xff] }
  0x3b   : > { %341 = vst [vmem:[%s3779_s29 + $0x2a8] sm:$0xff] %v340_v21  ;;  %343 = vst [vmem:[%s3779_s29 + $0x2b0] sm:$0xff] %v342_v22  ;;  %v350_v26 = vld [vmem:[%s3771_s28 + $0xb10] sm:$0xff]  ;;  %v352_v27 = vld [vmem:[%s3771_s28 + $0xb18] sm:$0xff] }
  0x3c   : > { %345 = vst [vmem:[%s3779_s29 + $0x2b8] sm:$0xff] %v344_v23  ;;  %347 = vst [vmem:[%s3779_s29 + $0x2c0] sm:$0xff] %v346_v24  ;;  %v354_v28 = vld [vmem:[%s3771_s28 + $0xb20] sm:$0xff]  ;;  %v356_v29 = vld [vmem:[%s3771_s28 + $0xb28] sm:$0xff] }
  0x3d   : > { %349 = vst [vmem:[%s3779_s29 + $0x2c8] sm:$0xff] %v348_v25  ;;  %351 = vst [vmem:[%s3779_s29 + $0x2d0] sm:$0xff] %v350_v26  ;;  %v358_v30 = vld [vmem:[%s3771_s28 + $0xb30] sm:$0xff]  ;;  %v360_v31 = vld [vmem:[%s3771_s28 + $0xb38] sm:$0xff] }
  0x3e   : > { %353 = vst [vmem:[%s3779_s29 + $0x2d8] sm:$0xff] %v352_v27  ;;  %355 = vst [vmem:[%s3779_s29 + $0x2e0] sm:$0xff] %v354_v28  ;;  %v362_v32 = vld [vmem:[%s3771_s28 + $0xc00] sm:$0xff]  ;;  %v364_v33 = vld [vmem:[%s3771_s28 + $0xc08] sm:$0xff] }
  0x3f   : > { %357 = vst [vmem:[%s3779_s29 + $0x2e8] sm:$0xff] %v356_v29  ;;  %359 = vst [vmem:[%s3779_s29 + $0x2f0] sm:$0xff] %v358_v30  ;;  %v366_v34 = vld [vmem:[%s3771_s28 + $0xc10] sm:$0xff]  ;;  %v368_v35 = vld [vmem:[%s3771_s28 + $0xc18] sm:$0xff] }
  0x40   : > { %361 = vst [vmem:[%s3779_s29 + $0x2f8] sm:$0xff] %v360_v31  ;;  %363 = vst [vmem:[%s3779_s29 + $0x300] sm:$0xff] %v362_v32  ;;  %v370_v36 = vld [vmem:[%s3771_s28 + $0xc20] sm:$0xff]  ;;  %v372_v37 = vld [vmem:[%s3771_s28 + $0xc28] sm:$0xff] }
  0x41   : > { %365 = vst [vmem:[%s3779_s29 + $0x308] sm:$0xff] %v364_v33  ;;  %367 = vst [vmem:[%s3779_s29 + $0x310] sm:$0xff] %v366_v34  ;;  %v374_v38 = vld [vmem:[%s3771_s28 + $0xc30] sm:$0xff]  ;;  %v376_v39 = vld [vmem:[%s3771_s28 + $0xc38] sm:$0xff] }
  0x42   : > { %369 = vst [vmem:[%s3779_s29 + $0x318] sm:$0xff] %v368_v35  ;;  %371 = vst [vmem:[%s3779_s29 + $0x320] sm:$0xff] %v370_v36  ;;  %v378_v40 = vld [vmem:[%s3771_s28 + $0xd00] sm:$0xff]  ;;  %v380_v41 = vld [vmem:[%s3771_s28 + $0xd08] sm:$0xff] }
  0x43   : > { %373 = vst [vmem:[%s3779_s29 + $0x328] sm:$0xff] %v372_v37  ;;  %375 = vst [vmem:[%s3779_s29 + $0x330] sm:$0xff] %v374_v38  ;;  %v382_v42 = vld [vmem:[%s3771_s28 + $0xd10] sm:$0xff]  ;;  %v384_v43 = vld [vmem:[%s3771_s28 + $0xd18] sm:$0xff] }
  0x44   : > { %377 = vst [vmem:[%s3779_s29 + $0x338] sm:$0xff] %v376_v39  ;;  %379 = vst [vmem:[%s3779_s29 + $0x340] sm:$0xff] %v378_v40  ;;  %v386_v44 = vld [vmem:[%s3771_s28 + $0xd20] sm:$0xff]  ;;  %v388_v45 = vld [vmem:[%s3771_s28 + $0xd28] sm:$0xff] }
  0x45   : > { %381 = vst [vmem:[%s3779_s29 + $0x348] sm:$0xff] %v380_v41  ;;  %383 = vst [vmem:[%s3779_s29 + $0x350] sm:$0xff] %v382_v42  ;;  %v390_v46 = vld [vmem:[%s3771_s28 + $0xd30] sm:$0xff]  ;;  %v392_v47 = vld [vmem:[%s3771_s28 + $0xd38] sm:$0xff] }
  0x46   : > { %385 = vst [vmem:[%s3779_s29 + $0x358] sm:$0xff] %v384_v43  ;;  %387 = vst [vmem:[%s3779_s29 + $0x360] sm:$0xff] %v386_v44  ;;  %v394_v48 = vld [vmem:[%s3771_s28 + $0xe00] sm:$0xff]  ;;  %v396_v49 = vld [vmem:[%s3771_s28 + $0xe08] sm:$0xff] }
  0x47   : > { %389 = vst [vmem:[%s3779_s29 + $0x368] sm:$0xff] %v388_v45  ;;  %391 = vst [vmem:[%s3779_s29 + $0x370] sm:$0xff] %v390_v46  ;;  %v398_v50 = vld [vmem:[%s3771_s28 + $0xe10] sm:$0xff]  ;;  %v400_v51 = vld [vmem:[%s3771_s28 + $0xe18] sm:$0xff] }
  0x48   : > { %393 = vst [vmem:[%s3779_s29 + $0x378] sm:$0xff] %v392_v47  ;;  %395 = vst [vmem:[%s3779_s29 + $0x380] sm:$0xff] %v394_v48  ;;  %v402_v52 = vld [vmem:[%s3771_s28 + $0xe20] sm:$0xff]  ;;  %v404_v53 = vld [vmem:[%s3771_s28 + $0xe28] sm:$0xff] }
  0x49   : > { %397 = vst [vmem:[%s3779_s29 + $0x388] sm:$0xff] %v396_v49  ;;  %399 = vst [vmem:[%s3779_s29 + $0x390] sm:$0xff] %v398_v50  ;;  %v406_v54 = vld [vmem:[%s3771_s28 + $0xe30] sm:$0xff]  ;;  %v408_v55 = vld [vmem:[%s3771_s28 + $0xe38] sm:$0xff] }
  0x4a   : > { %401 = vst [vmem:[%s3779_s29 + $0x398] sm:$0xff] %v400_v51  ;;  %403 = vst [vmem:[%s3779_s29 + $0x3a0] sm:$0xff] %v402_v52  ;;  %v410_v56 = vld [vmem:[%s3771_s28 + $0xf00] sm:$0xff]  ;;  %v412_v57 = vld [vmem:[%s3771_s28 + $0xf08] sm:$0xff] }
  0x4b   : > { %405 = vst [vmem:[%s3779_s29 + $0x3a8] sm:$0xff] %v404_v53  ;;  %407 = vst [vmem:[%s3779_s29 + $0x3b0] sm:$0xff] %v406_v54  ;;  %v414_v58 = vld [vmem:[%s3771_s28 + $0xf10] sm:$0xff]  ;;  %v416_v59 = vld [vmem:[%s3771_s28 + $0xf18] sm:$0xff] }
  0x4c   : > { %409 = vst [vmem:[%s3779_s29 + $0x3b8] sm:$0xff] %v408_v55  ;;  %411 = vst [vmem:[%s3779_s29 + $0x3c0] sm:$0xff] %v410_v56  ;;  %v418_v60 = vld [vmem:[%s3771_s28 + $0xf20] sm:$0xff]  ;;  %v420_v61 = vld [vmem:[%s3771_s28 + $0xf28] sm:$0xff] }
  0x4d   : > { %413 = vst [vmem:[%s3779_s29 + $0x3c8] sm:$0xff] %v412_v57  ;;  %415 = vst [vmem:[%s3779_s29 + $0x3d0] sm:$0xff] %v414_v58  ;;  %v422_v62 = vld [vmem:[%s3771_s28 + $0xf30] sm:$0xff]  ;;  %v424_v63 = vld [vmem:[%s3771_s28 + $0xf38] sm:$0xff] }
  0x4e   : > { %417 = vst [vmem:[%s3779_s29 + $0x3d8] sm:$0xff] %v416_v59  ;;  %419 = vst [vmem:[%s3779_s29 + $0x3e0] sm:$0xff] %v418_v60  ;;  %v426_v0 = vld [vmem:[%s3771_s28 + $0x1000] sm:$0xff]  ;;  %v428_v1 = vld [vmem:[%s3771_s28 + $0x1008] sm:$0xff] }
  0x4f   : > { %421 = vst [vmem:[%s3779_s29 + $0x3e8] sm:$0xff] %v420_v61  ;;  %423 = vst [vmem:[%s3779_s29 + $0x3f0] sm:$0xff] %v422_v62  ;;  %v430_v2 = vld [vmem:[%s3771_s28 + $0x1010] sm:$0xff]  ;;  %v432_v3 = vld [vmem:[%s3771_s28 + $0x1018] sm:$0xff] }
  0x50   : > { %425 = vst [vmem:[%s3779_s29 + $0x3f8] sm:$0xff] %v424_v63  ;;  %427 = vst [vmem:[%s3779_s29 + $0x400] sm:$0xff] %v426_v0  ;;  %v434_v4 = vld [vmem:[%s3771_s28 + $0x1020] sm:$0xff]  ;;  %v436_v5 = vld [vmem:[%s3771_s28 + $0x1028] sm:$0xff] }
  0x51   : > { %429 = vst [vmem:[%s3779_s29 + $0x408] sm:$0xff] %v428_v1  ;;  %431 = vst [vmem:[%s3779_s29 + $0x410] sm:$0xff] %v430_v2  ;;  %v438_v6 = vld [vmem:[%s3771_s28 + $0x1030] sm:$0xff]  ;;  %v440_v7 = vld [vmem:[%s3771_s28 + $0x1038] sm:$0xff] }
  0x52   : > { %433 = vst [vmem:[%s3779_s29 + $0x418] sm:$0xff] %v432_v3  ;;  %435 = vst [vmem:[%s3779_s29 + $0x420] sm:$0xff] %v434_v4  ;;  %v442_v8 = vld [vmem:[%s3771_s28 + $0x1100] sm:$0xff]  ;;  %v444_v9 = vld [vmem:[%s3771_s28 + $0x1108] sm:$0xff] }
  0x53   : > { %437 = vst [vmem:[%s3779_s29 + $0x428] sm:$0xff] %v436_v5  ;;  %439 = vst [vmem:[%s3779_s29 + $0x430] sm:$0xff] %v438_v6  ;;  %v446_v10 = vld [vmem:[%s3771_s28 + $0x1110] sm:$0xff]  ;;  %v448_v11 = vld [vmem:[%s3771_s28 + $0x1118] sm:$0xff] }
  0x54   : > { %441 = vst [vmem:[%s3779_s29 + $0x438] sm:$0xff] %v440_v7  ;;  %443 = vst [vmem:[%s3779_s29 + $0x440] sm:$0xff] %v442_v8  ;;  %v450_v12 = vld [vmem:[%s3771_s28 + $0x1120] sm:$0xff]  ;;  %v452_v13 = vld [vmem:[%s3771_s28 + $0x1128] sm:$0xff] }
  0x55   : > { %445 = vst [vmem:[%s3779_s29 + $0x448] sm:$0xff] %v444_v9  ;;  %447 = vst [vmem:[%s3779_s29 + $0x450] sm:$0xff] %v446_v10  ;;  %v454_v14 = vld [vmem:[%s3771_s28 + $0x1130] sm:$0xff]  ;;  %v456_v15 = vld [vmem:[%s3771_s28 + $0x1138] sm:$0xff] }
  0x56   : > { %449 = vst [vmem:[%s3779_s29 + $0x458] sm:$0xff] %v448_v11  ;;  %451 = vst [vmem:[%s3779_s29 + $0x460] sm:$0xff] %v450_v12 }
  0x57   : > { %453 = vst [vmem:[%s3779_s29 + $0x468] sm:$0xff] %v452_v13  ;;  %455 = vst [vmem:[%s3779_s29 + $0x470] sm:$0xff] %v454_v14 }
  0x58   : > { %457 = vst [vmem:[%s3779_s29 + $0x478] sm:$0xff] %v456_v15 }
  0x59 PF: > { %p3324_p5 = scmp.ge.s32.totalorder %s3706_s17, 1  ;;  %p462_p6 = scmp.lt.s32.totalorder %s3706_s17, 5 }
  0x5b   : > { %p463_p7 = pnand %p3324_p5, %p462_p6 }
  0x5c   : > { %s469_s30 = sand.u32 (!%p463_p7), 1, %s3698_s15   ;;  %p3325_p8 = scmp.ne.s32.totalorder (!%p463_p7), %s3751_s18, 0 }
  0x5d   : > { %466 = sbr.rel (%p463_p7) target bundleno = 1073 (0x431), region = 55 }
  0x5e   : > { %s3648_s5 = smul.u32 (!%p463_p7), 1152, %s469_s30 }
  0x60   : > { %s4066_s6 = scalar_lea.vmem (!%p463_p7), [#allocation4], %s3648_s5 }
  0x62   : > { %494 = sbr.rel (%p3325_p8) target bundleno = 106 (0x6a), region = 63 }
  0x67   : > { %vm495_vm0 = vcmask 7168   ;;  %v3708_v16 = vmov 0.0  }
  0x68   : > { %496 = vst.msk [vmem:[#allocation2] sm:$0xff] %vm495_vm0, %v3708_v16  ;;  %497 = vst.msk [vmem:[#allocation2 + $0x8] sm:$0xff] %vm495_vm0, %v3708_v16 }
  0x69   : > { %498 = vst.msk [vmem:[#allocation3] sm:$0xff] %vm495_vm0, %v3708_v16  ;;  %499 = vst.msk [vmem:[#allocation3 + $0x8] sm:$0xff] %vm495_vm0, %v3708_v16 }
  0x6a PF: > { %v614_v17 = vld [vmem:[%s4066_s6 + $0x380] sm:$0xff]  ;;  %v615_v19 = vld [vmem:[%s4066_s6 + $0x388] sm:$0xff]  ;;  %vm1375_vm1 = vcmask 130048   ;;  %s3582_s11 = sshll.u32 %s3751_s18, 7  ;;  %vm1761_vm2 = vcmask 7168   ;;  %p3498_p9 = scmp.ne.s32.totalorder %s3751_s18, 3 }
  0x6b   : > { %v622_v18 = vld [vmem:[%s4066_s6 + $0x3c0] sm:$0xff]  ;;  %v623_v21 = vld [vmem:[%s4066_s6 + $0x3c8] sm:$0xff]  ;;  %s4251_s14 = scalar_lea.vmem %s7459_s4, %s3582_s11 }
  0x6c   : > { %v3441_v20 = vcombine.high %v614_v17, %v622_v18  ;;  %v3440_v22 = vcombine.low %v614_v17, %v622_v18  ;;  %v598_v23 = vld [vmem:[%s4066_s6 + $0x300] sm:$0xff]  ;;  %v3443_v25 = vcombine.high %v615_v19, %v623_v21  ;;  %v3442_v26 = vcombine.low %v615_v19, %v623_v21  ;;  %v599_v28 = vld [vmem:[%s4066_s6 + $0x308] sm:$0xff] }
  0x6d   : > { %v606_v24 = vld [vmem:[%s4066_s6 + $0x340] sm:$0xff]  ;;  %v607_v29 = vld [vmem:[%s4066_s6 + $0x348] sm:$0xff] }
  0x6e   : > { %v3425_v27 = vcombine.high %v598_v23, %v606_v24  ;;  %v582_v30 = vld [vmem:[%s4066_s6 + $0x280] sm:$0xff]  ;;  %1379 = vmatprep.subr.bf16.mxu0 %v3441_v20  ;;  %v3427_v31 = vcombine.high %v599_v28, %v607_v29  ;;  %v583_v33 = vld [vmem:[%s4066_s6 + $0x288] sm:$0xff]  ;;  %1422 = vmatprep.subr.bf16.mxu1 %v3443_v25  ;;  %v3424_v35 = vcombine.low %v598_v23, %v606_v24  ;;  %v616_v24 = vld [vmem:[%s4066_s6 + $0x390] sm:$0xff] }
  0x6f   : > { %v590_v32 = vld [vmem:[%s4066_s6 + $0x2c0] sm:$0xff]  ;;  %v591_v34 = vld [vmem:[%s4066_s6 + $0x2c8] sm:$0xff]  ;;  %1380 = vmatpush1.bf16.msra.mxu0 %v3440_v22  ;;  %1423 = vmatpush1.bf16.msra.mxu1 %v3442_v26  ;;  %v3426_v36 = vcombine.low %v599_v28, %v607_v29  ;;  %v624_v25 = vld [vmem:[%s4066_s6 + $0x3d0] sm:$0xff] }
  0x70   : > { %1381 = vmatprep.subr.bf16.mxu0 %v3425_v27  ;;  %v3409_v37 = vcombine.high %v582_v30, %v590_v32  ;;  %1424 = vmatprep.subr.bf16.mxu1 %v3427_v31  ;;  %v3411_v38 = vcombine.high %v583_v33, %v591_v34  ;;  %v566_v39 = vld [vmem:[%s4066_s6 + $0x200] sm:$0xff]  ;;  %v567_v41 = vld [vmem:[%s4066_s6 + $0x208] sm:$0xff]  ;;  %v3408_v43 = vcombine.low %v582_v30, %v590_v32  ;;  %v617_v26 = vld [vmem:[%s4066_s6 + $0x398] sm:$0xff] }
  0x71   : > { %v574_v40 = vld [vmem:[%s4066_s6 + $0x240] sm:$0xff]  ;;  %v575_v42 = vld [vmem:[%s4066_s6 + $0x248] sm:$0xff]  ;;  %v3410_v44 = vcombine.low %v583_v33, %v591_v34  ;;  %v625_v27 = vld [vmem:[%s4066_s6 + $0x3d8] sm:$0xff]  ;;  %v3445_v30 = vcombine.high %v616_v24, %v624_v25 }
  0x72   : > { %v3393_v45 = vcombine.high %v566_v39, %v574_v40  ;;  %v3395_v46 = vcombine.high %v567_v41, %v575_v42  ;;  %v550_v47 = vld [vmem:[%s4066_s6 + $0x180] sm:$0xff]  ;;  %v551_v49 = vld [vmem:[%s4066_s6 + $0x188] sm:$0xff]  ;;  %v3392_v51 = vcombine.low %v566_v39, %v574_v40  ;;  %v3394_v53 = vcombine.low %v567_v41, %v575_v42  ;;  %v600_v32 = vld [vmem:[%s4066_s6 + $0x310] sm:$0xff] }
  0x73   : > { %1382 = vmatpush1.bf16.msra.mxu0 %v3424_v35  ;;  %1425 = vmatpush1.bf16.msra.mxu1 %v3426_v36  ;;  %v558_v48 = vld [vmem:[%s4066_s6 + $0x1c0] sm:$0xff]  ;;  %v559_v50 = vld [vmem:[%s4066_s6 + $0x1c8] sm:$0xff]  ;;  %v3447_v31 = vcombine.high %v617_v26, %v625_v27  ;;  %v608_v33 = vld [vmem:[%s4066_s6 + $0x350] sm:$0xff] }
  0x74   : > { %1383 = vmatprep.subr.bf16.mxu0 %v3409_v37  ;;  %1426 = vmatprep.subr.bf16.mxu1 %v3411_v38  ;;  %v4092_v52 = vld [vmem:[%s7456_s1 + $0x4] ss:$8 sps:$4 sm:$0xff]   ;;  %v3377_v54 = vcombine.high %v550_v47, %v558_v48  ;;  %v3379_v55 = vcombine.high %v551_v49, %v559_v50  ;;  %v3376_v60 = vcombine.low %v550_v47, %v558_v48  ;;  %v4123_v34 = vld [vmem:[%s7456_s1] ss:$8 sps:$4 sm:$0xff]   ;;  %v601_v35 = vld [vmem:[%s4066_s6 + $0x318] sm:$0xff] }
  0x75   : > { %v534_v56 = vld [vmem:[%s4066_s6 + $0x100] sm:$0xff]  ;;  %3472 = vmatprep.mubr.msk.bf16.mxu0 %vm1375_vm1, %v4092_v52  ;;  %v535_v58 = vld [vmem:[%s4066_s6 + $0x108] sm:$0xff]  ;;  %3473 = vmatprep.mubr.msk.bf16.mxu1 %vm1375_vm1, %v4092_v52  ;;  %v3378_v61 = vcombine.low %v551_v49, %v559_v50  ;;  %v609_v36 = vld [vmem:[%s4066_s6 + $0x358] sm:$0xff]  ;;  %v3444_v37 = vcombine.low %v616_v24, %v624_v25  ;;  %v3446_v38 = vcombine.low %v617_v26, %v625_v27 }
  0x76   : > { %v542_v57 = vld [vmem:[%s4066_s6 + $0x140] sm:$0xff]  ;;  %v543_v59 = vld [vmem:[%s4066_s6 + $0x148] sm:$0xff]  ;;  %v3429_v39 = vcombine.high %v600_v32, %v608_v33  ;;  %v3431_v40 = vcombine.high %v601_v35, %v609_v36  ;;  %v584_v41 = vld [vmem:[%s4066_s6 + $0x290] sm:$0xff] }
  0x77   : > { %1384 = vmatpush1.bf16.msra.mxu0 %v3408_v43  ;;  %1427 = vmatpush1.bf16.msra.mxu1 %v3410_v44  ;;  %v3361_v62 = vcombine.high %v534_v56, %v542_v57  ;;  %v3363_v63 = vcombine.high %v535_v58, %v543_v59  ;;  %v518_v0 = vld [vmem:[%s4066_s6 + $0x80] sm:$0xff]  ;;  %v519_v2 = vld [vmem:[%s4066_s6 + $0x88] sm:$0xff]  ;;  %v3360_v4 = vcombine.low %v534_v56, %v542_v57  ;;  %v592_v42 = vld [vmem:[%s4066_s6 + $0x2d0] sm:$0xff] }
  0x78   : > { %1385 = vmatprep.subr.bf16.mxu0 %v3393_v45  ;;  %1428 = vmatprep.subr.bf16.mxu1 %v3395_v46  ;;  %v526_v1 = vld [vmem:[%s4066_s6 + $0xc0] sm:$0xff]  ;;  %v527_v3 = vld [vmem:[%s4066_s6 + $0xc8] sm:$0xff]  ;;  %v3362_v5 = vcombine.low %v535_v58, %v543_v59  ;;  %v585_v43 = vld [vmem:[%s4066_s6 + $0x298] sm:$0xff]  ;;  %v3428_v45 = vcombine.low %v600_v32, %v608_v33  ;;  %v3430_v46 = vcombine.low %v601_v35, %v609_v36 }
  0x79   : > { %v3345_v6 = vcombine.high %v518_v0, %v526_v1  ;;  %v3347_v7 = vcombine.high %v519_v2, %v527_v3  ;;  %v502_v8 = vld [vmem:[%s4066_s6] sm:$0xff]  ;;  %v503_v10 = vld [vmem:[%s4066_s6 + $0x8] sm:$0xff]  ;;  %v3344_v12 = vcombine.low %v518_v0, %v526_v1  ;;  %v3346_v13 = vcombine.low %v519_v2, %v527_v3  ;;  %v593_v44 = vld [vmem:[%s4066_s6 + $0x2d8] sm:$0xff] }
  0x7a   : > { %v510_v9 = vld [vmem:[%s4066_s6 + $0x40] sm:$0xff]  ;;  %v511_v11 = vld [vmem:[%s4066_s6 + $0x48] sm:$0xff]  ;;  %v3413_v47 = vcombine.high %v584_v41, %v592_v42  ;;  %v3415_v48 = vcombine.high %v585_v43, %v593_v44  ;;  %v568_v49 = vld [vmem:[%s4066_s6 + $0x210] sm:$0xff] }
  0x7b   : > { %1386 = vmatpush1.bf16.msra.mxu0 %v3392_v51  ;;  %1429 = vmatpush1.bf16.msra.mxu1 %v3394_v53  ;;  %v3329_v14 = vcombine.high %v502_v8, %v510_v9  ;;  %v3331_v15 = vcombine.high %v503_v10, %v511_v11  ;;  %v630_v16 = vld [vmem:[%s4066_s6 + $0x400] sm:$0xff]  ;;  %v631_v18 = vld [vmem:[%s4066_s6 + $0x408] sm:$0xff]  ;;  %v3328_v20 = vcombine.low %v502_v8, %v510_v9  ;;  %v576_v50 = vld [vmem:[%s4066_s6 + $0x250] sm:$0xff] }
  0x7c   : > { %1387 = vmatprep.subr.bf16.mxu0 %v3377_v54  ;;  %1430 = vmatprep.subr.bf16.mxu1 %v3379_v55  ;;  %v638_v17 = vld [vmem:[%s4066_s6 + $0x440] sm:$0xff]  ;;  %v639_v19 = vld [vmem:[%s4066_s6 + $0x448] sm:$0xff]  ;;  %v3330_v21 = vcombine.low %v503_v10, %v511_v11  ;;  %v569_v51 = vld [vmem:[%s4066_s6 + $0x218] sm:$0xff]  ;;  %v3412_v54 = vcombine.low %v584_v41, %v592_v42  ;;  %v3414_v55 = vcombine.low %v585_v43, %v593_v44 }
  0x7d   : > { %v3457_v22 = vcombine.high %v630_v16, %v638_v17  ;;  %v3459_v23 = vcombine.high %v631_v18, %v639_v19  ;;  %v3456_v28 = vcombine.low %v630_v16, %v638_v17  ;;  %v3458_v29 = vcombine.low %v631_v18, %v639_v19  ;;  %v577_v53 = vld [vmem:[%s4066_s6 + $0x258] sm:$0xff]  ;;  %v552_v58 = vld [vmem:[%s4066_s6 + $0x190] sm:$0xff]  ;;  %v618_v35 = vld [vmem:[%s4066_s6 + $0x3a0] sm:$0xff] }
  0x7e   : > { %v3397_v56 = vcombine.high %v568_v49, %v576_v50  ;;  %v3399_v57 = vcombine.high %v569_v51, %v577_v53  ;;  %v560_v59 = vld [vmem:[%s4066_s6 + $0x1d0] sm:$0xff]  ;;  %v626_v36 = vld [vmem:[%s4066_s6 + $0x3e0] sm:$0xff] }
  0x7f   : > { %1388 = vmatpush1.bf16.msra.mxu0 %v3376_v60  ;;  %1431 = vmatpush1.bf16.msra.mxu1 %v3378_v61  ;;  %v553_v60 = vld [vmem:[%s4066_s6 + $0x198] sm:$0xff]  ;;  %v3381_v0 = vcombine.high %v552_v58, %v560_v59  ;;  %v536_v2 = vld [vmem:[%s4066_s6 + $0x110] sm:$0xff]  ;;  %v3449_v41 = vcombine.high %v618_v35, %v626_v36  ;;  %v602_v43 = vld [vmem:[%s4066_s6 + $0x320] sm:$0xff] }
  0x80   : > { %1389 = vmatprep.subr.bf16.mxu0 %v3361_v62  ;;  %1432 = vmatprep.subr.bf16.mxu1 %v3363_v63  ;;  %v561_v61 = vld [vmem:[%s4066_s6 + $0x1d8] sm:$0xff]  ;;  %v3396_v62 = vcombine.low %v568_v49, %v576_v50  ;;  %v3398_v63 = vcombine.low %v569_v51, %v577_v53  ;;  %v544_v3 = vld [vmem:[%s4066_s6 + $0x150] sm:$0xff]  ;;  %v610_v44 = vld [vmem:[%s4066_s6 + $0x360] sm:$0xff] }
  0x81   : > { %v3383_v1 = vcombine.high %v553_v60, %v561_v61  ;;  %v3365_v8 = vcombine.high %v536_v2, %v544_v3  ;;  %v520_v10 = vld [vmem:[%s4066_s6 + $0x90] sm:$0xff]  ;;  %v3433_v49 = vcombine.high %v602_v43, %v610_v44  ;;  %v586_v51 = vld [vmem:[%s4066_s6 + $0x2a0] sm:$0xff] }
  0x82   : > { %v528_v11 = vld [vmem:[%s4066_s6 + $0xd0] sm:$0xff]  ;;  %v594_v53 = vld [vmem:[%s4066_s6 + $0x2e0] sm:$0xff] }
  0x83   : > { %1390 = vmatpush1.bf16.msra.mxu0 %v3360_v4  ;;  %1433 = vmatpush1.bf16.msra.mxu1 %v3362_v5  ;;  %v537_v4 = vld [vmem:[%s4066_s6 + $0x118] sm:$0xff]  ;;  %v3349_v16 = vcombine.high %v520_v10, %v528_v11  ;;  %v504_v18 = vld [vmem:[%s4066_s6 + $0x10] sm:$0xff] }
  0x84   : > { %1391 = vmatprep.subr.bf16.mxu0 %v3345_v6  ;;  %1434 = vmatprep.subr.bf16.mxu1 %v3347_v7  ;;  %v545_v5 = vld [vmem:[%s4066_s6 + $0x158] sm:$0xff]  ;;  %v3380_v6 = vcombine.low %v552_v58, %v560_v59  ;;  %v3382_v7 = vcombine.low %v553_v60, %v561_v61  ;;  %v512_v19 = vld [vmem:[%s4066_s6 + $0x50] sm:$0xff]  ;;  %v3417_v58 = vcombine.high %v586_v51, %v594_v53  ;;  %v570_v60 = vld [vmem:[%s4066_s6 + $0x220] sm:$0xff] }
  0x85   : > { %v3367_v9 = vcombine.high %v537_v4, %v545_v5  ;;  %v3333_v24 = vcombine.high %v504_v18, %v512_v19  ;;  %v632_v26 = vld [vmem:[%s4066_s6 + $0x410] sm:$0xff]  ;;  %v578_v61 = vld [vmem:[%s4066_s6 + $0x260] sm:$0xff] }
  0x86   : > { %v640_v27 = vld [vmem:[%s4066_s6 + $0x450] sm:$0xff] }
  0x87   : > { %1392 = vmatpush1.bf16.msra.mxu0 %v3344_v12  ;;  %1435 = vmatpush1.bf16.msra.mxu1 %v3346_v13  ;;  %v521_v12 = vld [vmem:[%s4066_s6 + $0x98] sm:$0xff]  ;;  %v3461_v32 = vcombine.high %v632_v26, %v640_v27 }
  0x88   : > { %1393 = vmatprep.subr.bf16.mxu0 %v3329_v14  ;;  %1436 = vmatprep.subr.bf16.mxu1 %v3331_v15  ;;  %v529_v13 = vld [vmem:[%s4066_s6 + $0xd8] sm:$0xff]  ;;  %v3364_v14 = vcombine.low %v536_v2, %v544_v3  ;;  %v3366_v15 = vcombine.low %v537_v4, %v545_v5  ;;  %v3401_v2 = vcombine.high %v570_v60, %v578_v61  ;;  %v554_v4 = vld [vmem:[%s4066_s6 + $0x1a0] sm:$0xff] }
  0x89   : > { %v3351_v17 = vcombine.high %v521_v12, %v529_v13  ;;  %v562_v5 = vld [vmem:[%s4066_s6 + $0x1e0] sm:$0xff] }
  0x8b   : > { %1394 = vmatpush1.bf16.msra.mxu0 %v3328_v20  ;;  %1437 = vmatpush1.bf16.msra.mxu1 %v3330_v21  ;;  %v505_v20 = vld [vmem:[%s4066_s6 + $0x18] sm:$0xff] }
  0x8c   : > { %1409 = vmatprep.subr.bf16.mxu0 %v3457_v22  ;;  %1452 = vmatprep.subr.bf16.mxu1 %v3459_v23  ;;  %v513_v21 = vld [vmem:[%s4066_s6 + $0x58] sm:$0xff]  ;;  %v3348_v22 = vcombine.low %v520_v10, %v528_v11  ;;  %v3350_v23 = vcombine.low %v521_v12, %v529_v13  ;;  %v3385_v10 = vcombine.high %v554_v4, %v562_v5  ;;  %v538_v12 = vld [vmem:[%s4066_s6 + $0x120] sm:$0xff] }
  0x8d   : > { %v3335_v25 = vcombine.high %v505_v20, %v513_v21  ;;  %v546_v13 = vld [vmem:[%s4066_s6 + $0x160] sm:$0xff] }
  0x8f   : > { %1410 = vmatpush2.bf16.msra.mxu0 %v3456_v28  ;;  %1453 = vmatpush2.bf16.msra.mxu1 %v3458_v29  ;;  %v633_v28 = vld [vmem:[%s4066_s6 + $0x418] sm:$0xff] }
  0x90   : > { %1465 = vmatprep.subr.bf16.mxu0 %v3445_v30  ;;  %1508 = vmatprep.subr.bf16.mxu1 %v3447_v31  ;;  %v641_v29 = vld [vmem:[%s4066_s6 + $0x458] sm:$0xff]  ;;  %v3332_v30 = vcombine.low %v504_v18, %v512_v19  ;;  %v3334_v31 = vcombine.low %v505_v20, %v513_v21  ;;  %v3369_v18 = vcombine.high %v538_v12, %v546_v13  ;;  %v522_v20 = vld [vmem:[%s4066_s6 + $0xa0] sm:$0xff] }
  0x91   : > { %v3463_v33 = vcombine.high %v633_v28, %v641_v29  ;;  %v530_v21 = vld [vmem:[%s4066_s6 + $0xe0] sm:$0xff] }
  0x92   : > { %1412 = vmatmul.mubr.bf16.vlgmr.msra.gmra.mxu0 %v4123_v34  ;;  %1455 = vmatmul.mubr.bf16.vlgmr.msra.gmra.mxu1 %v4123_v34 }
  0x93   : > { %1466 = vmatpush1.bf16.msra.mxu0 %v3444_v37  ;;  %1509 = vmatpush1.bf16.msra.mxu1 %v3446_v38  ;;  %v619_v37 = vld [vmem:[%s4066_s6 + $0x3a8] sm:$0xff] }
  0x94   : > { %1467 = vmatprep.subr.bf16.mxu0 %v3429_v39  ;;  %1510 = vmatprep.subr.bf16.mxu1 %v3431_v40  ;;  %v627_v38 = vld [vmem:[%s4066_s6 + $0x3e8] sm:$0xff]  ;;  %v3460_v39 = vcombine.low %v632_v26, %v640_v27  ;;  %v3462_v40 = vcombine.low %v633_v28, %v641_v29  ;;  %v3353_v26 = vcombine.high %v522_v20, %v530_v21  ;;  %v506_v28 = vld [vmem:[%s4066_s6 + $0x20] sm:$0xff] }
  0x95   : > { %3474 = vmatprep.mubr.msk.bf16.mxu0 %vm1375_vm1, %v4092_v52  ;;  %3475 = vmatprep.mubr.msk.bf16.mxu1 %vm1375_vm1, %v4092_v52  ;;  %v3451_v42 = vcombine.high %v619_v37, %v627_v38  ;;  %v514_v29 = vld [vmem:[%s4066_s6 + $0x60] sm:$0xff] }
  0x97   : > { %1468 = vmatpush1.bf16.msra.mxu0 %v3428_v45  ;;  %1511 = vmatpush1.bf16.msra.mxu1 %v3430_v46  ;;  %v603_v45 = vld [vmem:[%s4066_s6 + $0x328] sm:$0xff] }
  0x98   : > { %1469 = vmatprep.subr.bf16.mxu0 %v3413_v47  ;;  %1512 = vmatprep.subr.bf16.mxu1 %v3415_v48  ;;  %v611_v46 = vld [vmem:[%s4066_s6 + $0x368] sm:$0xff]  ;;  %v3448_v47 = vcombine.low %v618_v35, %v626_v36  ;;  %v3450_v48 = vcombine.low %v619_v37, %v627_v38  ;;  %v3337_v35 = vcombine.high %v506_v28, %v514_v29  ;;  %v634_v37 = vld [vmem:[%s4066_s6 + $0x420] sm:$0xff] }
  0x99   : > { %v3435_v50 = vcombine.high %v603_v45, %v611_v46  ;;  %v642_v38 = vld [vmem:[%s4066_s6 + $0x460] sm:$0xff] }
  0x9b   : > { %1470 = vmatpush1.bf16.msra.mxu0 %v3412_v54  ;;  %1513 = vmatpush1.bf16.msra.mxu1 %v3414_v55  ;;  %v587_v54 = vld [vmem:[%s4066_s6 + $0x2a8] sm:$0xff] }
  0x9c   : > { %1471 = vmatprep.subr.bf16.mxu0 %v3397_v56  ;;  %1514 = vmatprep.subr.bf16.mxu1 %v3399_v57  ;;  %v595_v55 = vld [vmem:[%s4066_s6 + $0x2e8] sm:$0xff]  ;;  %v3432_v56 = vcombine.low %v602_v43, %v610_v44  ;;  %v3434_v57 = vcombine.low %v603_v45, %v611_v46  ;;  %v3465_v43 = vcombine.high %v634_v37, %v642_v38  ;;  %v620_v45 = vld [vmem:[%s4066_s6 + $0x3b0] sm:$0xff] }
  0x9d   : > { %v3419_v59 = vcombine.high %v587_v54, %v595_v55  ;;  %v628_v46 = vld [vmem:[%s4066_s6 + $0x3f0] sm:$0xff] }
  0x9f   : > { %1472 = vmatpush1.bf16.msra.mxu0 %v3396_v62  ;;  %1515 = vmatpush1.bf16.msra.mxu1 %v3398_v63  ;;  %v571_v62 = vld [vmem:[%s4066_s6 + $0x228] sm:$0xff] }
  0xa0   : > { %1473 = vmatprep.subr.bf16.mxu0 %v3381_v0  ;;  %1516 = vmatprep.subr.bf16.mxu1 %v3383_v1  ;;  %v579_v63 = vld [vmem:[%s4066_s6 + $0x268] sm:$0xff]  ;;  %v3416_v0 = vcombine.low %v586_v51, %v594_v53  ;;  %v3418_v1 = vcombine.low %v587_v54, %v595_v55  ;;  %v3453_v51 = vcombine.high %v620_v45, %v628_v46  ;;  %v604_v54 = vld [vmem:[%s4066_s6 + $0x330] sm:$0xff] }
  0xa1   : > { %v3403_v3 = vcombine.high %v571_v62, %v579_v63  ;;  %v612_v55 = vld [vmem:[%s4066_s6 + $0x370] sm:$0xff] }
  0xa3   : > { %1474 = vmatpush1.bf16.msra.mxu0 %v3380_v6  ;;  %1517 = vmatpush1.bf16.msra.mxu1 %v3382_v7  ;;  %v555_v6 = vld [vmem:[%s4066_s6 + $0x1a8] sm:$0xff] }
  0xa4   : > { %1475 = vmatprep.subr.bf16.mxu0 %v3365_v8  ;;  %1518 = vmatprep.subr.bf16.mxu1 %v3367_v9  ;;  %v563_v7 = vld [vmem:[%s4066_s6 + $0x1e8] sm:$0xff]  ;;  %v3400_v8 = vcombine.low %v570_v60, %v578_v61  ;;  %v3402_v9 = vcombine.low %v571_v62, %v579_v63  ;;  %v3437_v60 = vcombine.high %v604_v54, %v612_v55  ;;  %v588_v62 = vld [vmem:[%s4066_s6 + $0x2b0] sm:$0xff] }
  0xa5   : > { %v3387_v11 = vcombine.high %v555_v6, %v563_v7  ;;  %v596_v63 = vld [vmem:[%s4066_s6 + $0x2f0] sm:$0xff] }
  0xa7   : > { %1476 = vmatpush1.bf16.msra.mxu0 %v3364_v14  ;;  %1519 = vmatpush1.bf16.msra.mxu1 %v3366_v15  ;;  %v539_v14 = vld [vmem:[%s4066_s6 + $0x128] sm:$0xff] }
  0xa8   : > { %1477 = vmatprep.subr.bf16.mxu0 %v3349_v16  ;;  %1520 = vmatprep.subr.bf16.mxu1 %v3351_v17  ;;  %v547_v15 = vld [vmem:[%s4066_s6 + $0x168] sm:$0xff]  ;;  %v3384_v16 = vcombine.low %v554_v4, %v562_v5  ;;  %v3386_v17 = vcombine.low %v555_v6, %v563_v7  ;;  %v3421_v4 = vcombine.high %v588_v62, %v596_v63  ;;  %v572_v6 = vld [vmem:[%s4066_s6 + $0x230] sm:$0xff] }
  0xa9   : > { %v3371_v19 = vcombine.high %v539_v14, %v547_v15  ;;  %v580_v7 = vld [vmem:[%s4066_s6 + $0x270] sm:$0xff] }
  0xab   : > { %1478 = vmatpush1.bf16.msra.mxu0 %v3348_v22  ;;  %1521 = vmatpush1.bf16.msra.mxu1 %v3350_v23  ;;  %v523_v22 = vld [vmem:[%s4066_s6 + $0xa8] sm:$0xff] }
  0xac   : > { %1479 = vmatprep.subr.bf16.mxu0 %v3333_v24  ;;  %1522 = vmatprep.subr.bf16.mxu1 %v3335_v25  ;;  %v531_v23 = vld [vmem:[%s4066_s6 + $0xe8] sm:$0xff]  ;;  %v3368_v24 = vcombine.low %v538_v12, %v546_v13  ;;  %v3370_v25 = vcombine.low %v539_v14, %v547_v15  ;;  %v3405_v12 = vcombine.high %v572_v6, %v580_v7  ;;  %v556_v14 = vld [vmem:[%s4066_s6 + $0x1b0] sm:$0xff] }
  0xad   : > { %v3355_v27 = vcombine.high %v523_v22, %v531_v23  ;;  %v564_v15 = vld [vmem:[%s4066_s6 + $0x1f0] sm:$0xff] }
  0xaf   : > { %1480 = vmatpush1.bf16.msra.mxu0 %v3332_v30  ;;  %1523 = vmatpush1.bf16.msra.mxu1 %v3334_v31  ;;  %v507_v30 = vld [vmem:[%s4066_s6 + $0x28] sm:$0xff] }
  0xb0   : > { %1495 = vmatprep.subr.bf16.mxu0 %v3461_v32  ;;  %1538 = vmatprep.subr.bf16.mxu1 %v3463_v33  ;;  %v515_v31 = vld [vmem:[%s4066_s6 + $0x68] sm:$0xff]  ;;  %v3352_v32 = vcombine.low %v522_v20, %v530_v21  ;;  %v3354_v33 = vcombine.low %v523_v22, %v531_v23  ;;  %v540_v21 = vld [vmem:[%s4066_s6 + $0x130] sm:$0xff]  ;;  %v541_v23 = vld [vmem:[%s4066_s6 + $0x138] sm:$0xff] }
  0xb1   : > { %v3339_v36 = vcombine.high %v507_v30, %v515_v31  ;;  %v548_v22 = vld [vmem:[%s4066_s6 + $0x170] sm:$0xff] }
  0xb3   : > { %1496 = vmatpush2.bf16.msra.mxu0 %v3460_v39  ;;  %1539 = vmatpush2.bf16.msra.mxu1 %v3462_v40  ;;  %v635_v39 = vld [vmem:[%s4066_s6 + $0x428] sm:$0xff] }
  0xb4   : > { %1551 = vmatprep.subr.bf16.mxu0 %v3449_v41  ;;  %1594 = vmatprep.subr.bf16.mxu1 %v3451_v42  ;;  %v643_v40 = vld [vmem:[%s4066_s6 + $0x468] sm:$0xff]  ;;  %v3336_v41 = vcombine.low %v506_v28, %v514_v29  ;;  %v3338_v42 = vcombine.low %v507_v30, %v515_v31  ;;  %v524_v29 = vld [vmem:[%s4066_s6 + $0xb0] sm:$0xff]  ;;  %v525_v31 = vld [vmem:[%s4066_s6 + $0xb8] sm:$0xff] }
  0xb5   : > { %v3467_v44 = vcombine.high %v635_v39, %v643_v40  ;;  %v532_v30 = vld [vmem:[%s4066_s6 + $0xf0] sm:$0xff] }
  0xb6   : > { %1498 = vmatmul.mubr.bf16.vlgmr.msra.gmra.mxu0 %v4123_v34  ;;  %1541 = vmatmul.mubr.bf16.vlgmr.msra.gmra.mxu1 %v4123_v34 }
  0xb7   : > { %1552 = vmatpush1.bf16.msra.mxu0 %v3448_v47  ;;  %1595 = vmatpush1.bf16.msra.mxu1 %v3450_v48  ;;  %v621_v47 = vld [vmem:[%s4066_s6 + $0x3b8] sm:$0xff] }
  0xb8   : > { %1553 = vmatprep.subr.bf16.mxu0 %v3433_v49  ;;  %1596 = vmatprep.subr.bf16.mxu1 %v3435_v50  ;;  %v629_v48 = vld [vmem:[%s4066_s6 + $0x3f8] sm:$0xff]  ;;  %v3464_v49 = vcombine.low %v634_v37, %v642_v38  ;;  %v3466_v50 = vcombine.low %v635_v39, %v643_v40  ;;  %v508_v38 = vld [vmem:[%s4066_s6 + $0x30] sm:$0xff] }
  0xb9   : > { %3476 = vmatprep.mubr.msk.bf16.mxu0 %vm1375_vm1, %v4092_v52  ;;  %3477 = vmatprep.mubr.msk.bf16.mxu1 %vm1375_vm1, %v4092_v52  ;;  %v3455_v53 = vcombine.high %v621_v47, %v629_v48  ;;  %v516_v39 = vld [vmem:[%s4066_s6 + $0x70] sm:$0xff]  ;;  %v509_v40 = vld [vmem:[%s4066_s6 + $0x38] sm:$0xff] }
  0xbb   : > { %1554 = vmatpush1.bf16.msra.mxu0 %v3432_v56  ;;  %1597 = vmatpush1.bf16.msra.mxu1 %v3434_v57  ;;  %v605_v56 = vld [vmem:[%s4066_s6 + $0x338] sm:$0xff] }
  0xbc   : > { %1555 = vmatprep.subr.bf16.mxu0 %v3417_v58  ;;  %1598 = vmatprep.subr.bf16.mxu1 %v3419_v59  ;;  %v613_v57 = vld [vmem:[%s4066_s6 + $0x378] sm:$0xff]  ;;  %v3452_v58 = vcombine.low %v620_v45, %v628_v46  ;;  %v3454_v59 = vcombine.low %v621_v47, %v629_v48  ;;  %v636_v46 = vld [vmem:[%s4066_s6 + $0x430] sm:$0xff] }
  0xbd   : > { %v3439_v61 = vcombine.high %v605_v56, %v613_v57  ;;  %v644_v47 = vld [vmem:[%s4066_s6 + $0x470] sm:$0xff]  ;;  %v637_v48 = vld [vmem:[%s4066_s6 + $0x438] sm:$0xff] }
  0xbf   : > { %1556 = vmatpush1.bf16.msra.mxu0 %v3416_v0  ;;  %1599 = vmatpush1.bf16.msra.mxu1 %v3418_v1  ;;  %v589_v0 = vld [vmem:[%s4066_s6 + $0x2b8] sm:$0xff] }
  0xc0   : > { %1557 = vmatprep.subr.bf16.mxu0 %v3401_v2  ;;  %1600 = vmatprep.subr.bf16.mxu1 %v3403_v3  ;;  %v597_v1 = vld [vmem:[%s4066_s6 + $0x2f8] sm:$0xff]  ;;  %v3436_v2 = vcombine.low %v604_v54, %v612_v55  ;;  %v3438_v3 = vcombine.low %v605_v56, %v613_v57  ;;  %v3468_v55 = vcombine.low %v636_v46, %v644_v47 }
  0xc1   : > { %v3423_v5 = vcombine.high %v589_v0, %v597_v1 }
  0xc3   : > { %1558 = vmatpush1.bf16.msra.mxu0 %v3400_v8  ;;  %1601 = vmatpush1.bf16.msra.mxu1 %v3402_v9  ;;  %v573_v8 = vld [vmem:[%s4066_s6 + $0x238] sm:$0xff] }
  0xc4   : > { %1559 = vmatprep.subr.bf16.mxu0 %v3385_v10  ;;  %1602 = vmatprep.subr.bf16.mxu1 %v3387_v11  ;;  %v581_v9 = vld [vmem:[%s4066_s6 + $0x278] sm:$0xff]  ;;  %v3420_v10 = vcombine.low %v588_v62, %v596_v63  ;;  %v3422_v11 = vcombine.low %v589_v0, %v597_v1 }
  0xc5   : > { %v3407_v13 = vcombine.high %v573_v8, %v581_v9 }
  0xc7   : > { %1560 = vmatpush1.bf16.msra.mxu0 %v3384_v16  ;;  %1603 = vmatpush1.bf16.msra.mxu1 %v3386_v17  ;;  %v557_v16 = vld [vmem:[%s4066_s6 + $0x1b8] sm:$0xff] }
  0xc8   : > { %1561 = vmatprep.subr.bf16.mxu0 %v3369_v18  ;;  %1604 = vmatprep.subr.bf16.mxu1 %v3371_v19  ;;  %v565_v17 = vld [vmem:[%s4066_s6 + $0x1f8] sm:$0xff]  ;;  %v3404_v18 = vcombine.low %v572_v6, %v580_v7  ;;  %v3389_v19 = vcombine.high %v556_v14, %v564_v15 }
  0xc9   : > { %v3391_v20 = vcombine.high %v557_v16, %v565_v17 }
  0xcb   : > { %1562 = vmatpush1.bf16.msra.mxu0 %v3368_v24  ;;  %1605 = vmatpush1.bf16.msra.mxu1 %v3370_v25  ;;  %v549_v24 = vld [vmem:[%s4066_s6 + $0x178] sm:$0xff]  ;;  %v3388_v25 = vcombine.low %v556_v14, %v564_v15 }
  0xcc   : > { %1563 = vmatprep.subr.bf16.mxu0 %v3353_v26  ;;  %1606 = vmatprep.subr.bf16.mxu1 %v3355_v27  ;;  %v3390_v26 = vcombine.low %v557_v16, %v565_v17  ;;  %v3373_v27 = vcombine.high %v540_v21, %v548_v22  ;;  %v3375_v28 = vcombine.high %v541_v23, %v549_v24 }
  0xcf   : > { %1564 = vmatpush1.bf16.msra.mxu0 %v3352_v32  ;;  %1607 = vmatpush1.bf16.msra.mxu1 %v3354_v33  ;;  %v533_v32 = vld [vmem:[%s4066_s6 + $0xf8] sm:$0xff]  ;;  %v3372_v33 = vcombine.low %v540_v21, %v548_v22 }
  0xd0   : > { %1565 = vmatprep.subr.bf16.mxu0 %v3337_v35  ;;  %1608 = vmatprep.subr.bf16.mxu1 %v3339_v36  ;;  %v3374_v35 = vcombine.low %v541_v23, %v549_v24  ;;  %v3357_v36 = vcombine.high %v524_v29, %v532_v30  ;;  %v3359_v37 = vcombine.high %v525_v31, %v533_v32 }
  0xd3   : > { %1566 = vmatpush1.bf16.msra.mxu0 %v3336_v41  ;;  %1609 = vmatpush1.bf16.msra.mxu1 %v3338_v42  ;;  %v517_v41 = vld [vmem:[%s4066_s6 + $0x78] sm:$0xff]  ;;  %v3356_v42 = vcombine.low %v524_v29, %v532_v30 }
  0xd4   : > { %1581 = vmatprep.subr.bf16.mxu0 %v3465_v43  ;;  %1624 = vmatprep.subr.bf16.mxu1 %v3467_v44  ;;  %v3358_v43 = vcombine.low %v525_v31, %v533_v32  ;;  %v3341_v44 = vcombine.high %v508_v38, %v516_v39  ;;  %v3343_v45 = vcombine.high %v509_v40, %v517_v41 }
  0xd7   : > { %1582 = vmatpush2.bf16.msra.mxu0 %v3464_v49  ;;  %1625 = vmatpush2.bf16.msra.mxu1 %v3466_v50  ;;  %v645_v49 = vld [vmem:[%s4066_s6 + $0x478] sm:$0xff]  ;;  %v3340_v50 = vcombine.low %v508_v38, %v516_v39 }
  0xd8   : > { %1637 = vmatprep.subr.bf16.mxu0 %v3453_v51  ;;  %1680 = vmatprep.subr.bf16.mxu1 %v3455_v53  ;;  %v3342_v51 = vcombine.low %v509_v40, %v517_v41  ;;  %v3469_v53 = vcombine.high %v636_v46, %v644_v47  ;;  %v3471_v54 = vcombine.high %v637_v48, %v645_v49 }
  0xd9   : > { %v3470_v56 = vcombine.low %v637_v48, %v645_v49 }
  0xda   : > { %1584 = vmatmul.mubr.bf16.vlgmr.msra.gmra.mxu0 %v4123_v34  ;;  %1627 = vmatmul.mubr.bf16.vlgmr.msra.gmra.mxu1 %v4123_v34 }
  0xdb   : > { %1638 = vmatpush1.bf16.msra.mxu0 %v3452_v58  ;;  %1681 = vmatpush1.bf16.msra.mxu1 %v3454_v59 }
  0xdc   : > { %1639 = vmatprep.subr.bf16.mxu0 %v3437_v60  ;;  %1682 = vmatprep.subr.bf16.mxu1 %v3439_v61 }
  0xdd   : > { %3478 = vmatprep.mubr.msk.bf16.mxu0 %vm1375_vm1, %v4092_v52  ;;  %3479 = vmatprep.mubr.msk.bf16.mxu1 %vm1375_vm1, %v4092_v52  ;;  %v3406_v52 = vcombine.low %v573_v8, %v581_v9 }
  0xdf   : > { %1640 = vmatpush1.bf16.msra.mxu0 %v3436_v2  ;;  %1683 = vmatpush1.bf16.msra.mxu1 %v3438_v3 }
  0xe0   : > { %1641 = vmatprep.subr.bf16.mxu0 %v3421_v4  ;;  %1684 = vmatprep.subr.bf16.mxu1 %v3423_v5 }
  0xe3   : > { %1642 = vmatpush1.bf16.msra.mxu0 %v3420_v10  ;;  %1685 = vmatpush1.bf16.msra.mxu1 %v3422_v11 }
  0xe4   : > { %1643 = vmatprep.subr.bf16.mxu0 %v3405_v12  ;;  %1686 = vmatprep.subr.bf16.mxu1 %v3407_v13 }
  0xe7   : > { %1644 = vmatpush1.bf16.msra.mxu0 %v3404_v18  ;;  %1687 = vmatpush1.bf16.msra.mxu1 %v3406_v52 }
  0xe8   : > { %1645 = vmatprep.subr.bf16.mxu0 %v3389_v19  ;;  %1688 = vmatprep.subr.bf16.mxu1 %v3391_v20 }
  0xeb   : > { %1646 = vmatpush1.bf16.msra.mxu0 %v3388_v25  ;;  %1689 = vmatpush1.bf16.msra.mxu1 %v3390_v26 }
  0xec   : > { %1647 = vmatprep.subr.bf16.mxu0 %v3373_v27  ;;  %1690 = vmatprep.subr.bf16.mxu1 %v3375_v28 }
  0xef   : > { %1648 = vmatpush1.bf16.msra.mxu0 %v3372_v33  ;;  %1691 = vmatpush1.bf16.msra.mxu1 %v3374_v35 }
  0xf0   : > { %1649 = vmatprep.subr.bf16.mxu0 %v3357_v36  ;;  %1692 = vmatprep.subr.bf16.mxu1 %v3359_v37 }
  0xf3   : > { %1650 = vmatpush1.bf16.msra.mxu0 %v3356_v42  ;;  %1693 = vmatpush1.bf16.msra.mxu1 %v3358_v43 }
  0xf4   : > { %1651 = vmatprep.subr.bf16.mxu0 %v3341_v44  ;;  %1694 = vmatprep.subr.bf16.mxu1 %v3343_v45 }
  0xf7   : > { %1652 = vmatpush1.bf16.msra.mxu0 %v3340_v50  ;;  %1695 = vmatpush1.bf16.msra.mxu1 %v3342_v51 }
  0xf8   : > { %1667 = vmatprep.subr.bf16.mxu0 %v3469_v53  ;;  %1710 = vmatprep.subr.bf16.mxu1 %v3471_v54 }
  0xfb   : > { %1668 = vmatpush2.bf16.msra.mxu0 %v3468_v55  ;;  %1711 = vmatpush2.bf16.msra.mxu1 %v3470_v56 }
  0xfe   : > { %1670 = vmatmul.mubr.bf16.vlgmr.msra.gmra.mxu0 %v4123_v34  ;;  %1713 = vmatmul.mubr.bf16.vlgmr.msra.gmra.mxu1 %v4123_v34 }
 0x152   : > { %v1413_v57 = vpop.f32.mrf.mxu0  ;;  %v1456_v59 = vpop.f32.mrf.mxu1 }
 0x153   : > { %v1766_v58 = vmul.f32 %v1413_v57, %v1413_v57  ;;  %v1768_v61 = vmul.f32 %v1456_v59, %v1456_v59 }
 0x154   : > { %v1415_v60 = vpop.f32.mrf.mxu0  ;;  %v1458_v1 = vpop.f32.mrf.mxu1 }
 0x155   : > { %v1725_v62 = vadd.f32 %v1415_v60, %v1413_v57  ;;  %v1767_v63 = vmul.f32 %v1415_v60, %v1415_v60  ;;  %v3566_v0 = vpack.c.bf16 %v1415_v60, %v1413_v57  ;;  %v3567_v2 = vpack.c.bf16 %v1458_v1, %v1456_v59 }
 0x156   : > { %v1417_v3 = vpop.f32.mrf.mxu0  ;;  %v1769_v5 = vmul.f32 %v1458_v1, %v1458_v1  ;;  %v1460_v6 = vpop.f32.mrf.mxu1 }
 0x157   : > { %v1798_v34 = vadd.f32 %v1767_v63, %v1766_v58  ;;  %1935 = vst [vmem:[%s4251_s14] sm:$0xff] %v3566_v0  ;;  %v1726_v4 = vadd.f32 %v1725_v62, %v1456_v59  ;;  %1936 = vst [vmem:[%s4251_s14 + $0x8] sm:$0xff] %v3567_v2  ;;  %v1782_v7 = vmul.f32 %v1417_v3, %v1417_v3 }
 0x158   : > { %v1419_v8 = vpop.f32.mrf.mxu0  ;;  %v1462_v13 = vpop.f32.mrf.mxu1  ;;  %v1784_v17 = vmul.f32 %v1460_v6, %v1460_v6 }
 0x159   : > { %v1727_v9 = vadd.f32 %v1726_v4, %v1458_v1  ;;  %v1799_v10 = vadd.f32 %v1798_v34, %v1768_v61  ;;  %v1742_v11 = vadd.f32 %v1419_v8, %v1417_v3  ;;  %v1783_v12 = vmul.f32 %v1419_v8, %v1419_v8 }
 0x15a   : > { %v3574_v14 = vpack.c.bf16 %v1419_v8, %v1417_v3  ;;  %v3575_v15 = vpack.c.bf16 %v1462_v13, %v1460_v6  ;;  %v1785_v20 = vmul.f32 %v1462_v13, %v1462_v13 }
 0x15b   : > { %v1800_v16 = vadd.f32 %v1799_v10, %v1769_v5  ;;  %v1815_v18 = vadd.f32 %v1783_v12, %v1782_v7  ;;  %v1743_v52 = vadd.f32 %v1742_v11, %v1460_v6 }
 0x15c   : > { %1943 = vst [vmem:[%s4251_s14 + $0x40] sm:$0xff] %v3574_v14  ;;  %1944 = vst [vmem:[%s4251_s14 + $0x48] sm:$0xff] %v3575_v15 }
 0x15d   : > { %v1744_v19 = vadd.f32 %v1743_v52, %v1462_v13  ;;  %v1816_v21 = vadd.f32 %v1815_v18, %v1784_v17 }
 0x15f   : > { %v1817_v22 = vadd.f32 %v1816_v21, %v1785_v20 }
 0x176   : > { %v1499_v23 = vpop.f32.mrf.mxu0  ;;  %v1542_v24 = vpop.f32.mrf.mxu1 }
 0x177   : > { %v1770_v45 = vmul.f32 %v1499_v23, %v1499_v23  ;;  %v1728_v49 = vadd.f32 %v1727_v9, %v1499_v23  ;;  %v1772_v58 = vmul.f32 %v1542_v24, %v1542_v24 }
 0x178   : > { %v1501_v25 = vpop.f32.mrf.mxu0  ;;  %v1544_v27 = vpop.f32.mrf.mxu1 }
 0x179   : > { %v3568_v26 = vpack.c.bf16 %v1501_v25, %v1499_v23  ;;  %v3569_v28 = vpack.c.bf16 %v1544_v27, %v1542_v24  ;;  %v1801_v51 = vadd.f32 %v1800_v16, %v1770_v45  ;;  %v1771_v53 = vmul.f32 %v1501_v25, %v1501_v25 }
 0x17a   : > { %v1503_v29 = vpop.f32.mrf.mxu0  ;;  %v1546_v30 = vpop.f32.mrf.mxu1  ;;  %v1729_v55 = vadd.f32 %v1728_v49, %v1501_v25  ;;  %v1773_v63 = vmul.f32 %v1544_v27, %v1544_v27 }
 0x17b   : > { %1937 = vst [vmem:[%s4251_s14 + $0x10] sm:$0xff] %v3568_v26  ;;  %1938 = vst [vmem:[%s4251_s14 + $0x18] sm:$0xff] %v3569_v28  ;;  %v1786_v50 = vmul.f32 %v1503_v29, %v1503_v29  ;;  %v1745_v54 = vadd.f32 %v1744_v19, %v1503_v29  ;;  %v1802_v59 = vadd.f32 %v1801_v51, %v1771_v53 }
 0x17c   : > { %v1505_v31 = vpop.f32.mrf.mxu0  ;;  %v1548_v32 = vpop.f32.mrf.mxu1  ;;  %v1730_v61 = vadd.f32 %v1729_v55, %v1542_v24  ;;  %v1788_v1 = vmul.f32 %v1546_v30, %v1546_v30 }
 0x17d   : > { %v3576_v33 = vpack.c.bf16 %v1505_v31, %v1503_v29  ;;  %v3577_v35 = vpack.c.bf16 %v1548_v32, %v1546_v30  ;;  %v1818_v56 = vadd.f32 %v1817_v22, %v1786_v50  ;;  %v1787_v57 = vmul.f32 %v1505_v31, %v1505_v31 }
 0x17e   : > { %v1746_v60 = vadd.f32 %v1745_v54, %v1505_v31  ;;  %v1803_v0 = vadd.f32 %v1802_v59, %v1772_v58  ;;  %v1731_v3 = vadd.f32 %v1730_v61, %v1544_v27  ;;  %v1789_v8 = vmul.f32 %v1548_v32, %v1548_v32 }
 0x17f   : > { %1945 = vst [vmem:[%s4251_s14 + $0x50] sm:$0xff] %v3576_v33  ;;  %1946 = vst [vmem:[%s4251_s14 + $0x58] sm:$0xff] %v3577_v35  ;;  %v1819_v62 = vadd.f32 %v1818_v56, %v1787_v57 }
 0x180   : > { %v1747_v2 = vadd.f32 %v1746_v60, %v1546_v30  ;;  %v1804_v5 = vadd.f32 %v1803_v0, %v1773_v63 }
 0x181   : > { %v1820_v4 = vadd.f32 %v1819_v62, %v1788_v1 }
 0x182   : > { %v1748_v7 = vadd.f32 %v1747_v2, %v1548_v32 }
 0x183   : > { %v1821_v12 = vadd.f32 %v1820_v4, %v1789_v8  ;;  %v1723_v4 = vld [vmem:[#allocation2] sm:$0xff] }
 0x19a   : > { %v1585_v36 = vpop.f32.mrf.mxu0  ;;  %v1628_v37 = vpop.f32.mrf.mxu1 }
 0x19b   : > { %v1774_v34 = vmul.f32 %v1585_v36, %v1585_v36  ;;  %v1732_v6 = vadd.f32 %v1731_v3, %v1585_v36  ;;  %v1776_v17 = vmul.f32 %v1628_v37, %v1628_v37 }
 0x19c   : > { %v1587_v38 = vpop.f32.mrf.mxu0  ;;  %v1630_v40 = vpop.f32.mrf.mxu1 }
 0x19d   : > { %v3570_v39 = vpack.c.bf16 %v1587_v38, %v1585_v36  ;;  %v3571_v41 = vpack.c.bf16 %v1630_v40, %v1628_v37  ;;  %v1805_v10 = vadd.f32 %v1804_v5, %v1774_v34  ;;  %v1775_v11 = vmul.f32 %v1587_v38, %v1587_v38 }
 0x19e   : > { %v1589_v42 = vpop.f32.mrf.mxu0  ;;  %v1632_v43 = vpop.f32.mrf.mxu1  ;;  %v1733_v14 = vadd.f32 %v1732_v6, %v1587_v38  ;;  %v1777_v21 = vmul.f32 %v1630_v40, %v1630_v40  ;;  %v1764_v6 = vld [vmem:[#allocation3] sm:$0xff] }
 0x19f   : > { %1939 = vst [vmem:[%s4251_s14 + $0x20] sm:$0xff] %v3570_v39  ;;  %1940 = vst [vmem:[%s4251_s14 + $0x28] sm:$0xff] %v3571_v41  ;;  %v1790_v9 = vmul.f32 %v1589_v42, %v1589_v42  ;;  %v1749_v13 = vadd.f32 %v1748_v7, %v1589_v42  ;;  %v1806_v18 = vadd.f32 %v1805_v10, %v1775_v11 }
 0x1a0   : > { %v1591_v44 = vpop.f32.mrf.mxu0  ;;  %v1634_v46 = vpop.f32.mrf.mxu1  ;;  %v1734_v19 = vadd.f32 %v1733_v14, %v1628_v37  ;;  %v1792_v23 = vmul.f32 %v1632_v43, %v1632_v43 }
 0x1a1   : > { %v3578_v47 = vpack.c.bf16 %v1591_v44, %v1589_v42  ;;  %v3579_v48 = vpack.c.bf16 %v1634_v46, %v1632_v43  ;;  %v1822_v15 = vadd.f32 %v1821_v12, %v1790_v9  ;;  %v1791_v16 = vmul.f32 %v1591_v44, %v1591_v44  ;;  %v1724_v9 = vld [vmem:[#allocation2 + $0x8] sm:$0xff]  ;;  %v1765_v12 = vld [vmem:[#allocation3 + $0x8] sm:$0xff] }
 0x1a2   : > { %v1750_v52 = vadd.f32 %v1749_v13, %v1591_v44  ;;  %v1807_v22 = vadd.f32 %v1806_v18, %v1776_v17  ;;  %v1735_v25 = vadd.f32 %v1734_v19, %v1630_v40  ;;  %v1793_v33 = vmul.f32 %v1634_v46, %v1634_v46 }
 0x1a3   : > { %1947 = vst [vmem:[%s4251_s14 + $0x60] sm:$0xff] %v3578_v47  ;;  %1948 = vst [vmem:[%s4251_s14 + $0x68] sm:$0xff] %v3579_v48  ;;  %v1823_v20 = vadd.f32 %v1822_v15, %v1791_v16 }
 0x1a4   : > { %v1751_v24 = vadd.f32 %v1750_v52, %v1632_v43  ;;  %v1808_v28 = vadd.f32 %v1807_v22, %v1777_v21 }
 0x1a5   : > { %v1824_v26 = vadd.f32 %v1823_v20, %v1792_v23 }
 0x1a6   : > { %v1752_v32 = vadd.f32 %v1751_v24, %v1634_v46 }
 0x1a7   : > { %v1825_v42 = vadd.f32 %v1824_v26, %v1793_v33 }
 0x1be   : > { %v1671_v27 = vpop.f32.mrf.mxu0  ;;  %v1714_v31 = vpop.f32.mrf.mxu1 }
 0x1bf   : > { %v1736_v29 = vadd.f32 %v1735_v25, %v1671_v27  ;;  %v1778_v30 = vmul.f32 %v1671_v27, %v1671_v27  ;;  %v1780_v44 = vmul.f32 %v1714_v31, %v1714_v31 }
 0x1c0   : > { %v1673_v35 = vpop.f32.mrf.mxu0  ;;  %v1716_v41 = vpop.f32.mrf.mxu1 }
 0x1c1   : > { %v1809_v36 = vadd.f32 %v1808_v28, %v1778_v30  ;;  %v1737_v38 = vadd.f32 %v1736_v29, %v1673_v35  ;;  %v1779_v37 = vmul.f32 %v1673_v35, %v1673_v35  ;;  %v3572_v39 = vpack.c.bf16 %v1673_v35, %v1671_v27 }
 0x1c2   : > { %v3573_v43 = vpack.c.bf16 %v1716_v41, %v1714_v31  ;;  %v1675_v40 = vpop.f32.mrf.mxu0  ;;  %v1718_v48 = vpop.f32.mrf.mxu1  ;;  %v1781_v59 = vmul.f32 %v1716_v41, %v1716_v41 }
 0x1c3   : > { %1941 = vst [vmem:[%s4251_s14 + $0x30] sm:$0xff] %v3572_v39  ;;  %v1753_v45 = vadd.f32 %v1752_v32, %v1675_v40  ;;  %v1794_v47 = vmul.f32 %v1675_v40, %v1675_v40  ;;  %v1738_v49 = vadd.f32 %v1737_v38, %v1714_v31  ;;  %v1810_v50 = vadd.f32 %v1809_v36, %v1779_v37 }
 0x1c4   : > { %1942 = vst [vmem:[%s4251_s14 + $0x38] sm:$0xff] %v3573_v43  ;;  %v1677_v46 = vpop.f32.mrf.mxu0  ;;  %v1720_v56 = vpop.f32.mrf.mxu1  ;;  %v1796_v61 = vmul.f32 %v1718_v48, %v1718_v48 }
 0x1c5   : > { %v1826_v51 = vadd.f32 %v1825_v42, %v1794_v47  ;;  %v1754_v53 = vadd.f32 %v1753_v45, %v1677_v46  ;;  %v1795_v54 = vmul.f32 %v1677_v46, %v1677_v46  ;;  %v3580_v55 = vpack.c.bf16 %v1677_v46, %v1675_v40 }
 0x1c6   : > { %v3581_v57 = vpack.c.bf16 %v1720_v56, %v1718_v48  ;;  %v1739_v58 = vadd.f32 %v1738_v49, %v1716_v41  ;;  %v1811_v60 = vadd.f32 %v1810_v50, %v1780_v44  ;;  %v1797_v1 = vmul.f32 %v1720_v56, %v1720_v56 }
 0x1c7   : > { %v1827_v62 = vadd.f32 %v1826_v51, %v1795_v54  ;;  %1949 = vst [vmem:[%s4251_s14 + $0x70] sm:$0xff] %v3580_v55  ;;  %v1755_v63 = vadd.f32 %v1754_v53, %v1718_v48 }
 0x1c8   : > { %1950 = vst [vmem:[%s4251_s14 + $0x78] sm:$0xff] %v3581_v57  ;;  %1740 = vadd.xlane.f32.xlu0 %v1739_v58  ;;  %v1812_v0 = vadd.f32 %v1811_v60, %v1781_v59 }
 0x1c9   : > { %v1756_v2 = vadd.f32 %v1755_v63, %v1720_v56  ;;  %v1828_v3 = vadd.f32 %v1827_v62, %v1796_v61 }
 0x1ca   : > { %1813 = vadd.xlane.f32.xlu1 %v1812_v0 }
 0x1cb   : > { %v1829_v34 = vadd.f32 %v1828_v3, %v1797_v1 }
 0x1cc   : > { %1757 = vadd.xlane.f32.xlu0 %v1756_v2 }
 0x1ce   : > { %1830 = vadd.xlane.f32.xlu1 %v1829_v34 }
 0x251   : > { %v1741_v5 = vpop.xlane.xlu0 %1740 }
 0x252   : > { %v1759_v7 = vadd.f32 %v1741_v5, %v1723_v4 }
 0x253   : > { %v1814_v8 = vpop.xlane.xlu1 %1813 }
 0x254   : > { %1762 = vst.msk [vmem:[#allocation2] sm:$0xff] %vm1761_vm2, %v1759_v7  ;;  %v1832_v10 = vadd.f32 %v1814_v8, %v1764_v6 }
 0x255   : > { %v1758_v11 = vpop.xlane.xlu0 %1757 }
 0x256   : > { %1834 = vst.msk [vmem:[#allocation3] sm:$0xff] %vm1761_vm2, %v1832_v10  ;;  %v1760_v13 = vadd.f32 %v1758_v11, %v1724_v9  ;;  %1954 = sbr.rel (%p3498_p9) target bundleno = 1073 (0x431), region = 67 }
 0x257   : > { %v1831_v14 = vpop.xlane.xlu1 %1830 }
 0x258   : > { %1763 = vst.msk [vmem:[#allocation2 + $0x8] sm:$0xff] %vm1761_vm2, %v1760_v13  ;;  %v1833_v15 = vadd.f32 %v1831_v14, %v1765_v12 }
 0x25a   : > { %1835 = vst.msk [vmem:[#allocation3 + $0x8] sm:$0xff] %vm1761_vm2, %v1833_v15 }
 0x25b   : > { %v1955_v16 = vld [vmem:[#allocation2] sm:$0xff]  ;;  %v3709_v18 = vmov 0   ;;  %v1970_v33 = vld [vmem:[%s7457_s2 + $0x8] sm:$0xff]  ;;  %v4295_v48 = vld [vmem:[%s7459_s4 + $0x10] sm:$0xff] }
 0x25c   : > { %3678 = vset.pattern.permute.xlu0 %v3709_v18  ;;  %v1957_v52 = vmul.f32 0.00012207031, %v1955_v16  ;;  %3679 = vset.pattern.permute.xlu1 %v3709_v18  ;;  %v1969_v32 = vld [vmem:[%s7457_s2] sm:$0xff]  ;;  %v1978_v42 = vld [vmem:[%s7458_s3 + $0x8] sm:$0xff]  ;;  %v4300_v49 = vld [vmem:[%s7459_s4 + $0x18] sm:$0xff] }
 0x25d   : > { %v1959_v17 = vld [vmem:[#allocation3] sm:$0xff]  ;;  %v1977_v39 = vld [vmem:[%s7458_s3] sm:$0xff]  ;;  %v4290_v47 = vld [vmem:[%s7459_s4 + $0x8] sm:$0xff] }
 0x25e   : > { %v1961_v19 = vmul.f32 0.00012207031, %v1959_v17  ;;  %v1963_v24 = vmul.f32 %v1957_v52, %v1957_v52  ;;  %v4285_v45 = vld [vmem:[%s7459_s4] sm:$0xff]  ;;  %v4310_v46 = vld [vmem:[%s7459_s4 + $0x28] sm:$0xff]  ;;  %v4315_v51 = vld [vmem:[%s7459_s4 + $0x30] sm:$0xff]  ;;  %v7591_v55 = vunpack.c.l.bf16 %v4290_v47 }
 0x25f   : > { %v1956_v20 = vld [vmem:[#allocation2 + $0x8] sm:$0xff]  ;;  %v4305_v50 = vld [vmem:[%s7459_s4 + $0x20] sm:$0xff]  ;;  %v4320_v53 = vld [vmem:[%s7459_s4 + $0x38] sm:$0xff] }
 0x260   : > { %v1958_v22 = vmul.f32 0.00012207031, %v1956_v20  ;;  %v1965_v26 = vsub.f32 %v1961_v19, %v1963_v24  ;;  %v4328_v57 = vld [vmem:[%s7459_s4 + $0x40] sm:$0xff]  ;;  %v4333_v58 = vld [vmem:[%s7459_s4 + $0x48] sm:$0xff]  ;;  %v4342_v63 = vld [vmem:[%s7459_s4 + $0x50] sm:$0xff] }
 0x261   : > { %v1960_v21 = vld [vmem:[#allocation3 + $0x8] sm:$0xff]  ;;  %v4356_v4 = vld [vmem:[%s7459_s4 + $0x60] sm:$0xff]  ;;  %v4361_v5 = vld [vmem:[%s7459_s4 + $0x68] sm:$0xff] }
 0x262   : > { %v1962_v23 = vmul.f32 0.00012207031, %v1960_v21  ;;  %v1964_v25 = vmul.f32 %v1958_v22, %v1958_v22  ;;  %v1967_v28 = vmax.f32 %v1965_v26, 0.0  ;;  %v4347_v0 = vld [vmem:[%s7459_s4 + $0x58] sm:$0xff]  ;;  %v4370_v10 = vld [vmem:[%s7459_s4 + $0x70] sm:$0xff]  ;;  %v4384_v16 = vld [vmem:[%s7459_s4 + $0x80] sm:$0xff] }
 0x263   : > { %v4375_v11 = vld [vmem:[%s7459_s4 + $0x78] sm:$0xff]  ;;  %v4389_v17 = vld [vmem:[%s7459_s4 + $0x88] sm:$0xff]  ;;  %v4398_v21 = vld [vmem:[%s7459_s4 + $0x90] sm:$0xff] }
 0x264   : > { %v1966_v27 = vsub.f32 %v1962_v23, %v1964_v25  ;;  %v1971_v30 = vadd.f32 1e-05, %v1967_v28  ;;  %v4417_v28 = vld [vmem:[%s7459_s4 + $0xa8] sm:$0xff]  ;;  %v4515_v24 = vld [vmem:[%s7459_s4 + $0x118] sm:$0xff]  ;;  %v4566_v25 = vld [vmem:[%s7459_s4 + $0x150] sm:$0xff] }
 0x265   : > { %v4501_v26 = vld [vmem:[%s7459_s4 + $0x108] sm:$0xff]  ;;  %v4571_v13 = vld [vmem:[%s7459_s4 + $0x158] sm:$0xff]  ;;  %v4580_v23 = vld [vmem:[%s7459_s4 + $0x160] sm:$0xff] }
 0x266   : > { %v1968_v29 = vmax.f32 %v1966_v27, 0.0  ;;  %3680 = vrsqrt.f32 %v1971_v30  ;;  %v4412_v27 = vld [vmem:[%s7459_s4 + $0xa0] sm:$0xff]  ;;  %v4487_v30 = vld [vmem:[%s7459_s4 + $0xf8] sm:$0xff]  ;;  %v4529_v20 = vld [vmem:[%s7459_s4 + $0x128] sm:$0xff]  ;;  %7578 = vst [vmem:[#allocation5_spill] sm:$0xff] %v4580_v23  ;;  %v7590_v23 = vunpack.c.h.bf16 %v4285_v45 }
 0x267   : > { %v4557_v15 = vld [vmem:[%s7459_s4 + $0x148] sm:$0xff]  ;;  %v4594_v19 = vld [vmem:[%s7459_s4 + $0x170] sm:$0xff]  ;;  %v4599_v7 = vld [vmem:[%s7459_s4 + $0x178] sm:$0xff] }
 0x268   : > { %v1972_v31 = vadd.f32 1e-05, %v1968_v29  ;;  %v4552_v29 = vld [vmem:[%s7459_s4 + $0x140] sm:$0xff]  ;;  %v4585_v9 = vld [vmem:[%s7459_s4 + $0x168] sm:$0xff]  ;;  %7580 = vst [vmem:[#allocation7_spill] sm:$0xff] %v4594_v19  ;;  %7581 = vst [vmem:[#allocation8_spill] sm:$0xff] %v4599_v7  ;;  %v7589_v19 = vunpack.c.l.bf16 %v4285_v45  ;;  %v7596_v45 = vunpack.c.h.bf16 %v4295_v48 }
 0x269   : > { %7579 = vst [vmem:[#allocation6_spill] sm:$0xff] %v4585_v9  ;;  %v4608_v18 = vld [vmem:[%s7459_s4 + $0x180] sm:$0xff]  ;;  %v4613_v34 = vld [vmem:[%s7459_s4 + $0x188] sm:$0xff]  ;;  %v4622_v14 = vld [vmem:[%s7459_s4 + $0x190] sm:$0xff] }
 0x26a   : > { %3682 = vrsqrt.f32 %v1972_v31  ;;  %v4538_v31 = vld [vmem:[%s7459_s4 + $0x130] sm:$0xff]  ;;  %7582 = vst [vmem:[#allocation9_spill] sm:$0xff] %v4608_v18  ;;  %7583 = vst [vmem:[#allocation10_spill] sm:$0xff] %v4613_v34  ;;  %v4627_v2 = vld [vmem:[%s7459_s4 + $0x198] sm:$0xff] }
 0x26b   : > { %7584 = vst [vmem:[#allocation11_spill] sm:$0xff] %v4622_v14  ;;  %7585 = vst [vmem:[#allocation12_spill] sm:$0xff] %v4627_v2  ;;  %v4636_v12 = vld [vmem:[%s7459_s4 + $0x1a0] sm:$0xff]  ;;  %v4641_v62 = vld [vmem:[%s7459_s4 + $0x1a8] sm:$0xff] }
 0x26c   : > { %7586 = vst [vmem:[#allocation13_spill] sm:$0xff] %v4636_v12  ;;  %7587 = vst [vmem:[#allocation14_spill] sm:$0xff] %v4641_v62  ;;  %v4650_v8 = vld [vmem:[%s7459_s4 + $0x1b0] sm:$0xff]  ;;  %v4655_v60 = vld [vmem:[%s7459_s4 + $0x1b8] sm:$0xff] }
 0x26d   : > { %7588 = vst [vmem:[#allocation15_spill] sm:$0xff] %v4650_v8  ;;  %v4664_v6 = vld [vmem:[%s7459_s4 + $0x1c0] sm:$0xff]  ;;  %v4669_v56 = vld [vmem:[%s7459_s4 + $0x1c8] sm:$0xff]  ;;  %v4678_v3 = vld [vmem:[%s7459_s4 + $0x1d0] sm:$0xff]  ;;  %v7593_v8 = vunpack.c.h.bf16 %v4290_v47  ;;  %v7599_v47 = vunpack.c.h.bf16 %v4300_v49 }
 0x26e   : > { %v4683_v54 = vld [vmem:[%s7459_s4 + $0x1d8] sm:$0xff]  ;;  %v4694_v1 = vld [vmem:[%s7459_s4 + $0x1e0] sm:$0xff]  ;;  %v4699_v34 = vld [vmem:[%s7459_s4 + $0x1e8] sm:$0xff] }
 0x26f   : > { %v4708_v12 = vld [vmem:[%s7459_s4 + $0x1f0] sm:$0xff]  ;;  %v4713_v2 = vld [vmem:[%s7459_s4 + $0x1f8] sm:$0xff] }
 0x273   : > { %v3681_v35 = vpop.eup %3680 }
 0x274   : > { %v1975_v38 = vmul.f32 %v3681_v35, %v1969_v32  ;;  %v4431_v35 = vld [vmem:[%s7459_s4 + $0xb8] sm:$0xff]  ;;  %v4473_v32 = vld [vmem:[%s7459_s4 + $0xe8] sm:$0xff] }
 0x276   : > { %2177 = vperm.xlu0 %3678, %v1975_v38   ;;  %v1979_v41 = vmul.f32 %v1975_v38, %v1957_v52  ;;  %v4459_v38 = vld [vmem:[%s7459_s4 + $0xd8] sm:$0xff] }
 0x277   : > { %v3683_v36 = vpop.eup %3682  ;;  %v4543_v52 = vld [vmem:[%s7459_s4 + $0x138] sm:$0xff] }
 0x278   : > { %v1976_v37 = vmul.f32 %v3683_v36, %v1970_v33  ;;  %v1981_v43 = vsub.f32 %v1977_v39, %v1979_v41  ;;  %v4426_v33 = vld [vmem:[%s7459_s4 + $0xb0] sm:$0xff]  ;;  %v4440_v41 = vld [vmem:[%s7459_s4 + $0xc0] sm:$0xff] }
 0x279   : > { %v4454_v39 = vld [vmem:[%s7459_s4 + $0xd0] sm:$0xff]  ;;  %v4524_v36 = vld [vmem:[%s7459_s4 + $0x120] sm:$0xff] }
 0x27a   : > { %v1980_v44 = vmul.f32 %v1976_v37, %v1958_v22  ;;  %2182 = vperm.xlu0 %3678, %v1976_v37   ;;  %2315 = vperm.xlu1 %3679, %v1981_v43   ;;  %v4403_v22 = vld [vmem:[%s7459_s4 + $0x98] sm:$0xff]  ;;  %v4468_v37 = vld [vmem:[%s7459_s4 + $0xe0] sm:$0xff] }
 0x27b   : > { %v4496_v43 = vld [vmem:[%s7459_s4 + $0x100] sm:$0xff] }
 0x27c   : > { %v1982_v40 = vsub.f32 %v1978_v42, %v1980_v44  ;;  %v4445_v42 = vld [vmem:[%s7459_s4 + $0xc8] sm:$0xff]  ;;  %v4510_v44 = vld [vmem:[%s7459_s4 + $0x110] sm:$0xff] }
 0x27e   : > { %2320 = vperm.xlu1 %3679, %v1982_v40   ;;  %v4482_v40 = vld [vmem:[%s7459_s4 + $0xf0] sm:$0xff] }
 0x2f1   : > { %v4689_v14 = vpop.permute.xlu0 %2177 }
 0x2f2   : > { %v4735_v9 = vmul.f32 %v4689_v14, %v7589_v19  ;;  %v4740_v7 = vmul.f32 %v4689_v14, %v7590_v23  ;;  %v4745_v59 = vmul.f32 %v4689_v14, %v7591_v55  ;;  %v4752_v62 = vmul.f32 %v4689_v14, %v7593_v8 }
 0x2f3   : > { %v7595_v19 = vunpack.c.l.bf16 %v4295_v48  ;;  %v4762_v23 = vmul.f32 %v4689_v14, %v7596_v45  ;;  %v7598_v55 = vunpack.c.l.bf16 %v4300_v49  ;;  %v4772_v8 = vmul.f32 %v4689_v14, %v7599_v47 }
 0x2f4   : > { %7592 = vst [vmem:[#allocation16_spill] sm:$0xff] %v4745_v59  ;;  %7594 = vst [vmem:[#allocation17_spill] sm:$0xff] %v4752_v62  ;;  %v7601_v62 = vunpack.c.l.bf16 %v4305_v50  ;;  %v7602_v48 = vunpack.c.h.bf16 %v4305_v50  ;;  %v7605_v49 = vunpack.c.h.bf16 %v4310_v46  ;;  %v7608_v50 = vunpack.c.h.bf16 %v4315_v51 }
 0x2f5   : > { %v4747_v61 = vpop.permute.xlu0 %2182  ;;  %v4757_v18 = vmul.f32 %v4689_v14, %v7595_v19  ;;  %7597 = vst [vmem:[#allocation18_spill] sm:$0xff] %v4762_v23  ;;  %v4767_v59 = vmul.f32 %v4689_v14, %v7598_v55  ;;  %7600 = vst [vmem:[#allocation19_spill] sm:$0xff] %v4772_v8  ;;  %v7604_v23 = vunpack.c.l.bf16 %v4310_v46  ;;  %v7607_v8 = vunpack.c.l.bf16 %v4315_v51 }
 0x2f6   : > { %v4777_v19 = vmul.f32 %v4689_v14, %v7601_v62  ;;  %v4782_v45 = vmul.f32 %v4689_v14, %v7602_v48  ;;  %v4792_v47 = vmul.f32 %v4689_v14, %v7605_v49  ;;  %v4802_v48 = vmul.f32 %v4689_v14, %v7608_v50 }
 0x2f7   : > { %v4787_v55 = vmul.f32 %v4689_v14, %v7604_v23  ;;  %v4797_v62 = vmul.f32 %v4689_v14, %v7607_v8  ;;  %v7611_v46 = vunpack.c.h.bf16 %v4320_v53  ;;  %v7614_v51 = vunpack.c.h.bf16 %v4328_v57 }
 0x2f8   : > { %7603 = vst [vmem:[#allocation20_spill] sm:$0xff] %v4782_v45  ;;  %7606 = vst [vmem:[#allocation21_spill] sm:$0xff] %v4792_v47  ;;  %v7610_v45 = vunpack.c.l.bf16 %v4320_v53  ;;  %v7613_v47 = vunpack.c.l.bf16 %v4328_v57  ;;  %v7617_v53 = vunpack.c.h.bf16 %v4333_v58  ;;  %v7620_v57 = vunpack.c.h.bf16 %v4342_v63 }
 0x2f9   : > { %7609 = vst [vmem:[#allocation22_spill] sm:$0xff] %v4802_v48  ;;  %v4812_v49 = vmul.f32 %v4689_v14, %v7611_v46  ;;  %v4822_v50 = vmul.f32 %v4747_v61, %v7614_v51  ;;  %v7616_v48 = vunpack.c.l.bf16 %v4333_v58  ;;  %v7623_v58 = vunpack.c.h.bf16 %v4347_v0 }
 0x2fa   : > { %v4807_v23 = vmul.f32 %v4689_v14, %v7610_v45  ;;  %v4817_v8 = vmul.f32 %v4747_v61, %v7613_v47  ;;  %v4832_v46 = vmul.f32 %v4747_v61, %v7617_v53  ;;  %v4842_v51 = vmul.f32 %v4747_v61, %v7620_v57 }
 0x2fb   : > { %7612 = vst [vmem:[#allocation23_spill] sm:$0xff] %v4812_v49  ;;  %7615 = vst [vmem:[#allocation24_spill] sm:$0xff] %v4822_v50  ;;  %v4827_v45 = vmul.f32 %v4747_v61, %v7616_v48  ;;  %v7619_v49 = vunpack.c.l.bf16 %v4342_v63  ;;  %v7622_v50 = vunpack.c.l.bf16 %v4347_v0  ;;  %v4852_v53 = vmul.f32 %v4747_v61, %v7623_v58 }
 0x2fc   : > { %7618 = vst [vmem:[#allocation25_spill] sm:$0xff] %v4832_v46  ;;  %7621 = vst [vmem:[#allocation26_spill] sm:$0xff] %v4842_v51  ;;  %v7625_v46 = vunpack.c.l.bf16 %v4356_v4  ;;  %v7626_v63 = vunpack.c.h.bf16 %v4356_v4  ;;  %v7628_v51 = vunpack.c.l.bf16 %v4361_v5  ;;  %v7629_v0 = vunpack.c.h.bf16 %v4361_v5 }
 0x2fd   : > { %v4837_v47 = vmul.f32 %v4747_v61, %v7619_v49  ;;  %v4847_v48 = vmul.f32 %v4747_v61, %v7622_v50  ;;  %7624 = vst [vmem:[#allocation27_spill] sm:$0xff] %v4852_v53  ;;  %v7631_v53 = vunpack.c.l.bf16 %v4370_v10  ;;  %v7632_v4 = vunpack.c.h.bf16 %v4370_v10 }
 0x2fe   : > { %v4857_v49 = vmul.f32 %v4747_v61, %v7625_v46  ;;  %v4862_v57 = vmul.f32 %v4747_v61, %v7626_v63  ;;  %v4867_v50 = vmul.f32 %v4747_v61, %v7628_v51  ;;  %v4872_v58 = vmul.f32 %v4747_v61, %v7629_v0 }
 0x2ff   : > { %v4877_v46 = vmul.f32 %v4747_v61, %v7631_v53  ;;  %v4882_v63 = vmul.f32 %v4747_v61, %v7632_v4  ;;  %v7635_v5 = vunpack.c.h.bf16 %v4375_v11  ;;  %v7638_v10 = vunpack.c.h.bf16 %v4384_v16 }
 0x300   : > { %7627 = vst [vmem:[#allocation28_spill] sm:$0xff] %v4862_v57  ;;  %7630 = vst [vmem:[#allocation29_spill] sm:$0xff] %v4872_v58  ;;  %v7634_v57 = vunpack.c.l.bf16 %v4375_v11  ;;  %v7637_v58 = vunpack.c.l.bf16 %v4384_v16  ;;  %v7641_v11 = vunpack.c.h.bf16 %v4389_v17  ;;  %v7644_v16 = vunpack.c.h.bf16 %v4398_v21 }
 0x301   : > { %7633 = vst [vmem:[#allocation30_spill] sm:$0xff] %v4882_v63  ;;  %v4892_v0 = vmul.f32 %v4747_v61, %v7635_v5  ;;  %v4902_v4 = vmul.f32 %v4689_v14, %v7638_v10  ;;  %v7640_v63 = vunpack.c.l.bf16 %v4389_v17  ;;  %v7647_v17 = vunpack.c.h.bf16 %v4403_v22 }
 0x302   : > { %v4887_v51 = vmul.f32 %v4747_v61, %v7634_v57  ;;  %v4897_v53 = vmul.f32 %v4689_v14, %v7637_v58  ;;  %v4912_v5 = vmul.f32 %v4689_v14, %v7641_v11  ;;  %v4922_v10 = vmul.f32 %v4689_v14, %v7644_v16 }
 0x303   : > { %7636 = vst [vmem:[#allocation31_spill] sm:$0xff] %v4892_v0  ;;  %7639 = vst [vmem:[#allocation32_spill] sm:$0xff] %v4902_v4  ;;  %v4907_v57 = vmul.f32 %v4689_v14, %v7640_v63  ;;  %v7643_v0 = vunpack.c.l.bf16 %v4398_v21  ;;  %v7646_v4 = vunpack.c.l.bf16 %v4403_v22  ;;  %v4932_v11 = vmul.f32 %v4689_v14, %v7647_v17 }
 0x304   : > { %7642 = vst [vmem:[#allocation33_spill] sm:$0xff] %v4912_v5  ;;  %7645 = vst [vmem:[#allocation34_spill] sm:$0xff] %v4922_v10  ;;  %v7649_v5 = vunpack.c.l.bf16 %v4412_v27  ;;  %v7650_v21 = vunpack.c.h.bf16 %v4412_v27  ;;  %v7652_v10 = vunpack.c.l.bf16 %v4417_v28  ;;  %v7653_v22 = vunpack.c.h.bf16 %v4417_v28 }
 0x305   : > { %v4917_v58 = vmul.f32 %v4689_v14, %v7643_v0  ;;  %v4927_v63 = vmul.f32 %v4689_v14, %v7646_v4  ;;  %7648 = vst [vmem:[#allocation35_spill] sm:$0xff] %v4932_v11  ;;  %v7655_v11 = vunpack.c.l.bf16 %v4426_v33  ;;  %v7656_v27 = vunpack.c.h.bf16 %v4426_v33 }
 0x306   : > { %v4937_v0 = vmul.f32 %v4689_v14, %v7649_v5  ;;  %v4942_v16 = vmul.f32 %v4689_v14, %v7650_v21  ;;  %v4947_v4 = vmul.f32 %v4689_v14, %v7652_v10  ;;  %v4952_v17 = vmul.f32 %v4689_v14, %v7653_v22 }
 0x307   : > { %v4957_v5 = vmul.f32 %v4689_v14, %v7655_v11  ;;  %v4962_v21 = vmul.f32 %v4689_v14, %v7656_v27  ;;  %v7659_v28 = vunpack.c.h.bf16 %v4431_v35  ;;  %v7662_v33 = vunpack.c.h.bf16 %v4440_v41 }
 0x308   : > { %7651 = vst [vmem:[#allocation36_spill] sm:$0xff] %v4942_v16  ;;  %7654 = vst [vmem:[#allocation37_spill] sm:$0xff] %v4952_v17  ;;  %v7658_v16 = vunpack.c.l.bf16 %v4431_v35  ;;  %v7661_v17 = vunpack.c.l.bf16 %v4440_v41  ;;  %v7665_v35 = vunpack.c.h.bf16 %v4445_v42  ;;  %v7668_v41 = vunpack.c.h.bf16 %v4454_v39 }
 0x309   : > { %7657 = vst [vmem:[#allocation38_spill] sm:$0xff] %v4962_v21  ;;  %v4972_v22 = vmul.f32 %v4689_v14, %v7659_v28  ;;  %v4982_v27 = vmul.f32 %v4747_v61, %v7662_v33  ;;  %v7664_v21 = vunpack.c.l.bf16 %v4445_v42  ;;  %v7671_v42 = vunpack.c.h.bf16 %v4459_v38 }
 0x30a   : > { %v4967_v10 = vmul.f32 %v4689_v14, %v7658_v16  ;;  %v4977_v11 = vmul.f32 %v4747_v61, %v7661_v17  ;;  %v4992_v28 = vmul.f32 %v4747_v61, %v7665_v35  ;;  %v5002_v33 = vmul.f32 %v4747_v61, %v7668_v41 }
 0x30b   : > { %7660 = vst [vmem:[#allocation39_spill] sm:$0xff] %v4972_v22  ;;  %7663 = vst [vmem:[#allocation40_spill] sm:$0xff] %v4982_v27  ;;  %v4987_v16 = vmul.f32 %v4747_v61, %v7664_v21  ;;  %v7667_v22 = vunpack.c.l.bf16 %v4454_v39  ;;  %v7670_v27 = vunpack.c.l.bf16 %v4459_v38  ;;  %v5012_v35 = vmul.f32 %v4747_v61, %v7671_v42 }
 0x30c   : > { %7666 = vst [vmem:[#allocation41_spill] sm:$0xff] %v4992_v28  ;;  %7669 = vst [vmem:[#allocation42_spill] sm:$0xff] %v5002_v33  ;;  %v7673_v28 = vunpack.c.l.bf16 %v4468_v37  ;;  %v7674_v39 = vunpack.c.h.bf16 %v4468_v37  ;;  %v7676_v33 = vunpack.c.l.bf16 %v4473_v32  ;;  %v7677_v38 = vunpack.c.h.bf16 %v4473_v32 }
 0x30d   : > { %v4997_v17 = vmul.f32 %v4747_v61, %v7667_v22  ;;  %v5007_v21 = vmul.f32 %v4747_v61, %v7670_v27  ;;  %7672 = vst [vmem:[#allocation43_spill] sm:$0xff] %v5012_v35  ;;  %v7679_v35 = vunpack.c.l.bf16 %v4482_v40  ;;  %v7680_v37 = vunpack.c.h.bf16 %v4482_v40 }
 0x30e   : > { %v5017_v22 = vmul.f32 %v4747_v61, %v7673_v28  ;;  %v5022_v41 = vmul.f32 %v4747_v61, %v7674_v39  ;;  %v5027_v27 = vmul.f32 %v4747_v61, %v7676_v33  ;;  %v5032_v42 = vmul.f32 %v4747_v61, %v7677_v38 }
 0x30f   : > { %v5037_v28 = vmul.f32 %v4747_v61, %v7679_v35  ;;  %v5042_v39 = vmul.f32 %v4747_v61, %v7680_v37  ;;  %v7683_v32 = vunpack.c.h.bf16 %v4487_v30  ;;  %v7686_v40 = vunpack.c.h.bf16 %v4496_v43 }
 0x310   : > { %7675 = vst [vmem:[#allocation44_spill] sm:$0xff] %v5022_v41  ;;  %7678 = vst [vmem:[#allocation45_spill] sm:$0xff] %v5032_v42  ;;  %v7682_v41 = vunpack.c.l.bf16 %v4487_v30  ;;  %v7685_v42 = vunpack.c.l.bf16 %v4496_v43  ;;  %v7689_v30 = vunpack.c.h.bf16 %v4501_v26  ;;  %v7692_v43 = vunpack.c.h.bf16 %v4510_v44 }
 0x311   : > { %7681 = vst [vmem:[#allocation46_spill] sm:$0xff] %v5042_v39  ;;  %v5052_v38 = vmul.f32 %v4747_v61, %v7683_v32  ;;  %v5062_v37 = vmul.f32 %v4689_v14, %v7686_v40  ;;  %v7688_v39 = vunpack.c.l.bf16 %v4501_v26  ;;  %v7695_v26 = vunpack.c.h.bf16 %v4515_v24 }
 0x312   : > { %v5047_v33 = vmul.f32 %v4747_v61, %v7682_v41  ;;  %v5057_v35 = vmul.f32 %v4689_v14, %v7685_v42  ;;  %v5072_v32 = vmul.f32 %v4689_v14, %v7689_v30  ;;  %v5082_v40 = vmul.f32 %v4689_v14, %v7692_v43 }
 0x313   : > { %7684 = vst [vmem:[#allocation47_spill] sm:$0xff] %v5052_v38  ;;  %7687 = vst [vmem:[#allocation48_spill] sm:$0xff] %v5062_v37  ;;  %v5067_v41 = vmul.f32 %v4689_v14, %v7688_v39  ;;  %v7691_v38 = vunpack.c.l.bf16 %v4510_v44  ;;  %v7694_v37 = vunpack.c.l.bf16 %v4515_v24  ;;  %v5092_v30 = vmul.f32 %v4689_v14, %v7695_v26 }
 0x314   : > { %7690 = vst [vmem:[#allocation49_spill] sm:$0xff] %v5072_v32  ;;  %7693 = vst [vmem:[#allocation50_spill] sm:$0xff] %v5082_v40  ;;  %v7697_v32 = vunpack.c.l.bf16 %v4524_v36  ;;  %v7698_v44 = vunpack.c.h.bf16 %v4524_v36  ;;  %v7700_v40 = vunpack.c.l.bf16 %v4529_v20  ;;  %v7701_v24 = vunpack.c.h.bf16 %v4529_v20 }
 0x315   : > { %v5077_v42 = vmul.f32 %v4689_v14, %v7691_v38  ;;  %v5087_v39 = vmul.f32 %v4689_v14, %v7694_v37  ;;  %7696 = vst [vmem:[#allocation51_spill] sm:$0xff] %v5092_v30  ;;  %v7703_v30 = vunpack.c.l.bf16 %v4538_v31  ;;  %v7704_v36 = vunpack.c.h.bf16 %v4538_v31 }
 0x316   : > { %v5097_v38 = vmul.f32 %v4689_v14, %v7697_v32  ;;  %v5102_v43 = vmul.f32 %v4689_v14, %v7698_v44  ;;  %v5107_v37 = vmul.f32 %v4689_v14, %v7700_v40  ;;  %v5112_v26 = vmul.f32 %v4689_v14, %v7701_v24 }
 0x317   : > { %v5117_v32 = vmul.f32 %v4689_v14, %v7703_v30  ;;  %v5122_v44 = vmul.f32 %v4689_v14, %v7704_v36  ;;  %v7707_v20 = vunpack.c.h.bf16 %v4543_v52  ;;  %v7710_v31 = vunpack.c.h.bf16 %v4552_v29 }
 0x318   : > { %7699 = vst [vmem:[#allocation52_spill] sm:$0xff] %v5102_v43  ;;  %7702 = vst [vmem:[#allocation53_spill] sm:$0xff] %v5112_v26  ;;  %v7706_v43 = vunpack.c.l.bf16 %v4543_v52  ;;  %v7709_v26 = vunpack.c.l.bf16 %v4552_v29  ;;  %v7714_v52 = vunpack.c.h.bf16 %v4557_v15  ;;  %v7718_v29 = vunpack.c.h.bf16 %v4566_v25 }
 0x319   : > { %7705 = vst [vmem:[#allocation54_spill] sm:$0xff] %v5122_v44  ;;  %v5132_v24 = vmul.f32 %v4689_v14, %v7707_v20  ;;  %v5142_v36 = vmul.f32 %v4747_v61, %v7710_v31  ;;  %v7712_v44 = vunpack.c.l.bf16 %v4557_v15  ;;  %v7722_v15 = vunpack.c.h.bf16 %v4571_v13 }
 0x31a   : > { %v5127_v40 = vmul.f32 %v4689_v14, %v7706_v43  ;;  %v5137_v30 = vmul.f32 %v4747_v61, %v7709_v26  ;;  %v5152_v20 = vmul.f32 %v4747_v61, %v7714_v52  ;;  %v5162_v31 = vmul.f32 %v4747_v61, %v7718_v29 }
 0x31b   : > { %7708 = vst [vmem:[#allocation55_spill] sm:$0xff] %v5132_v24  ;;  %7711 = vst [vmem:[#allocation56_spill] sm:$0xff] %v5142_v36  ;;  %v5147_v43 = vmul.f32 %v4747_v61, %v7712_v44  ;;  %v7716_v24 = vunpack.c.l.bf16 %v4566_v25  ;;  %v7720_v36 = vunpack.c.l.bf16 %v4571_v13  ;;  %v5172_v52 = vmul.f32 %v4747_v61, %v7722_v15 }
 0x31c   : > { %7715 = vst [vmem:[#allocation58_spill] sm:$0xff] %v5152_v20  ;;  %7719 = vst [vmem:[#allocation60_spill] sm:$0xff] %v5162_v31  ;;  %v7724_v20 = vld [vmem:[#allocation5_spill] sm:$0xff]  ;;  %v7729_v31 = vld [vmem:[#allocation6_spill] sm:$0xff] }
 0x31d   : > { %7713 = vst [vmem:[#allocation57_spill] sm:$0xff] %v5147_v43  ;;  %v5157_v26 = vmul.f32 %v4747_v61, %v7716_v24  ;;  %v5167_v44 = vmul.f32 %v4747_v61, %v7720_v36  ;;  %7723 = vst [vmem:[#allocation62_spill] sm:$0xff] %v5172_v52  ;;  %v7725_v43 = vunpack.c.l.bf16 %v7724_v20  ;;  %v7727_v25 = vunpack.c.h.bf16 %v7724_v20  ;;  %v7734_v52 = vld [vmem:[#allocation7_spill] sm:$0xff] }
 0x31e   : > { %v7732_v13 = vunpack.c.h.bf16 %v7729_v31  ;;  %v7737_v20 = vunpack.c.h.bf16 %v7734_v52 }
 0x31f   : > { %7717 = vst [vmem:[#allocation59_spill] sm:$0xff] %v5157_v26  ;;  %7721 = vst [vmem:[#allocation61_spill] sm:$0xff] %v5167_v44  ;;  %v5177_v24 = vmul.f32 %v4747_v61, %v7725_v43  ;;  %v5182_v29 = vmul.f32 %v4747_v61, %v7727_v25  ;;  %v7730_v26 = vunpack.c.l.bf16 %v7729_v31  ;;  %v7735_v44 = vunpack.c.l.bf16 %v7734_v52 }
 0x320   : > { %v5192_v15 = vmul.f32 %v4747_v61, %v7732_v13  ;;  %v5202_v25 = vmul.f32 %v4747_v61, %v7737_v20 }
 0x321   : > { %7726 = vst [vmem:[#allocation5_spill] sm:$0xff] %v5177_v24  ;;  %7728 = vst [vmem:[#allocation63_spill] sm:$0xff] %v5182_v29  ;;  %v5187_v36 = vmul.f32 %v4747_v61, %v7730_v26  ;;  %v5197_v43 = vmul.f32 %v4747_v61, %v7735_v44  ;;  %v7739_v29 = vld [vmem:[#allocation8_spill] sm:$0xff] }
 0x322   : > { %7733 = vst [vmem:[#allocation64_spill] sm:$0xff] %v5192_v15  ;;  %7738 = vst [vmem:[#allocation65_spill] sm:$0xff] %v5202_v25  ;;  %v7740_v24 = vunpack.c.l.bf16 %v7739_v29  ;;  %v7742_v31 = vunpack.c.h.bf16 %v7739_v29  ;;  %v7744_v15 = vld [vmem:[#allocation9_spill] sm:$0xff]  ;;  %v7749_v25 = vld [vmem:[#allocation10_spill] sm:$0xff] }
 0x323   : > { %7731 = vst [vmem:[#allocation6_spill] sm:$0xff] %v5187_v36  ;;  %7736 = vst [vmem:[#allocation7_spill] sm:$0xff] %v5197_v43  ;;  %v7745_v36 = vunpack.c.l.bf16 %v7744_v15  ;;  %v7747_v52 = vunpack.c.h.bf16 %v7744_v15  ;;  %v7750_v43 = vunpack.c.l.bf16 %v7749_v25  ;;  %v7752_v29 = vunpack.c.h.bf16 %v7749_v25 }
 0x324   : > { %v5207_v26 = vmul.f32 %v4747_v61, %v7740_v24  ;;  %v5212_v13 = vmul.f32 %v4747_v61, %v7742_v31 }
 0x325   : > { %v5217_v44 = vmul.f32 %v4689_v14, %v7745_v36  ;;  %v5222_v20 = vmul.f32 %v4689_v14, %v7747_v52  ;;  %v5227_v24 = vmul.f32 %v4689_v14, %v7750_v43  ;;  %v5232_v31 = vmul.f32 %v4689_v14, %v7752_v29 }
 0x326   : > { %7741 = vst [vmem:[#allocation8_spill] sm:$0xff] %v5207_v26  ;;  %7743 = vst [vmem:[#allocation66_spill] sm:$0xff] %v5212_v13  ;;  %v7754_v13 = vld [vmem:[#allocation11_spill] sm:$0xff] }
 0x327   : > { %7746 = vst [vmem:[#allocation9_spill] sm:$0xff] %v5217_v44  ;;  %7748 = vst [vmem:[#allocation67_spill] sm:$0xff] %v5222_v20  ;;  %v7755_v26 = vunpack.c.l.bf16 %v7754_v13  ;;  %v7757_v15 = vunpack.c.h.bf16 %v7754_v13  ;;  %v7759_v20 = vld [vmem:[#allocation12_spill] sm:$0xff] }
 0x328   : > { %7751 = vst [vmem:[#allocation10_spill] sm:$0xff] %v5227_v24  ;;  %7753 = vst [vmem:[#allocation68_spill] sm:$0xff] %v5232_v31  ;;  %v7760_v44 = vunpack.c.l.bf16 %v7759_v20  ;;  %v7762_v25 = vunpack.c.h.bf16 %v7759_v20  ;;  %v7764_v31 = vld [vmem:[#allocation13_spill] sm:$0xff] }
 0x329   : > { %v5237_v36 = vmul.f32 %v4689_v14, %v7755_v26  ;;  %v5242_v52 = vmul.f32 %v4689_v14, %v7757_v15  ;;  %v7765_v24 = vunpack.c.l.bf16 %v7764_v31  ;;  %v7767_v13 = vunpack.c.h.bf16 %v7764_v31 }
 0x32a   : > { %v5247_v43 = vmul.f32 %v4689_v14, %v7760_v44  ;;  %v5252_v29 = vmul.f32 %v4689_v14, %v7762_v25 }
 0x32b   : > { %7756 = vst [vmem:[#allocation11_spill] sm:$0xff] %v5237_v36  ;;  %7758 = vst [vmem:[#allocation69_spill] sm:$0xff] %v5242_v52  ;;  %v5257_v26 = vmul.f32 %v4689_v14, %v7765_v24  ;;  %v5262_v15 = vmul.f32 %v4689_v14, %v7767_v13  ;;  %v7768_v52 = vld [vmem:[#allocation14_spill] sm:$0xff] }
 0x32c   : > { %7761 = vst [vmem:[#allocation12_spill] sm:$0xff] %v5247_v43  ;;  %7763 = vst [vmem:[#allocation70_spill] sm:$0xff] %v5252_v29  ;;  %v7769_v36 = vunpack.c.l.bf16 %v7768_v52  ;;  %v5269_v43 = vpop.permute.xlu1 %2315  ;;  %v7771_v20 = vunpack.c.h.bf16 %v7768_v52  ;;  %v7773_v29 = vld [vmem:[#allocation15_spill] sm:$0xff]  ;;  %v7778_v52 = vunpack.c.h.bf16 %v4655_v60 }
 0x32d   : > { %7766 = vst [vmem:[#allocation13_spill] sm:$0xff] %v5257_v26  ;;  %v7774_v24 = vunpack.c.l.bf16 %v7773_v29  ;;  %v7775_v31 = vunpack.c.h.bf16 %v7773_v29  ;;  %v7780_v29 = vunpack.c.h.bf16 %v4664_v6 }
 0x32e   : > { %v5267_v44 = vmul.f32 %v4689_v14, %v7769_v36  ;;  %v5274_v25 = vmul.f32 %v4689_v14, %v7771_v20  ;;  %v7777_v36 = vunpack.c.l.bf16 %v4655_v60  ;;  %v5294_v20 = vmul.f32 %v4689_v14, %v7778_v52 }
 0x32f   : > { %v5279_v26 = vmul.f32 %v4689_v14, %v7774_v24  ;;  %v5284_v13 = vmul.f32 %v4689_v14, %v7775_v31  ;;  %v5304_v31 = vmul.f32 %v4747_v61, %v7780_v29  ;;  %v7783_v60 = vunpack.c.h.bf16 %v4669_v56 }
 0x330   : > { %7770 = vst [vmem:[#allocation14_spill] sm:$0xff] %v5267_v44  ;;  %7772 = vst [vmem:[#allocation71_spill] sm:$0xff] %v5274_v25  ;;  %v5289_v44 = vmul.f32 %v4689_v14, %v7777_v36  ;;  %v7779_v25 = vunpack.c.l.bf16 %v4664_v6  ;;  %v7785_v52 = vunpack.c.l.bf16 %v4678_v3  ;;  %v7786_v6 = vunpack.c.h.bf16 %v4678_v3 }
 0x331   : > { %7776 = vst [vmem:[#allocation15_spill] sm:$0xff] %v5284_v13  ;;  %7781 = vst [vmem:[#allocation72_spill] sm:$0xff] %v5304_v31  ;;  %v7782_v13 = vunpack.c.l.bf16 %v4669_v56  ;;  %v5314_v14 = vmul.f32 %v4747_v61, %v7783_v60  ;;  %v7788_v31 = vunpack.c.l.bf16 %v4683_v54  ;;  %v7789_v56 = vunpack.c.h.bf16 %v4683_v54 }
 0x332   : > { %v5299_v24 = vmul.f32 %v4747_v61, %v7779_v25  ;;  %v5319_v25 = vmul.f32 %v4747_v61, %v7785_v52  ;;  %v5324_v29 = vmul.f32 %v4747_v61, %v7786_v6  ;;  %v7792_v3 = vunpack.c.h.bf16 %v4694_v1 }
 0x333   : > { %v5309_v36 = vmul.f32 %v4747_v61, %v7782_v13  ;;  %7784 = vst [vmem:[#allocation73_spill] sm:$0xff] %v5314_v14  ;;  %v5329_v13 = vmul.f32 %v4747_v61, %v7788_v31  ;;  %v5334_v60 = vmul.f32 %v4747_v61, %v7789_v56  ;;  %v7791_v14 = vunpack.c.l.bf16 %v4694_v1 }
 0x334   : > { %7787 = vst [vmem:[#allocation74_spill] sm:$0xff] %v5324_v29  ;;  %v5344_v6 = vmul.f32 %v4747_v61, %v7792_v3  ;;  %v7794_v29 = vunpack.c.l.bf16 %v4699_v34  ;;  %v7795_v54 = vunpack.c.h.bf16 %v4699_v34  ;;  %v7798_v1 = vunpack.c.h.bf16 %v4708_v12 }
 0x335   : > { %7790 = vst [vmem:[#allocation75_spill] sm:$0xff] %v5334_v60  ;;  %v5339_v52 = vmul.f32 %v4747_v61, %v7791_v14  ;;  %v7797_v60 = vunpack.c.l.bf16 %v4708_v12  ;;  %v7802_v34 = vunpack.c.h.bf16 %v4713_v2  ;;  %v5382_v12 = vadd.f32 %v5269_v43, %v4740_v7 }
 0x336   : > { %7793 = vst [vmem:[#allocation76_spill] sm:$0xff] %v5344_v6  ;;  %v5349_v31 = vmul.f32 %v4747_v61, %v7794_v29  ;;  %v5354_v56 = vmul.f32 %v4747_v61, %v7795_v54  ;;  %v5364_v3 = vmul.f32 %v4747_v61, %v7798_v1  ;;  %v7800_v6 = vunpack.c.l.bf16 %v4713_v2 }
 0x337   : > { %v5359_v14 = vmul.f32 %v4747_v61, %v7797_v60  ;;  %v5374_v54 = vmul.f32 %v4747_v61, %v7802_v34  ;;  %v7804_v60 = vld [vmem:[#allocation16_spill] sm:$0xff]  ;;  %v5404_v7 = vadd.f32 %v5269_v43, %v4767_v59  ;;  %vm2452_vm4 = vcmp.gt.f32.partialorder %v5382_v12, 0.0 }
 0x338   : > { %7796 = vst [vmem:[#allocation77_spill] sm:$0xff] %v5354_v56  ;;  %7799 = vst [vmem:[#allocation78_spill] sm:$0xff] %v5364_v3  ;;  %v5369_v29 = vmul.f32 %v4747_v61, %v7800_v6  ;;  %v5378_v56 = vadd.f32 %v5269_v43, %v4735_v9  ;;  %v5386_v1 = vadd.f32 %v5269_v43, %v7804_v60  ;;  %v5388_v3 = vpop.permute.xlu1 %2320  ;;  %v7805_v6 = vld [vmem:[#allocation17_spill] sm:$0xff]  ;;  %v7806_v9 = vld [vmem:[#allocation18_spill] sm:$0xff] }
 0x339   : > { %7803 = vst [vmem:[#allocation80_spill] sm:$0xff] %v5374_v54  ;;  %v5392_v2 = vadd.f32 %v5269_v43, %v7805_v6  ;;  %v5396_v61 = vadd.f32 %v5269_v43, %v4757_v18  ;;  %v5400_v34 = vadd.f32 %v5269_v43, %v7806_v9  ;;  %v7808_v60 = vld [vmem:[#allocation19_spill] sm:$0xff]  ;;  %v5412_v6 = vadd.f32 %v5269_v43, %v4777_v19 }
 0x33a   : > { %7801 = vst [vmem:[#allocation79_spill] sm:$0xff] %v5369_v29  ;;  %v5408_v54 = vadd.f32 %v5269_v43, %v7808_v60  ;;  %v7810_v29 = vld [vmem:[#allocation20_spill] sm:$0xff]  ;;  %v5420_v9 = vadd.f32 %v5269_v43, %v4787_v55  ;;  %v5428_v60 = vadd.f32 %v5269_v43, %v4797_v62  ;;  %vm2451_vm3 = vcmp.gt.f32.partialorder %v5378_v56, 0.0 }
 0x33b   : > { %7807 = vst [vmem:[#allocation16_spill] sm:$0xff] %v5400_v34  ;;  %v5416_v18 = vadd.f32 %v5269_v43, %v7810_v29  ;;  %v7812_v34 = vld [vmem:[#allocation21_spill] sm:$0xff]  ;;  %v5436_v29 = vadd.f32 %v5269_v43, %v4807_v23  ;;  %vm2453_vm5 = vcmp.gt.f32.partialorder %v5386_v1, 0.0  ;;  %vm2454_vm6 = vcmp.gt.f32.partialorder %v5392_v2, 0.0 }
 0x33c   : > { %7809 = vst [vmem:[#allocation17_spill] sm:$0xff] %v5408_v54  ;;  %v5424_v59 = vadd.f32 %v5269_v43, %v7812_v34  ;;  %v7814_v54 = vld [vmem:[#allocation22_spill] sm:$0xff]  ;;  %v5444_v34 = vadd.f32 %v5388_v3, %v4817_v8  ;;  %vm2455_vm7 = vcmp.gt.f32.partialorder %v5396_v61, 0.0  ;;  %vm2457_vm9 = vcmp.gt.f32.partialorder %v5404_v7, 0.0 }
 0x33d   : > { %7811 = vst [vmem:[#allocation18_spill] sm:$0xff] %v5416_v18  ;;  %v5432_v19 = vadd.f32 %v5269_v43, %v7814_v54  ;;  %v7816_v18 = vld [vmem:[#allocation23_spill] sm:$0xff]  ;;  %v5452_v54 = vadd.f32 %v5388_v3, %v4827_v45  ;;  %vm2459_vm11 = vcmp.gt.f32.partialorder %v5412_v6, 0.0  ;;  %vm2461_vm13 = vcmp.gt.f32.partialorder %v5420_v9, 0.0 }
 0x33e   : > { %7813 = vst [vmem:[#allocation19_spill] sm:$0xff] %v5424_v59  ;;  %v5440_v55 = vadd.f32 %v5269_v43, %v7816_v18  ;;  %v7818_v59 = vld [vmem:[#allocation24_spill] sm:$0xff]  ;;  %v5460_v18 = vadd.f32 %v5388_v3, %v4837_v47  ;;  %vm2463_vm15 = vcmp.gt.f32.partialorder %v5428_v60, 0.0  ;;  %vm2465_vm1 = vcmp.gt.f32.partialorder %v5436_v29, 0.0 }
 0x33f   : > { %7815 = vst [vmem:[#allocation20_spill] sm:$0xff] %v5432_v19  ;;  %v5448_v62 = vadd.f32 %v5388_v3, %v7818_v59  ;;  %v7820_v19 = vld [vmem:[#allocation25_spill] sm:$0xff]  ;;  %v5468_v59 = vadd.f32 %v5388_v3, %v4847_v48 }
 0x340   : > { %7817 = vst [vmem:[#allocation21_spill] sm:$0xff] %v5440_v55  ;;  %v5456_v23 = vadd.f32 %v5388_v3, %v7820_v19  ;;  %v7822_v55 = vld [vmem:[#allocation26_spill] sm:$0xff]  ;;  %v5476_v19 = vadd.f32 %v5388_v3, %v4857_v49 }
 0x341   : > { %7819 = vst [vmem:[#allocation22_spill] sm:$0xff] %v5448_v62  ;;  %v5464_v8 = vadd.f32 %v5388_v3, %v7822_v55  ;;  %v7824_v62 = vld [vmem:[#allocation27_spill] sm:$0xff]  ;;  %v5484_v55 = vadd.f32 %v5388_v3, %v4867_v50 }
 0x342   : > { %7821 = vst [vmem:[#allocation23_spill] sm:$0xff] %v5456_v23  ;;  %v5472_v45 = vadd.f32 %v5388_v3, %v7824_v62  ;;  %v7826_v23 = vld [vmem:[#allocation28_spill] sm:$0xff]  ;;  %v5492_v62 = vadd.f32 %v5388_v3, %v4877_v46 }
 0x343   : > { %7823 = vst [vmem:[#allocation24_spill] sm:$0xff] %v5464_v8  ;;  %v5480_v47 = vadd.f32 %v5388_v3, %v7826_v23  ;;  %v7828_v8 = vld [vmem:[#allocation29_spill] sm:$0xff]  ;;  %v5500_v23 = vadd.f32 %v5388_v3, %v4887_v51 }
 0x344   : > { %7825 = vst [vmem:[#allocation25_spill] sm:$0xff] %v5472_v45  ;;  %v5488_v48 = vadd.f32 %v5388_v3, %v7828_v8  ;;  %v7830_v45 = vld [vmem:[#allocation30_spill] sm:$0xff]  ;;  %v5508_v8 = vadd.f32 %v5269_v43, %v4897_v53 }
 0x345   : > { %7827 = vst [vmem:[#allocation26_spill] sm:$0xff] %v5480_v47  ;;  %v5496_v49 = vadd.f32 %v5388_v3, %v7830_v45  ;;  %v7832_v47 = vld [vmem:[#allocation31_spill] sm:$0xff]  ;;  %v5516_v45 = vadd.f32 %v5269_v43, %v4907_v57 }
 0x346   : > { %7829 = vst [vmem:[#allocation27_spill] sm:$0xff] %v5488_v48  ;;  %v5504_v50 = vadd.f32 %v5388_v3, %v7832_v47  ;;  %v7834_v48 = vld [vmem:[#allocation32_spill] sm:$0xff]  ;;  %v5524_v47 = vadd.f32 %v5269_v43, %v4917_v58 }
 0x347   : > { %7831 = vst [vmem:[#allocation28_spill] sm:$0xff] %v5496_v49  ;;  %v5512_v46 = vadd.f32 %v5269_v43, %v7834_v48  ;;  %v7836_v49 = vld [vmem:[#allocation33_spill] sm:$0xff]  ;;  %v5532_v48 = vadd.f32 %v5269_v43, %v4927_v63 }
 0x348   : > { %7833 = vst [vmem:[#allocation29_spill] sm:$0xff] %v5504_v50  ;;  %v5520_v51 = vadd.f32 %v5269_v43, %v7836_v49  ;;  %v7838_v50 = vld [vmem:[#allocation34_spill] sm:$0xff]  ;;  %v5540_v49 = vadd.f32 %v5269_v43, %v4937_v0 }
 0x349   : > { %7835 = vst [vmem:[#allocation30_spill] sm:$0xff] %v5512_v46  ;;  %v5528_v53 = vadd.f32 %v5269_v43, %v7838_v50  ;;  %v7840_v46 = vld [vmem:[#allocation35_spill] sm:$0xff]  ;;  %v5548_v50 = vadd.f32 %v5269_v43, %v4947_v4 }
 0x34a   : > { %7837 = vst [vmem:[#allocation31_spill] sm:$0xff] %v5520_v51  ;;  %v5536_v57 = vadd.f32 %v5269_v43, %v7840_v46  ;;  %v7842_v51 = vld [vmem:[#allocation36_spill] sm:$0xff]  ;;  %v5556_v46 = vadd.f32 %v5269_v43, %v4957_v5 }
 0x34b   : > { %7839 = vst [vmem:[#allocation32_spill] sm:$0xff] %v5528_v53  ;;  %v5544_v58 = vadd.f32 %v5269_v43, %v7842_v51  ;;  %v7844_v53 = vld [vmem:[#allocation37_spill] sm:$0xff]  ;;  %v5564_v51 = vadd.f32 %v5269_v43, %v4967_v10 }
 0x34c   : > { %7841 = vst [vmem:[#allocation33_spill] sm:$0xff] %v5536_v57  ;;  %v5552_v63 = vadd.f32 %v5269_v43, %v7844_v53  ;;  %v7846_v57 = vld [vmem:[#allocation38_spill] sm:$0xff]  ;;  %v5572_v53 = vadd.f32 %v5388_v3, %v4977_v11 }
 0x34d   : > { %7843 = vst [vmem:[#allocation34_spill] sm:$0xff] %v5544_v58  ;;  %v5560_v0 = vadd.f32 %v5269_v43, %v7846_v57  ;;  %v7848_v58 = vld [vmem:[#allocation39_spill] sm:$0xff]  ;;  %v5580_v57 = vadd.f32 %v5388_v3, %v4987_v16 }
 0x34e   : > { %7845 = vst [vmem:[#allocation35_spill] sm:$0xff] %v5552_v63  ;;  %v5568_v4 = vadd.f32 %v5269_v43, %v7848_v58  ;;  %v7850_v63 = vld [vmem:[#allocation40_spill] sm:$0xff]  ;;  %v5588_v58 = vadd.f32 %v5388_v3, %v4997_v17 }
 0x34f   : > { %7847 = vst [vmem:[#allocation36_spill] sm:$0xff] %v5560_v0  ;;  %v5576_v5 = vadd.f32 %v5388_v3, %v7850_v63  ;;  %v7852_v0 = vld [vmem:[#allocation41_spill] sm:$0xff]  ;;  %v5596_v63 = vadd.f32 %v5388_v3, %v5007_v21 }
 0x350   : > { %7849 = vst [vmem:[#allocation37_spill] sm:$0xff] %v5568_v4  ;;  %v5584_v10 = vadd.f32 %v5388_v3, %v7852_v0  ;;  %v7854_v4 = vld [vmem:[#allocation42_spill] sm:$0xff]  ;;  %v5604_v0 = vadd.f32 %v5388_v3, %v5017_v22 }
 0x351   : > { %7851 = vst [vmem:[#allocation38_spill] sm:$0xff] %v5576_v5  ;;  %v5592_v11 = vadd.f32 %v5388_v3, %v7854_v4  ;;  %v7856_v5 = vld [vmem:[#allocation43_spill] sm:$0xff]  ;;  %v5612_v4 = vadd.f32 %v5388_v3, %v5027_v27 }
 0x352   : > { %7853 = vst [vmem:[#allocation39_spill] sm:$0xff] %v5584_v10  ;;  %v5600_v16 = vadd.f32 %v5388_v3, %v7856_v5  ;;  %v7858_v10 = vld [vmem:[#allocation44_spill] sm:$0xff]  ;;  %v5620_v5 = vadd.f32 %v5388_v3, %v5037_v28 }
 0x353   : > { %7855 = vst [vmem:[#allocation40_spill] sm:$0xff] %v5592_v11  ;;  %v5608_v17 = vadd.f32 %v5388_v3, %v7858_v10  ;;  %v7860_v11 = vld [vmem:[#allocation45_spill] sm:$0xff]  ;;  %v5628_v10 = vadd.f32 %v5388_v3, %v5047_v33 }
 0x354   : > { %7857 = vst [vmem:[#allocation41_spill] sm:$0xff] %v5600_v16  ;;  %v5616_v21 = vadd.f32 %v5388_v3, %v7860_v11  ;;  %v7862_v16 = vld [vmem:[#allocation46_spill] sm:$0xff]  ;;  %v5636_v11 = vadd.f32 %v5269_v43, %v5057_v35 }
 0x355   : > { %7859 = vst [vmem:[#allocation42_spill] sm:$0xff] %v5608_v17  ;;  %v5624_v22 = vadd.f32 %v5388_v3, %v7862_v16  ;;  %v7864_v17 = vld [vmem:[#allocation47_spill] sm:$0xff]  ;;  %v5644_v16 = vadd.f32 %v5269_v43, %v5067_v41 }
 0x356   : > { %7861 = vst [vmem:[#allocation43_spill] sm:$0xff] %v5616_v21  ;;  %v5632_v27 = vadd.f32 %v5388_v3, %v7864_v17  ;;  %v7866_v21 = vld [vmem:[#allocation48_spill] sm:$0xff]  ;;  %v5652_v17 = vadd.f32 %v5269_v43, %v5077_v42 }
 0x357   : > { %7863 = vst [vmem:[#allocation44_spill] sm:$0xff] %v5624_v22  ;;  %v5640_v28 = vadd.f32 %v5269_v43, %v7866_v21  ;;  %v7868_v22 = vld [vmem:[#allocation49_spill] sm:$0xff]  ;;  %v5660_v21 = vadd.f32 %v5269_v43, %v5087_v39 }
 0x358   : > { %7865 = vst [vmem:[#allocation45_spill] sm:$0xff] %v5632_v27  ;;  %v5648_v33 = vadd.f32 %v5269_v43, %v7868_v22  ;;  %v7870_v27 = vld [vmem:[#allocation50_spill] sm:$0xff]  ;;  %v5668_v22 = vadd.f32 %v5269_v43, %v5097_v38 }
 0x359   : > { %7867 = vst [vmem:[#allocation46_spill] sm:$0xff] %v5640_v28  ;;  %v5656_v35 = vadd.f32 %v5269_v43, %v7870_v27  ;;  %7872 = vst [vmem:[#allocation49_spill] sm:$0xff] %v5660_v21  ;;  %v7873_v28 = vld [vmem:[#allocation51_spill] sm:$0xff]  ;;  %v5676_v27 = vadd.f32 %v5269_v43, %v5107_v37 }
 0x35a   : > { %7869 = vst [vmem:[#allocation47_spill] sm:$0xff] %v5648_v33  ;;  %v5664_v41 = vadd.f32 %v5269_v43, %v7873_v28  ;;  %7875 = vst [vmem:[#allocation51_spill] sm:$0xff] %v5668_v22  ;;  %v7876_v33 = vld [vmem:[#allocation52_spill] sm:$0xff]  ;;  %v5684_v28 = vadd.f32 %v5269_v43, %v5117_v32  ;;  %v7988_v22 = vld [vmem:[#allocation25_spill] sm:$0xff] }
 0x35b   : > { %7871 = vst [vmem:[#allocation48_spill] sm:$0xff] %v5656_v35  ;;  %v5672_v42 = vadd.f32 %v5269_v43, %v7876_v33  ;;  %7878 = vst [vmem:[#allocation81_spill] sm:$0xff] %v5676_v27  ;;  %v7879_v35 = vld [vmem:[#allocation53_spill] sm:$0xff]  ;;  %v5692_v33 = vadd.f32 %v5269_v43, %v5127_v40  ;;  %v5972_v21 = vmul.f32 0.2, %v7988_v22 }
 0x35c   : > { %7874 = vst [vmem:[#allocation50_spill] sm:$0xff] %v5664_v41  ;;  %v5680_v39 = vadd.f32 %v5269_v43, %v7879_v35  ;;  %7881 = vst [vmem:[#allocation82_spill] sm:$0xff] %v5684_v28  ;;  %v7882_v41 = vld [vmem:[#allocation54_spill] sm:$0xff]  ;;  %v5700_v35 = vadd.f32 %v5388_v3, %v5137_v30  ;;  %v7890_v28 = vld [vmem:[#allocation57_spill] sm:$0xff] }
 0x35d   : > { %7877 = vst [vmem:[#allocation52_spill] sm:$0xff] %v5672_v42  ;;  %v5688_v38 = vadd.f32 %v5269_v43, %v7882_v41  ;;  %7884 = vst [vmem:[#allocation83_spill] sm:$0xff] %v5692_v33  ;;  %v7885_v42 = vld [vmem:[#allocation55_spill] sm:$0xff]  ;;  %v5708_v41 = vadd.f32 %v5388_v3, %v7890_v28 }
 0x35e   : > { %7880 = vst [vmem:[#allocation53_spill] sm:$0xff] %v5680_v39  ;;  %v5696_v37 = vadd.f32 %v5269_v43, %v7885_v42  ;;  %7887 = vst [vmem:[#allocation84_spill] sm:$0xff] %v5700_v35  ;;  %v7888_v39 = vld [vmem:[#allocation56_spill] sm:$0xff]  ;;  %v7894_v33 = vld [vmem:[#allocation59_spill] sm:$0xff] }
 0x35f   : > { %7883 = vst [vmem:[#allocation54_spill] sm:$0xff] %v5688_v38  ;;  %v5704_v32 = vadd.f32 %v5388_v3, %v7888_v39  ;;  %7891 = vst [vmem:[#allocation57_spill] sm:$0xff] %v5708_v41  ;;  %v7892_v38 = vld [vmem:[#allocation58_spill] sm:$0xff]  ;;  %v5716_v42 = vadd.f32 %v5388_v3, %v7894_v33  ;;  %v7898_v35 = vld [vmem:[#allocation61_spill] sm:$0xff] }
 0x360   : > { %7886 = vst [vmem:[#allocation55_spill] sm:$0xff] %v5696_v37  ;;  %v5712_v40 = vadd.f32 %v5388_v3, %v7892_v38  ;;  %v7896_v37 = vld [vmem:[#allocation60_spill] sm:$0xff]  ;;  %v5724_v39 = vadd.f32 %v5388_v3, %v7898_v35  ;;  %v7902_v41 = vld [vmem:[#allocation5_spill] sm:$0xff] }
 0x361   : > { %7889 = vst [vmem:[#allocation56_spill] sm:$0xff] %v5704_v32  ;;  %7895 = vst [vmem:[#allocation59_spill] sm:$0xff] %v5716_v42  ;;  %v5720_v30 = vadd.f32 %v5388_v3, %v7896_v37  ;;  %v7900_v32 = vld [vmem:[#allocation62_spill] sm:$0xff]  ;;  %v5732_v38 = vadd.f32 %v5388_v3, %v7902_v41 }
 0x362   : > { %7893 = vst [vmem:[#allocation58_spill] sm:$0xff] %v5712_v40  ;;  %7899 = vst [vmem:[#allocation61_spill] sm:$0xff] %v5724_v39  ;;  %v5728_v28 = vadd.f32 %v5388_v3, %v7900_v32  ;;  %v7904_v40 = vld [vmem:[#allocation63_spill] sm:$0xff]  ;;  %v7906_v42 = vld [vmem:[#allocation6_spill] sm:$0xff] }
 0x363   : > { %7897 = vst [vmem:[#allocation60_spill] sm:$0xff] %v5720_v30  ;;  %7903 = vst [vmem:[#allocation5_spill] sm:$0xff] %v5732_v38  ;;  %v5736_v33 = vadd.f32 %v5388_v3, %v7904_v40  ;;  %v5740_v37 = vadd.f32 %v5388_v3, %v7906_v42  ;;  %v7908_v30 = vld [vmem:[#allocation64_spill] sm:$0xff]  ;;  %v7910_v39 = vld [vmem:[#allocation7_spill] sm:$0xff] }
 0x364   : > { %7901 = vst [vmem:[#allocation62_spill] sm:$0xff] %v5728_v28  ;;  %v5744_v35 = vadd.f32 %v5388_v3, %v7908_v30  ;;  %v5748_v32 = vadd.f32 %v5388_v3, %v7910_v39  ;;  %v7912_v28 = vld [vmem:[#allocation65_spill] sm:$0xff]  ;;  %v7914_v38 = vld [vmem:[#allocation8_spill] sm:$0xff] }
 0x365   : > { %7905 = vst [vmem:[#allocation63_spill] sm:$0xff] %v5736_v33  ;;  %7907 = vst [vmem:[#allocation6_spill] sm:$0xff] %v5740_v37  ;;  %v5752_v41 = vadd.f32 %v5388_v3, %v7912_v28  ;;  %v5756_v40 = vadd.f32 %v5388_v3, %v7914_v38  ;;  %v7916_v33 = vld [vmem:[#allocation66_spill] sm:$0xff]  ;;  %v7918_v37 = vld [vmem:[#allocation9_spill] sm:$0xff] }
 0x366   : > { %7909 = vst [vmem:[#allocation64_spill] sm:$0xff] %v5744_v35  ;;  %7911 = vst [vmem:[#allocation7_spill] sm:$0xff] %v5748_v32  ;;  %v5760_v42 = vadd.f32 %v5388_v3, %v7916_v33  ;;  %v5764_v30 = vadd.f32 %v5269_v43, %v7918_v37  ;;  %v7920_v35 = vld [vmem:[#allocation67_spill] sm:$0xff]  ;;  %v7922_v32 = vld [vmem:[#allocation10_spill] sm:$0xff] }
 0x367   : > { %7913 = vst [vmem:[#allocation65_spill] sm:$0xff] %v5752_v41  ;;  %7915 = vst [vmem:[#allocation8_spill] sm:$0xff] %v5756_v40  ;;  %v5768_v39 = vadd.f32 %v5269_v43, %v7920_v35  ;;  %v5772_v28 = vadd.f32 %v5269_v43, %v7922_v32  ;;  %v7924_v41 = vld [vmem:[#allocation68_spill] sm:$0xff]  ;;  %v7926_v40 = vld [vmem:[#allocation11_spill] sm:$0xff] }
 0x368   : > { %7917 = vst [vmem:[#allocation66_spill] sm:$0xff] %v5760_v42  ;;  %7919 = vst [vmem:[#allocation9_spill] sm:$0xff] %v5764_v30  ;;  %v5776_v38 = vadd.f32 %v5269_v43, %v7924_v41  ;;  %v5780_v33 = vadd.f32 %v5269_v43, %v7926_v40  ;;  %v7928_v42 = vld [vmem:[#allocation69_spill] sm:$0xff]  ;;  %v7930_v30 = vld [vmem:[#allocation12_spill] sm:$0xff]  ;;  %v5800_v40 = vadd.f32 %v5269_v43, %v5262_v15 }
 0x369   : > { %7921 = vst [vmem:[#allocation67_spill] sm:$0xff] %v5768_v39  ;;  %7923 = vst [vmem:[#allocation10_spill] sm:$0xff] %v5772_v28  ;;  %v5784_v37 = vadd.f32 %v5269_v43, %v7928_v42  ;;  %v5788_v35 = vadd.f32 %v5269_v43, %v7930_v30  ;;  %v7932_v39 = vld [vmem:[#allocation70_spill] sm:$0xff]  ;;  %v7934_v28 = vld [vmem:[#allocation13_spill] sm:$0xff]  ;;  %v5820_v15 = vadd.f32 %v5269_v43, %v5289_v44 }
 0x36a   : > { %7925 = vst [vmem:[#allocation68_spill] sm:$0xff] %v5776_v38  ;;  %7927 = vst [vmem:[#allocation11_spill] sm:$0xff] %v5780_v33  ;;  %v5792_v32 = vadd.f32 %v5269_v43, %v7932_v39  ;;  %v5796_v41 = vadd.f32 %v5269_v43, %v7934_v28  ;;  %v7937_v33 = vld [vmem:[#allocation14_spill] sm:$0xff]  ;;  %v5812_v39 = vadd.f32 %v5269_v43, %v5279_v26  ;;  %v5957_v38 = vmul.f32 0.2, %v5460_v18 }
 0x36b   : > { %7929 = vst [vmem:[#allocation69_spill] sm:$0xff] %v5784_v37  ;;  %7931 = vst [vmem:[#allocation12_spill] sm:$0xff] %v5788_v35  ;;  %v5804_v42 = vadd.f32 %v5269_v43, %v7937_v33  ;;  %v7939_v37 = vld [vmem:[#allocation71_spill] sm:$0xff]  ;;  %v5824_v33 = vadd.f32 %v5269_v43, %v5294_v20  ;;  %v7953_v20 = vld [vmem:[#allocation74_spill] sm:$0xff] }
 0x36c   : > { %7933 = vst [vmem:[#allocation70_spill] sm:$0xff] %v5792_v32  ;;  %7935 = vst [vmem:[#allocation13_spill] sm:$0xff] %v5796_v41  ;;  %v5808_v30 = vadd.f32 %v5269_v43, %v7939_v37  ;;  %v7942_v32 = vld [vmem:[#allocation15_spill] sm:$0xff]  ;;  %v5828_v37 = vadd.f32 %v5388_v3, %v5299_v24  ;;  %v5848_v24 = vadd.f32 %v5388_v3, %v7953_v20 }
 0x36d   : > { %7936 = vst [vmem:[#allocation85_spill] sm:$0xff] %v5800_v40  ;;  %7938 = vst [vmem:[#allocation14_spill] sm:$0xff] %v5804_v42  ;;  %v5816_v28 = vadd.f32 %v5269_v43, %v7942_v32  ;;  %v5836_v32 = vadd.f32 %v5388_v3, %v5309_v36  ;;  %v5844_v43 = vadd.f32 %v5388_v3, %v5319_v25  ;;  %v2591_v42 = vmul.f32 0.2, %v5428_v60  ;;  %v7979_v40 = vld [vmem:[#allocation21_spill] sm:$0xff] }
 0x36e   : > { %7940 = vst [vmem:[#allocation71_spill] sm:$0xff] %v5808_v30  ;;  %7941 = vst [vmem:[#allocation86_spill] sm:$0xff] %v5812_v39  ;;  %v7947_v30 = vld [vmem:[#allocation72_spill] sm:$0xff]  ;;  %v5868_v20 = vadd.f32 %v5388_v3, %v5349_v31  ;;  %v5936_v41 = vmul.f32 0.2, %v7979_v40  ;;  %vm2466_vm2 = vcmp.gt.f32.partialorder %v7979_v40, 0.0 }
 0x36f   : > { %7943 = vst [vmem:[#allocation15_spill] sm:$0xff] %v5816_v28  ;;  %7944 = vst [vmem:[#allocation87_spill] sm:$0xff] %v5820_v15  ;;  %v5832_v26 = vadd.f32 %v5388_v3, %v7947_v30  ;;  %v7950_v28 = vld [vmem:[#allocation73_spill] sm:$0xff]  ;;  %v5852_v30 = vadd.f32 %v5388_v3, %v5329_v13  ;;  %v7967_v31 = vld [vmem:[#allocation16_spill] sm:$0xff] }
 0x370   : > { %7945 = vst [vmem:[#allocation88_spill] sm:$0xff] %v5824_v33  ;;  %7946 = vst [vmem:[#allocation89_spill] sm:$0xff] %v5828_v37  ;;  %v5840_v44 = vadd.f32 %v5388_v3, %v7950_v28  ;;  %v5860_v28 = vadd.f32 %v5388_v3, %v5339_v52  ;;  %vm2456_vm8 = vcmp.gt.f32.partialorder %v7967_v31, 0.0  ;;  %v2587_v37 = vmul.f32 0.2, %v5412_v6  ;;  %v7977_v39 = vld [vmem:[#allocation20_spill] sm:$0xff] }
 0x371   : > { %7948 = vst [vmem:[#allocation72_spill] sm:$0xff] %v5832_v26  ;;  %7949 = vst [vmem:[#allocation90_spill] sm:$0xff] %v5836_v32  ;;  %v7956_v26 = vld [vmem:[#allocation75_spill] sm:$0xff]  ;;  %vm2464_vm0 = vcmp.gt.f32.partialorder %v7977_v39, 0.0 }
 0x372   : > { %7951 = vst [vmem:[#allocation73_spill] sm:$0xff] %v5840_v44  ;;  %7952 = vst [vmem:[#allocation91_spill] sm:$0xff] %v5844_v43  ;;  %v5856_v36 = vadd.f32 %v5388_v3, %v7956_v26  ;;  %v7959_v44 = vld [vmem:[#allocation76_spill] sm:$0xff]  ;;  %v5876_v26 = vadd.f32 %v5388_v3, %v5359_v14  ;;  %v7968_v14 = vld [vmem:[#allocation17_spill] sm:$0xff]  ;;  %v2585_v43 = vmul.f32 0.2, %v5404_v7 }
 0x373   : > { %7954 = vst [vmem:[#allocation74_spill] sm:$0xff] %v5848_v24  ;;  %7955 = vst [vmem:[#allocation92_spill] sm:$0xff] %v5852_v30  ;;  %v5864_v25 = vadd.f32 %v5388_v3, %v7959_v44  ;;  %v7962_v24 = vld [vmem:[#allocation77_spill] sm:$0xff]  ;;  %vm2458_vm10 = vcmp.gt.f32.partialorder %v7968_v14, 0.0  ;;  %v7969_v44 = vld [vmem:[#allocation79_spill] sm:$0xff] }
 0x374   : > { %7957 = vst [vmem:[#allocation75_spill] sm:$0xff] %v5856_v36  ;;  %7958 = vst [vmem:[#allocation93_spill] sm:$0xff] %v5860_v28  ;;  %v5872_v13 = vadd.f32 %v5388_v3, %v7962_v24  ;;  %v7965_v36 = vld [vmem:[#allocation78_spill] sm:$0xff]  ;;  %v5893_v24 = vadd.f32 %v5388_v3, %v7969_v44  ;;  %v2582_v28 = vmul.f32 0.2, %v5392_v2 }
 0x375   : > { %7960 = vst [vmem:[#allocation76_spill] sm:$0xff] %v5864_v25  ;;  %7961 = vst [vmem:[#allocation94_spill] sm:$0xff] %v5868_v20  ;;  %v5880_v52 = vadd.f32 %v5388_v3, %v7965_v36  ;;  %v7971_v36 = vld [vmem:[#allocation18_spill] sm:$0xff]  ;;  %v7972_v20 = vld [vmem:[#allocation80_spill] sm:$0xff]  ;;  %v2583_v30 = vmul.f32 0.2, %v5396_v61 }
 0x376   : > { %7963 = vst [vmem:[#allocation77_spill] sm:$0xff] %v5872_v13  ;;  %7964 = vst [vmem:[#allocation95_spill] sm:$0xff] %v5876_v26  ;;  %vm2460_vm12 = vcmp.gt.f32.partialorder %v7971_v36, 0.0  ;;  %v2580_v26 = vmul.f32 0.2, %v5382_v12  ;;  %v5901_v25 = vadd.f32 %v5388_v3, %v7972_v20  ;;  %v5947_v35 = vsel %vm2454_vm6, %v5392_v2, %v2582_v28  ;;  %v7985_v2 = vld [vmem:[#allocation24_spill] sm:$0xff] }
 0x377   : > { %7966 = vst [vmem:[#allocation78_spill] sm:$0xff] %v5880_v52  ;;  %7970 = vst [vmem:[#allocation16_spill] sm:$0xff] %v5893_v24  ;;  %v2579_v52 = vmul.f32 0.2, %v5378_v56  ;;  %v2581_v13 = vmul.f32 0.2, %v5386_v1  ;;  %v5962_v27 = vsel %vm2455_vm7, %v5396_v61, %v2583_v30 }
 0x378   : > { %7973 = vst [vmem:[#allocation17_spill] sm:$0xff] %v5901_v25  ;;  %v2584_v44 = vmul.f32 0.2, %v7967_v31  ;;  %v7974_v24 = vld [vmem:[#allocation19_spill] sm:$0xff]  ;;  %v2586_v32 = vmul.f32 0.2, %v7968_v14  ;;  %v5923_v15 = vsel %vm2452_vm4, %v5382_v12, %v2580_v26 }
 0x379   : > { %vm2462_vm14 = vcmp.gt.f32.partialorder %v7974_v24, 0.0  ;;  %v5914_v3 = vsel %vm2451_vm3, %v5378_v56, %v2579_v52  ;;  %v2588_v20 = vmul.f32 0.2, %v7971_v36  ;;  %v2589_v25 = vmul.f32 0.2, %v5420_v9  ;;  %7976 = vst [vmem:[#allocation18_spill] sm:$0xff] %v5923_v15 }
 0x37a   : > { %7975 = vst [vmem:[#allocation79_spill] sm:$0xff] %v5914_v3  ;;  %v2590_v33 = vmul.f32 0.2, %v7974_v24  ;;  %v2592_v56 = vmul.f32 0.2, %v7977_v39  ;;  %v5932_v3 = vsel %vm2453_vm5, %v5386_v1, %v2581_v13  ;;  %v7980_v26 = vld [vmem:[#allocation22_spill] sm:$0xff] }
 0x37b   : > { %v2593_v52 = vmul.f32 0.2, %v5436_v29  ;;  %7978 = vst [vmem:[#allocation80_spill] sm:$0xff] %v5932_v3  ;;  %v5939_v12 = vmul.f32 0.2, %v5444_v34  ;;  %7981 = vst [vmem:[#allocation19_spill] sm:$0xff] %v5947_v35 }
 0x37c   : > { %v5942_v15 = vmul.f32 0.2, %v7980_v26  ;;  %v5951_v1 = vmul.f32 0.2, %v5452_v54  ;;  %v7982_v13 = vld [vmem:[#allocation23_spill] sm:$0xff]  ;;  %7983 = vst [vmem:[#allocation20_spill] sm:$0xff] %v5957_v38  ;;  %v5977_v38 = vsel %vm2456_vm8, %v7967_v31, %v2584_v44 }
 0x37d   : > { %v5954_v3 = vmul.f32 0.2, %v7982_v13  ;;  %7984 = vst [vmem:[#allocation21_spill] sm:$0xff] %v5962_v27  ;;  %vm2467_vm3 = vcmp.gt.f32.partialorder %v5444_v34, 0.0  ;;  %v5966_v28 = vmul.f32 0.2, %v7985_v2 }
 0x37e   : > { %v5969_v35 = vmul.f32 0.2, %v5468_v59  ;;  %7989 = vst [vmem:[#allocation24_spill] sm:$0xff] %v5972_v21  ;;  %7990 = vst [vmem:[#allocation25_spill] sm:$0xff] %v5977_v38  ;;  %vm2468_vm4 = vcmp.gt.f32.partialorder %v7980_v26, 0.0  ;;  %v7992_v30 = vld [vmem:[#allocation26_spill] sm:$0xff]  ;;  %v5992_v21 = vsel %vm2457_vm9, %v5404_v7, %v2585_v43 }
 0x37f   : > { %7986 = vst [vmem:[#allocation22_spill] sm:$0xff] %v5966_v28  ;;  %v5981_v61 = vmul.f32 0.2, %v5476_v19  ;;  %v5984_v27 = vmul.f32 0.2, %v7992_v30  ;;  %7994 = vst [vmem:[#allocation97_spill] sm:$0xff] %v5992_v21 }
 0x380   : > { %7987 = vst [vmem:[#allocation23_spill] sm:$0xff] %v5969_v35  ;;  %v5987_v28 = vmul.f32 0.2, %v5484_v55  ;;  %vm2469_vm5 = vcmp.gt.f32.partialorder %v5452_v54, 0.0  ;;  %v7995_v31 = vld [vmem:[#allocation27_spill] sm:$0xff]  ;;  %vm2470_vm6 = vcmp.gt.f32.partialorder %v7982_v13, 0.0 }
 0x381   : > { %7991 = vst [vmem:[#allocation96_spill] sm:$0xff] %v5981_v61  ;;  %v5996_v44 = vmul.f32 0.2, %v7995_v31  ;;  %v5999_v38 = vmul.f32 0.2, %v5492_v62  ;;  %v7998_v61 = vld [vmem:[#allocation28_spill] sm:$0xff] }
 0x382   : > { %7993 = vst [vmem:[#allocation26_spill] sm:$0xff] %v5987_v28  ;;  %v6002_v35 = vmul.f32 0.2, %v7998_v61  ;;  %v6007_v28 = vsel %vm2458_vm10, %v7968_v14, %v2586_v32  ;;  %v6011_v7 = vmul.f32 0.2, %v5500_v23  ;;  %v8002_v43 = vld [vmem:[#allocation29_spill] sm:$0xff] }
 0x383   : > { %7996 = vst [vmem:[#allocation27_spill] sm:$0xff] %v5996_v44  ;;  %7997 = vst [vmem:[#allocation98_spill] sm:$0xff] %v5999_v38  ;;  %v6014_v21 = vmul.f32 0.2, %v8002_v43  ;;  %v6017_v44 = vmul.f32 0.2, %v5508_v8 }
 0x384   : > { %7999 = vst [vmem:[#allocation28_spill] sm:$0xff] %v6002_v35  ;;  %8000 = vst [vmem:[#allocation99_spill] sm:$0xff] %v6007_v28  ;;  %v6022_v35 = vsel %vm2459_vm11, %v5412_v6, %v2587_v37  ;;  %vm2471_vm7 = vcmp.gt.f32.partialorder %v5460_v18, 0.0  ;;  %v8005_v32 = vld [vmem:[#allocation30_spill] sm:$0xff]  ;;  %v6029_v28 = vmul.f32 0.2, %v5516_v45 }
 0x385   : > { %8001 = vst [vmem:[#allocation100_spill] sm:$0xff] %v6011_v7  ;;  %8003 = vst [vmem:[#allocation29_spill] sm:$0xff] %v6017_v44  ;;  %v6026_v14 = vmul.f32 0.2, %v8005_v32  ;;  %v8008_v7 = vld [vmem:[#allocation31_spill] sm:$0xff]  ;;  %v6037_v44 = vsel %vm2460_vm12, %v7971_v36, %v2588_v20  ;;  %vm2472_vm8 = vcmp.gt.f32.partialorder %v7985_v2, 0.0 }
 0x386   : > { %8004 = vst [vmem:[#allocation101_spill] sm:$0xff] %v6022_v35  ;;  %8007 = vst [vmem:[#allocation102_spill] sm:$0xff] %v6029_v28  ;;  %v6032_v38 = vmul.f32 0.2, %v8008_v7  ;;  %v6041_v6 = vmul.f32 0.2, %v5524_v47 }
 0x387   : > { %8006 = vst [vmem:[#allocation30_spill] sm:$0xff] %v6026_v14  ;;  %8010 = vst [vmem:[#allocation103_spill] sm:$0xff] %v6037_v44  ;;  %v8012_v37 = vld [vmem:[#allocation32_spill] sm:$0xff]  ;;  %v6047_v14 = vmul.f32 0.2, %v5532_v48  ;;  %vm2473_vm9 = vcmp.gt.f32.partialorder %v5468_v59, 0.0 }
 0x388   : > { %8009 = vst [vmem:[#allocation31_spill] sm:$0xff] %v6032_v38  ;;  %8011 = vst [vmem:[#allocation104_spill] sm:$0xff] %v6041_v6  ;;  %v6044_v35 = vmul.f32 0.2, %v8012_v37  ;;  %v6052_v38 = vsel %vm2461_vm13, %v5420_v9, %v2589_v25  ;;  %v8016_v36 = vld [vmem:[#allocation33_spill] sm:$0xff]  ;;  %v8019_v6 = vld [vmem:[#allocation34_spill] sm:$0xff] }
 0x389   : > { %8014 = vst [vmem:[#allocation105_spill] sm:$0xff] %v6047_v14  ;;  %8015 = vst [vmem:[#allocation106_spill] sm:$0xff] %v6052_v38  ;;  %v6056_v20 = vmul.f32 0.2, %v8016_v36  ;;  %v6059_v44 = vmul.f32 0.2, %v5540_v49  ;;  %v6067_v14 = vsel %vm2462_vm14, %v7974_v24, %v2590_v33 }
 0x38a   : > { %8013 = vst [vmem:[#allocation32_spill] sm:$0xff] %v6044_v35  ;;  %v6062_v28 = vmul.f32 0.2, %v8019_v6  ;;  %8021 = vst [vmem:[#allocation108_spill] sm:$0xff] %v6067_v14  ;;  %vm2474_vm10 = vcmp.gt.f32.partialorder %v7988_v22, 0.0  ;;  %v8023_v25 = vld [vmem:[#allocation35_spill] sm:$0xff] }
 0x38b   : > { %8017 = vst [vmem:[#allocation33_spill] sm:$0xff] %v6056_v20  ;;  %8018 = vst [vmem:[#allocation107_spill] sm:$0xff] %v6059_v44  ;;  %v6071_v9 = vmul.f32 0.2, %v5548_v50  ;;  %v6074_v38 = vmul.f32 0.2, %v8023_v25 }
 0x38c   : > { %8020 = vst [vmem:[#allocation34_spill] sm:$0xff] %v6062_v28  ;;  %v6077_v20 = vmul.f32 0.2, %v5556_v46  ;;  %v6082_v28 = vsel %vm2463_vm15, %v5428_v60, %v2591_v42  ;;  %vm2475_vm11 = vcmp.gt.f32.partialorder %v5476_v19, 0.0  ;;  %v8027_v33 = vld [vmem:[#allocation36_spill] sm:$0xff]  ;;  %vm2476_vm12 = vcmp.gt.f32.partialorder %v7992_v30, 0.0 }
 0x38d   : > { %8022 = vst [vmem:[#allocation109_spill] sm:$0xff] %v6071_v9  ;;  %8024 = vst [vmem:[#allocation35_spill] sm:$0xff] %v6074_v38  ;;  %v6086_v24 = vmul.f32 0.2, %v8027_v33  ;;  %v6089_v14 = vmul.f32 0.2, %v5564_v51 }
 0x38e   : > { %8025 = vst [vmem:[#allocation110_spill] sm:$0xff] %v6077_v20  ;;  %8026 = vst [vmem:[#allocation111_spill] sm:$0xff] %v6082_v28  ;;  %v8030_v9 = vld [vmem:[#allocation37_spill] sm:$0xff]  ;;  %v6097_v20 = vsel %vm2464_vm0, %v7977_v39, %v2592_v56  ;;  %v6101_v60 = vmul.f32 0.2, %v5572_v53  ;;  %v8034_v42 = vld [vmem:[#allocation38_spill] sm:$0xff] }
 0x38f   : > { %8028 = vst [vmem:[#allocation36_spill] sm:$0xff] %v6086_v24  ;;  %8029 = vst [vmem:[#allocation112_spill] sm:$0xff] %v6089_v14  ;;  %v6092_v44 = vmul.f32 0.2, %v8030_v9  ;;  %v6104_v28 = vmul.f32 0.2, %v8034_v42 }
 0x390   : > { %8032 = vst [vmem:[#allocation113_spill] sm:$0xff] %v6097_v20  ;;  %8033 = vst [vmem:[#allocation114_spill] sm:$0xff] %v6101_v60  ;;  %v6107_v24 = vmul.f32 0.2, %v5580_v57  ;;  %vm2477_vm13 = vcmp.gt.f32.partialorder %v5484_v55, 0.0  ;;  %v8038_v39 = vld [vmem:[#allocation39_spill] sm:$0xff] }
 0x391   : > { %8031 = vst [vmem:[#allocation37_spill] sm:$0xff] %v6092_v44  ;;  %8035 = vst [vmem:[#allocation38_spill] sm:$0xff] %v6104_v28  ;;  %v6112_v44 = vsel %vm2465_vm1, %v5436_v29, %v2593_v52  ;;  %v6116_v56 = vmul.f32 0.2, %v8038_v39  ;;  %v6119_v20 = vmul.f32 0.2, %v5588_v58 }
 0x392   : > { %8036 = vst [vmem:[#allocation115_spill] sm:$0xff] %v6107_v24  ;;  %8037 = vst [vmem:[#allocation116_spill] sm:$0xff] %v6112_v44  ;;  %v8041_v60 = vld [vmem:[#allocation40_spill] sm:$0xff]  ;;  %v6128_v24 = vsel %vm2466_vm2, %v7979_v40, %v5936_v41  ;;  %vm2478_vm14 = vcmp.gt.f32.partialorder %v7995_v31, 0.0  ;;  %v6132_v29 = vmul.f32 0.2, %v5596_v63 }
 0x393   : > { %8039 = vst [vmem:[#allocation39_spill] sm:$0xff] %v6116_v56  ;;  %8040 = vst [vmem:[#allocation117_spill] sm:$0xff] %v6119_v20  ;;  %v6122_v14 = vmul.f32 0.2, %v8041_v60  ;;  %v8045_v52 = vld [vmem:[#allocation41_spill] sm:$0xff]  ;;  %vm2479_vm15 = vcmp.gt.f32.partialorder %v5492_v62, 0.0 }
 0x394   : > { %8043 = vst [vmem:[#allocation118_spill] sm:$0xff] %v6128_v24  ;;  %8044 = vst [vmem:[#allocation119_spill] sm:$0xff] %v6132_v29  ;;  %v6135_v44 = vmul.f32 0.2, %v8045_v52  ;;  %v6138_v56 = vmul.f32 0.2, %v5604_v0 }
 0x395   : > { %8042 = vst [vmem:[#allocation40_spill] sm:$0xff] %v6122_v14  ;;  %v6144_v14 = vsel %vm2467_vm3, %v5444_v34, %v5939_v12  ;;  %v8049_v41 = vld [vmem:[#allocation42_spill] sm:$0xff]  ;;  %v6151_v24 = vmul.f32 0.2, %v5612_v4  ;;  %v8052_v29 = vld [vmem:[#allocation43_spill] sm:$0xff]  ;;  %vm2480_vm0 = vcmp.gt.f32.partialorder %v7998_v61, 0.0 }
 0x396   : > { %8046 = vst [vmem:[#allocation41_spill] sm:$0xff] %v6135_v44  ;;  %8047 = vst [vmem:[#allocation120_spill] sm:$0xff] %v6138_v56  ;;  %v6148_v40 = vmul.f32 0.2, %v8049_v41  ;;  %v6154_v20 = vmul.f32 0.2, %v8052_v29  ;;  %v6160_v56 = vsel %vm2468_vm4, %v7980_v26, %v5942_v15 }
 0x397   : > { %8048 = vst [vmem:[#allocation121_spill] sm:$0xff] %v6144_v14  ;;  %8051 = vst [vmem:[#allocation122_spill] sm:$0xff] %v6151_v24  ;;  %v6164_v34 = vmul.f32 0.2, %v5620_v5  ;;  %v8056_v12 = vld [vmem:[#allocation44_spill] sm:$0xff]  ;;  %vm2481_vm1 = vcmp.gt.f32.partialorder %v5500_v23, 0.0 }
 0x398   : > { %8050 = vst [vmem:[#allocation42_spill] sm:$0xff] %v6148_v40  ;;  %8053 = vst [vmem:[#allocation43_spill] sm:$0xff] %v6154_v20  ;;  %v6167_v14 = vmul.f32 0.2, %v8056_v12  ;;  %v6170_v40 = vmul.f32 0.2, %v5628_v10  ;;  %v6176_v20 = vsel %vm2469_vm5, %v5452_v54, %v5951_v1 }
 0x399   : > { %8054 = vst [vmem:[#allocation123_spill] sm:$0xff] %v6160_v56  ;;  %8055 = vst [vmem:[#allocation124_spill] sm:$0xff] %v6164_v34  ;;  %v8060_v15 = vld [vmem:[#allocation45_spill] sm:$0xff]  ;;  %v6183_v56 = vmul.f32 0.2, %v5636_v11  ;;  %v8063_v34 = vld [vmem:[#allocation46_spill] sm:$0xff] }
 0x39a   : > { %8057 = vst [vmem:[#allocation44_spill] sm:$0xff] %v6167_v14  ;;  %8058 = vst [vmem:[#allocation125_spill] sm:$0xff] %v6170_v40  ;;  %v6180_v26 = vmul.f32 0.2, %v8060_v15  ;;  %v6186_v24 = vmul.f32 0.2, %v8063_v34  ;;  %v6192_v40 = vsel %vm2470_vm6, %v7982_v13, %v5954_v3 }
 0x39b   : > { %8059 = vst [vmem:[#allocation126_spill] sm:$0xff] %v6176_v20  ;;  %8062 = vst [vmem:[#allocation127_spill] sm:$0xff] %v6183_v56  ;;  %vm2482_vm2 = vcmp.gt.f32.partialorder %v8002_v43, 0.0  ;;  %v6196_v54 = vmul.f32 0.2, %v5644_v16  ;;  %v8067_v1 = vld [vmem:[#allocation47_spill] sm:$0xff] }
 0x39c   : > { %8061 = vst [vmem:[#allocation45_spill] sm:$0xff] %v6180_v26  ;;  %8064 = vst [vmem:[#allocation46_spill] sm:$0xff] %v6186_v24  ;;  %v6199_v20 = vmul.f32 0.2, %v8067_v1  ;;  %v6202_v26 = vmul.f32 0.2, %v5652_v17 }
 0x39d   : > { %8065 = vst [vmem:[#allocation128_spill] sm:$0xff] %v6192_v40  ;;  %8066 = vst [vmem:[#allocation129_spill] sm:$0xff] %v6196_v54  ;;  %v8070_v56 = vld [vmem:[#allocation20_spill] sm:$0xff]  ;;  %vm2483_vm3 = vcmp.gt.f32.partialorder %v5508_v8, 0.0  ;;  %v8074_v40 = vld [vmem:[#allocation49_spill] sm:$0xff]  ;;  %vm2484_vm4 = vcmp.gt.f32.partialorder %v8005_v32, 0.0 }
 0x39e   : > { %8068 = vst [vmem:[#allocation47_spill] sm:$0xff] %v6199_v20  ;;  %8069 = vst [vmem:[#allocation130_spill] sm:$0xff] %v6202_v26  ;;  %v6208_v24 = vsel %vm2471_vm7, %v5460_v18, %v8070_v56  ;;  %v8072_v3 = vld [vmem:[#allocation48_spill] sm:$0xff]  ;;  %v6215_v14 = vmul.f32 0.2, %v8074_v40  ;;  %v8076_v54 = vld [vmem:[#allocation50_spill] sm:$0xff] }
 0x39f   : > { %8071 = vst [vmem:[#allocation20_spill] sm:$0xff] %v6208_v24  ;;  %v6212_v13 = vmul.f32 0.2, %v8072_v3  ;;  %v6218_v44 = vmul.f32 0.2, %v8076_v54  ;;  %v8078_v20 = vld [vmem:[#allocation22_spill] sm:$0xff] }
 0x3a0   : > { %8075 = vst [vmem:[#allocation49_spill] sm:$0xff] %v6215_v14  ;;  %v6224_v26 = vsel %vm2472_vm8, %v7985_v2, %v8078_v20  ;;  %v8080_v18 = vld [vmem:[#allocation51_spill] sm:$0xff]  ;;  %v8082_v24 = vld [vmem:[#allocation52_spill] sm:$0xff]  ;;  %vm2485_vm5 = vcmp.gt.f32.partialorder %v5516_v45, 0.0  ;;  %v8088_v2 = vld [vmem:[#allocation53_spill] sm:$0xff]  ;;  %vm2486_vm6 = vcmp.gt.f32.partialorder %v8008_v7, 0.0 }
 0x3a1   : > { %8073 = vst [vmem:[#allocation48_spill] sm:$0xff] %v6212_v13  ;;  %8077 = vst [vmem:[#allocation50_spill] sm:$0xff] %v6218_v44  ;;  %v6228_v56 = vmul.f32 0.2, %v8080_v18  ;;  %v6231_v28 = vmul.f32 0.2, %v8082_v24 }
 0x3a2   : > { %8079 = vst [vmem:[#allocation22_spill] sm:$0xff] %v6224_v26  ;;  %v8084_v13 = vld [vmem:[#allocation81_spill] sm:$0xff]  ;;  %v8086_v14 = vld [vmem:[#allocation23_spill] sm:$0xff]  ;;  %v6244_v20 = vmul.f32 0.2, %v8088_v2  ;;  %v8090_v26 = vld [vmem:[#allocation82_spill] sm:$0xff] }
 0x3a3   : > { %8081 = vst [vmem:[#allocation131_spill] sm:$0xff] %v6228_v56  ;;  %8083 = vst [vmem:[#allocation132_spill] sm:$0xff] %v6231_v28  ;;  %v6234_v38 = vmul.f32 0.2, %v8084_v13  ;;  %v6240_v44 = vsel %vm2473_vm9, %v5468_v59, %v8086_v14  ;;  %v6247_v35 = vmul.f32 0.2, %v8090_v26 }
 0x3a4   : > { %8087 = vst [vmem:[#allocation23_spill] sm:$0xff] %v6240_v44  ;;  %8089 = vst [vmem:[#allocation133_spill] sm:$0xff] %v6244_v20  ;;  %v8092_v56 = vld [vmem:[#allocation54_spill] sm:$0xff]  ;;  %v8094_v28 = vld [vmem:[#allocation24_spill] sm:$0xff]  ;;  %vm2487_vm7 = vcmp.gt.f32.partialorder %v5524_v47, 0.0  ;;  %vm2488_vm8 = vcmp.gt.f32.partialorder %v8012_v37, 0.0 }
 0x3a5   : > { %8085 = vst [vmem:[#allocation81_spill] sm:$0xff] %v6234_v38  ;;  %8091 = vst [vmem:[#allocation134_spill] sm:$0xff] %v6247_v35  ;;  %v6250_v24 = vmul.f32 0.2, %v8092_v56  ;;  %v6256_v38 = vsel %vm2474_vm10, %v7988_v22, %v8094_v28  ;;  %v8096_v59 = vld [vmem:[#allocation83_spill] sm:$0xff]  ;;  %v8100_v20 = vld [vmem:[#allocation84_spill] sm:$0xff] }
 0x3a6   : > { %8095 = vst [vmem:[#allocation24_spill] sm:$0xff] %v6256_v38  ;;  %v6260_v14 = vmul.f32 0.2, %v8096_v59  ;;  %v8098_v44 = vld [vmem:[#allocation55_spill] sm:$0xff]  ;;  %v6266_v26 = vmul.f32 0.2, %v8100_v20 }
 0x3a7   : > { %8093 = vst [vmem:[#allocation135_spill] sm:$0xff] %v6250_v24  ;;  %v6263_v2 = vmul.f32 0.2, %v8098_v44  ;;  %v8102_v35 = vld [vmem:[#allocation96_spill] sm:$0xff]  ;;  %v8106_v38 = vld [vmem:[#allocation57_spill] sm:$0xff]  ;;  %vm2489_vm9 = vcmp.gt.f32.partialorder %v5532_v48, 0.0 }
 0x3a8   : > { %8097 = vst [vmem:[#allocation136_spill] sm:$0xff] %v6260_v14  ;;  %8101 = vst [vmem:[#allocation138_spill] sm:$0xff] %v6266_v26  ;;  %v6272_v24 = vsel %vm2475_vm11, %v5476_v19, %v8102_v35  ;;  %v8104_v22 = vld [vmem:[#allocation56_spill] sm:$0xff]  ;;  %v6279_v59 = vmul.f32 0.2, %v8106_v38  ;;  %v8108_v14 = vld [vmem:[#allocation58_spill] sm:$0xff]  ;;  %v6288_v26 = vsel %vm2476_vm12, %v7992_v30, %v5984_v27 }
 0x3a9   : > { %8099 = vst [vmem:[#allocation137_spill] sm:$0xff] %v6263_v2  ;;  %8103 = vst [vmem:[#allocation96_spill] sm:$0xff] %v6272_v24  ;;  %v6276_v28 = vmul.f32 0.2, %v8104_v22  ;;  %v6282_v44 = vmul.f32 0.2, %v8108_v14 }
 0x3aa   : > { %8107 = vst [vmem:[#allocation140_spill] sm:$0xff] %v6279_v59  ;;  %8110 = vst [vmem:[#allocation141_spill] sm:$0xff] %v6288_v26  ;;  %v8111_v19 = vld [vmem:[#allocation59_spill] sm:$0xff]  ;;  %v8113_v24 = vld [vmem:[#allocation60_spill] sm:$0xff]  ;;  %vm2490_vm10 = vcmp.gt.f32.partialorder %v8016_v36, 0.0  ;;  %vm2491_vm11 = vcmp.gt.f32.partialorder %v5540_v49, 0.0 }
 0x3ab   : > { %8105 = vst [vmem:[#allocation139_spill] sm:$0xff] %v6276_v28  ;;  %8109 = vst [vmem:[#allocation58_spill] sm:$0xff] %v6282_v44  ;;  %v6292_v35 = vmul.f32 0.2, %v8111_v19  ;;  %v6295_v2 = vmul.f32 0.2, %v8113_v24 }
 0x3ac   : > { %v8115_v28 = vld [vmem:[#allocation61_spill] sm:$0xff]  ;;  %v8117_v59 = vld [vmem:[#allocation26_spill] sm:$0xff] }
 0x3ad   : > { %8112 = vst [vmem:[#allocation142_spill] sm:$0xff] %v6292_v35  ;;  %8114 = vst [vmem:[#allocation143_spill] sm:$0xff] %v6295_v2  ;;  %v6298_v38 = vmul.f32 0.2, %v8115_v28  ;;  %v6304_v44 = vsel %vm2477_vm13, %v5484_v55, %v8117_v59  ;;  %v8119_v27 = vld [vmem:[#allocation62_spill] sm:$0xff]  ;;  %v8121_v26 = vld [vmem:[#allocation5_spill] sm:$0xff] }
 0x3ae   : > { %8118 = vst [vmem:[#allocation26_spill] sm:$0xff] %v6304_v44  ;;  %v6308_v30 = vmul.f32 0.2, %v8119_v27  ;;  %v6311_v19 = vmul.f32 0.2, %v8121_v26  ;;  %v8123_v35 = vld [vmem:[#allocation63_spill] sm:$0xff] }
 0x3af   : > { %8116 = vst [vmem:[#allocation61_spill] sm:$0xff] %v6298_v38  ;;  %v6314_v24 = vmul.f32 0.2, %v8123_v35  ;;  %v8125_v2 = vld [vmem:[#allocation27_spill] sm:$0xff]  ;;  %v8127_v55 = vld [vmem:[#allocation6_spill] sm:$0xff]  ;;  %v8129_v44 = vld [vmem:[#allocation64_spill] sm:$0xff] }
 0x3b0   : > { %8120 = vst [vmem:[#allocation144_spill] sm:$0xff] %v6308_v30  ;;  %8122 = vst [vmem:[#allocation145_spill] sm:$0xff] %v6311_v19  ;;  %v6320_v38 = vsel %vm2478_vm14, %v7995_v31, %v8125_v2  ;;  %v6324_v59 = vmul.f32 0.2, %v8127_v55  ;;  %v6327_v27 = vmul.f32 0.2, %v8129_v44 }
 0x3b1   : > { %8124 = vst [vmem:[#allocation146_spill] sm:$0xff] %v6314_v24  ;;  %8126 = vst [vmem:[#allocation27_spill] sm:$0xff] %v6320_v38  ;;  %v8131_v30 = vld [vmem:[#allocation7_spill] sm:$0xff]  ;;  %v8133_v19 = vld [vmem:[#allocation98_spill] sm:$0xff]  ;;  %vm2493_vm13 = vcmp.gt.f32.partialorder %v5548_v50, 0.0  ;;  %vm2537_vm14 = vcmp.gt.f32.partialorder %v8115_v28, 0.0 }
 0x3b2   : > { %8128 = vst [vmem:[#allocation6_spill] sm:$0xff] %v6324_v59  ;;  %8130 = vst [vmem:[#allocation147_spill] sm:$0xff] %v6327_v27  ;;  %v6330_v26 = vmul.f32 0.2, %v8131_v30  ;;  %v6336_v24 = vsel %vm2479_vm15, %v5492_v62, %v8133_v19  ;;  %v8135_v31 = vld [vmem:[#allocation65_spill] sm:$0xff]  ;;  %v8137_v38 = vld [vmem:[#allocation8_spill] sm:$0xff] }
 0x3b3   : > { %8134 = vst [vmem:[#allocation98_spill] sm:$0xff] %v6336_v24  ;;  %v6341_v2 = vmul.f32 0.2, %v8135_v31  ;;  %v6344_v59 = vmul.f32 0.2, %v8137_v38  ;;  %v8139_v27 = vld [vmem:[#allocation66_spill] sm:$0xff] }
 0x3b4   : > { %8132 = vst [vmem:[#allocation148_spill] sm:$0xff] %v6330_v26  ;;  %v6347_v44 = vmul.f32 0.2, %v8139_v27  ;;  %v8141_v26 = vld [vmem:[#allocation28_spill] sm:$0xff]  ;;  %v8143_v62 = vld [vmem:[#allocation9_spill] sm:$0xff]  ;;  %v8145_v24 = vld [vmem:[#allocation67_spill] sm:$0xff] }
 0x3b5   : > { %8136 = vst [vmem:[#allocation65_spill] sm:$0xff] %v6341_v2  ;;  %8138 = vst [vmem:[#allocation8_spill] sm:$0xff] %v6344_v59  ;;  %v6353_v30 = vsel %vm2480_vm0, %v7998_v61, %v8141_v26  ;;  %v6360_v19 = vmul.f32 0.2, %v8143_v62  ;;  %v6363_v59 = vmul.f32 0.2, %v8145_v24 }
 0x3b6   : > { %8140 = vst [vmem:[#allocation149_spill] sm:$0xff] %v6347_v44  ;;  %8142 = vst [vmem:[#allocation28_spill] sm:$0xff] %v6353_v30  ;;  %v8147_v44 = vld [vmem:[#allocation10_spill] sm:$0xff]  ;;  %v8149_v27 = vld [vmem:[#allocation100_spill] sm:$0xff]  ;;  %vm2497_vm0 = vcmp.gt.f32.partialorder %v5564_v51, 0.0 }
 0x3b7   : > { %8144 = vst [vmem:[#allocation9_spill] sm:$0xff] %v6360_v19  ;;  %8146 = vst [vmem:[#allocation67_spill] sm:$0xff] %v6363_v59  ;;  %v6366_v2 = vmul.f32 0.2, %v8147_v44  ;;  %v6372_v61 = vsel %vm2481_vm1, %v5500_v23, %v8149_v27  ;;  %v8151_v26 = vld [vmem:[#allocation68_spill] sm:$0xff]  ;;  %v8153_v59 = vld [vmem:[#allocation11_spill] sm:$0xff]  ;;  %v6391_v23 = vsel %vm2482_vm2, %v8002_v43, %v6014_v21 }
 0x3b8   : > { %8150 = vst [vmem:[#allocation100_spill] sm:$0xff] %v6372_v61  ;;  %v6379_v30 = vmul.f32 0.2, %v8151_v26  ;;  %v6382_v19 = vmul.f32 0.2, %v8153_v59  ;;  %8157 = vst [vmem:[#allocation153_spill] sm:$0xff] %v6391_v23 }
 0x3b9   : > { %8148 = vst [vmem:[#allocation150_spill] sm:$0xff] %v6366_v2  ;;  %v8155_v2 = vld [vmem:[#allocation69_spill] sm:$0xff]  ;;  %vm2501_vm1 = vcmp.gt.f32.partialorder %v5580_v57, 0.0  ;;  %v8158_v27 = vld [vmem:[#allocation12_spill] sm:$0xff]  ;;  %vm2505_vm2 = vcmp.gt.f32.partialorder %v5596_v63, 0.0  ;;  %v8239_v22 = vld [vmem:[#allocation62_spill] sm:$0xff] }
 0x3ba   : > { %8152 = vst [vmem:[#allocation68_spill] sm:$0xff] %v6379_v30  ;;  %8154 = vst [vmem:[#allocation151_spill] sm:$0xff] %v6382_v19  ;;  %v6385_v44 = vmul.f32 0.2, %v8155_v2  ;;  %v6398_v61 = vmul.f32 0.2, %v8158_v27 }
 0x3bb   : > { %v8160_v19 = vld [vmem:[#allocation70_spill] sm:$0xff]  ;;  %v8164_v59 = vld [vmem:[#allocation29_spill] sm:$0xff] }
 0x3bc   : > { %8156 = vst [vmem:[#allocation152_spill] sm:$0xff] %v6385_v44  ;;  %8159 = vst [vmem:[#allocation12_spill] sm:$0xff] %v6398_v61  ;;  %v6401_v30 = vmul.f32 0.2, %v8160_v19  ;;  %v8162_v44 = vld [vmem:[#allocation13_spill] sm:$0xff]  ;;  %v6410_v21 = vsel %vm2483_vm3, %v5508_v8, %v8164_v59  ;;  %v8172_v19 = vld [vmem:[#allocation30_spill] sm:$0xff] }
 0x3bd   : > { %v6404_v2 = vmul.f32 0.2, %v8162_v44  ;;  %8165 = vst [vmem:[#allocation29_spill] sm:$0xff] %v6410_v21  ;;  %v8166_v43 = vld [vmem:[#allocation85_spill] sm:$0xff]  ;;  %v6429_v8 = vsel %vm2484_vm4, %v8005_v32, %v8172_v19  ;;  %vm2509_vm3 = vcmp.gt.f32.partialorder %v5612_v4, 0.0  ;;  %v8174_v59 = vld [vmem:[#allocation86_spill] sm:$0xff] }
 0x3be   : > { %8161 = vst [vmem:[#allocation154_spill] sm:$0xff] %v6401_v30  ;;  %v6417_v23 = vmul.f32 0.2, %v8166_v43  ;;  %v8168_v30 = vld [vmem:[#allocation14_spill] sm:$0xff]  ;;  %8173 = vst [vmem:[#allocation30_spill] sm:$0xff] %v6429_v8  ;;  %vm2513_vm4 = vcmp.gt.f32.partialorder %v5628_v10, 0.0 }
 0x3bf   : > { %8163 = vst [vmem:[#allocation155_spill] sm:$0xff] %v6404_v2  ;;  %v6420_v61 = vmul.f32 0.2, %v8168_v30  ;;  %v8170_v2 = vld [vmem:[#allocation71_spill] sm:$0xff]  ;;  %v6436_v21 = vmul.f32 0.2, %v8174_v59 }
 0x3c0   : > { %8167 = vst [vmem:[#allocation85_spill] sm:$0xff] %v6417_v23  ;;  %v6423_v44 = vmul.f32 0.2, %v8170_v2  ;;  %v8180_v30 = vld [vmem:[#allocation102_spill] sm:$0xff]  ;;  %v8182_v19 = vld [vmem:[#allocation88_spill] sm:$0xff]  ;;  %v8215_v18 = vld [vmem:[#allocation105_spill] sm:$0xff] }
 0x3c1   : > { %8169 = vst [vmem:[#allocation156_spill] sm:$0xff] %v6420_v61  ;;  %8175 = vst [vmem:[#allocation86_spill] sm:$0xff] %v6436_v21  ;;  %v8176_v61 = vld [vmem:[#allocation15_spill] sm:$0xff]  ;;  %v6448_v32 = vsel %vm2485_vm5, %v5516_v45, %v8180_v30  ;;  %v6455_v8 = vmul.f32 0.2, %v8182_v19  ;;  %vm2517_vm5 = vcmp.gt.f32.partialorder %v5644_v16, 0.0 }
 0x3c2   : > { %8171 = vst [vmem:[#allocation157_spill] sm:$0xff] %v6423_v44  ;;  %v6439_v23 = vmul.f32 0.2, %v8176_v61  ;;  %v8178_v44 = vld [vmem:[#allocation87_spill] sm:$0xff]  ;;  %8181 = vst [vmem:[#allocation102_spill] sm:$0xff] %v6448_v32  ;;  %v8190_v30 = vld [vmem:[#allocation90_spill] sm:$0xff] }
 0x3c3   : > { %v6442_v2 = vmul.f32 0.2, %v8178_v44  ;;  %8183 = vst [vmem:[#allocation88_spill] sm:$0xff] %v6455_v8  ;;  %v8188_v61 = vld [vmem:[#allocation31_spill] sm:$0xff]  ;;  %v6474_v32 = vmul.f32 0.2, %v8190_v30 }
 0x3c4   : > { %8177 = vst [vmem:[#allocation158_spill] sm:$0xff] %v6439_v23  ;;  %v8184_v23 = vld [vmem:[#allocation89_spill] sm:$0xff]  ;;  %v6467_v45 = vsel %vm2486_vm6, %v8008_v7, %v8188_v61  ;;  %vm2521_vm6 = vcmp.gt.f32.partialorder %v8074_v40, 0.0  ;;  %v8205_v30 = vld [vmem:[#allocation32_spill] sm:$0xff] }
 0x3c5   : > { %8179 = vst [vmem:[#allocation159_spill] sm:$0xff] %v6442_v2  ;;  %v6458_v21 = vmul.f32 0.2, %v8184_v23  ;;  %v8186_v2 = vld [vmem:[#allocation72_spill] sm:$0xff]  ;;  %8189 = vst [vmem:[#allocation31_spill] sm:$0xff] %v6467_v45  ;;  %v8199_v45 = vld [vmem:[#allocation74_spill] sm:$0xff] }
 0x3c6   : > { %v6461_v44 = vmul.f32 0.2, %v8186_v2  ;;  %8191 = vst [vmem:[#allocation162_spill] sm:$0xff] %v6474_v32  ;;  %v8196_v23 = vld [vmem:[#allocation104_spill] sm:$0xff]  ;;  %v6493_v32 = vmul.f32 0.2, %v8199_v45 }
 0x3c7   : > { %8185 = vst [vmem:[#allocation160_spill] sm:$0xff] %v6458_v21  ;;  %v8192_v21 = vld [vmem:[#allocation73_spill] sm:$0xff]  ;;  %v6486_v7 = vsel %vm2487_vm7, %v5524_v47, %v8196_v23  ;;  %v6505_v47 = vsel %vm2488_vm8, %v8012_v37, %v8205_v30  ;;  %vm2525_vm7 = vcmp.gt.f32.partialorder %v8084_v13, 0.0  ;;  %v6524_v37 = vsel %vm2489_vm9, %v5532_v48, %v8215_v18  ;;  %v8217_v30 = vld [vmem:[#allocation83_spill] sm:$0xff] }
 0x3c8   : > { %8187 = vst [vmem:[#allocation161_spill] sm:$0xff] %v6461_v44  ;;  %v6477_v8 = vmul.f32 0.2, %v8192_v21  ;;  %v8194_v44 = vld [vmem:[#allocation91_spill] sm:$0xff]  ;;  %8197 = vst [vmem:[#allocation104_spill] sm:$0xff] %v6486_v7  ;;  %vm2529_vm8 = vcmp.gt.f32.partialorder %v8217_v30, 0.0 }
 0x3c9   : > { %v6480_v2 = vmul.f32 0.2, %v8194_v44  ;;  %8200 = vst [vmem:[#allocation74_spill] sm:$0xff] %v6493_v32  ;;  %8206 = vst [vmem:[#allocation32_spill] sm:$0xff] %v6505_v47  ;;  %v8209_v32 = vld [vmem:[#allocation93_spill] sm:$0xff]  ;;  %vm8248_vm9 = vcmp.gt.f32.partialorder %v8027_v33, 0.0 }
 0x3ca   : > { %8193 = vst [vmem:[#allocation163_spill] sm:$0xff] %v6477_v8  ;;  %v8201_v8 = vld [vmem:[#allocation92_spill] sm:$0xff]  ;;  %8216 = vst [vmem:[#allocation105_spill] sm:$0xff] %v6524_v37  ;;  %v8225_v23 = vld [vmem:[#allocation33_spill] sm:$0xff] }
 0x3cb   : > { %8195 = vst [vmem:[#allocation164_spill] sm:$0xff] %v6480_v2  ;;  %v6496_v44 = vmul.f32 0.2, %v8201_v8  ;;  %v8203_v2 = vld [vmem:[#allocation75_spill] sm:$0xff]  ;;  %v6512_v8 = vmul.f32 0.2, %v8209_v32  ;;  %v6543_v48 = vsel %vm2490_vm10, %v8016_v36, %v8225_v23 }
 0x3cc   : > { %v6499_v21 = vmul.f32 0.2, %v8203_v2  ;;  %v8227_v18 = vld [vmem:[#allocation57_spill] sm:$0xff]  ;;  %v8228_v37 = vld [vmem:[#allocation59_spill] sm:$0xff]  ;;  %v8236_v23 = vld [vmem:[#allocation34_spill] sm:$0xff]  ;;  %vm8237_vm10 = vcmp.gt.f32.partialorder %v8019_v6, 0.0 }
 0x3cd   : > { %8202 = vst [vmem:[#allocation165_spill] sm:$0xff] %v6496_v44  ;;  %8210 = vst [vmem:[#allocation93_spill] sm:$0xff] %v6512_v8  ;;  %v8211_v44 = vld [vmem:[#allocation76_spill] sm:$0xff]  ;;  %v8219_v8 = vld [vmem:[#allocation77_spill] sm:$0xff] }
 0x3ce   : > { %8204 = vst [vmem:[#allocation166_spill] sm:$0xff] %v6499_v21  ;;  %v6515_v2 = vmul.f32 0.2, %v8211_v44  ;;  %v8213_v21 = vld [vmem:[#allocation94_spill] sm:$0xff]  ;;  %v6531_v56 = vmul.f32 0.2, %v8219_v8 }
 0x3cf   : > { %v6518_v61 = vmul.f32 0.2, %v8213_v21  ;;  %vm2574_vm15 = vcmp.gt.f32.partialorder %v8219_v8, 0.0 }
 0x3d0   : > { %8212 = vst [vmem:[#allocation76_spill] sm:$0xff] %v6515_v2  ;;  %8220 = vst [vmem:[#allocation83_spill] sm:$0xff] %v6531_v56  ;;  %v8221_v2 = vld [vmem:[#allocation95_spill] sm:$0xff]  ;;  %v8230_v56 = vld [vmem:[#allocation16_spill] sm:$0xff] }
 0x3d1   : > { %8214 = vst [vmem:[#allocation167_spill] sm:$0xff] %v6518_v61  ;;  %v6534_v21 = vmul.f32 0.2, %v8221_v2  ;;  %v8223_v61 = vld [vmem:[#allocation78_spill] sm:$0xff]  ;;  %v6550_v20 = vmul.f32 0.2, %v8230_v56 }
 0x3d2   : > { %v6537_v7 = vmul.f32 0.2, %v8223_v61  ;;  %8226 = vst [vmem:[#allocation78_spill] sm:$0xff] %v6543_v48  ;;  %v6565_v48 = vsel %vm8237_vm10, %v8019_v6, %v8236_v23  ;;  %v8244_v23 = vld [vmem:[#allocation110_spill] sm:$0xff]  ;;  %vm8245_vm10 = vcmp.gt.f32.partialorder %v5556_v46, 0.0 }
 0x3d3   : > { %8222 = vst [vmem:[#allocation77_spill] sm:$0xff] %v6534_v21  ;;  %8231 = vst [vmem:[#allocation33_spill] sm:$0xff] %v6550_v20  ;;  %v8232_v21 = vld [vmem:[#allocation17_spill] sm:$0xff] }
 0x3d4   : > { %8224 = vst [vmem:[#allocation95_spill] sm:$0xff] %v6537_v7  ;;  %v6553_v47 = vmul.f32 0.2, %v8232_v21  ;;  %v8234_v7 = vld [vmem:[#allocation107_spill] sm:$0xff]  ;;  %8238 = vst [vmem:[#allocation16_spill] sm:$0xff] %v6565_v48  ;;  %v8240_v20 = vld [vmem:[#allocation5_spill] sm:$0xff]  ;;  %v6587_v48 = vsel %vm8245_vm10, %v5556_v46, %v8244_v23 }
 0x3d5   : > { %v6559_v36 = vsel %vm2491_vm11, %v5540_v49, %v8234_v7  ;;  %v8242_v7 = vld [vmem:[#allocation35_spill] sm:$0xff]  ;;  %vm8243_vm11 = vcmp.gt.f32.partialorder %v8023_v25, 0.0  ;;  %8246 = vst [vmem:[#allocation17_spill] sm:$0xff] %v6587_v48  ;;  %vm8254_vm10 = vcmp.gt.f32.partialorder %v8030_v9, 0.0 }
 0x3d6   : > { %8233 = vst [vmem:[#allocation57_spill] sm:$0xff] %v6553_v47  ;;  %8235 = vst [vmem:[#allocation59_spill] sm:$0xff] %v6559_v36  ;;  %v8241_v47 = vld [vmem:[#allocation109_spill] sm:$0xff]  ;;  %v6581_v6 = vsel %vm8243_vm11, %v8023_v25, %v8242_v7  ;;  %v8247_v36 = vld [vmem:[#allocation36_spill] sm:$0xff]  ;;  %vm8258_vm11 = vcmp.gt.f32.partialorder %v8034_v42, 0.0 }
 0x3d7   : > { %v6575_v49 = vsel %vm2493_vm13, %v5548_v50, %v8241_v47  ;;  %v6593_v35 = vsel %vm8248_vm9, %v8027_v33, %v8247_v36  ;;  %vm2541_vm13 = vcmp.gt.f32.partialorder %v8127_v55, 0.0  ;;  %v8250_v50 = vld [vmem:[#allocation64_spill] sm:$0xff]  ;;  %v8251_v47 = vld [vmem:[#allocation7_spill] sm:$0xff]  ;;  %v8253_v7 = vld [vmem:[#allocation37_spill] sm:$0xff]  ;;  %vm8256_vm9 = vcmp.gt.f32.partialorder %v5572_v53, 0.0 }
 0x3d8   : > { %8249 = vst [vmem:[#allocation107_spill] sm:$0xff] %v6593_v35  ;;  %v8252_v25 = vld [vmem:[#allocation112_spill] sm:$0xff]  ;;  %v6609_v33 = vsel %vm8254_vm10, %v8030_v9, %v8253_v7  ;;  %v8255_v36 = vld [vmem:[#allocation114_spill] sm:$0xff]  ;;  %v8261_v9 = vld [vmem:[#allocation115_spill] sm:$0xff]  ;;  %vm8269_vm10 = vcmp.gt.f32.partialorder %v8041_v60, 0.0 }
 0x3d9   : > { %v6603_v46 = vsel %vm2497_vm0, %v5564_v51, %v8252_v25  ;;  %v6615_v23 = vsel %vm8256_vm9, %v5572_v53, %v8255_v36  ;;  %v8257_v35 = vld [vmem:[#allocation38_spill] sm:$0xff]  ;;  %vm2545_vm0 = vcmp.gt.f32.partialorder %v8137_v38, 0.0  ;;  %v6631_v53 = vsel %vm2501_vm1, %v5580_v57, %v8261_v9  ;;  %v8262_v25 = vld [vmem:[#allocation39_spill] sm:$0xff]  ;;  %v8268_v36 = vld [vmem:[#allocation40_spill] sm:$0xff] }
 0x3da   : > { %v6621_v48 = vsel %vm8258_vm11, %v8034_v42, %v8257_v35  ;;  %v8260_v51 = vld [vmem:[#allocation66_spill] sm:$0xff]  ;;  %vm8263_vm9 = vcmp.gt.f32.partialorder %v8038_v39, 0.0  ;;  %v8265_v35 = vld [vmem:[#allocation117_spill] sm:$0xff]  ;;  %vm8266_vm11 = vcmp.gt.f32.partialorder %v5588_v58, 0.0  ;;  %v8272_v9 = vld [vmem:[#allocation11_spill] sm:$0xff] }
 0x3db   : > { %8259 = vst [vmem:[#allocation34_spill] sm:$0xff] %v6621_v48  ;;  %v6637_v42 = vsel %vm8263_vm9, %v8038_v39, %v8262_v25  ;;  %v6643_v7 = vsel %vm8266_vm11, %v5588_v58, %v8265_v35  ;;  %v6649_v48 = vsel %vm8269_vm10, %v8041_v60, %v8268_v36  ;;  %v8271_v57 = vld [vmem:[#allocation10_spill] sm:$0xff]  ;;  %v8273_v39 = vld [vmem:[#allocation69_spill] sm:$0xff]  ;;  %v8274_v25 = vld [vmem:[#allocation119_spill] sm:$0xff]  ;;  %vm8276_vm11 = vcmp.gt.f32.partialorder %v8045_v52, 0.0 }
 0x3dc   : > { %8264 = vst [vmem:[#allocation62_spill] sm:$0xff] %v6637_v42  ;;  %8267 = vst [vmem:[#allocation5_spill] sm:$0xff] %v6643_v7  ;;  %vm2549_vm1 = vcmp.gt.f32.partialorder %v8271_v57, 0.0  ;;  %v6659_v58 = vsel %vm2505_vm2, %v5596_v63, %v8274_v25  ;;  %v8275_v35 = vld [vmem:[#allocation41_spill] sm:$0xff]  ;;  %v8277_v36 = vld [vmem:[#allocation120_spill] sm:$0xff]  ;;  %vm8278_vm10 = vcmp.gt.f32.partialorder %v5604_v0, 0.0 }
 0x3dd   : > { %8270 = vst [vmem:[#allocation109_spill] sm:$0xff] %v6649_v48  ;;  %v6665_v60 = vsel %vm8276_vm11, %v8045_v52, %v8275_v35  ;;  %v6671_v48 = vsel %vm8278_vm10, %v5604_v0, %v8277_v36  ;;  %v8280_v7 = vld [vmem:[#allocation42_spill] sm:$0xff]  ;;  %vm8281_vm9 = vcmp.gt.f32.partialorder %v8049_v41, 0.0  ;;  %vm2553_vm2 = vcmp.gt.f32.partialorder %v8158_v27, 0.0  ;;  %v8284_v25 = vld [vmem:[#allocation13_spill] sm:$0xff]  ;;  %v8287_v35 = vld [vmem:[#allocation43_spill] sm:$0xff] }
 0x3de   : > { %8279 = vst [vmem:[#allocation35_spill] sm:$0xff] %v6671_v48  ;;  %v6677_v42 = vsel %vm8281_vm9, %v8049_v41, %v8280_v7  ;;  %v8283_v63 = vld [vmem:[#allocation70_spill] sm:$0xff]  ;;  %vm8288_vm10 = vcmp.gt.f32.partialorder %v8052_v29, 0.0  ;;  %v8290_v7 = vld [vmem:[#allocation124_spill] sm:$0xff]  ;;  %vm8291_vm9 = vcmp.gt.f32.partialorder %v5620_v5, 0.0  ;;  %vm8294_vm11 = vcmp.gt.f32.partialorder %v8056_v12, 0.0 }
 0x3df   : > { %8282 = vst [vmem:[#allocation110_spill] sm:$0xff] %v6677_v42  ;;  %v8285_v52 = vld [vmem:[#allocation122_spill] sm:$0xff]  ;;  %v6693_v41 = vsel %vm8288_vm10, %v8052_v29, %v8287_v35  ;;  %v6699_v36 = vsel %vm8291_vm9, %v5620_v5, %v8290_v7  ;;  %v8293_v42 = vld [vmem:[#allocation44_spill] sm:$0xff]  ;;  %v8298_v29 = vld [vmem:[#allocation15_spill] sm:$0xff]  ;;  %vm8302_vm9 = vcmp.gt.f32.partialorder %v8060_v15, 0.0  ;;  %vm8308_vm10 = vcmp.gt.f32.partialorder %v8063_v34, 0.0 }
 0x3e0   : > { %v6687_v0 = vsel %vm2509_vm3, %v5612_v4, %v8285_v52  ;;  %8289 = vst [vmem:[#allocation64_spill] sm:$0xff] %v6693_v41  ;;  %8292 = vst [vmem:[#allocation7_spill] sm:$0xff] %v6699_v36  ;;  %v6705_v48 = vsel %vm8294_vm11, %v8056_v12, %v8293_v42  ;;  %v8296_v4 = vld [vmem:[#allocation14_spill] sm:$0xff]  ;;  %v8297_v52 = vld [vmem:[#allocation71_spill] sm:$0xff]  ;;  %vm8305_vm11 = vcmp.gt.f32.partialorder %v5636_v11, 0.0 }
 0x3e1   : > { %8286 = vst [vmem:[#allocation36_spill] sm:$0xff] %v6687_v0  ;;  %8295 = vst [vmem:[#allocation112_spill] sm:$0xff] %v6705_v48  ;;  %vm2557_vm3 = vcmp.gt.f32.partialorder %v8296_v4, 0.0  ;;  %v8299_v35 = vld [vmem:[#allocation125_spill] sm:$0xff]  ;;  %v8304_v42 = vld [vmem:[#allocation127_spill] sm:$0xff] }
 0x3e2   : > { %v6715_v5 = vsel %vm2513_vm4, %v5628_v10, %v8299_v35  ;;  %v8301_v7 = vld [vmem:[#allocation45_spill] sm:$0xff]  ;;  %v6727_v48 = vsel %vm8305_vm11, %v5636_v11, %v8304_v42  ;;  %v8307_v36 = vld [vmem:[#allocation46_spill] sm:$0xff]  ;;  %v8310_v10 = vld [vmem:[#allocation87_spill] sm:$0xff]  ;;  %vm8316_vm11 = vcmp.gt.f32.partialorder %v8067_v1, 0.0 }
 0x3e3   : > { %8300 = vst [vmem:[#allocation37_spill] sm:$0xff] %v6715_v5  ;;  %v6721_v12 = vsel %vm8302_vm9, %v8060_v15, %v8301_v7  ;;  %8306 = vst [vmem:[#allocation38_spill] sm:$0xff] %v6727_v48  ;;  %v6733_v41 = vsel %vm8308_vm10, %v8063_v34, %v8307_v36  ;;  %vm2561_vm4 = vcmp.gt.f32.partialorder %v8310_v10, 0.0  ;;  %v8311_v35 = vld [vmem:[#allocation89_spill] sm:$0xff]  ;;  %v8312_v15 = vld [vmem:[#allocation72_spill] sm:$0xff]  ;;  %vm8319_vm10 = vcmp.gt.f32.partialorder %v5652_v17, 0.0 }
 0x3e4   : > { %8303 = vst [vmem:[#allocation114_spill] sm:$0xff] %v6721_v12  ;;  %8309 = vst [vmem:[#allocation66_spill] sm:$0xff] %v6733_v41  ;;  %v8313_v7 = vld [vmem:[#allocation129_spill] sm:$0xff]  ;;  %v8315_v42 = vld [vmem:[#allocation47_spill] sm:$0xff]  ;;  %vm8322_vm9 = vcmp.gt.f32.partialorder %v8072_v3, 0.0 }
 0x3e5   : > { %v6743_v11 = vsel %vm2517_vm5, %v5644_v16, %v8313_v7  ;;  %v6749_v34 = vsel %vm8316_vm11, %v8067_v1, %v8315_v42  ;;  %v8318_v36 = vld [vmem:[#allocation130_spill] sm:$0xff]  ;;  %v8321_v48 = vld [vmem:[#allocation48_spill] sm:$0xff]  ;;  %v8325_v7 = vld [vmem:[#allocation73_spill] sm:$0xff] }
 0x3e6   : > { %8314 = vst [vmem:[#allocation115_spill] sm:$0xff] %v6743_v11  ;;  %8317 = vst [vmem:[#allocation39_spill] sm:$0xff] %v6749_v34  ;;  %v6755_v41 = vsel %vm8319_vm10, %v5652_v17, %v8318_v36  ;;  %v6761_v12 = vsel %vm8322_vm9, %v8072_v3, %v8321_v48  ;;  %v8324_v16 = vld [vmem:[#allocation90_spill] sm:$0xff]  ;;  %v8326_v11 = vld [vmem:[#allocation91_spill] sm:$0xff]  ;;  %vm8330_vm10 = vcmp.gt.f32.partialorder %v8076_v54, 0.0 }
 0x3e7   : > { %8320 = vst [vmem:[#allocation117_spill] sm:$0xff] %v6755_v41  ;;  %8323 = vst [vmem:[#allocation40_spill] sm:$0xff] %v6761_v12  ;;  %vm2565_vm5 = vcmp.gt.f32.partialorder %v8324_v16, 0.0  ;;  %v8327_v1 = vld [vmem:[#allocation49_spill] sm:$0xff]  ;;  %v8329_v42 = vld [vmem:[#allocation50_spill] sm:$0xff] }
 0x3e8   : > { %v6771_v17 = vsel %vm2521_vm6, %v8074_v40, %v8327_v1  ;;  %v6777_v3 = vsel %vm8330_vm10, %v8076_v54, %v8329_v42  ;;  %v8332_v48 = vld [vmem:[#allocation131_spill] sm:$0xff]  ;;  %v8336_v41 = vld [vmem:[#allocation132_spill] sm:$0xff]  ;;  %v8342_v54 = vld [vmem:[#allocation81_spill] sm:$0xff] }
 0x3e9   : > { %8328 = vst [vmem:[#allocation10_spill] sm:$0xff] %v6771_v17  ;;  %8331 = vst [vmem:[#allocation11_spill] sm:$0xff] %v6777_v3  ;;  %v8333_v36 = vld [vmem:[#allocation51_spill] sm:$0xff]  ;;  %v8337_v34 = vld [vmem:[#allocation52_spill] sm:$0xff]  ;;  %v6799_v42 = vsel %vm2525_vm7, %v8084_v13, %v8342_v54 }
 0x3ea   : > { %vm8334_vm9 = vcmp.gt.f32.partialorder %v8333_v36, 0.0  ;;  %vm8338_vm11 = vcmp.gt.f32.partialorder %v8337_v34, 0.0  ;;  %v8340_v40 = vld [vmem:[#allocation92_spill] sm:$0xff]  ;;  %v8341_v1 = vld [vmem:[#allocation75_spill] sm:$0xff]  ;;  %8343 = vst [vmem:[#allocation41_spill] sm:$0xff] %v6799_v42  ;;  %v8353_v17 = vld [vmem:[#allocation54_spill] sm:$0xff] }
 0x3eb   : > { %v6783_v12 = vsel %vm8334_vm9, %v8333_v36, %v8332_v48  ;;  %v6789_v5 = vsel %vm8338_vm11, %v8337_v34, %v8336_v41  ;;  %vm2569_vm6 = vcmp.gt.f32.partialorder %v8340_v40, 0.0  ;;  %v8344_v48 = vld [vmem:[#allocation133_spill] sm:$0xff]  ;;  %v8348_v34 = vld [vmem:[#allocation134_spill] sm:$0xff]  ;;  %v8352_v3 = vld [vmem:[#allocation135_spill] sm:$0xff]  ;;  %vm8354_vm10 = vcmp.gt.f32.partialorder %v8353_v17, 0.0 }
 0x3ec   : > { %8335 = vst [vmem:[#allocation69_spill] sm:$0xff] %v6783_v12  ;;  %8339 = vst [vmem:[#allocation119_spill] sm:$0xff] %v6789_v5  ;;  %v8345_v36 = vld [vmem:[#allocation53_spill] sm:$0xff]  ;;  %v8349_v5 = vld [vmem:[#allocation82_spill] sm:$0xff]  ;;  %v6817_v0 = vsel %vm8354_vm10, %v8353_v17, %v8352_v3 }
 0x3ed   : > { %vm8346_vm9 = vcmp.gt.f32.partialorder %v8345_v36, 0.0  ;;  %vm8350_vm11 = vcmp.gt.f32.partialorder %v8349_v5, 0.0  ;;  %8355 = vst [vmem:[#allocation70_spill] sm:$0xff] %v6817_v0  ;;  %v8356_v13 = vld [vmem:[#allocation94_spill] sm:$0xff]  ;;  %v8357_v54 = vld [vmem:[#allocation136_spill] sm:$0xff] }
 0x3ee   : > { %v6805_v41 = vsel %vm8346_vm9, %v8345_v36, %v8344_v48  ;;  %v6811_v12 = vsel %vm8350_vm11, %v8349_v5, %v8348_v34  ;;  %vm2573_vm7 = vcmp.gt.f32.partialorder %v8356_v13, 0.0  ;;  %v6827_v5 = vsel %vm2529_vm8, %v8217_v30, %v8357_v54  ;;  %v8358_v48 = vld [vmem:[#allocation137_spill] sm:$0xff]  ;;  %v8359_v36 = vld [vmem:[#allocation55_spill] sm:$0xff]  ;;  %v8361_v3 = vld [vmem:[#allocation138_spill] sm:$0xff] }
 0x3ef   : > { %8347 = vst [vmem:[#allocation120_spill] sm:$0xff] %v6805_v41  ;;  %8351 = vst [vmem:[#allocation42_spill] sm:$0xff] %v6811_v12  ;;  %vm8360_vm11 = vcmp.gt.f32.partialorder %v8359_v36, 0.0  ;;  %v8362_v34 = vld [vmem:[#allocation84_spill] sm:$0xff]  ;;  %v8364_v12 = vld [vmem:[#allocation139_spill] sm:$0xff]  ;;  %vm2577_vm8 = vcmp.gt.f32.partialorder %v8230_v56, 0.0 }
 0x3f0   : > { %v6833_v17 = vsel %vm8360_vm11, %v8359_v36, %v8358_v48  ;;  %vm8363_vm10 = vcmp.gt.f32.partialorder %v8362_v34, 0.0  ;;  %v8365_v41 = vld [vmem:[#allocation56_spill] sm:$0xff]  ;;  %vm8369_vm11 = vcmp.gt.f32.partialorder %v8227_v18, 0.0  ;;  %v8370_v48 = vld [vmem:[#allocation58_spill] sm:$0xff] }
 0x3f1   : > { %v6839_v0 = vsel %vm8363_vm10, %v8362_v34, %v8361_v3  ;;  %vm8366_vm9 = vcmp.gt.f32.partialorder %v8365_v41, 0.0  ;;  %v8368_v30 = vld [vmem:[#allocation140_spill] sm:$0xff]  ;;  %vm8371_vm10 = vcmp.gt.f32.partialorder %v8108_v14, 0.0  ;;  %v8372_v3 = vld [vmem:[#allocation142_spill] sm:$0xff] }
 0x3f2   : > { %v6845_v42 = vsel %vm8366_vm9, %v8365_v41, %v8364_v12  ;;  %v6853_v54 = vsel %vm8369_vm11, %v8227_v18, %v8368_v30  ;;  %v6859_v36 = vsel %vm8371_vm10, %v8108_v14, %v8370_v48  ;;  %vm8373_vm9 = vcmp.gt.f32.partialorder %v8228_v37, 0.0  ;;  %v8374_v41 = vld [vmem:[#allocation143_spill] sm:$0xff]  ;;  %v8375_v34 = vld [vmem:[#allocation60_spill] sm:$0xff]  ;;  %v8378_v18 = vld [vmem:[#allocation61_spill] sm:$0xff] }
 0x3f3   : > { %8367 = vst [vmem:[#allocation13_spill] sm:$0xff] %v6845_v42  ;;  %v6865_v12 = vsel %vm8373_vm9, %v8228_v37, %v8372_v3  ;;  %vm8376_vm12 = vcmp.gt.f32.partialorder %v8375_v34, 0.0  ;;  %v6877_v30 = vsel %vm2537_vm14, %v8115_v28, %v8378_v18  ;;  %v8379_v14 = vld [vmem:[#allocation144_spill] sm:$0xff]  ;;  %vm8380_vm11 = vcmp.gt.f32.partialorder %v8239_v22, 0.0  ;;  %v8381_v37 = vld [vmem:[#allocation145_spill] sm:$0xff]  ;;  %v8386_v28 = vld [vmem:[#allocation6_spill] sm:$0xff] }
 0x3f4   : > { %v6871_v42 = vsel %vm8376_vm12, %v8375_v34, %v8374_v41  ;;  %v6883_v48 = vsel %vm8380_vm11, %v8239_v22, %v8379_v14  ;;  %vm8382_vm10 = vcmp.gt.f32.partialorder %v8240_v20, 0.0  ;;  %v8383_v41 = vld [vmem:[#allocation146_spill] sm:$0xff]  ;;  %v8384_v34 = vld [vmem:[#allocation63_spill] sm:$0xff]  ;;  %v6901_v18 = vsel %vm2541_vm13, %v8127_v55, %v8386_v28  ;;  %v8393_v55 = vld [vmem:[#allocation8_spill] sm:$0xff] }
 0x3f5   : > { %8377 = vst [vmem:[#allocation122_spill] sm:$0xff] %v6871_v42  ;;  %v6889_v3 = vsel %vm8382_vm10, %v8240_v20, %v8381_v37  ;;  %vm8385_vm12 = vcmp.gt.f32.partialorder %v8384_v34, 0.0  ;;  %v8387_v22 = vld [vmem:[#allocation147_spill] sm:$0xff]  ;;  %vm8388_vm14 = vcmp.gt.f32.partialorder %v8250_v50, 0.0  ;;  %v8389_v20 = vld [vmem:[#allocation148_spill] sm:$0xff]  ;;  %vm8390_vm9 = vcmp.gt.f32.partialorder %v8251_v47, 0.0 }
 0x3f6   : > { %v6895_v42 = vsel %vm8385_vm12, %v8384_v34, %v8383_v41  ;;  %v6907_v14 = vsel %vm8388_vm14, %v8250_v50, %v8387_v22  ;;  %v6913_v37 = vsel %vm8390_vm9, %v8251_v47, %v8389_v20  ;;  %v8391_v41 = vld [vmem:[#allocation65_spill] sm:$0xff]  ;;  %vm8392_vm11 = vcmp.gt.f32.partialorder %v8135_v31, 0.0 }
 0x3f7   : > { %v6919_v34 = vsel %vm8392_vm11, %v8135_v31, %v8391_v41  ;;  %v6925_v28 = vsel %vm2545_vm0, %v8137_v38, %v8393_v55  ;;  %v8394_v50 = vld [vmem:[#allocation149_spill] sm:$0xff]  ;;  %vm8395_vm13 = vcmp.gt.f32.partialorder %v8260_v51, 0.0  ;;  %vm8397_vm10 = vcmp.gt.f32.partialorder %v8143_v62, 0.0  ;;  %v8398_v31 = vld [vmem:[#allocation67_spill] sm:$0xff]  ;;  %v8400_v38 = vld [vmem:[#allocation150_spill] sm:$0xff] }
 0x3f8   : > { %v6931_v22 = vsel %vm8395_vm13, %v8260_v51, %v8394_v50  ;;  %v8396_v47 = vld [vmem:[#allocation9_spill] sm:$0xff]  ;;  %vm8399_vm12 = vcmp.gt.f32.partialorder %v8145_v24, 0.0  ;;  %v6949_v55 = vsel %vm2549_vm1, %v8271_v57, %v8400_v38  ;;  %v8401_v51 = vld [vmem:[#allocation68_spill] sm:$0xff]  ;;  %vm8402_vm0 = vcmp.gt.f32.partialorder %v8151_v26, 0.0 }
 0x3f9   : > { %v6937_v20 = vsel %vm8397_vm10, %v8143_v62, %v8396_v47  ;;  %v6943_v41 = vsel %vm8399_vm12, %v8145_v24, %v8398_v31  ;;  %v6955_v50 = vsel %vm8402_vm0, %v8151_v26, %v8401_v51  ;;  %v8403_v62 = vld [vmem:[#allocation151_spill] sm:$0xff]  ;;  %vm8404_vm14 = vcmp.gt.f32.partialorder %v8272_v9, 0.0  ;;  %v8405_v24 = vld [vmem:[#allocation152_spill] sm:$0xff]  ;;  %v8408_v26 = vld [vmem:[#allocation154_spill] sm:$0xff] }
 0x3fa   : > { %v6961_v47 = vsel %vm8404_vm14, %v8272_v9, %v8403_v62  ;;  %vm8406_vm9 = vcmp.gt.f32.partialorder %v8273_v39, 0.0  ;;  %v8407_v57 = vld [vmem:[#allocation12_spill] sm:$0xff]  ;;  %vm8409_vm1 = vcmp.gt.f32.partialorder %v8283_v63, 0.0  ;;  %v8410_v9 = vld [vmem:[#allocation155_spill] sm:$0xff]  ;;  %vm8411_vm11 = vcmp.gt.f32.partialorder %v8284_v25, 0.0 }
 0x3fb   : > { %v6967_v31 = vsel %vm8406_vm9, %v8273_v39, %v8405_v24  ;;  %v6973_v38 = vsel %vm2553_vm2, %v8158_v27, %v8407_v57  ;;  %v6979_v51 = vsel %vm8409_vm1, %v8283_v63, %v8408_v26  ;;  %v6985_v62 = vsel %vm8411_vm11, %v8284_v25, %v8410_v9  ;;  %v8412_v39 = vld [vmem:[#allocation85_spill] sm:$0xff]  ;;  %v8414_v27 = vld [vmem:[#allocation156_spill] sm:$0xff]  ;;  %v8417_v25 = vld [vmem:[#allocation86_spill] sm:$0xff] }
 0x3fc   : > { %vm8413_vm13 = vcmp.gt.f32.partialorder %v8166_v43, 0.0  ;;  %v6997_v57 = vsel %vm2557_vm3, %v8296_v4, %v8414_v27  ;;  %v8415_v63 = vld [vmem:[#allocation157_spill] sm:$0xff]  ;;  %vm8416_vm2 = vcmp.gt.f32.partialorder %v8297_v52, 0.0  ;;  %vm8418_vm10 = vcmp.gt.f32.partialorder %v8174_v59, 0.0  ;;  %v8421_v4 = vld [vmem:[#allocation159_spill] sm:$0xff] }
 0x3fd   : > { %v6991_v24 = vsel %vm8413_vm13, %v8166_v43, %v8412_v39  ;;  %v7003_v26 = vsel %vm8416_vm2, %v8297_v52, %v8415_v63  ;;  %v7009_v9 = vsel %vm8418_vm10, %v8174_v59, %v8417_v25  ;;  %v8419_v43 = vld [vmem:[#allocation158_spill] sm:$0xff]  ;;  %vm8420_vm12 = vcmp.gt.f32.partialorder %v8298_v29, 0.0  ;;  %v8422_v52 = vld [vmem:[#allocation88_spill] sm:$0xff] }
 0x3fe   : > { %v7015_v39 = vsel %vm8420_vm12, %v8298_v29, %v8419_v43  ;;  %v7021_v27 = vsel %vm2561_vm4, %v8310_v10, %v8421_v4  ;;  %vm8423_vm3 = vcmp.gt.f32.partialorder %v8182_v19, 0.0  ;;  %v8424_v59 = vld [vmem:[#allocation160_spill] sm:$0xff]  ;;  %vm8425_vm0 = vcmp.gt.f32.partialorder %v8311_v35, 0.0  ;;  %v8427_v29 = vld [vmem:[#allocation161_spill] sm:$0xff]  ;;  %v8430_v10 = vld [vmem:[#allocation162_spill] sm:$0xff] }
 0x3ff   : > { %v7027_v63 = vsel %vm8423_vm3, %v8182_v19, %v8422_v52  ;;  %v7033_v25 = vsel %vm8425_vm0, %v8311_v35, %v8424_v59  ;;  %vm8428_vm14 = vcmp.gt.f32.partialorder %v8312_v15, 0.0  ;;  %v7045_v4 = vsel %vm2565_vm5, %v8324_v16, %v8430_v10  ;;  %v8432_v19 = vld [vmem:[#allocation163_spill] sm:$0xff]  ;;  %v8435_v35 = vld [vmem:[#allocation164_spill] sm:$0xff]  ;;  %v8441_v16 = vld [vmem:[#allocation165_spill] sm:$0xff] }
 0x400   : > { %8426 = vst [vmem:[#allocation43_spill] sm:$0xff] %v7033_v25  ;;  %v7039_v43 = vsel %vm8428_vm14, %v8312_v15, %v8427_v29  ;;  %8431 = vst [vmem:[#allocation44_spill] sm:$0xff] %v7045_v4  ;;  %vm8433_vm4 = vcmp.gt.f32.partialorder %v8325_v7, 0.0  ;;  %vm8436_vm9 = vcmp.gt.f32.partialorder %v8326_v11, 0.0  ;;  %v8438_v15 = vld [vmem:[#allocation74_spill] sm:$0xff]  ;;  %vm8439_vm1 = vcmp.gt.f32.partialorder %v8199_v45, 0.0 }
 0x401   : > { %8429 = vst [vmem:[#allocation124_spill] sm:$0xff] %v7039_v43  ;;  %v7051_v52 = vsel %vm8433_vm4, %v8325_v7, %v8432_v19  ;;  %v7057_v59 = vsel %vm8436_vm9, %v8326_v11, %v8435_v35  ;;  %v7063_v29 = vsel %vm8439_vm1, %v8199_v45, %v8438_v15  ;;  %v7069_v10 = vsel %vm2569_vm6, %v8340_v40, %v8441_v16  ;;  %v8443_v7 = vld [vmem:[#allocation166_spill] sm:$0xff]  ;;  %v8446_v11 = vld [vmem:[#allocation93_spill] sm:$0xff]  ;;  %v8449_v45 = vld [vmem:[#allocation76_spill] sm:$0xff] }
 0x402   : > { %8434 = vst [vmem:[#allocation14_spill] sm:$0xff] %v7051_v52  ;;  %8437 = vst [vmem:[#allocation71_spill] sm:$0xff] %v7057_v59  ;;  %vm8444_vm5 = vcmp.gt.f32.partialorder %v8341_v1, 0.0  ;;  %vm8447_vm11 = vcmp.gt.f32.partialorder %v8209_v32, 0.0  ;;  %vm8450_vm13 = vcmp.gt.f32.partialorder %v8211_v44, 0.0  ;;  %v8452_v40 = vld [vmem:[#allocation167_spill] sm:$0xff] }
 0x403   : > { %8440 = vst [vmem:[#allocation15_spill] sm:$0xff] %v7063_v29  ;;  %8442 = vst [vmem:[#allocation125_spill] sm:$0xff] %v7069_v10  ;;  %v7075_v19 = vsel %vm8444_vm5, %v8341_v1, %v8443_v7  ;;  %v7081_v35 = vsel %vm8447_vm11, %v8209_v32, %v8446_v11  ;;  %v7087_v15 = vsel %vm8450_vm13, %v8211_v44, %v8449_v45  ;;  %v8454_v1 = vld [vmem:[#allocation83_spill] sm:$0xff]  ;;  %v8456_v32 = vld [vmem:[#allocation77_spill] sm:$0xff]  ;;  %vm8457_vm6 = vcmp.gt.f32.partialorder %v8221_v2, 0.0 }
 0x404   : > { %8445 = vst [vmem:[#allocation45_spill] sm:$0xff] %v7075_v19  ;;  %8448 = vst [vmem:[#allocation127_spill] sm:$0xff] %v7081_v35  ;;  %v7093_v16 = vsel %vm2573_vm7, %v8356_v13, %v8452_v40  ;;  %v7099_v7 = vsel %vm2574_vm15, %v8219_v8, %v8454_v1  ;;  %v7105_v11 = vsel %vm8457_vm6, %v8221_v2, %v8456_v32  ;;  %v8459_v44 = vld [vmem:[#allocation95_spill] sm:$0xff]  ;;  %vm8460_vm2 = vcmp.gt.f32.partialorder %v8223_v61, 0.0  ;;  %v8462_v13 = vld [vmem:[#allocation33_spill] sm:$0xff] }
 0x405   : > { %8451 = vst [vmem:[#allocation46_spill] sm:$0xff] %v7087_v15  ;;  %8453 = vst [vmem:[#allocation87_spill] sm:$0xff] %v7093_v16  ;;  %v7111_v45 = vsel %vm8460_vm2, %v8223_v61, %v8459_v44  ;;  %v7117_v40 = vsel %vm2577_vm8, %v8230_v56, %v8462_v13  ;;  %v8464_v8 = vld [vmem:[#allocation57_spill] sm:$0xff]  ;;  %vm8465_vm15 = vcmp.gt.f32.partialorder %v8232_v21, 0.0  ;;  %v8467_v2 = vld [vmem:[#allocation79_spill] sm:$0xff] }
 0x406   : > { %8455 = vst [vmem:[#allocation89_spill] sm:$0xff] %v7099_v7  ;;  %8458 = vst [vmem:[#allocation72_spill] sm:$0xff] %v7105_v11  ;;  %v7123_v1 = vsel %vm8465_vm15, %v8232_v21, %v8464_v8  ;;  %v8468_v32 = vld [vmem:[#allocation18_spill] sm:$0xff]  ;;  %v8469_v7 = vld [vmem:[#allocation80_spill] sm:$0xff] }
 0x407   : > { %8461 = vst [vmem:[#allocation129_spill] sm:$0xff] %v7111_v45  ;;  %8463 = vst [vmem:[#allocation47_spill] sm:$0xff] %v7117_v40  ;;  %v3583_v11 = vpack.c.bf16 %v8468_v32, %v8467_v2  ;;  %v8470_v16 = vld [vmem:[#allocation19_spill] sm:$0xff]  ;;  %v8471_v61 = vld [vmem:[#allocation21_spill] sm:$0xff] }
 0x408   : > { %8466 = vst [vmem:[#allocation130_spill] sm:$0xff] %v7123_v1  ;;  %v3584_v15 = vpack.c.bf16 %v8470_v16, %v8469_v7  ;;  %v8472_v44 = vld [vmem:[#allocation25_spill] sm:$0xff]  ;;  %v8474_v19 = vld [vmem:[#allocation99_spill] sm:$0xff]  ;;  %v8477_v29 = vld [vmem:[#allocation106_spill] sm:$0xff] }
 0x409   : > { %v3585_v45 = vpack.c.bf16 %v8472_v44, %v8471_v61  ;;  %v8473_v35 = vld [vmem:[#allocation97_spill] sm:$0xff]  ;;  %v8476_v13 = vld [vmem:[#allocation103_spill] sm:$0xff]  ;;  %v8478_v59 = vld [vmem:[#allocation108_spill] sm:$0xff]  ;;  %3219 = vst [vmem:[%s7459_s4] sm:$0xff] %v3583_v11 }
 0x40a   : > { %v3586_v10 = vpack.c.bf16 %v8474_v19, %v8473_v35  ;;  %v8475_v56 = vld [vmem:[#allocation101_spill] sm:$0xff]  ;;  %v3588_v52 = vpack.c.bf16 %v8478_v59, %v8477_v29  ;;  %v8479_v21 = vld [vmem:[#allocation111_spill] sm:$0xff]  ;;  %v8481_v4 = vld [vmem:[#allocation116_spill] sm:$0xff]  ;;  %3220 = vst [vmem:[%s7459_s4 + $0x8] sm:$0xff] %v3584_v15 }
 0x40b   : > { %v3587_v40 = vpack.c.bf16 %v8476_v13, %v8475_v56  ;;  %v8480_v8 = vld [vmem:[#allocation113_spill] sm:$0xff]  ;;  %v8482_v2 = vld [vmem:[#allocation118_spill] sm:$0xff]  ;;  %v8484_v16 = vld [vmem:[#allocation123_spill] sm:$0xff]  ;;  %3221 = vst [vmem:[%s7459_s4 + $0x10] sm:$0xff] %v3585_v45 }
 0x40c   : > { %v3589_v1 = vpack.c.bf16 %v8480_v8, %v8479_v21  ;;  %v3590_v32 = vpack.c.bf16 %v8482_v2, %v8481_v4  ;;  %v8483_v43 = vld [vmem:[#allocation121_spill] sm:$0xff]  ;;  %v8485_v25 = vld [vmem:[#allocation126_spill] sm:$0xff]  ;;  %v8486_v61 = vld [vmem:[#allocation128_spill] sm:$0xff]  ;;  %3222 = vst [vmem:[%s7459_s4 + $0x18] sm:$0xff] %v3586_v10 }
 0x40d   : > { %v3591_v7 = vpack.c.bf16 %v8484_v16, %v8483_v43  ;;  %v3592_v44 = vpack.c.bf16 %v8486_v61, %v8485_v25  ;;  %v8487_v59 = vld [vmem:[#allocation20_spill] sm:$0xff]  ;;  %v8488_v29 = vld [vmem:[#allocation22_spill] sm:$0xff]  ;;  %v8489_v35 = vld [vmem:[#allocation23_spill] sm:$0xff]  ;;  %3223 = vst [vmem:[%s7459_s4 + $0x20] sm:$0xff] %v3587_v40 }
 0x40e   : > { %v3593_v19 = vpack.c.bf16 %v8488_v29, %v8487_v59  ;;  %v8490_v56 = vld [vmem:[#allocation24_spill] sm:$0xff]  ;;  %v8492_v21 = vld [vmem:[#allocation141_spill] sm:$0xff]  ;;  %v8493_v8 = vld [vmem:[#allocation26_spill] sm:$0xff]  ;;  %3224 = vst [vmem:[%s7459_s4 + $0x28] sm:$0xff] %v3588_v52 }
 0x40f   : > { %v3594_v4 = vpack.c.bf16 %v8490_v56, %v8489_v35  ;;  %v8491_v13 = vld [vmem:[#allocation96_spill] sm:$0xff]  ;;  %v8494_v2 = vld [vmem:[#allocation27_spill] sm:$0xff]  ;;  %v8495_v15 = vld [vmem:[#allocation98_spill] sm:$0xff]  ;;  %3225 = vst [vmem:[%s7459_s4 + $0x30] sm:$0xff] %v3589_v1 }
 0x410   : > { %v3595_v43 = vpack.c.bf16 %v8492_v21, %v8491_v13  ;;  %v3596_v25 = vpack.c.bf16 %v8494_v2, %v8493_v8  ;;  %v8496_v11 = vld [vmem:[#allocation28_spill] sm:$0xff]  ;;  %v8498_v59 = vld [vmem:[#allocation153_spill] sm:$0xff]  ;;  %v8500_v45 = vld [vmem:[#allocation30_spill] sm:$0xff]  ;;  %3226 = vst [vmem:[%s7459_s4 + $0x38] sm:$0xff] %v3590_v32  ;;  %v3604_v32 = vpack.c.bf16 %v6581_v6, %v6575_v49  ;;  %v3606_v49 = vpack.c.bf16 %v6609_v33, %v6603_v46 }
 0x411   : > { %v3597_v16 = vpack.c.bf16 %v8496_v11, %v8495_v15  ;;  %v8497_v61 = vld [vmem:[#allocation100_spill] sm:$0xff]  ;;  %v8499_v35 = vld [vmem:[#allocation29_spill] sm:$0xff]  ;;  %v8501_v13 = vld [vmem:[#allocation102_spill] sm:$0xff]  ;;  %3227 = vst [vmem:[%s7459_s4 + $0x40] sm:$0xff] %v3591_v7 }
 0x412   : > { %v3598_v29 = vpack.c.bf16 %v8498_v59, %v8497_v61  ;;  %v3599_v56 = vpack.c.bf16 %v8500_v45, %v8499_v35  ;;  %v8502_v21 = vld [vmem:[#allocation31_spill] sm:$0xff]  ;;  %3228 = vst [vmem:[%s7459_s4 + $0x48] sm:$0xff] %v3592_v44  ;;  %v8503_v52 = vld [vmem:[#allocation104_spill] sm:$0xff]  ;;  %v8505_v2 = vld [vmem:[#allocation105_spill] sm:$0xff] }
 0x413   : > { %v3600_v10 = vpack.c.bf16 %v8502_v21, %v8501_v13  ;;  %v8504_v40 = vld [vmem:[#allocation32_spill] sm:$0xff]  ;;  %v8506_v15 = vld [vmem:[#allocation78_spill] sm:$0xff]  ;;  %v8507_v61 = vld [vmem:[#allocation59_spill] sm:$0xff]  ;;  %3229 = vst [vmem:[%s7459_s4 + $0x50] sm:$0xff] %v3593_v19 }
 0x414   : > { %v3601_v8 = vpack.c.bf16 %v8504_v40, %v8503_v52  ;;  %v3602_v11 = vpack.c.bf16 %v8506_v15, %v8505_v2  ;;  %v8508_v1 = vld [vmem:[#allocation16_spill] sm:$0xff]  ;;  %3230 = vst [vmem:[%s7459_s4 + $0x58] sm:$0xff] %v3594_v4  ;;  %3231 = vst [vmem:[%s7459_s4 + $0x60] sm:$0xff] %v3595_v43  ;;  %v8509_v7 = vld [vmem:[#allocation17_spill] sm:$0xff] }
 0x415   : > { %v3603_v59 = vpack.c.bf16 %v8508_v1, %v8507_v61  ;;  %3232 = vst [vmem:[%s7459_s4 + $0x68] sm:$0xff] %v3596_v25  ;;  %v8510_v44 = vld [vmem:[#allocation107_spill] sm:$0xff]  ;;  %v8511_v6 = vld [vmem:[#allocation34_spill] sm:$0xff]  ;;  %3233 = vst [vmem:[%s7459_s4 + $0x70] sm:$0xff] %v3597_v16 }
 0x416   : > { %v3605_v35 = vpack.c.bf16 %v8510_v44, %v8509_v7  ;;  %v3607_v19 = vpack.c.bf16 %v8511_v6, %v6615_v23  ;;  %v8512_v45 = vld [vmem:[#allocation62_spill] sm:$0xff]  ;;  %3234 = vst [vmem:[%s7459_s4 + $0x78] sm:$0xff] %v3598_v29  ;;  %3235 = vst [vmem:[%s7459_s4 + $0x80] sm:$0xff] %v3599_v56  ;;  %v8513_v46 = vld [vmem:[#allocation5_spill] sm:$0xff] }
 0x417   : > { %v3608_v4 = vpack.c.bf16 %v8512_v45, %v6631_v53  ;;  %3236 = vst [vmem:[%s7459_s4 + $0x88] sm:$0xff] %v3600_v10  ;;  %v8514_v33 = vld [vmem:[#allocation109_spill] sm:$0xff]  ;;  %v3610_v53 = vpack.c.bf16 %v6665_v60, %v6659_v58  ;;  %v8515_v43 = vld [vmem:[#allocation35_spill] sm:$0xff]  ;;  %v8516_v25 = vld [vmem:[#allocation110_spill] sm:$0xff] }
 0x418   : > { %v3609_v23 = vpack.c.bf16 %v8514_v33, %v8513_v46  ;;  %v3611_v16 = vpack.c.bf16 %v8516_v25, %v8515_v43  ;;  %v8517_v13 = vld [vmem:[#allocation36_spill] sm:$0xff]  ;;  %3237 = vst [vmem:[%s7459_s4 + $0x90] sm:$0xff] %v3601_v8  ;;  %3238 = vst [vmem:[%s7459_s4 + $0x98] sm:$0xff] %v3602_v11  ;;  %v8519_v58 = vld [vmem:[#allocation7_spill] sm:$0xff] }
 0x419   : > { %v8518_v21 = vld [vmem:[#allocation64_spill] sm:$0xff]  ;;  %3239 = vst [vmem:[%s7459_s4 + $0xa0] sm:$0xff] %v3603_v59  ;;  %3240 = vst [vmem:[%s7459_s4 + $0xa8] sm:$0xff] %v3604_v32  ;;  %v8521_v10 = vld [vmem:[#allocation37_spill] sm:$0xff] }
 0x41a   : > { %v3612_v29 = vpack.c.bf16 %v8518_v21, %v8517_v13  ;;  %v8520_v60 = vld [vmem:[#allocation112_spill] sm:$0xff]  ;;  %v8522_v52 = vld [vmem:[#allocation114_spill] sm:$0xff]  ;;  %v8525_v61 = vld [vmem:[#allocation115_spill] sm:$0xff]  ;;  %3241 = vst [vmem:[%s7459_s4 + $0xb0] sm:$0xff] %v3605_v35  ;;  %v3622_v21 = vpack.c.bf16 %v6833_v17, %v6827_v5  ;;  %v3626_v17 = vpack.c.bf16 %v6883_v48, %v6877_v30  ;;  %v3631_v30 = vpack.c.bf16 %v6943_v41, %v6937_v20 }
 0x41b   : > { %v3613_v56 = vpack.c.bf16 %v8520_v60, %v8519_v58  ;;  %v3614_v40 = vpack.c.bf16 %v8522_v52, %v8521_v10  ;;  %v8523_v2 = vld [vmem:[#allocation38_spill] sm:$0xff]  ;;  %v8526_v1 = vld [vmem:[#allocation39_spill] sm:$0xff]  ;;  %3242 = vst [vmem:[%s7459_s4 + $0xb8] sm:$0xff] %v3606_v49  ;;  %3243 = vst [vmem:[%s7459_s4 + $0xc0] sm:$0xff] %v3607_v19  ;;  %v3632_v48 = vpack.c.bf16 %v6955_v50, %v6949_v55 }
 0x41c   : > { %v8524_v8 = vld [vmem:[#allocation66_spill] sm:$0xff]  ;;  %v3616_v11 = vpack.c.bf16 %v8526_v1, %v8525_v61  ;;  %3244 = vst [vmem:[%s7459_s4 + $0xc8] sm:$0xff] %v3608_v4  ;;  %v8527_v59 = vld [vmem:[#allocation117_spill] sm:$0xff]  ;;  %v8528_v32 = vld [vmem:[#allocation40_spill] sm:$0xff] }
 0x41d   : > { %v3615_v15 = vpack.c.bf16 %v8524_v8, %v8523_v2  ;;  %v3617_v7 = vpack.c.bf16 %v8528_v32, %v8527_v59  ;;  %v8529_v44 = vld [vmem:[#allocation10_spill] sm:$0xff]  ;;  %v8530_v6 = vld [vmem:[#allocation11_spill] sm:$0xff]  ;;  %v8531_v46 = vld [vmem:[#allocation69_spill] sm:$0xff]  ;;  %3245 = vst [vmem:[%s7459_s4 + $0xd0] sm:$0xff] %v3609_v23 }
 0x41e   : > { %v3618_v45 = vpack.c.bf16 %v8530_v6, %v8529_v44  ;;  %v8532_v35 = vld [vmem:[#allocation119_spill] sm:$0xff]  ;;  %v8533_v43 = vld [vmem:[#allocation41_spill] sm:$0xff]  ;;  %v8534_v25 = vld [vmem:[#allocation120_spill] sm:$0xff]  ;;  %3246 = vst [vmem:[%s7459_s4 + $0xd8] sm:$0xff] %v3610_v53  ;;  %v3624_v53 = vpack.c.bf16 %v6859_v36, %v6853_v54  ;;  %v3627_v54 = vpack.c.bf16 %v6895_v42, %v6889_v3  ;;  %v3628_v36 = vpack.c.bf16 %v6907_v14, %v6901_v18 }
 0x41f   : > { %v3619_v33 = vpack.c.bf16 %v8532_v35, %v8531_v46  ;;  %v3620_v49 = vpack.c.bf16 %v8534_v25, %v8533_v43  ;;  %3247 = vst [vmem:[%s7459_s4 + $0xe0] sm:$0xff] %v3611_v16  ;;  %3248 = vst [vmem:[%s7459_s4 + $0xe8] sm:$0xff] %v3612_v29  ;;  %v8535_v19 = vld [vmem:[#allocation42_spill] sm:$0xff]  ;;  %v8537_v23 = vld [vmem:[#allocation13_spill] sm:$0xff]  ;;  %v3629_v42 = vpack.c.bf16 %v6919_v34, %v6913_v37 }
 0x420   : > { %v8536_v4 = vld [vmem:[#allocation70_spill] sm:$0xff]  ;;  %v3623_v58 = vpack.c.bf16 %v8537_v23, %v6839_v0  ;;  %3249 = vst [vmem:[%s7459_s4 + $0xf0] sm:$0xff] %v3613_v56  ;;  %3250 = vst [vmem:[%s7459_s4 + $0xf8] sm:$0xff] %v3614_v40  ;;  %v3633_v3 = vpack.c.bf16 %v6967_v31, %v6961_v47  ;;  %v3634_v18 = vpack.c.bf16 %v6979_v51, %v6973_v38  ;;  %v8540_v20 = vld [vmem:[#allocation124_spill] sm:$0xff] }
 0x421   : > { %v3621_v13 = vpack.c.bf16 %v8536_v4, %v8535_v19  ;;  %3251 = vst [vmem:[%s7459_s4 + $0x100] sm:$0xff] %v3615_v15  ;;  %3252 = vst [vmem:[%s7459_s4 + $0x108] sm:$0xff] %v3616_v11  ;;  %v8538_v0 = vld [vmem:[#allocation122_spill] sm:$0xff]  ;;  %v3635_v14 = vpack.c.bf16 %v6991_v24, %v6985_v62  ;;  %v3636_v37 = vpack.c.bf16 %v7003_v26, %v6997_v57  ;;  %v8541_v55 = vld [vmem:[#allocation44_spill] sm:$0xff] }
 0x422   : > { %v3625_v5 = vpack.c.bf16 %v8538_v0, %v6865_v12  ;;  %3253 = vst [vmem:[%s7459_s4 + $0x110] sm:$0xff] %v3617_v7  ;;  %3254 = vst [vmem:[%s7459_s4 + $0x118] sm:$0xff] %v3618_v45  ;;  %v3630_v12 = vpack.c.bf16 %v6931_v22, %v6925_v28  ;;  %v3637_v34 = vpack.c.bf16 %v7015_v39, %v7009_v9  ;;  %v8539_v22 = vld [vmem:[#allocation43_spill] sm:$0xff]  ;;  %v8542_v50 = vld [vmem:[#allocation14_spill] sm:$0xff] }
 0x423   : > { %3255 = vst [vmem:[%s7459_s4 + $0x120] sm:$0xff] %v3619_v33  ;;  %3256 = vst [vmem:[%s7459_s4 + $0x128] sm:$0xff] %v3620_v49  ;;  %v3638_v28 = vpack.c.bf16 %v7027_v63, %v7021_v27  ;;  %v3639_v41 = vpack.c.bf16 %v8540_v20, %v8539_v22  ;;  %v3640_v47 = vpack.c.bf16 %v8542_v50, %v8541_v55  ;;  %v8543_v31 = vld [vmem:[#allocation71_spill] sm:$0xff]  ;;  %v8545_v62 = vld [vmem:[#allocation125_spill] sm:$0xff] }
 0x424   : > { %3257 = vst [vmem:[%s7459_s4 + $0x130] sm:$0xff] %v3621_v13  ;;  %3258 = vst [vmem:[%s7459_s4 + $0x138] sm:$0xff] %v3622_v21  ;;  %v8544_v38 = vld [vmem:[#allocation15_spill] sm:$0xff]  ;;  %v8546_v24 = vld [vmem:[#allocation45_spill] sm:$0xff] }
 0x425   : > { %3259 = vst [vmem:[%s7459_s4 + $0x140] sm:$0xff] %v3623_v58  ;;  %3260 = vst [vmem:[%s7459_s4 + $0x148] sm:$0xff] %v3624_v53  ;;  %v3641_v51 = vpack.c.bf16 %v8544_v38, %v8543_v31  ;;  %v3642_v57 = vpack.c.bf16 %v8546_v24, %v8545_v62  ;;  %v8547_v26 = vld [vmem:[#allocation127_spill] sm:$0xff]  ;;  %v8548_v9 = vld [vmem:[#allocation46_spill] sm:$0xff] }
 0x426   : > { %3261 = vst [vmem:[%s7459_s4 + $0x150] sm:$0xff] %v3625_v5  ;;  %3262 = vst [vmem:[%s7459_s4 + $0x158] sm:$0xff] %v3626_v17  ;;  %v3643_v39 = vpack.c.bf16 %v8548_v9, %v8547_v26  ;;  %v8549_v27 = vld [vmem:[#allocation87_spill] sm:$0xff]  ;;  %v8550_v63 = vld [vmem:[#allocation89_spill] sm:$0xff] }
 0x427   : > { %3263 = vst [vmem:[%s7459_s4 + $0x160] sm:$0xff] %v3627_v54  ;;  %3264 = vst [vmem:[%s7459_s4 + $0x168] sm:$0xff] %v3628_v36  ;;  %v3644_v16 = vpack.c.bf16 %v8550_v63, %v8549_v27  ;;  %v8551_v29 = vld [vmem:[#allocation72_spill] sm:$0xff]  ;;  %v8552_v60 = vld [vmem:[#allocation129_spill] sm:$0xff] }
 0x428   : > { %3265 = vst [vmem:[%s7459_s4 + $0x170] sm:$0xff] %v3629_v42  ;;  %3266 = vst [vmem:[%s7459_s4 + $0x178] sm:$0xff] %v3630_v12  ;;  %v3645_v56 = vpack.c.bf16 %v8552_v60, %v8551_v29  ;;  %v8553_v10 = vld [vmem:[#allocation47_spill] sm:$0xff]  ;;  %v8554_v52 = vld [vmem:[#allocation130_spill] sm:$0xff] }
 0x429   : > { %3267 = vst [vmem:[%s7459_s4 + $0x180] sm:$0xff] %v3631_v30  ;;  %3268 = vst [vmem:[%s7459_s4 + $0x188] sm:$0xff] %v3632_v48  ;;  %v3646_v40 = vpack.c.bf16 %v8554_v52, %v8553_v10 }
 0x42a   : > { %3269 = vst [vmem:[%s7459_s4 + $0x190] sm:$0xff] %v3633_v3  ;;  %3270 = vst [vmem:[%s7459_s4 + $0x198] sm:$0xff] %v3634_v18 }
 0x42b   : > { %3271 = vst [vmem:[%s7459_s4 + $0x1a0] sm:$0xff] %v3635_v14  ;;  %3272 = vst [vmem:[%s7459_s4 + $0x1a8] sm:$0xff] %v3636_v37 }
 0x42c   : > { %3273 = vst [vmem:[%s7459_s4 + $0x1b0] sm:$0xff] %v3637_v34  ;;  %3274 = vst [vmem:[%s7459_s4 + $0x1b8] sm:$0xff] %v3638_v28 }
 0x42d   : > { %3275 = vst [vmem:[%s7459_s4 + $0x1c0] sm:$0xff] %v3639_v41  ;;  %3276 = vst [vmem:[%s7459_s4 + $0x1c8] sm:$0xff] %v3640_v47 }
 0x42e   : > { %3277 = vst [vmem:[%s7459_s4 + $0x1d0] sm:$0xff] %v3641_v51  ;;  %3278 = vst [vmem:[%s7459_s4 + $0x1d8] sm:$0xff] %v3642_v57 }
 0x42f   : > { %3279 = vst [vmem:[%s7459_s4 + $0x1e0] sm:$0xff] %v3643_v39  ;;  %3280 = vst [vmem:[%s7459_s4 + $0x1e8] sm:$0xff] %v3644_v16 }
 0x430   : > { %3281 = vst [vmem:[%s7459_s4 + $0x1f0] sm:$0xff] %v3645_v56  ;;  %3282 = vst [vmem:[%s7459_s4 + $0x1f8] sm:$0xff] %v3646_v40 }
 0x431 PF: > { %p11_p10 = scmp.ge.s32.totalorder %s3754_s19, 6   ;;  %s8555_s15 = smov %s3702_s16 }
 0x432   : > { %s8556_s16 = smov %s3763_s22  ;;  %s8557_s17 = smov %s3754_s19 }
 0x433   :  { %13 = sbr.rel (!%p11_p10) target bundleno = 2 (0x2), region = 99 }

// kernel: discriminator_forward.6
= control target key start
LH: loop header
LB: loop body
LE: loop exit
PB: predicated region body
PF: predicated region fallthrough
CT: control target
= control target key end

     0   :  { %vm21_vm0 = vcmask 7168   ;;  %s3945_s0 = inlined_call_operand.vmem [shape: bf16[256,2048], index: 0, kind: input, shape index: {}]   ;;  %s3946_s1 = inlined_call_operand.vmem [shape: bf16[16,256], index: 1, kind: input, shape index: {}]   ;;  %s3947_s2 = inlined_call_operand.vmem [shape: f32[16,1], index: 2, kind: input, shape index: {}]   ;;  %s3948_s3 = inlined_call_operand.vmem [shape: f32[16,1], index: 3, kind: input, shape index: {}]   ;;  %s3949_s4 = inlined_call_operand.vmem [shape: bf16[1,16,2048], index: 4, kind: output, shape index: {}]  }
   0x1   :  { %v140_v0 = vld [vmem:[%s3945_s0 + $0x380] sm:$0xff]  ;;  %v141_v2 = vld [vmem:[%s3945_s0 + $0x388] sm:$0xff] }
   0x2   :  { %v148_v1 = vld [vmem:[%s3945_s0 + $0x3c0] sm:$0xff]  ;;  %v149_v4 = vld [vmem:[%s3945_s0 + $0x3c8] sm:$0xff] }
   0x3   :  { %v2636_v3 = vcombine.high %v140_v0, %v148_v1  ;;  %v2635_v5 = vcombine.low %v140_v0, %v148_v1  ;;  %v124_v6 = vld [vmem:[%s3945_s0 + $0x300] sm:$0xff]  ;;  %v2638_v8 = vcombine.high %v141_v2, %v149_v4  ;;  %v2637_v9 = vcombine.low %v141_v2, %v149_v4  ;;  %v125_v11 = vld [vmem:[%s3945_s0 + $0x308] sm:$0xff] }
   0x4   :  { %v132_v7 = vld [vmem:[%s3945_s0 + $0x340] sm:$0xff]  ;;  %v133_v12 = vld [vmem:[%s3945_s0 + $0x348] sm:$0xff] }
   0x5   :  { %v2620_v10 = vcombine.high %v124_v6, %v132_v7  ;;  %v108_v13 = vld [vmem:[%s3945_s0 + $0x280] sm:$0xff]  ;;  %1574 = vmatprep.subr.bf16.mxu0 %v2636_v3  ;;  %v2622_v14 = vcombine.high %v125_v11, %v133_v12  ;;  %v109_v16 = vld [vmem:[%s3945_s0 + $0x288] sm:$0xff]  ;;  %1617 = vmatprep.subr.bf16.mxu1 %v2638_v8  ;;  %v2619_v18 = vcombine.low %v124_v6, %v132_v7 }
   0x6   :  { %v116_v15 = vld [vmem:[%s3945_s0 + $0x2c0] sm:$0xff]  ;;  %v117_v17 = vld [vmem:[%s3945_s0 + $0x2c8] sm:$0xff]  ;;  %1575 = vmatpush1.bf16.msra.mxu0 %v2635_v5  ;;  %1618 = vmatpush1.bf16.msra.mxu1 %v2637_v9  ;;  %v2621_v19 = vcombine.low %v125_v11, %v133_v12 }
   0x7   :  { %1576 = vmatprep.subr.bf16.mxu0 %v2620_v10  ;;  %v2604_v20 = vcombine.high %v108_v13, %v116_v15  ;;  %1619 = vmatprep.subr.bf16.mxu1 %v2622_v14  ;;  %v2606_v21 = vcombine.high %v109_v16, %v117_v17  ;;  %v92_v22 = vld [vmem:[%s3945_s0 + $0x200] sm:$0xff]  ;;  %v93_v24 = vld [vmem:[%s3945_s0 + $0x208] sm:$0xff]  ;;  %v2603_v26 = vcombine.low %v108_v13, %v116_v15 }
   0x8   :  { %v100_v23 = vld [vmem:[%s3945_s0 + $0x240] sm:$0xff]  ;;  %v101_v25 = vld [vmem:[%s3945_s0 + $0x248] sm:$0xff]  ;;  %v2605_v27 = vcombine.low %v109_v16, %v117_v17 }
   0x9   :  { %v2588_v28 = vcombine.high %v92_v22, %v100_v23  ;;  %v2590_v29 = vcombine.high %v93_v24, %v101_v25  ;;  %v76_v30 = vld [vmem:[%s3945_s0 + $0x180] sm:$0xff]  ;;  %v77_v32 = vld [vmem:[%s3945_s0 + $0x188] sm:$0xff]  ;;  %v2587_v34 = vcombine.low %v92_v22, %v100_v23  ;;  %v2589_v35 = vcombine.low %v93_v24, %v101_v25 }
   0xa   :  { %1577 = vmatpush1.bf16.msra.mxu0 %v2619_v18  ;;  %1620 = vmatpush1.bf16.msra.mxu1 %v2621_v19  ;;  %v84_v31 = vld [vmem:[%s3945_s0 + $0x1c0] sm:$0xff]  ;;  %v85_v33 = vld [vmem:[%s3945_s0 + $0x1c8] sm:$0xff] }
   0xb   :  { %1578 = vmatprep.subr.bf16.mxu0 %v2604_v20  ;;  %1621 = vmatprep.subr.bf16.mxu1 %v2606_v21  ;;  %v2572_v36 = vcombine.high %v76_v30, %v84_v31  ;;  %v2574_v37 = vcombine.high %v77_v32, %v85_v33  ;;  %v60_v38 = vld [vmem:[%s3945_s0 + $0x100] sm:$0xff]  ;;  %v61_v40 = vld [vmem:[%s3945_s0 + $0x108] sm:$0xff]  ;;  %v2571_v42 = vcombine.low %v76_v30, %v84_v31 }
   0xc   :  { %v68_v39 = vld [vmem:[%s3945_s0 + $0x140] sm:$0xff]  ;;  %v69_v41 = vld [vmem:[%s3945_s0 + $0x148] sm:$0xff]  ;;  %v2573_v43 = vcombine.low %v77_v32, %v85_v33 }
   0xd   :  { %v2556_v44 = vcombine.high %v60_v38, %v68_v39  ;;  %v2558_v45 = vcombine.high %v61_v40, %v69_v41  ;;  %v44_v46 = vld [vmem:[%s3945_s0 + $0x80] sm:$0xff]  ;;  %v45_v48 = vld [vmem:[%s3945_s0 + $0x88] sm:$0xff]  ;;  %v2555_v50 = vcombine.low %v60_v38, %v68_v39  ;;  %v2557_v51 = vcombine.low %v61_v40, %v69_v41 }
   0xe   :  { %1579 = vmatpush1.bf16.msra.mxu0 %v2603_v26  ;;  %1622 = vmatpush1.bf16.msra.mxu1 %v2605_v27  ;;  %v52_v47 = vld [vmem:[%s3945_s0 + $0xc0] sm:$0xff]  ;;  %v53_v49 = vld [vmem:[%s3945_s0 + $0xc8] sm:$0xff] }
   0xf   :  { %1580 = vmatprep.subr.bf16.mxu0 %v2588_v28  ;;  %1623 = vmatprep.subr.bf16.mxu1 %v2590_v29  ;;  %v2540_v52 = vcombine.high %v44_v46, %v52_v47  ;;  %v2542_v53 = vcombine.high %v45_v48, %v53_v49  ;;  %v28_v54 = vld [vmem:[%s3945_s0] sm:$0xff]  ;;  %v29_v57 = vld [vmem:[%s3945_s0 + $0x8] sm:$0xff]  ;;  %v2539_v59 = vcombine.low %v44_v46, %v52_v47 }
  0x10   :  { %v36_v55 = vld [vmem:[%s3945_s0 + $0x40] sm:$0xff]  ;;  %v37_v58 = vld [vmem:[%s3945_s0 + $0x48] sm:$0xff]  ;;  %v2541_v60 = vcombine.low %v45_v48, %v53_v49 }
  0x11   :  { %v2976_v56 = vld [vmem:[%s3946_s1 + $0x4] ss:$8 sps:$4 sm:$0xff]   ;;  %v2524_v61 = vcombine.high %v28_v54, %v36_v55  ;;  %v2526_v62 = vcombine.high %v29_v57, %v37_v58  ;;  %v2523_v3 = vcombine.low %v28_v54, %v36_v55  ;;  %v2525_v4 = vcombine.low %v29_v57, %v37_v58 }
  0x12   :  { %1581 = vmatpush1.bf16.msra.mxu0 %v2587_v34  ;;  %1624 = vmatpush1.bf16.msra.mxu1 %v2589_v35  ;;  %v268_v63 = vld [vmem:[%s3945_s0 + $0x780] sm:$0xff]  ;;  %v269_v1 = vld [vmem:[%s3945_s0 + $0x788] sm:$0xff] }
  0x13   :  { %1582 = vmatprep.subr.bf16.mxu0 %v2572_v36  ;;  %1625 = vmatprep.subr.bf16.mxu1 %v2574_v37  ;;  %v276_v0 = vld [vmem:[%s3945_s0 + $0x7c0] sm:$0xff]  ;;  %v277_v2 = vld [vmem:[%s3945_s0 + $0x7c8] sm:$0xff] }
  0x14   :  { %1606 = vmatprep.mubr.bf16.mxu0 %v2976_v56  ;;  %1649 = vmatprep.mubr.bf16.mxu1 %v2976_v56  ;;  %v2764_v5 = vcombine.high %v268_v63, %v276_v0  ;;  %v2766_v6 = vcombine.high %v269_v1, %v277_v2  ;;  %v252_v7 = vld [vmem:[%s3945_s0 + $0x700] sm:$0xff]  ;;  %v253_v9 = vld [vmem:[%s3945_s0 + $0x708] sm:$0xff]  ;;  %v2763_v11 = vcombine.low %v268_v63, %v276_v0  ;;  %v142_v0 = vld [vmem:[%s3945_s0 + $0x390] sm:$0xff] }
  0x15   :  { %v260_v8 = vld [vmem:[%s3945_s0 + $0x740] sm:$0xff]  ;;  %v261_v10 = vld [vmem:[%s3945_s0 + $0x748] sm:$0xff]  ;;  %v2765_v12 = vcombine.low %v269_v1, %v277_v2  ;;  %v150_v1 = vld [vmem:[%s3945_s0 + $0x3d0] sm:$0xff] }
  0x16   :  { %1583 = vmatpush1.bf16.msra.mxu0 %v2571_v42  ;;  %1626 = vmatpush1.bf16.msra.mxu1 %v2573_v43  ;;  %v2748_v13 = vcombine.high %v252_v7, %v260_v8  ;;  %v2750_v14 = vcombine.high %v253_v9, %v261_v10  ;;  %v236_v15 = vld [vmem:[%s3945_s0 + $0x680] sm:$0xff]  ;;  %v237_v17 = vld [vmem:[%s3945_s0 + $0x688] sm:$0xff]  ;;  %v2747_v19 = vcombine.low %v252_v7, %v260_v8  ;;  %v143_v2 = vld [vmem:[%s3945_s0 + $0x398] sm:$0xff] }
  0x17   :  { %1584 = vmatprep.subr.bf16.mxu0 %v2556_v44  ;;  %1627 = vmatprep.subr.bf16.mxu1 %v2558_v45  ;;  %v244_v16 = vld [vmem:[%s3945_s0 + $0x6c0] sm:$0xff]  ;;  %v245_v18 = vld [vmem:[%s3945_s0 + $0x6c8] sm:$0xff]  ;;  %v2749_v20 = vcombine.low %v253_v9, %v261_v10  ;;  %v126_v8 = vld [vmem:[%s3945_s0 + $0x310] sm:$0xff] }
  0x18   :  { %v2732_v21 = vcombine.high %v236_v15, %v244_v16  ;;  %v2734_v22 = vcombine.high %v237_v17, %v245_v18  ;;  %v220_v23 = vld [vmem:[%s3945_s0 + $0x600] sm:$0xff]  ;;  %v221_v25 = vld [vmem:[%s3945_s0 + $0x608] sm:$0xff]  ;;  %v2731_v27 = vcombine.low %v236_v15, %v244_v16  ;;  %v2733_v28 = vcombine.low %v237_v17, %v245_v18  ;;  %v134_v9 = vld [vmem:[%s3945_s0 + $0x350] sm:$0xff] }
  0x19   :  { %v228_v24 = vld [vmem:[%s3945_s0 + $0x640] sm:$0xff]  ;;  %v229_v26 = vld [vmem:[%s3945_s0 + $0x648] sm:$0xff]  ;;  %v2624_v15 = vcombine.high %v126_v8, %v134_v9  ;;  %v110_v17 = vld [vmem:[%s3945_s0 + $0x290] sm:$0xff] }
  0x1a   :  { %1585 = vmatpush1.bf16.msra.mxu0 %v2555_v50  ;;  %1628 = vmatpush1.bf16.msra.mxu1 %v2557_v51  ;;  %v2716_v29 = vcombine.high %v220_v23, %v228_v24  ;;  %v2718_v30 = vcombine.high %v221_v25, %v229_v26  ;;  %v204_v31 = vld [vmem:[%s3945_s0 + $0x580] sm:$0xff]  ;;  %v205_v33 = vld [vmem:[%s3945_s0 + $0x588] sm:$0xff]  ;;  %v2715_v35 = vcombine.low %v220_v23, %v228_v24  ;;  %v118_v18 = vld [vmem:[%s3945_s0 + $0x2d0] sm:$0xff] }
  0x1b   :  { %1586 = vmatprep.subr.bf16.mxu0 %v2540_v52  ;;  %1629 = vmatprep.subr.bf16.mxu1 %v2542_v53  ;;  %v212_v32 = vld [vmem:[%s3945_s0 + $0x5c0] sm:$0xff]  ;;  %v213_v34 = vld [vmem:[%s3945_s0 + $0x5c8] sm:$0xff]  ;;  %v2717_v36 = vcombine.low %v221_v25, %v229_v26  ;;  %v2608_v23 = vcombine.high %v110_v17, %v118_v18  ;;  %v94_v25 = vld [vmem:[%s3945_s0 + $0x210] sm:$0xff] }
  0x1c   :  { %v2700_v37 = vcombine.high %v204_v31, %v212_v32  ;;  %v2702_v38 = vcombine.high %v205_v33, %v213_v34  ;;  %v188_v39 = vld [vmem:[%s3945_s0 + $0x500] sm:$0xff]  ;;  %v189_v41 = vld [vmem:[%s3945_s0 + $0x508] sm:$0xff]  ;;  %v2699_v43 = vcombine.low %v204_v31, %v212_v32  ;;  %v2701_v44 = vcombine.low %v205_v33, %v213_v34  ;;  %v102_v26 = vld [vmem:[%s3945_s0 + $0x250] sm:$0xff] }
  0x1d   :  { %v196_v40 = vld [vmem:[%s3945_s0 + $0x540] sm:$0xff]  ;;  %v197_v42 = vld [vmem:[%s3945_s0 + $0x548] sm:$0xff]  ;;  %v2592_v31 = vcombine.high %v94_v25, %v102_v26  ;;  %v78_v33 = vld [vmem:[%s3945_s0 + $0x190] sm:$0xff] }
  0x1e   :  { %1587 = vmatpush1.bf16.msra.mxu0 %v2539_v59  ;;  %1630 = vmatpush1.bf16.msra.mxu1 %v2541_v60  ;;  %v2684_v45 = vcombine.high %v188_v39, %v196_v40  ;;  %v2686_v46 = vcombine.high %v189_v41, %v197_v42  ;;  %v172_v47 = vld [vmem:[%s3945_s0 + $0x480] sm:$0xff]  ;;  %v173_v49 = vld [vmem:[%s3945_s0 + $0x488] sm:$0xff]  ;;  %v2683_v51 = vcombine.low %v188_v39, %v196_v40  ;;  %v86_v34 = vld [vmem:[%s3945_s0 + $0x1d0] sm:$0xff] }
  0x1f   :  { %1588 = vmatprep.subr.bf16.mxu0 %v2524_v61  ;;  %1631 = vmatprep.subr.bf16.mxu1 %v2526_v62  ;;  %v180_v48 = vld [vmem:[%s3945_s0 + $0x4c0] sm:$0xff]  ;;  %v181_v50 = vld [vmem:[%s3945_s0 + $0x4c8] sm:$0xff]  ;;  %v2685_v52 = vcombine.low %v189_v41, %v197_v42  ;;  %v2576_v39 = vcombine.high %v78_v33, %v86_v34  ;;  %v62_v41 = vld [vmem:[%s3945_s0 + $0x110] sm:$0xff] }
  0x20   :  { %v2668_v53 = vcombine.high %v172_v47, %v180_v48  ;;  %v2670_v54 = vcombine.high %v173_v49, %v181_v50  ;;  %v156_v55 = vld [vmem:[%s3945_s0 + $0x400] sm:$0xff]  ;;  %v157_v58 = vld [vmem:[%s3945_s0 + $0x408] sm:$0xff]  ;;  %v2667_v60 = vcombine.low %v172_v47, %v180_v48  ;;  %v2669_v61 = vcombine.low %v173_v49, %v181_v50  ;;  %v70_v42 = vld [vmem:[%s3945_s0 + $0x150] sm:$0xff] }
  0x21   :  { %v164_v57 = vld [vmem:[%s3945_s0 + $0x440] sm:$0xff]  ;;  %v165_v59 = vld [vmem:[%s3945_s0 + $0x448] sm:$0xff]  ;;  %v2560_v47 = vcombine.high %v62_v41, %v70_v42  ;;  %v46_v49 = vld [vmem:[%s3945_s0 + $0x90] sm:$0xff] }
  0x22   :  { %1589 = vmatpush1.bf16.msra.mxu0 %v2523_v3  ;;  %1632 = vmatpush1.bf16.msra.mxu1 %v2525_v4  ;;  %v2652_v62 = vcombine.high %v156_v55, %v164_v57  ;;  %v2654_v63 = vcombine.high %v157_v58, %v165_v59  ;;  %v151_v3 = vld [vmem:[%s3945_s0 + $0x3d8] sm:$0xff]  ;;  %v2651_v4 = vcombine.low %v156_v55, %v164_v57  ;;  %v3103_v10 = vld [vmem:[%s3946_s1] ss:$8 sps:$4 sm:$0xff]   ;;  %v54_v50 = vld [vmem:[%s3945_s0 + $0xd0] sm:$0xff] }
  0x23   :  { %1590 = vmatprep.subr.bf16.mxu0 %v2764_v5  ;;  %1633 = vmatprep.subr.bf16.mxu1 %v2766_v6  ;;  %v2653_v5 = vcombine.low %v157_v58, %v165_v59  ;;  %v2640_v6 = vcombine.high %v142_v0, %v150_v1  ;;  %v2642_v7 = vcombine.high %v143_v2, %v151_v3  ;;  %v30_v58 = vld [vmem:[%s3945_s0 + $0x10] sm:$0xff] }
  0x24   :  { %v2544_v55 = vcombine.high %v46_v49, %v54_v50  ;;  %v38_v59 = vld [vmem:[%s3945_s0 + $0x50] sm:$0xff] }
  0x26   :  { %1591 = vmatpush2.bf16.msra.mxu0 %v2763_v11  ;;  %1634 = vmatpush2.bf16.msra.mxu1 %v2765_v12  ;;  %v127_v11 = vld [vmem:[%s3945_s0 + $0x318] sm:$0xff] }
  0x27   :  { %1592 = vmatprep.subr.bf16.mxu0 %v2748_v13  ;;  %1635 = vmatprep.subr.bf16.mxu1 %v2750_v14  ;;  %v135_v12 = vld [vmem:[%s3945_s0 + $0x358] sm:$0xff]  ;;  %v2639_v13 = vcombine.low %v142_v0, %v150_v1  ;;  %v2641_v14 = vcombine.low %v143_v2, %v151_v3  ;;  %v2528_v0 = vcombine.high %v30_v58, %v38_v59  ;;  %v270_v2 = vld [vmem:[%s3945_s0 + $0x790] sm:$0xff] }
  0x28   :  { %v2626_v16 = vcombine.high %v127_v11, %v135_v12  ;;  %v278_v3 = vld [vmem:[%s3945_s0 + $0x7d0] sm:$0xff] }
  0x2a   :  { %1593 = vmatpush2.bf16.msra.mxu0 %v2747_v19  ;;  %1636 = vmatpush2.bf16.msra.mxu1 %v2749_v20  ;;  %v111_v19 = vld [vmem:[%s3945_s0 + $0x298] sm:$0xff] }
  0x2b   :  { %1594 = vmatprep.subr.bf16.mxu0 %v2732_v21  ;;  %1637 = vmatprep.subr.bf16.mxu1 %v2734_v22  ;;  %v119_v20 = vld [vmem:[%s3945_s0 + $0x2d8] sm:$0xff]  ;;  %v2623_v21 = vcombine.low %v126_v8, %v134_v9  ;;  %v2625_v22 = vcombine.low %v127_v11, %v135_v12  ;;  %v2768_v8 = vcombine.high %v270_v2, %v278_v3  ;;  %v254_v11 = vld [vmem:[%s3945_s0 + $0x710] sm:$0xff] }
  0x2c   :  { %v2610_v24 = vcombine.high %v111_v19, %v119_v20  ;;  %v262_v12 = vld [vmem:[%s3945_s0 + $0x750] sm:$0xff] }
  0x2e   :  { %1595 = vmatpush2.bf16.msra.mxu0 %v2731_v27  ;;  %1638 = vmatpush2.bf16.msra.mxu1 %v2733_v28  ;;  %v95_v27 = vld [vmem:[%s3945_s0 + $0x218] sm:$0xff] }
  0x2f   :  { %1596 = vmatprep.subr.bf16.mxu0 %v2716_v29  ;;  %1639 = vmatprep.subr.bf16.mxu1 %v2718_v30  ;;  %v103_v28 = vld [vmem:[%s3945_s0 + $0x258] sm:$0xff]  ;;  %v2607_v29 = vcombine.low %v110_v17, %v118_v18  ;;  %v2609_v30 = vcombine.low %v111_v19, %v119_v20  ;;  %v2752_v17 = vcombine.high %v254_v11, %v262_v12  ;;  %v238_v19 = vld [vmem:[%s3945_s0 + $0x690] sm:$0xff] }
  0x30   :  { %v2594_v32 = vcombine.high %v95_v27, %v103_v28  ;;  %v246_v20 = vld [vmem:[%s3945_s0 + $0x6d0] sm:$0xff] }
  0x32   :  { %1597 = vmatpush2.bf16.msra.mxu0 %v2715_v35  ;;  %1640 = vmatpush2.bf16.msra.mxu1 %v2717_v36  ;;  %v79_v35 = vld [vmem:[%s3945_s0 + $0x198] sm:$0xff] }
  0x33   :  { %1598 = vmatprep.subr.bf16.mxu0 %v2700_v37  ;;  %1641 = vmatprep.subr.bf16.mxu1 %v2702_v38  ;;  %v87_v36 = vld [vmem:[%s3945_s0 + $0x1d8] sm:$0xff]  ;;  %v2591_v37 = vcombine.low %v94_v25, %v102_v26  ;;  %v2593_v38 = vcombine.low %v95_v27, %v103_v28  ;;  %v2736_v25 = vcombine.high %v238_v19, %v246_v20  ;;  %v222_v27 = vld [vmem:[%s3945_s0 + $0x610] sm:$0xff] }
  0x34   :  { %v2578_v40 = vcombine.high %v79_v35, %v87_v36  ;;  %v230_v28 = vld [vmem:[%s3945_s0 + $0x650] sm:$0xff] }
  0x36   :  { %1599 = vmatpush2.bf16.msra.mxu0 %v2699_v43  ;;  %1642 = vmatpush2.bf16.msra.mxu1 %v2701_v44  ;;  %v63_v43 = vld [vmem:[%s3945_s0 + $0x118] sm:$0xff] }
  0x37   :  { %1600 = vmatprep.subr.bf16.mxu0 %v2684_v45  ;;  %1643 = vmatprep.subr.bf16.mxu1 %v2686_v46  ;;  %v71_v44 = vld [vmem:[%s3945_s0 + $0x158] sm:$0xff]  ;;  %v2575_v45 = vcombine.low %v78_v33, %v86_v34  ;;  %v2577_v46 = vcombine.low %v79_v35, %v87_v36  ;;  %v2720_v33 = vcombine.high %v222_v27, %v230_v28  ;;  %v206_v35 = vld [vmem:[%s3945_s0 + $0x590] sm:$0xff] }
  0x38   :  { %v2562_v48 = vcombine.high %v63_v43, %v71_v44  ;;  %v214_v36 = vld [vmem:[%s3945_s0 + $0x5d0] sm:$0xff] }
  0x3a   :  { %1601 = vmatpush2.bf16.msra.mxu0 %v2683_v51  ;;  %1644 = vmatpush2.bf16.msra.mxu1 %v2685_v52  ;;  %v47_v51 = vld [vmem:[%s3945_s0 + $0x98] sm:$0xff] }
  0x3b   :  { %1602 = vmatprep.subr.bf16.mxu0 %v2668_v53  ;;  %1645 = vmatprep.subr.bf16.mxu1 %v2670_v54  ;;  %v55_v52 = vld [vmem:[%s3945_s0 + $0xd8] sm:$0xff]  ;;  %v2559_v53 = vcombine.low %v62_v41, %v70_v42  ;;  %v2561_v54 = vcombine.low %v63_v43, %v71_v44  ;;  %v2704_v41 = vcombine.high %v206_v35, %v214_v36  ;;  %v190_v43 = vld [vmem:[%s3945_s0 + $0x510] sm:$0xff] }
  0x3c   :  { %v2546_v57 = vcombine.high %v47_v51, %v55_v52  ;;  %v198_v44 = vld [vmem:[%s3945_s0 + $0x550] sm:$0xff] }
  0x3e   :  { %1603 = vmatpush2.bf16.msra.mxu0 %v2667_v60  ;;  %1646 = vmatpush2.bf16.msra.mxu1 %v2669_v61  ;;  %v31_v60 = vld [vmem:[%s3945_s0 + $0x18] sm:$0xff] }
  0x3f   :  { %1604 = vmatprep.subr.bf16.mxu0 %v2652_v62  ;;  %1647 = vmatprep.subr.bf16.mxu1 %v2654_v63  ;;  %v39_v61 = vld [vmem:[%s3945_s0 + $0x58] sm:$0xff]  ;;  %v2543_v62 = vcombine.low %v46_v49, %v54_v50  ;;  %v2545_v63 = vcombine.low %v47_v51, %v55_v52  ;;  %v2688_v49 = vcombine.high %v190_v43, %v198_v44  ;;  %v174_v51 = vld [vmem:[%s3945_s0 + $0x490] sm:$0xff] }
  0x40   :  { %v2530_v1 = vcombine.high %v31_v60, %v39_v61  ;;  %v182_v52 = vld [vmem:[%s3945_s0 + $0x4d0] sm:$0xff] }
  0x42   :  { %1605 = vmatpush2.bf16.msra.mxu0 %v2651_v4  ;;  %1648 = vmatpush2.bf16.msra.mxu1 %v2653_v5  ;;  %v271_v4 = vld [vmem:[%s3945_s0 + $0x798] sm:$0xff] }
  0x43   :  { %1660 = vmatprep.subr.bf16.mxu0 %v2640_v6  ;;  %1703 = vmatprep.subr.bf16.mxu1 %v2642_v7  ;;  %v279_v5 = vld [vmem:[%s3945_s0 + $0x7d8] sm:$0xff]  ;;  %v2527_v6 = vcombine.low %v30_v58, %v38_v59  ;;  %v2529_v7 = vcombine.low %v31_v60, %v39_v61  ;;  %v2672_v58 = vcombine.high %v174_v51, %v182_v52  ;;  %v158_v60 = vld [vmem:[%s3945_s0 + $0x410] sm:$0xff] }
  0x44   :  { %v2770_v9 = vcombine.high %v271_v4, %v279_v5  ;;  %v166_v61 = vld [vmem:[%s3945_s0 + $0x450] sm:$0xff] }
  0x45   :  { %1607 = vmatmul.mubr.bf16.vlgmr.msra.gmra.mxu0 %v3103_v10  ;;  %1650 = vmatmul.mubr.bf16.vlgmr.msra.gmra.mxu1 %v3103_v10 }
  0x46   :  { %1661 = vmatpush1.bf16.msra.mxu0 %v2639_v13  ;;  %1704 = vmatpush1.bf16.msra.mxu1 %v2641_v14  ;;  %v255_v13 = vld [vmem:[%s3945_s0 + $0x718] sm:$0xff] }
  0x47   :  { %1662 = vmatprep.subr.bf16.mxu0 %v2624_v15  ;;  %1705 = vmatprep.subr.bf16.mxu1 %v2626_v16  ;;  %v263_v14 = vld [vmem:[%s3945_s0 + $0x758] sm:$0xff]  ;;  %v2767_v15 = vcombine.low %v270_v2, %v278_v3  ;;  %v2769_v16 = vcombine.low %v271_v4, %v279_v5  ;;  %v2656_v2 = vcombine.high %v158_v60, %v166_v61  ;;  %v144_v4 = vld [vmem:[%s3945_s0 + $0x3a0] sm:$0xff] }
  0x48   :  { %1692 = vmatprep.mubr.bf16.mxu0 %v2976_v56  ;;  %1735 = vmatprep.mubr.bf16.mxu1 %v2976_v56  ;;  %v2754_v18 = vcombine.high %v255_v13, %v263_v14  ;;  %v152_v5 = vld [vmem:[%s3945_s0 + $0x3e0] sm:$0xff] }
  0x4a   :  { %1663 = vmatpush1.bf16.msra.mxu0 %v2623_v21  ;;  %1706 = vmatpush1.bf16.msra.mxu1 %v2625_v22  ;;  %v239_v21 = vld [vmem:[%s3945_s0 + $0x698] sm:$0xff] }
  0x4b   :  { %1664 = vmatprep.subr.bf16.mxu0 %v2608_v23  ;;  %1707 = vmatprep.subr.bf16.mxu1 %v2610_v24  ;;  %v247_v22 = vld [vmem:[%s3945_s0 + $0x6d8] sm:$0xff]  ;;  %v2751_v23 = vcombine.low %v254_v11, %v262_v12  ;;  %v2753_v24 = vcombine.low %v255_v13, %v263_v14  ;;  %v2644_v11 = vcombine.high %v144_v4, %v152_v5  ;;  %v128_v13 = vld [vmem:[%s3945_s0 + $0x320] sm:$0xff] }
  0x4c   :  { %v2738_v26 = vcombine.high %v239_v21, %v247_v22  ;;  %v136_v14 = vld [vmem:[%s3945_s0 + $0x360] sm:$0xff] }
  0x4e   :  { %1665 = vmatpush1.bf16.msra.mxu0 %v2607_v29  ;;  %1708 = vmatpush1.bf16.msra.mxu1 %v2609_v30  ;;  %v223_v29 = vld [vmem:[%s3945_s0 + $0x618] sm:$0xff] }
  0x4f   :  { %1666 = vmatprep.subr.bf16.mxu0 %v2592_v31  ;;  %1709 = vmatprep.subr.bf16.mxu1 %v2594_v32  ;;  %v231_v30 = vld [vmem:[%s3945_s0 + $0x658] sm:$0xff]  ;;  %v2735_v31 = vcombine.low %v238_v19, %v246_v20  ;;  %v2737_v32 = vcombine.low %v239_v21, %v247_v22  ;;  %v2628_v19 = vcombine.high %v128_v13, %v136_v14  ;;  %v112_v21 = vld [vmem:[%s3945_s0 + $0x2a0] sm:$0xff] }
  0x50   :  { %v2722_v34 = vcombine.high %v223_v29, %v231_v30  ;;  %v120_v22 = vld [vmem:[%s3945_s0 + $0x2e0] sm:$0xff] }
  0x52   :  { %1667 = vmatpush1.bf16.msra.mxu0 %v2591_v37  ;;  %1710 = vmatpush1.bf16.msra.mxu1 %v2593_v38  ;;  %v207_v37 = vld [vmem:[%s3945_s0 + $0x598] sm:$0xff] }
  0x53   :  { %1668 = vmatprep.subr.bf16.mxu0 %v2576_v39  ;;  %1711 = vmatprep.subr.bf16.mxu1 %v2578_v40  ;;  %v215_v38 = vld [vmem:[%s3945_s0 + $0x5d8] sm:$0xff]  ;;  %v2719_v39 = vcombine.low %v222_v27, %v230_v28  ;;  %v2721_v40 = vcombine.low %v223_v29, %v231_v30  ;;  %v2612_v27 = vcombine.high %v112_v21, %v120_v22  ;;  %v96_v29 = vld [vmem:[%s3945_s0 + $0x220] sm:$0xff] }
  0x54   :  { %v2706_v42 = vcombine.high %v207_v37, %v215_v38  ;;  %v104_v30 = vld [vmem:[%s3945_s0 + $0x260] sm:$0xff] }
  0x56   :  { %1669 = vmatpush1.bf16.msra.mxu0 %v2575_v45  ;;  %1712 = vmatpush1.bf16.msra.mxu1 %v2577_v46  ;;  %v191_v45 = vld [vmem:[%s3945_s0 + $0x518] sm:$0xff] }
  0x57   :  { %1670 = vmatprep.subr.bf16.mxu0 %v2560_v47  ;;  %1713 = vmatprep.subr.bf16.mxu1 %v2562_v48  ;;  %v199_v46 = vld [vmem:[%s3945_s0 + $0x558] sm:$0xff]  ;;  %v2703_v47 = vcombine.low %v206_v35, %v214_v36  ;;  %v2705_v48 = vcombine.low %v207_v37, %v215_v38  ;;  %v2596_v35 = vcombine.high %v96_v29, %v104_v30  ;;  %v80_v37 = vld [vmem:[%s3945_s0 + $0x1a0] sm:$0xff] }
  0x58   :  { %v2690_v50 = vcombine.high %v191_v45, %v199_v46  ;;  %v88_v38 = vld [vmem:[%s3945_s0 + $0x1e0] sm:$0xff] }
  0x5a   :  { %1671 = vmatpush1.bf16.msra.mxu0 %v2559_v53  ;;  %1714 = vmatpush1.bf16.msra.mxu1 %v2561_v54  ;;  %v175_v53 = vld [vmem:[%s3945_s0 + $0x498] sm:$0xff] }
  0x5b   :  { %1672 = vmatprep.subr.bf16.mxu0 %v2544_v55  ;;  %1715 = vmatprep.subr.bf16.mxu1 %v2546_v57  ;;  %v183_v54 = vld [vmem:[%s3945_s0 + $0x4d8] sm:$0xff]  ;;  %v2687_v55 = vcombine.low %v190_v43, %v198_v44  ;;  %v2689_v57 = vcombine.low %v191_v45, %v199_v46  ;;  %v64_v44 = vld [vmem:[%s3945_s0 + $0x120] sm:$0xff]  ;;  %v65_v46 = vld [vmem:[%s3945_s0 + $0x128] sm:$0xff] }
  0x5c   :  { %v2674_v59 = vcombine.high %v175_v53, %v183_v54  ;;  %v72_v45 = vld [vmem:[%s3945_s0 + $0x160] sm:$0xff] }
  0x5e   :  { %1673 = vmatpush1.bf16.msra.mxu0 %v2543_v62  ;;  %1716 = vmatpush1.bf16.msra.mxu1 %v2545_v63  ;;  %v159_v62 = vld [vmem:[%s3945_s0 + $0x418] sm:$0xff] }
  0x5f   :  { %1674 = vmatprep.subr.bf16.mxu0 %v2528_v0  ;;  %1717 = vmatprep.subr.bf16.mxu1 %v2530_v1  ;;  %v167_v63 = vld [vmem:[%s3945_s0 + $0x458] sm:$0xff]  ;;  %v2671_v0 = vcombine.low %v174_v51, %v182_v52  ;;  %v2673_v1 = vcombine.low %v175_v53, %v183_v54  ;;  %v48_v52 = vld [vmem:[%s3945_s0 + $0xa0] sm:$0xff]  ;;  %v49_v54 = vld [vmem:[%s3945_s0 + $0xa8] sm:$0xff] }
  0x60   :  { %v2658_v3 = vcombine.high %v159_v62, %v167_v63  ;;  %v56_v53 = vld [vmem:[%s3945_s0 + $0xe0] sm:$0xff] }
  0x62   :  { %1675 = vmatpush1.bf16.msra.mxu0 %v2527_v6  ;;  %1718 = vmatpush1.bf16.msra.mxu1 %v2529_v7  ;;  %v145_v6 = vld [vmem:[%s3945_s0 + $0x3a8] sm:$0xff] }
  0x63   :  { %1676 = vmatprep.subr.bf16.mxu0 %v2768_v8  ;;  %1719 = vmatprep.subr.bf16.mxu1 %v2770_v9  ;;  %v153_v7 = vld [vmem:[%s3945_s0 + $0x3e8] sm:$0xff]  ;;  %v2655_v8 = vcombine.low %v158_v60, %v166_v61  ;;  %v2657_v9 = vcombine.low %v159_v62, %v167_v63  ;;  %v32_v61 = vld [vmem:[%s3945_s0 + $0x20] sm:$0xff] }
  0x64   :  { %v2646_v12 = vcombine.high %v145_v6, %v153_v7  ;;  %v40_v62 = vld [vmem:[%s3945_s0 + $0x60] sm:$0xff]  ;;  %v33_v63 = vld [vmem:[%s3945_s0 + $0x28] sm:$0xff] }
  0x66   :  { %1677 = vmatpush2.bf16.msra.mxu0 %v2767_v15  ;;  %1720 = vmatpush2.bf16.msra.mxu1 %v2769_v16  ;;  %v129_v15 = vld [vmem:[%s3945_s0 + $0x328] sm:$0xff] }
  0x67   :  { %1678 = vmatprep.subr.bf16.mxu0 %v2752_v17  ;;  %1721 = vmatprep.subr.bf16.mxu1 %v2754_v18  ;;  %v137_v16 = vld [vmem:[%s3945_s0 + $0x368] sm:$0xff]  ;;  %v2643_v17 = vcombine.low %v144_v4, %v152_v5  ;;  %v2645_v18 = vcombine.low %v145_v6, %v153_v7  ;;  %v272_v5 = vld [vmem:[%s3945_s0 + $0x7a0] sm:$0xff] }
  0x68   :  { %v2630_v20 = vcombine.high %v129_v15, %v137_v16  ;;  %v280_v6 = vld [vmem:[%s3945_s0 + $0x7e0] sm:$0xff]  ;;  %v273_v7 = vld [vmem:[%s3945_s0 + $0x7a8] sm:$0xff] }
  0x6a   :  { %1679 = vmatpush2.bf16.msra.mxu0 %v2751_v23  ;;  %1722 = vmatpush2.bf16.msra.mxu1 %v2753_v24  ;;  %v113_v23 = vld [vmem:[%s3945_s0 + $0x2a8] sm:$0xff] }
  0x6b   :  { %1680 = vmatprep.subr.bf16.mxu0 %v2736_v25  ;;  %1723 = vmatprep.subr.bf16.mxu1 %v2738_v26  ;;  %v121_v24 = vld [vmem:[%s3945_s0 + $0x2e8] sm:$0xff]  ;;  %v2627_v25 = vcombine.low %v128_v13, %v136_v14  ;;  %v2629_v26 = vcombine.low %v129_v15, %v137_v16  ;;  %v256_v14 = vld [vmem:[%s3945_s0 + $0x720] sm:$0xff] }
  0x6c   :  { %v2614_v28 = vcombine.high %v113_v23, %v121_v24  ;;  %v264_v15 = vld [vmem:[%s3945_s0 + $0x760] sm:$0xff]  ;;  %v257_v16 = vld [vmem:[%s3945_s0 + $0x728] sm:$0xff] }
  0x6e   :  { %1681 = vmatpush2.bf16.msra.mxu0 %v2735_v31  ;;  %1724 = vmatpush2.bf16.msra.mxu1 %v2737_v32  ;;  %v97_v31 = vld [vmem:[%s3945_s0 + $0x228] sm:$0xff] }
  0x6f   :  { %1682 = vmatprep.subr.bf16.mxu0 %v2720_v33  ;;  %1725 = vmatprep.subr.bf16.mxu1 %v2722_v34  ;;  %v105_v32 = vld [vmem:[%s3945_s0 + $0x268] sm:$0xff]  ;;  %v2611_v33 = vcombine.low %v112_v21, %v120_v22  ;;  %v2613_v34 = vcombine.low %v113_v23, %v121_v24  ;;  %v240_v22 = vld [vmem:[%s3945_s0 + $0x6a0] sm:$0xff] }
  0x70   :  { %v2598_v36 = vcombine.high %v97_v31, %v105_v32  ;;  %v248_v23 = vld [vmem:[%s3945_s0 + $0x6e0] sm:$0xff]  ;;  %v241_v24 = vld [vmem:[%s3945_s0 + $0x6a8] sm:$0xff] }
  0x72   :  { %1683 = vmatpush2.bf16.msra.mxu0 %v2719_v39  ;;  %1726 = vmatpush2.bf16.msra.mxu1 %v2721_v40  ;;  %v89_v39 = vld [vmem:[%s3945_s0 + $0x1e8] sm:$0xff]  ;;  %v2595_v40 = vcombine.low %v96_v29, %v104_v30  ;;  %v224_v30 = vld [vmem:[%s3945_s0 + $0x620] sm:$0xff] }
  0x73   :  { %1684 = vmatprep.subr.bf16.mxu0 %v2704_v41  ;;  %1727 = vmatprep.subr.bf16.mxu1 %v2706_v42  ;;  %v2597_v41 = vcombine.low %v97_v31, %v105_v32  ;;  %v2580_v42 = vcombine.high %v80_v37, %v88_v38  ;;  %v232_v31 = vld [vmem:[%s3945_s0 + $0x660] sm:$0xff]  ;;  %v225_v32 = vld [vmem:[%s3945_s0 + $0x628] sm:$0xff] }
  0x76   :  { %1685 = vmatpush2.bf16.msra.mxu0 %v2703_v47  ;;  %1728 = vmatpush2.bf16.msra.mxu1 %v2705_v48  ;;  %v73_v47 = vld [vmem:[%s3945_s0 + $0x168] sm:$0xff]  ;;  %v2579_v48 = vcombine.low %v80_v37, %v88_v38  ;;  %v208_v38 = vld [vmem:[%s3945_s0 + $0x5a0] sm:$0xff] }
  0x77   :  { %1686 = vmatprep.subr.bf16.mxu0 %v2688_v49  ;;  %1729 = vmatprep.subr.bf16.mxu1 %v2690_v50  ;;  %v2564_v50 = vcombine.high %v64_v44, %v72_v45  ;;  %v2566_v51 = vcombine.high %v65_v46, %v73_v47 }
  0x7a   :  { %1687 = vmatpush2.bf16.msra.mxu0 %v2687_v55  ;;  %1730 = vmatpush2.bf16.msra.mxu1 %v2689_v57  ;;  %v57_v55 = vld [vmem:[%s3945_s0 + $0xe8] sm:$0xff]  ;;  %v2563_v57 = vcombine.low %v64_v44, %v72_v45  ;;  %v192_v45 = vld [vmem:[%s3945_s0 + $0x520] sm:$0xff] }
  0x7b   :  { %1688 = vmatprep.subr.bf16.mxu0 %v2672_v58  ;;  %1731 = vmatprep.subr.bf16.mxu1 %v2674_v59  ;;  %v2565_v58 = vcombine.low %v65_v46, %v73_v47  ;;  %v2548_v59 = vcombine.high %v48_v52, %v56_v53  ;;  %v2550_v60 = vcombine.high %v49_v54, %v57_v55  ;;  %v200_v46 = vld [vmem:[%s3945_s0 + $0x560] sm:$0xff]  ;;  %v193_v47 = vld [vmem:[%s3945_s0 + $0x528] sm:$0xff] }
  0x7e   :  { %1689 = vmatpush2.bf16.msra.mxu0 %v2671_v0  ;;  %1732 = vmatpush2.bf16.msra.mxu1 %v2673_v1  ;;  %v41_v0 = vld [vmem:[%s3945_s0 + $0x68] sm:$0xff]  ;;  %v2547_v1 = vcombine.low %v48_v52, %v56_v53  ;;  %v176_v53 = vld [vmem:[%s3945_s0 + $0x4a0] sm:$0xff] }
  0x7f   :  { %1690 = vmatprep.subr.bf16.mxu0 %v2656_v2  ;;  %1733 = vmatprep.subr.bf16.mxu1 %v2658_v3  ;;  %v2549_v2 = vcombine.low %v49_v54, %v57_v55  ;;  %v2532_v3 = vcombine.high %v32_v61, %v40_v62  ;;  %v2534_v4 = vcombine.high %v33_v63, %v41_v0  ;;  %v184_v54 = vld [vmem:[%s3945_s0 + $0x4e0] sm:$0xff]  ;;  %v177_v55 = vld [vmem:[%s3945_s0 + $0x4a8] sm:$0xff] }
  0x82   :  { %1691 = vmatpush2.bf16.msra.mxu0 %v2655_v8  ;;  %1734 = vmatpush2.bf16.msra.mxu1 %v2657_v9  ;;  %v281_v8 = vld [vmem:[%s3945_s0 + $0x7e8] sm:$0xff]  ;;  %v2531_v9 = vcombine.low %v32_v61, %v40_v62  ;;  %v160_v62 = vld [vmem:[%s3945_s0 + $0x420] sm:$0xff] }
  0x83   :  { %1746 = vmatprep.subr.bf16.mxu0 %v2644_v11  ;;  %1789 = vmatprep.subr.bf16.mxu1 %v2646_v12  ;;  %v2533_v11 = vcombine.low %v33_v63, %v41_v0  ;;  %v2772_v12 = vcombine.high %v272_v5, %v280_v6  ;;  %v2774_v13 = vcombine.high %v273_v7, %v281_v8  ;;  %v168_v63 = vld [vmem:[%s3945_s0 + $0x460] sm:$0xff]  ;;  %v161_v0 = vld [vmem:[%s3945_s0 + $0x428] sm:$0xff] }
  0x85   :  { %1693 = vmatmul.mubr.bf16.vlgmr.msra.gmra.mxu0 %v3103_v10  ;;  %1736 = vmatmul.mubr.bf16.vlgmr.msra.gmra.mxu1 %v3103_v10 }
  0x86   :  { %1747 = vmatpush1.bf16.msra.mxu0 %v2643_v17  ;;  %1790 = vmatpush1.bf16.msra.mxu1 %v2645_v18  ;;  %v265_v17 = vld [vmem:[%s3945_s0 + $0x768] sm:$0xff]  ;;  %v2771_v18 = vcombine.low %v272_v5, %v280_v6  ;;  %v146_v6 = vld [vmem:[%s3945_s0 + $0x3b0] sm:$0xff] }
  0x87   :  { %1748 = vmatprep.subr.bf16.mxu0 %v2628_v19  ;;  %1791 = vmatprep.subr.bf16.mxu1 %v2630_v20  ;;  %v2773_v19 = vcombine.low %v273_v7, %v281_v8  ;;  %v2756_v20 = vcombine.high %v256_v14, %v264_v15  ;;  %v2758_v21 = vcombine.high %v257_v16, %v265_v17  ;;  %v154_v7 = vld [vmem:[%s3945_s0 + $0x3f0] sm:$0xff]  ;;  %v147_v8 = vld [vmem:[%s3945_s0 + $0x3b8] sm:$0xff] }
  0x88   :  { %1778 = vmatprep.mubr.bf16.mxu0 %v2976_v56  ;;  %1821 = vmatprep.mubr.bf16.mxu1 %v2976_v56  ;;  %v81_v56 = vld [vmem:[%s3945_s0 + $0x1a8] sm:$0xff] }
  0x89   :  { %v2582_v43 = vcombine.high %v81_v56, %v89_v39  ;;  %v2581_v49 = vcombine.low %v81_v56, %v89_v39  ;;  %v216_v56 = vld [vmem:[%s3945_s0 + $0x5e0] sm:$0xff]  ;;  %v209_v39 = vld [vmem:[%s3945_s0 + $0x5a8] sm:$0xff] }
  0x8a   :  { %1749 = vmatpush1.bf16.msra.mxu0 %v2627_v25  ;;  %1792 = vmatpush1.bf16.msra.mxu1 %v2629_v26  ;;  %v249_v25 = vld [vmem:[%s3945_s0 + $0x6e8] sm:$0xff]  ;;  %v2755_v26 = vcombine.low %v256_v14, %v264_v15  ;;  %v130_v15 = vld [vmem:[%s3945_s0 + $0x330] sm:$0xff] }
  0x8b   :  { %1750 = vmatprep.subr.bf16.mxu0 %v2612_v27  ;;  %1793 = vmatprep.subr.bf16.mxu1 %v2614_v28  ;;  %v2757_v27 = vcombine.low %v257_v16, %v265_v17  ;;  %v2740_v28 = vcombine.high %v240_v22, %v248_v23  ;;  %v2742_v29 = vcombine.high %v241_v24, %v249_v25  ;;  %v138_v16 = vld [vmem:[%s3945_s0 + $0x370] sm:$0xff]  ;;  %v131_v17 = vld [vmem:[%s3945_s0 + $0x338] sm:$0xff] }
  0x8e   :  { %1751 = vmatpush1.bf16.msra.mxu0 %v2611_v33  ;;  %1794 = vmatpush1.bf16.msra.mxu1 %v2613_v34  ;;  %v233_v33 = vld [vmem:[%s3945_s0 + $0x668] sm:$0xff]  ;;  %v2739_v34 = vcombine.low %v240_v22, %v248_v23  ;;  %v114_v23 = vld [vmem:[%s3945_s0 + $0x2b0] sm:$0xff] }
  0x8f   :  { %1752 = vmatprep.subr.bf16.mxu0 %v2596_v35  ;;  %1795 = vmatprep.subr.bf16.mxu1 %v2598_v36  ;;  %v2741_v35 = vcombine.low %v241_v24, %v249_v25  ;;  %v2724_v36 = vcombine.high %v224_v30, %v232_v31  ;;  %v2726_v37 = vcombine.high %v225_v32, %v233_v33  ;;  %v122_v24 = vld [vmem:[%s3945_s0 + $0x2f0] sm:$0xff]  ;;  %v115_v25 = vld [vmem:[%s3945_s0 + $0x2b8] sm:$0xff] }
  0x92   :  { %1753 = vmatpush1.bf16.msra.mxu0 %v2595_v40  ;;  %1796 = vmatpush1.bf16.msra.mxu1 %v2597_v41  ;;  %v217_v40 = vld [vmem:[%s3945_s0 + $0x5e8] sm:$0xff]  ;;  %v2723_v41 = vcombine.low %v224_v30, %v232_v31  ;;  %v98_v31 = vld [vmem:[%s3945_s0 + $0x230] sm:$0xff] }
  0x93   :  { %1754 = vmatprep.subr.bf16.mxu0 %v2580_v42  ;;  %1797 = vmatprep.subr.bf16.mxu1 %v2582_v43  ;;  %v2725_v42 = vcombine.low %v225_v32, %v233_v33  ;;  %v2708_v43 = vcombine.high %v208_v38, %v216_v56  ;;  %v2710_v44 = vcombine.high %v209_v39, %v217_v40  ;;  %v106_v32 = vld [vmem:[%s3945_s0 + $0x270] sm:$0xff]  ;;  %v99_v33 = vld [vmem:[%s3945_s0 + $0x238] sm:$0xff] }
  0x96   :  { %1755 = vmatpush1.bf16.msra.mxu0 %v2579_v48  ;;  %1798 = vmatpush1.bf16.msra.mxu1 %v2581_v49  ;;  %v201_v48 = vld [vmem:[%s3945_s0 + $0x568] sm:$0xff]  ;;  %v2707_v49 = vcombine.low %v208_v38, %v216_v56  ;;  %v82_v56 = vld [vmem:[%s3945_s0 + $0x1b0] sm:$0xff] }
  0x97   :  { %1756 = vmatprep.subr.bf16.mxu0 %v2564_v50  ;;  %1799 = vmatprep.subr.bf16.mxu1 %v2566_v51  ;;  %v2709_v50 = vcombine.low %v209_v39, %v217_v40  ;;  %v2692_v51 = vcombine.high %v192_v45, %v200_v46  ;;  %v2694_v52 = vcombine.high %v193_v47, %v201_v48  ;;  %v90_v39 = vld [vmem:[%s3945_s0 + $0x1f0] sm:$0xff]  ;;  %v83_v40 = vld [vmem:[%s3945_s0 + $0x1b8] sm:$0xff] }
  0x9a   :  { %1757 = vmatpush1.bf16.msra.mxu0 %v2563_v57  ;;  %1800 = vmatpush1.bf16.msra.mxu1 %v2565_v58  ;;  %v185_v57 = vld [vmem:[%s3945_s0 + $0x4e8] sm:$0xff]  ;;  %v2691_v58 = vcombine.low %v192_v45, %v200_v46  ;;  %v66_v46 = vld [vmem:[%s3945_s0 + $0x130] sm:$0xff] }
  0x9b   :  { %1758 = vmatprep.subr.bf16.mxu0 %v2548_v59  ;;  %1801 = vmatprep.subr.bf16.mxu1 %v2550_v60  ;;  %v2693_v59 = vcombine.low %v193_v47, %v201_v48  ;;  %v2676_v60 = vcombine.high %v176_v53, %v184_v54  ;;  %v2678_v61 = vcombine.high %v177_v55, %v185_v57  ;;  %v74_v47 = vld [vmem:[%s3945_s0 + $0x170] sm:$0xff]  ;;  %v67_v48 = vld [vmem:[%s3945_s0 + $0x138] sm:$0xff] }
  0x9e   :  { %1759 = vmatpush1.bf16.msra.mxu0 %v2547_v1  ;;  %1802 = vmatpush1.bf16.msra.mxu1 %v2549_v2  ;;  %v169_v1 = vld [vmem:[%s3945_s0 + $0x468] sm:$0xff]  ;;  %v2675_v2 = vcombine.low %v176_v53, %v184_v54  ;;  %v50_v54 = vld [vmem:[%s3945_s0 + $0xb0] sm:$0xff] }
  0x9f   :  { %1760 = vmatprep.subr.bf16.mxu0 %v2532_v3  ;;  %1803 = vmatprep.subr.bf16.mxu1 %v2534_v4  ;;  %v2677_v3 = vcombine.low %v177_v55, %v185_v57  ;;  %v2660_v4 = vcombine.high %v160_v62, %v168_v63  ;;  %v2662_v5 = vcombine.high %v161_v0, %v169_v1  ;;  %v58_v55 = vld [vmem:[%s3945_s0 + $0xf0] sm:$0xff]  ;;  %v51_v57 = vld [vmem:[%s3945_s0 + $0xb8] sm:$0xff] }
  0xa2   :  { %1761 = vmatpush1.bf16.msra.mxu0 %v2531_v9  ;;  %1804 = vmatpush1.bf16.msra.mxu1 %v2533_v11  ;;  %v155_v9 = vld [vmem:[%s3945_s0 + $0x3f8] sm:$0xff]  ;;  %v2659_v11 = vcombine.low %v160_v62, %v168_v63  ;;  %v34_v63 = vld [vmem:[%s3945_s0 + $0x30] sm:$0xff] }
  0xa3   :  { %1762 = vmatprep.subr.bf16.mxu0 %v2772_v12  ;;  %1805 = vmatprep.subr.bf16.mxu1 %v2774_v13  ;;  %v2661_v12 = vcombine.low %v161_v0, %v169_v1  ;;  %v2648_v13 = vcombine.high %v146_v6, %v154_v7  ;;  %v2650_v14 = vcombine.high %v147_v8, %v155_v9  ;;  %v42_v0 = vld [vmem:[%s3945_s0 + $0x70] sm:$0xff]  ;;  %v35_v1 = vld [vmem:[%s3945_s0 + $0x38] sm:$0xff] }
  0xa6   :  { %1763 = vmatpush2.bf16.msra.mxu0 %v2771_v18  ;;  %1806 = vmatpush2.bf16.msra.mxu1 %v2773_v19  ;;  %v139_v18 = vld [vmem:[%s3945_s0 + $0x378] sm:$0xff]  ;;  %v2647_v19 = vcombine.low %v146_v6, %v154_v7  ;;  %v274_v7 = vld [vmem:[%s3945_s0 + $0x7b0] sm:$0xff] }
  0xa7   :  { %1764 = vmatprep.subr.bf16.mxu0 %v2756_v20  ;;  %1807 = vmatprep.subr.bf16.mxu1 %v2758_v21  ;;  %v2649_v20 = vcombine.low %v147_v8, %v155_v9  ;;  %v2632_v21 = vcombine.high %v130_v15, %v138_v16  ;;  %v2634_v22 = vcombine.high %v131_v17, %v139_v18  ;;  %v282_v8 = vld [vmem:[%s3945_s0 + $0x7f0] sm:$0xff]  ;;  %v275_v9 = vld [vmem:[%s3945_s0 + $0x7b8] sm:$0xff] }
  0xaa   :  { %1765 = vmatpush2.bf16.msra.mxu0 %v2755_v26  ;;  %1808 = vmatpush2.bf16.msra.mxu1 %v2757_v27  ;;  %v123_v26 = vld [vmem:[%s3945_s0 + $0x2f8] sm:$0xff]  ;;  %v2631_v27 = vcombine.low %v130_v15, %v138_v16  ;;  %v258_v16 = vld [vmem:[%s3945_s0 + $0x730] sm:$0xff] }
  0xab   :  { %1766 = vmatprep.subr.bf16.mxu0 %v2740_v28  ;;  %1809 = vmatprep.subr.bf16.mxu1 %v2742_v29  ;;  %v2633_v28 = vcombine.low %v131_v17, %v139_v18  ;;  %v2616_v29 = vcombine.high %v114_v23, %v122_v24  ;;  %v2618_v30 = vcombine.high %v115_v25, %v123_v26  ;;  %v266_v17 = vld [vmem:[%s3945_s0 + $0x770] sm:$0xff]  ;;  %v259_v18 = vld [vmem:[%s3945_s0 + $0x738] sm:$0xff] }
  0xae   :  { %1767 = vmatpush2.bf16.msra.mxu0 %v2739_v34  ;;  %1810 = vmatpush2.bf16.msra.mxu1 %v2741_v35  ;;  %v107_v34 = vld [vmem:[%s3945_s0 + $0x278] sm:$0xff]  ;;  %v2615_v35 = vcombine.low %v114_v23, %v122_v24  ;;  %v242_v24 = vld [vmem:[%s3945_s0 + $0x6b0] sm:$0xff] }
  0xaf   :  { %1768 = vmatprep.subr.bf16.mxu0 %v2724_v36  ;;  %1811 = vmatprep.subr.bf16.mxu1 %v2726_v37  ;;  %v2617_v36 = vcombine.low %v115_v25, %v123_v26  ;;  %v2600_v37 = vcombine.high %v98_v31, %v106_v32  ;;  %v2602_v38 = vcombine.high %v99_v33, %v107_v34  ;;  %v250_v25 = vld [vmem:[%s3945_s0 + $0x6f0] sm:$0xff]  ;;  %v243_v26 = vld [vmem:[%s3945_s0 + $0x6b8] sm:$0xff] }
  0xb2   :  { %1769 = vmatpush2.bf16.msra.mxu0 %v2723_v41  ;;  %1812 = vmatpush2.bf16.msra.mxu1 %v2725_v42  ;;  %v91_v41 = vld [vmem:[%s3945_s0 + $0x1f8] sm:$0xff]  ;;  %v2599_v42 = vcombine.low %v98_v31, %v106_v32  ;;  %v226_v32 = vld [vmem:[%s3945_s0 + $0x630] sm:$0xff] }
  0xb3   :  { %1770 = vmatprep.subr.bf16.mxu0 %v2708_v43  ;;  %1813 = vmatprep.subr.bf16.mxu1 %v2710_v44  ;;  %v2601_v43 = vcombine.low %v99_v33, %v107_v34  ;;  %v2584_v44 = vcombine.high %v82_v56, %v90_v39  ;;  %v2586_v45 = vcombine.high %v83_v40, %v91_v41  ;;  %v227_v33 = vld [vmem:[%s3945_s0 + $0x638] sm:$0xff] }
  0xb4   :  { %v235_v34 = vld [vmem:[%s3945_s0 + $0x678] sm:$0xff] }
  0xb6   :  { %1771 = vmatpush2.bf16.msra.mxu0 %v2707_v49  ;;  %1814 = vmatpush2.bf16.msra.mxu1 %v2709_v50  ;;  %v75_v49 = vld [vmem:[%s3945_s0 + $0x178] sm:$0xff]  ;;  %v2583_v50 = vcombine.low %v82_v56, %v90_v39  ;;  %v210_v56 = vld [vmem:[%s3945_s0 + $0x5b0] sm:$0xff] }
  0xb7   :  { %1772 = vmatprep.subr.bf16.mxu0 %v2692_v51  ;;  %1815 = vmatprep.subr.bf16.mxu1 %v2694_v52  ;;  %v2585_v51 = vcombine.low %v83_v40, %v91_v41  ;;  %v2568_v52 = vcombine.high %v66_v46, %v74_v47  ;;  %v2570_v53 = vcombine.high %v67_v48, %v75_v49  ;;  %v218_v39 = vld [vmem:[%s3945_s0 + $0x5f0] sm:$0xff]  ;;  %v211_v40 = vld [vmem:[%s3945_s0 + $0x5b8] sm:$0xff] }
  0xb8   :  { %v219_v41 = vld [vmem:[%s3945_s0 + $0x5f8] sm:$0xff] }
  0xba   :  { %1773 = vmatpush2.bf16.msra.mxu0 %v2691_v58  ;;  %1816 = vmatpush2.bf16.msra.mxu1 %v2693_v59  ;;  %v59_v58 = vld [vmem:[%s3945_s0 + $0xf8] sm:$0xff]  ;;  %v2567_v59 = vcombine.low %v66_v46, %v74_v47  ;;  %v194_v46 = vld [vmem:[%s3945_s0 + $0x530] sm:$0xff] }
  0xbb   :  { %1774 = vmatprep.subr.bf16.mxu0 %v2676_v60  ;;  %1817 = vmatprep.subr.bf16.mxu1 %v2678_v61  ;;  %v2569_v60 = vcombine.low %v67_v48, %v75_v49  ;;  %v2552_v61 = vcombine.high %v50_v54, %v58_v55  ;;  %v2554_v62 = vcombine.high %v51_v57, %v59_v58  ;;  %v202_v47 = vld [vmem:[%s3945_s0 + $0x570] sm:$0xff]  ;;  %v195_v48 = vld [vmem:[%s3945_s0 + $0x538] sm:$0xff] }
  0xbc   :  { %v203_v49 = vld [vmem:[%s3945_s0 + $0x578] sm:$0xff] }
  0xbe   :  { %1775 = vmatpush2.bf16.msra.mxu0 %v2675_v2  ;;  %1818 = vmatpush2.bf16.msra.mxu1 %v2677_v3  ;;  %v43_v2 = vld [vmem:[%s3945_s0 + $0x78] sm:$0xff]  ;;  %v2551_v3 = vcombine.low %v50_v54, %v58_v55  ;;  %v178_v54 = vld [vmem:[%s3945_s0 + $0x4b0] sm:$0xff] }
  0xbf   :  { %1776 = vmatprep.subr.bf16.mxu0 %v2660_v4  ;;  %1819 = vmatprep.subr.bf16.mxu1 %v2662_v5  ;;  %v2553_v4 = vcombine.low %v51_v57, %v59_v58  ;;  %v2536_v5 = vcombine.high %v34_v63, %v42_v0  ;;  %v2538_v6 = vcombine.high %v35_v1, %v43_v2  ;;  %v186_v55 = vld [vmem:[%s3945_s0 + $0x4f0] sm:$0xff]  ;;  %v179_v57 = vld [vmem:[%s3945_s0 + $0x4b8] sm:$0xff] }
  0xc0   :  { %v187_v58 = vld [vmem:[%s3945_s0 + $0x4f8] sm:$0xff] }
  0xc2   :  { %1777 = vmatpush2.bf16.msra.mxu0 %v2659_v11  ;;  %1820 = vmatpush2.bf16.msra.mxu1 %v2661_v12  ;;  %v283_v11 = vld [vmem:[%s3945_s0 + $0x7f8] sm:$0xff]  ;;  %v2535_v12 = vcombine.low %v34_v63, %v42_v0  ;;  %v162_v63 = vld [vmem:[%s3945_s0 + $0x430] sm:$0xff] }
  0xc3   :  { %1832 = vmatprep.subr.bf16.mxu0 %v2648_v13  ;;  %1875 = vmatprep.subr.bf16.mxu1 %v2650_v14  ;;  %v2537_v13 = vcombine.low %v35_v1, %v43_v2  ;;  %v2776_v14 = vcombine.high %v274_v7, %v282_v8  ;;  %v2778_v15 = vcombine.high %v275_v9, %v283_v11  ;;  %v170_v0 = vld [vmem:[%s3945_s0 + $0x470] sm:$0xff]  ;;  %v163_v1 = vld [vmem:[%s3945_s0 + $0x438] sm:$0xff] }
  0xc4   :  { %v171_v2 = vld [vmem:[%s3945_s0 + $0x478] sm:$0xff] }
  0xc5   :  { %1779 = vmatmul.mubr.bf16.vlgmr.msra.gmra.mxu0 %v3103_v10  ;;  %1822 = vmatmul.mubr.bf16.vlgmr.msra.gmra.mxu1 %v3103_v10  ;;  %v2854_v10 = vld [vmem:[%s3946_s1 + $0x4] ss:$8 sps:$4 sm:$0xff]  }
  0xc6   :  { %1833 = vmatpush1.bf16.msra.mxu0 %v2647_v19  ;;  %1876 = vmatpush1.bf16.msra.mxu1 %v2649_v20  ;;  %v267_v19 = vld [vmem:[%s3945_s0 + $0x778] sm:$0xff]  ;;  %v2775_v20 = vcombine.low %v274_v7, %v282_v8  ;;  %v2663_v7 = vcombine.low %v162_v63, %v170_v0  ;;  %v2665_v8 = vcombine.low %v163_v1, %v171_v2 }
  0xc7   :  { %1834 = vmatprep.subr.bf16.mxu0 %v2632_v21  ;;  %1877 = vmatprep.subr.bf16.mxu1 %v2634_v22  ;;  %v2777_v21 = vcombine.low %v275_v9, %v283_v11  ;;  %v2760_v22 = vcombine.high %v258_v16, %v266_v17  ;;  %v2762_v23 = vcombine.high %v259_v18, %v267_v19  ;;  %v2855_v11 = vld [vmem:[%s3946_s1] ss:$8 sps:$4 sm:$0xff]  }
  0xc8   :  { %1864 = vmatprep.mubr.bf16.mxu0 %v2854_v10  ;;  %1907 = vmatprep.mubr.bf16.mxu1 %v2854_v10  ;;  %v234_v10 = vld [vmem:[%s3945_s0 + $0x670] sm:$0xff] }
  0xca   :  { %1835 = vmatpush1.bf16.msra.mxu0 %v2631_v27  ;;  %1878 = vmatpush1.bf16.msra.mxu1 %v2633_v28  ;;  %v251_v27 = vld [vmem:[%s3945_s0 + $0x6f8] sm:$0xff]  ;;  %v2759_v28 = vcombine.low %v258_v16, %v266_v17 }
  0xcb   :  { %1836 = vmatprep.subr.bf16.mxu0 %v2616_v29  ;;  %1879 = vmatprep.subr.bf16.mxu1 %v2618_v30  ;;  %v2761_v29 = vcombine.low %v259_v18, %v267_v19  ;;  %v2744_v30 = vcombine.high %v242_v24, %v250_v25  ;;  %v2746_v31 = vcombine.high %v243_v26, %v251_v27 }
  0xce   :  { %1837 = vmatpush1.bf16.msra.mxu0 %v2615_v35  ;;  %1880 = vmatpush1.bf16.msra.mxu1 %v2617_v36  ;;  %v2743_v35 = vcombine.low %v242_v24, %v250_v25  ;;  %v2745_v36 = vcombine.low %v243_v26, %v251_v27 }
  0xcf   :  { %1838 = vmatprep.subr.bf16.mxu0 %v2600_v37  ;;  %1881 = vmatprep.subr.bf16.mxu1 %v2602_v38  ;;  %v2728_v37 = vcombine.high %v226_v32, %v234_v10  ;;  %v2730_v38 = vcombine.high %v227_v33, %v235_v34 }
  0xd2   :  { %1839 = vmatpush1.bf16.msra.mxu0 %v2599_v42  ;;  %1882 = vmatpush1.bf16.msra.mxu1 %v2601_v43  ;;  %v2727_v42 = vcombine.low %v226_v32, %v234_v10  ;;  %v2729_v43 = vcombine.low %v227_v33, %v235_v34  ;;  %v2856_v34 = vmov 0.0  }
  0xd3   :  { %1840 = vmatprep.subr.bf16.mxu0 %v2584_v44  ;;  %1883 = vmatprep.subr.bf16.mxu1 %v2586_v45  ;;  %v2712_v44 = vcombine.high %v210_v56, %v218_v39  ;;  %v2714_v45 = vcombine.high %v211_v40, %v219_v41  ;;  %22 = vst.msk [vmem:[#allocation2] sm:$0xff] %vm21_vm0, %v2856_v34  ;;  %23 = vst.msk [vmem:[#allocation2 + $0x8] sm:$0xff] %vm21_vm0, %v2856_v34 }
  0xd4   :  { %24 = vst.msk [vmem:[#allocation3] sm:$0xff] %vm21_vm0, %v2856_v34  ;;  %25 = vst.msk [vmem:[#allocation3 + $0x8] sm:$0xff] %vm21_vm0, %v2856_v34 }
  0xd6   :  { %1841 = vmatpush1.bf16.msra.mxu0 %v2583_v50  ;;  %1884 = vmatpush1.bf16.msra.mxu1 %v2585_v51  ;;  %v2711_v50 = vcombine.low %v210_v56, %v218_v39  ;;  %v2713_v51 = vcombine.low %v211_v40, %v219_v41 }
  0xd7   :  { %1842 = vmatprep.subr.bf16.mxu0 %v2568_v52  ;;  %1885 = vmatprep.subr.bf16.mxu1 %v2570_v53  ;;  %v2696_v52 = vcombine.high %v194_v46, %v202_v47  ;;  %v2698_v53 = vcombine.high %v195_v48, %v203_v49 }
  0xda   :  { %1843 = vmatpush1.bf16.msra.mxu0 %v2567_v59  ;;  %1886 = vmatpush1.bf16.msra.mxu1 %v2569_v60  ;;  %v2695_v59 = vcombine.low %v194_v46, %v202_v47  ;;  %v2697_v60 = vcombine.low %v195_v48, %v203_v49 }
  0xdb   :  { %1844 = vmatprep.subr.bf16.mxu0 %v2552_v61  ;;  %1887 = vmatprep.subr.bf16.mxu1 %v2554_v62  ;;  %v2680_v61 = vcombine.high %v178_v54, %v186_v55  ;;  %v2682_v62 = vcombine.high %v179_v57, %v187_v58 }
  0xde   :  { %1845 = vmatpush1.bf16.msra.mxu0 %v2551_v3  ;;  %1888 = vmatpush1.bf16.msra.mxu1 %v2553_v4  ;;  %v2679_v3 = vcombine.low %v178_v54, %v186_v55  ;;  %v2681_v4 = vcombine.low %v179_v57, %v187_v58 }
  0xdf   :  { %1846 = vmatprep.subr.bf16.mxu0 %v2536_v5  ;;  %1889 = vmatprep.subr.bf16.mxu1 %v2538_v6  ;;  %v2664_v5 = vcombine.high %v162_v63, %v170_v0  ;;  %v2666_v6 = vcombine.high %v163_v1, %v171_v2 }
  0xe2   :  { %1847 = vmatpush1.bf16.msra.mxu0 %v2535_v12  ;;  %1890 = vmatpush1.bf16.msra.mxu1 %v2537_v13 }
  0xe3   :  { %1848 = vmatprep.subr.bf16.mxu0 %v2776_v14  ;;  %1891 = vmatprep.subr.bf16.mxu1 %v2778_v15 }
  0xe6   :  { %1849 = vmatpush2.bf16.msra.mxu0 %v2775_v20  ;;  %1892 = vmatpush2.bf16.msra.mxu1 %v2777_v21 }
  0xe7   :  { %1850 = vmatprep.subr.bf16.mxu0 %v2760_v22  ;;  %1893 = vmatprep.subr.bf16.mxu1 %v2762_v23 }
  0xea   :  { %1851 = vmatpush2.bf16.msra.mxu0 %v2759_v28  ;;  %1894 = vmatpush2.bf16.msra.mxu1 %v2761_v29 }
  0xeb   :  { %1852 = vmatprep.subr.bf16.mxu0 %v2744_v30  ;;  %1895 = vmatprep.subr.bf16.mxu1 %v2746_v31 }
  0xee   :  { %1853 = vmatpush2.bf16.msra.mxu0 %v2743_v35  ;;  %1896 = vmatpush2.bf16.msra.mxu1 %v2745_v36 }
  0xef   :  { %1854 = vmatprep.subr.bf16.mxu0 %v2728_v37  ;;  %1897 = vmatprep.subr.bf16.mxu1 %v2730_v38 }
  0xf2   :  { %1855 = vmatpush2.bf16.msra.mxu0 %v2727_v42  ;;  %1898 = vmatpush2.bf16.msra.mxu1 %v2729_v43 }
  0xf3   :  { %1856 = vmatprep.subr.bf16.mxu0 %v2712_v44  ;;  %1899 = vmatprep.subr.bf16.mxu1 %v2714_v45 }
  0xf6   :  { %1857 = vmatpush2.bf16.msra.mxu0 %v2711_v50  ;;  %1900 = vmatpush2.bf16.msra.mxu1 %v2713_v51 }
  0xf7   :  { %1858 = vmatprep.subr.bf16.mxu0 %v2696_v52  ;;  %1901 = vmatprep.subr.bf16.mxu1 %v2698_v53 }
  0xfa   :  { %1859 = vmatpush2.bf16.msra.mxu0 %v2695_v59  ;;  %1902 = vmatpush2.bf16.msra.mxu1 %v2697_v60 }
  0xfb   :  { %1860 = vmatprep.subr.bf16.mxu0 %v2680_v61  ;;  %1903 = vmatprep.subr.bf16.mxu1 %v2682_v62 }
  0xfe   :  { %1861 = vmatpush2.bf16.msra.mxu0 %v2679_v3  ;;  %1904 = vmatpush2.bf16.msra.mxu1 %v2681_v4 }
  0xff   :  { %1862 = vmatprep.subr.bf16.mxu0 %v2664_v5  ;;  %1905 = vmatprep.subr.bf16.mxu1 %v2666_v6 }
 0x102   :  { %1863 = vmatpush2.bf16.msra.mxu0 %v2663_v7  ;;  %1906 = vmatpush2.bf16.msra.mxu1 %v2665_v8 }
 0x105   :  { %v1608_v9 = vpop.f32.mrf.mxu0  ;;  %1865 = vmatmul.mubr.bf16.vlgmr.msra.gmra.mxu0 %v2855_v11  ;;  %v1651_v12 = vpop.f32.mrf.mxu1  ;;  %1908 = vmatmul.mubr.bf16.vlgmr.msra.gmra.mxu1 %v2855_v11 }
 0x106   :  { %v1961_v46 = vmul.f32 %v1608_v9, %v1608_v9  ;;  %v1963_v50 = vmul.f32 %v1651_v12, %v1651_v12 }
 0x107   :  { %v1610_v13 = vpop.f32.mrf.mxu0  ;;  %v1653_v15 = vpop.f32.mrf.mxu1 }
 0x108   :  { %v3679_v14 = vpack.c.bf16 %v1610_v13, %v1608_v9  ;;  %v3681_v16 = vpack.c.bf16 %v1653_v15, %v1651_v12  ;;  %v1962_v47 = vmul.f32 %v1610_v13, %v1610_v13  ;;  %v1920_v48 = vadd.f32 %v1610_v13, %v1608_v9 }
 0x109   :  { %v1612_v17 = vpop.f32.mrf.mxu0  ;;  %v1655_v18 = vpop.f32.mrf.mxu1  ;;  %v1964_v57 = vmul.f32 %v1653_v15, %v1653_v15 }
 0x10a   :  { %v1993_v51 = vadd.f32 %v1962_v47, %v1961_v46  ;;  %v1921_v52 = vadd.f32 %v1920_v48, %v1651_v12  ;;  %v1977_v53 = vmul.f32 %v1612_v17, %v1612_v17  ;;  %v1979_v60 = vmul.f32 %v1655_v18, %v1655_v18 }
 0x10b   :  { %v1614_v19 = vpop.f32.mrf.mxu0  ;;  %v1657_v20 = vpop.f32.mrf.mxu1 }
 0x10c   :  { %v3683_v21 = vpack.c.bf16 %v1614_v19, %v1612_v17  ;;  %v3685_v22 = vpack.c.bf16 %v1657_v20, %v1655_v18  ;;  %v1978_v49 = vmul.f32 %v1614_v19, %v1614_v19  ;;  %v1937_v54 = vadd.f32 %v1614_v19, %v1612_v17 }
 0x10d   :  { %v1994_v58 = vadd.f32 %v1993_v51, %v1963_v50  ;;  %v1922_v59 = vadd.f32 %v1921_v52, %v1653_v15  ;;  %v1980_v3 = vmul.f32 %v1657_v20, %v1657_v20 }
 0x10e   :  { %v2010_v55 = vadd.f32 %v1978_v49, %v1977_v53  ;;  %v1938_v61 = vadd.f32 %v1937_v54, %v1655_v18 }
 0x10f   :  { %v1995_v1 = vadd.f32 %v1994_v58, %v1964_v57 }
 0x110   :  { %v2011_v63 = vadd.f32 %v2010_v55, %v1979_v60  ;;  %v1939_v2 = vadd.f32 %v1938_v61, %v1657_v20 }
 0x112   :  { %v2012_v7 = vadd.f32 %v2011_v63, %v1980_v3 }
 0x145   :  { %v1694_v23 = vpop.f32.mrf.mxu0  ;;  %v1737_v24 = vpop.f32.mrf.mxu1 }
 0x146   :  { %v1965_v62 = vmul.f32 %v1694_v23, %v1694_v23  ;;  %v1923_v0 = vadd.f32 %v1922_v59, %v1694_v23  ;;  %v1967_v13 = vmul.f32 %v1737_v24, %v1737_v24 }
 0x147   :  { %v1696_v25 = vpop.f32.mrf.mxu0  ;;  %v1739_v27 = vpop.f32.mrf.mxu1 }
 0x148   :  { %v3687_v26 = vpack.c.bf16 %v1696_v25, %v1694_v23  ;;  %v3689_v28 = vpack.c.bf16 %v1739_v27, %v1737_v24  ;;  %v1996_v5 = vadd.f32 %v1995_v1, %v1965_v62  ;;  %v1966_v6 = vmul.f32 %v1696_v25, %v1696_v25 }
 0x149   :  { %v1698_v29 = vpop.f32.mrf.mxu0  ;;  %v1741_v30 = vpop.f32.mrf.mxu1  ;;  %v1924_v8 = vadd.f32 %v1923_v0, %v1696_v25  ;;  %v1968_v18 = vmul.f32 %v1739_v27, %v1739_v27 }
 0x14a   :  { %v1981_v4 = vmul.f32 %v1698_v29, %v1698_v29  ;;  %v1940_v9 = vadd.f32 %v1939_v2, %v1698_v29  ;;  %v1997_v17 = vadd.f32 %v1996_v5, %v1966_v6  ;;  %v1983_v23 = vmul.f32 %v1741_v30, %v1741_v30 }
 0x14b   :  { %v1700_v31 = vpop.f32.mrf.mxu0  ;;  %v3691_v32 = vpop.f32.mrf.mxu1  ;;  %v1925_v19 = vadd.f32 %v1924_v8, %v1737_v24 }
 0x14c   :  { %v3693_v10 = vpack.c.bf16 %v1700_v31, %v1698_v29  ;;  %v3696_v33 = vpack.c.bf16 %v3691_v32, %v1741_v30  ;;  %v2013_v11 = vadd.f32 %v2012_v7, %v1981_v4  ;;  %v1982_v12 = vmul.f32 %v1700_v31, %v1700_v31 }
 0x14d   :  { %v1941_v15 = vadd.f32 %v1940_v9, %v1700_v31  ;;  %v1998_v46 = vadd.f32 %v1997_v17, %v1967_v13  ;;  %v1926_v47 = vadd.f32 %v1925_v19, %v1739_v27  ;;  %v1984_v25 = vmul.f32 %v3691_v32, %v3691_v32 }
 0x14e   :  { %v2014_v34 = vadd.f32 %v2013_v11, %v1982_v12 }
 0x14f   :  { %v1942_v48 = vadd.f32 %v1941_v15, %v1741_v30  ;;  %v1999_v51 = vadd.f32 %v1998_v46, %v1968_v18 }
 0x150   :  { %v2015_v20 = vadd.f32 %v2014_v34, %v1983_v23 }
 0x151   :  { %v1943_v52 = vadd.f32 %v1942_v48, %v3691_v32 }
 0x152   :  { %v2016_v24 = vadd.f32 %v2015_v20, %v1984_v25 }
 0x185   :  { %v1780_v35 = vpop.f32.mrf.mxu0  ;;  %v3702_v36 = vpop.f32.mrf.mxu1 }
 0x186   :  { %v1969_v49 = vmul.f32 %v1780_v35, %v1780_v35  ;;  %v1927_v50 = vadd.f32 %v1926_v47, %v1780_v35  ;;  %v1971_v27 = vmul.f32 %v3702_v36, %v3702_v36 }
 0x187   :  { %v1782_v37 = vpop.f32.mrf.mxu0  ;;  %v3706_v56 = vpop.f32.mrf.mxu1 }
 0x188   :  { %v3704_v38 = vpack.c.bf16 %v1782_v37, %v1780_v35  ;;  %v3710_v39 = vpack.c.bf16 %v3706_v56, %v3702_v36  ;;  %v2000_v53 = vadd.f32 %v1999_v51, %v1969_v49  ;;  %v1970_v54 = vmul.f32 %v1782_v37, %v1782_v37 }
 0x189   :  { %v1784_v40 = vpop.f32.mrf.mxu0  ;;  %v3712_v41 = vpop.f32.mrf.mxu1  ;;  %v1928_v31 = vadd.f32 %v1927_v50, %v1782_v37  ;;  %v1972_v61 = vmul.f32 %v3706_v56, %v3706_v56 }
 0x18a   :  { %v1985_v29 = vmul.f32 %v1784_v40, %v1784_v40  ;;  %v1944_v55 = vadd.f32 %v1943_v52, %v1784_v40  ;;  %v2001_v30 = vadd.f32 %v2000_v53, %v1970_v54  ;;  %v1987_v37 = vmul.f32 %v3712_v41, %v3712_v41 }
 0x18b   :  { %v1786_v42 = vpop.f32.mrf.mxu0  ;;  %v3714_v43 = vpop.f32.mrf.mxu1  ;;  %v1929_v35 = vadd.f32 %v1928_v31, %v3702_v36 }
 0x18c   :  { %v3716_v44 = vpack.c.bf16 %v1786_v42, %v1784_v40  ;;  %v3720_v45 = vpack.c.bf16 %v3714_v43, %v3712_v41  ;;  %v2017_v57 = vadd.f32 %v2016_v24, %v1985_v29  ;;  %v1986_v58 = vmul.f32 %v1786_v42, %v1786_v42 }
 0x18d   :  { %v1945_v59 = vadd.f32 %v1944_v55, %v1786_v42  ;;  %v2002_v32 = vadd.f32 %v2001_v30, %v1971_v27  ;;  %v1930_v62 = vadd.f32 %v1929_v35, %v3706_v56  ;;  %v1988_v5 = vmul.f32 %v3714_v43, %v3714_v43  ;;  %v1918_v27 = vld [vmem:[#allocation2] sm:$0xff] }
 0x18e   :  { %v2018_v60 = vadd.f32 %v2017_v57, %v1986_v58  ;;  %v2857_v58 = vmov 0  }
 0x18f   :  { %v1946_v40 = vadd.f32 %v1945_v59, %v3712_v41  ;;  %v2003_v4 = vadd.f32 %v2002_v32, %v1972_v61  ;;  %2845 = vset.pattern.permute.xlu0 %v2857_v58  ;;  %2846 = vset.pattern.permute.xlu1 %v2857_v58  ;;  %v1959_v59 = vld [vmem:[#allocation3] sm:$0xff]  ;;  %v2212_v58 = vunpack.c.h.bf16 %v3685_v22 }
 0x190   :  { %v2019_v0 = vadd.f32 %v2018_v60, %v1987_v37  ;;  %v1919_v60 = vld [vmem:[#allocation2 + $0x8] sm:$0xff] }
 0x191   :  { %v1947_v42 = vadd.f32 %v1946_v40, %v3714_v43  ;;  %v1960_v40 = vld [vmem:[#allocation3 + $0x8] sm:$0xff] }
 0x192   :  { %v2020_v12 = vadd.f32 %v2019_v0, %v1988_v5 }
 0x1c5   :  { %v1866_v63 = vpop.f32.mrf.mxu0  ;;  %v1909_v3 = vpop.f32.mrf.mxu1 }
 0x1c6   :  { %v1931_v1 = vadd.f32 %v1930_v62, %v1866_v63  ;;  %v1973_v2 = vmul.f32 %v1866_v63, %v1866_v63  ;;  %v1975_v15 = vmul.f32 %v1909_v3, %v1909_v3 }
 0x1c7   :  { %v1868_v36 = vpop.f32.mrf.mxu0  ;;  %v1911_v56 = vpop.f32.mrf.mxu1 }
 0x1c8   :  { %v1932_v6 = vadd.f32 %v1931_v1, %v1868_v36  ;;  %v3737_v7 = vpack.c.bf16 %v1868_v36, %v1866_v63  ;;  %v2004_v8 = vadd.f32 %v2003_v4, %v1973_v2  ;;  %v1974_v9 = vmul.f32 %v1868_v36, %v1868_v36 }
 0x1c9   :  { %v3739_v11 = vpack.c.bf16 %v1911_v56, %v1909_v3  ;;  %v1870_v41 = vpop.f32.mrf.mxu0  ;;  %v1913_v19 = vpop.f32.mrf.mxu1  ;;  %v1976_v29 = vmul.f32 %v1911_v56, %v1911_v56 }
 0x1ca   :  { %v1948_v13 = vadd.f32 %v1947_v42, %v1870_v41  ;;  %v1989_v17 = vmul.f32 %v1870_v41, %v1870_v41  ;;  %v1933_v18 = vadd.f32 %v1932_v6, %v1909_v3  ;;  %v2005_v50 = vadd.f32 %v2004_v8, %v1974_v9 }
 0x1cb   :  { %v1872_v34 = vpop.f32.mrf.mxu0  ;;  %v1915_v48 = vpop.f32.mrf.mxu1  ;;  %v1991_v51 = vmul.f32 %v1913_v19, %v1913_v19 }
 0x1cc   :  { %v2021_v46 = vadd.f32 %v2020_v12, %v1989_v17  ;;  %v1949_v47 = vadd.f32 %v1948_v13, %v1872_v34  ;;  %v1990_v23 = vmul.f32 %v1872_v34, %v1872_v34  ;;  %v3741_v43 = vpack.c.bf16 %v1872_v34, %v1870_v41 }
 0x1cd   :  { %v3743_v49 = vpack.c.bf16 %v1915_v48, %v1913_v19  ;;  %v1934_v20 = vadd.f32 %v1933_v18, %v1911_v56  ;;  %v2006_v53 = vadd.f32 %v2005_v50, %v1975_v15  ;;  %v1992_v31 = vmul.f32 %v1915_v48, %v1915_v48  ;;  %v2163_v15 = vld [vmem:[%s3947_s2] sm:$0xff] }
 0x1ce   :  { %v2022_v52 = vadd.f32 %v2021_v46, %v1990_v23  ;;  %v1950_v25 = vadd.f32 %v1949_v47, %v1913_v19  ;;  %v2164_v46 = vld [vmem:[%s3947_s2 + $0x8] sm:$0xff] }
 0x1cf   :  { %1935 = vadd.xlane.f32.xlu0 %v1934_v20  ;;  %v2007_v55 = vadd.f32 %v2006_v53, %v1976_v29  ;;  %v2171_v20 = vld [vmem:[%s3948_s3] sm:$0xff]  ;;  %v2193_v29 = vunpack.c.l.bf16 %v3679_v14  ;;  %v2194_v53 = vunpack.c.h.bf16 %v3679_v14  ;;  %v2200_v14 = vunpack.c.h.bf16 %v3689_v28 }
 0x1d0   :  { %v1951_v54 = vadd.f32 %v1950_v25, %v1915_v48  ;;  %v2023_v24 = vadd.f32 %v2022_v52, %v1991_v51  ;;  %v2172_v52 = vld [vmem:[%s3948_s3 + $0x8] sm:$0xff] }
 0x1d1   :  { %2008 = vadd.xlane.f32.xlu1 %v2007_v55  ;;  %v2210_v55 = vunpack.c.h.bf16 %v3683_v21 }
 0x1d2   :  { %v2024_v57 = vadd.f32 %v2023_v24, %v1992_v31  ;;  %v2196_v24 = vunpack.c.h.bf16 %v3681_v16  ;;  %v2209_v31 = vunpack.c.l.bf16 %v3683_v21  ;;  %v2216_v21 = vunpack.c.h.bf16 %v3696_v33 }
 0x1d3   :  { %1952 = vadd.xlane.f32.xlu0 %v1951_v54  ;;  %v2195_v54 = vunpack.c.l.bf16 %v3681_v16  ;;  %v2214_v16 = vunpack.c.h.bf16 %v3693_v10 }
 0x1d5   :  { %2025 = vadd.xlane.f32.xlu1 %v2024_v57  ;;  %v2211_v57 = vunpack.c.l.bf16 %v3685_v22  ;;  %v2202_v22 = vunpack.c.h.bf16 %v3704_v38 }
 0x258   :  { %v1936_v30 = vpop.xlane.xlu0 %1935 }
 0x259   :  { %v1954_v35 = vadd.f32 %v1936_v30, %v1918_v27  ;;  %v2197_v27 = vunpack.c.l.bf16 %v3687_v26  ;;  %v2198_v30 = vunpack.c.h.bf16 %v3687_v26  ;;  %v2204_v26 = vunpack.c.h.bf16 %v3710_v39 }
 0x25a   :  { %v2009_v61 = vpop.xlane.xlu1 %2008 }
 0x25b   :  { %1957 = vst.msk [vmem:[#allocation2] sm:$0xff] %vm21_vm0, %v1954_v35  ;;  %v2027_v62 = vadd.f32 %v2009_v61, %v1959_v59  ;;  %v2199_v35 = vunpack.c.l.bf16 %v3689_v28  ;;  %v2213_v59 = vunpack.c.l.bf16 %v3693_v10  ;;  %v2201_v61 = vunpack.c.l.bf16 %v3704_v38 }
 0x25c   :  { %v1953_v32 = vpop.xlane.xlu0 %1952  ;;  %v2218_v28 = vunpack.c.h.bf16 %v3716_v44  ;;  %v2220_v10 = vunpack.c.h.bf16 %v3720_v45  ;;  %v2208_v38 = vunpack.c.h.bf16 %v3739_v11 }
 0x25d   :  { %v1955_v37 = vadd.f32 %v1953_v32, %v1919_v60  ;;  %2029 = vst.msk [vmem:[#allocation3] sm:$0xff] %vm21_vm0, %v2027_v62  ;;  %v2215_v60 = vunpack.c.l.bf16 %v3696_v33  ;;  %v2203_v32 = vunpack.c.l.bf16 %v3710_v39  ;;  %v2217_v62 = vunpack.c.l.bf16 %v3716_v44 }
 0x25e   :  { %v2026_v63 = vpop.xlane.xlu1 %2025  ;;  %v2206_v33 = vunpack.c.h.bf16 %v3737_v7  ;;  %v2222_v39 = vunpack.c.h.bf16 %v3741_v43  ;;  %v2224_v44 = vunpack.c.h.bf16 %v3743_v49 }
 0x25f   :  { %1958 = vst.msk [vmem:[#allocation2 + $0x8] sm:$0xff] %vm21_vm0, %v1955_v37  ;;  %v2028_v0 = vadd.f32 %v2026_v63, %v1960_v40  ;;  %v2219_v37 = vunpack.c.l.bf16 %v3720_v45  ;;  %v2205_v40 = vunpack.c.l.bf16 %v3737_v7  ;;  %v2207_v63 = vunpack.c.l.bf16 %v3739_v11 }
 0x261   :  { %2030 = vst.msk [vmem:[#allocation3 + $0x8] sm:$0xff] %vm21_vm0, %v2028_v0  ;;  %v2221_v0 = vunpack.c.l.bf16 %v3741_v43 }
 0x262   :  { %v2149_v1 = vld [vmem:[#allocation2] sm:$0xff] }
 0x263   :  { %v2151_v2 = vmul.f32 0.00048828125, %v2149_v1  ;;  %v2223_v1 = vunpack.c.l.bf16 %v3743_v49 }
 0x264   :  { %v2153_v4 = vld [vmem:[#allocation3] sm:$0xff] }
 0x265   :  { %v2157_v3 = vmul.f32 %v2151_v2, %v2151_v2  ;;  %v2155_v42 = vmul.f32 0.00048828125, %v2153_v4 }
 0x266   :  { %v2150_v36 = vld [vmem:[#allocation2 + $0x8] sm:$0xff] }
 0x267   :  { %v2152_v5 = vmul.f32 0.00048828125, %v2150_v36  ;;  %v2159_v6 = vsub.f32 %v2155_v42, %v2157_v3 }
 0x268   :  { %v2154_v8 = vld [vmem:[#allocation3 + $0x8] sm:$0xff] }
 0x269   :  { %v2158_v56 = vmul.f32 %v2152_v5, %v2152_v5  ;;  %v2161_v9 = vmax.f32 %v2159_v6, 0.0  ;;  %v2156_v41 = vmul.f32 0.00048828125, %v2154_v8 }
 0x26b   :  { %v2165_v12 = vadd.f32 1e-05, %v2161_v9  ;;  %v2160_v13 = vsub.f32 %v2156_v41, %v2158_v56 }
 0x26d   :  { %2850 = vrsqrt.f32 %v2165_v12  ;;  %v2162_v17 = vmax.f32 %v2160_v13, 0.0 }
 0x26f   :  { %v2166_v19 = vadd.f32 1e-05, %v2162_v17 }
 0x271   :  { %2852 = vrsqrt.f32 %v2166_v19 }
 0x27a   :  { %v2851_v34 = vpop.eup %2850 }
 0x27b   :  { %v2169_v18 = vmul.f32 %v2851_v34, %v2163_v15 }
 0x27d   :  { %2227 = vperm.xlu0 %2845, %v2169_v18   ;;  %v2173_v48 = vmul.f32 %v2169_v18, %v2151_v2 }
 0x27e   :  { %v2853_v47 = vpop.eup %2852 }
 0x27f   :  { %v2170_v23 = vmul.f32 %v2853_v47, %v2164_v46  ;;  %v2175_v50 = vsub.f32 %v2171_v20, %v2173_v48 }
 0x281   :  { %2232 = vperm.xlu1 %2846, %v2170_v23   ;;  %v2174_v51 = vmul.f32 %v2170_v23, %v2152_v5 }
 0x283   :  { %v2176_v25 = vsub.f32 %v2172_v52, %v2174_v51 }
 0x285   :  { %2269 = vperm.xlu1 %2846, %v2175_v50  }
 0x289   :  { %2274 = vperm.xlu1 %2846, %v2176_v25  }
 0x2f8   :  { %v2228_v2 = vpop.permute.xlu0 %2227 }
 0x2f9   :  { %v2235_v3 = vmul.f32 %v2228_v2, %v2193_v29  ;;  %v2236_v4 = vmul.f32 %v2228_v2, %v2194_v53  ;;  %v2237_v45 = vmul.f32 %v2228_v2, %v2195_v54  ;;  %v2238_v36 = vmul.f32 %v2228_v2, %v2196_v24 }
 0x2fa   :  { %v2239_v42 = vmul.f32 %v2228_v2, %v2197_v27  ;;  %v2240_v5 = vmul.f32 %v2228_v2, %v2198_v30  ;;  %v2241_v7 = vmul.f32 %v2228_v2, %v2199_v35  ;;  %v2242_v6 = vmul.f32 %v2228_v2, %v2200_v14 }
 0x2fb   :  { %v2243_v56 = vmul.f32 %v2228_v2, %v2201_v61  ;;  %v2244_v8 = vmul.f32 %v2228_v2, %v2202_v22  ;;  %v2245_v11 = vmul.f32 %v2228_v2, %v2203_v32  ;;  %v2246_v9 = vmul.f32 %v2228_v2, %v2204_v26 }
 0x2fc   :  { %v2247_v41 = vmul.f32 %v2228_v2, %v2205_v40  ;;  %v2248_v12 = vmul.f32 %v2228_v2, %v2206_v33  ;;  %v2249_v43 = vmul.f32 %v2228_v2, %v2207_v63  ;;  %v2250_v13 = vmul.f32 %v2228_v2, %v2208_v38  ;;  %v2233_v17 = vpop.permute.xlu1 %2232 }
 0x2fd   :  { %v2251_v19 = vmul.f32 %v2233_v17, %v2209_v31  ;;  %v2252_v49 = vmul.f32 %v2233_v17, %v2210_v55  ;;  %v3793_v15 = vmul.f32 %v2233_v17, %v2211_v57  ;;  %v3795_v34 = vmul.f32 %v2233_v17, %v2212_v58 }
 0x2fe   :  { %v3797_v18 = vmul.f32 %v2233_v17, %v2213_v59  ;;  %v3799_v46 = vmul.f32 %v2233_v17, %v2214_v16  ;;  %v3801_v47 = vmul.f32 %v2233_v17, %v2215_v60  ;;  %v3803_v23 = vmul.f32 %v2233_v17, %v2216_v21 }
 0x2ff   :  { %v3805_v48 = vmul.f32 %v2233_v17, %v2217_v62  ;;  %v3807_v20 = vmul.f32 %v2233_v17, %v2218_v28  ;;  %v3809_v50 = vmul.f32 %v2233_v17, %v2219_v37  ;;  %v3811_v51 = vmul.f32 %v2233_v17, %v2220_v10 }
 0x300   :  { %v2270_v52 = vpop.permute.xlu1 %2269  ;;  %v3813_v25 = vmul.f32 %v2233_v17, %v2221_v0  ;;  %v3815_v29 = vmul.f32 %v2233_v17, %v2222_v39  ;;  %v3817_v53 = vmul.f32 %v2233_v17, %v2223_v1  ;;  %v3819_v54 = vmul.f32 %v2233_v17, %v2224_v44 }
 0x301   :  { %v2277_v24 = vadd.f32 %v2270_v52, %v2235_v3  ;;  %v2278_v31 = vadd.f32 %v2270_v52, %v2236_v4  ;;  %v2279_v55 = vadd.f32 %v2270_v52, %v2237_v45  ;;  %v2280_v57 = vadd.f32 %v2270_v52, %v2238_v36 }
 0x302   :  { %v2281_v58 = vadd.f32 %v2270_v52, %v2239_v42  ;;  %v2282_v27 = vadd.f32 %v2270_v52, %v2240_v5  ;;  %v2283_v30 = vadd.f32 %v2270_v52, %v2241_v7  ;;  %v2284_v35 = vadd.f32 %v2270_v52, %v2242_v6 }
 0x303   :  { %v2285_v14 = vadd.f32 %v2270_v52, %v2243_v56  ;;  %v2286_v59 = vadd.f32 %v2270_v52, %v2244_v8  ;;  %v2287_v16 = vadd.f32 %v2270_v52, %v2245_v11  ;;  %v2288_v60 = vadd.f32 %v2270_v52, %v2246_v9 }
 0x304   :  { %v2289_v21 = vadd.f32 %v2270_v52, %v2247_v41  ;;  %v2290_v61 = vadd.f32 %v2270_v52, %v2248_v12  ;;  %v2291_v22 = vadd.f32 %v2270_v52, %v2249_v43  ;;  %v2292_v32 = vadd.f32 %v2270_v52, %v2250_v13  ;;  %v3821_v26 = vpop.permute.xlu1 %2274 }
 0x305   :  { %vm2309_vm1 = vcmp.gt.f32.partialorder %v2277_v24, 0.0  ;;  %vm2310_vm2 = vcmp.gt.f32.partialorder %v2278_v31, 0.0  ;;  %vm2311_vm3 = vcmp.gt.f32.partialorder %v2279_v55, 0.0  ;;  %vm2312_vm4 = vcmp.gt.f32.partialorder %v2280_v57, 0.0 }
 0x306   :  { %vm2313_vm5 = vcmp.gt.f32.partialorder %v2281_v58, 0.0  ;;  %vm2314_vm6 = vcmp.gt.f32.partialorder %v2282_v27, 0.0  ;;  %vm2315_vm7 = vcmp.gt.f32.partialorder %v2283_v30, 0.0  ;;  %vm2316_vm8 = vcmp.gt.f32.partialorder %v2284_v35, 0.0 }
 0x307   :  { %vm2317_vm9 = vcmp.gt.f32.partialorder %v2285_v14, 0.0  ;;  %vm2318_vm10 = vcmp.gt.f32.partialorder %v2286_v59, 0.0  ;;  %vm2319_vm11 = vcmp.gt.f32.partialorder %v2287_v16, 0.0  ;;  %vm2320_vm12 = vcmp.gt.f32.partialorder %v2288_v60, 0.0 }
 0x308   :  { %vm2321_vm13 = vcmp.gt.f32.partialorder %v2289_v21, 0.0  ;;  %vm2322_vm14 = vcmp.gt.f32.partialorder %v2290_v61, 0.0  ;;  %vm2323_vm15 = vcmp.gt.f32.partialorder %v2291_v22, 0.0  ;;  %vm2324_vm0 = vcmp.gt.f32.partialorder %v2292_v32, 0.0 }
 0x309   :  { %v2341_v62 = vmul.f32 0.2, %v2277_v24  ;;  %v2342_v28 = vmul.f32 0.2, %v2278_v31  ;;  %v2343_v37 = vmul.f32 0.2, %v2279_v55  ;;  %v3824_v10 = vadd.f32 %v3821_v26, %v2251_v19 }
 0x30a   :  { %v2344_v40 = vmul.f32 0.2, %v2280_v57  ;;  %v2345_v33 = vmul.f32 0.2, %v2281_v58  ;;  %v2346_v63 = vmul.f32 0.2, %v2282_v27  ;;  %v3827_v38 = vadd.f32 %v3821_v26, %v2252_v49 }
 0x30b   :  { %v2347_v0 = vmul.f32 0.2, %v2283_v30  ;;  %v2348_v39 = vmul.f32 0.2, %v2284_v35  ;;  %v2349_v1 = vmul.f32 0.2, %v2285_v14  ;;  %v2373_v44 = vsel %vm2309_vm1, %v2277_v24, %v2341_v62 }
 0x30c   :  { %v2350_v2 = vmul.f32 0.2, %v2286_v59  ;;  %v2351_v3 = vmul.f32 0.2, %v2287_v16  ;;  %v2352_v4 = vmul.f32 0.2, %v2288_v60  ;;  %v2374_v45 = vsel %vm2310_vm2, %v2278_v31, %v2342_v28 }
 0x30d   :  { %v2353_v36 = vmul.f32 0.2, %v2289_v21  ;;  %v2354_v42 = vmul.f32 0.2, %v2290_v61  ;;  %v2355_v5 = vmul.f32 0.2, %v2291_v22  ;;  %v2375_v7 = vsel %vm2311_vm3, %v2279_v55, %v2343_v37 }
 0x30e   :  { %v2356_v6 = vmul.f32 0.2, %v2292_v32  ;;  %v2376_v56 = vsel %vm2312_vm4, %v2280_v57, %v2344_v40  ;;  %v2377_v8 = vsel %vm2313_vm5, %v2281_v58, %v2345_v33  ;;  %v2378_v11 = vsel %vm2314_vm6, %v2282_v27, %v2346_v63 }
 0x30f   :  { %v2379_v9 = vsel %vm2315_vm7, %v2283_v30, %v2347_v0  ;;  %v2380_v41 = vsel %vm2316_vm8, %v2284_v35, %v2348_v39  ;;  %v2381_v12 = vsel %vm2317_vm9, %v2285_v14, %v2349_v1  ;;  %v2382_v43 = vsel %vm2318_vm10, %v2286_v59, %v2350_v2 }
 0x310   :  { %v2383_v13 = vsel %vm2319_vm11, %v2287_v16, %v2351_v3  ;;  %v2384_v17 = vsel %vm2320_vm12, %v2288_v60, %v2352_v4  ;;  %v2385_v19 = vsel %vm2321_vm13, %v2289_v21, %v2353_v36  ;;  %v2386_v49 = vsel %vm2322_vm14, %v2290_v61, %v2354_v42 }
 0x311   :  { %v2387_v52 = vsel %vm2323_vm15, %v2291_v22, %v2355_v5  ;;  %v2388_v24 = vsel %vm2324_vm0, %v2292_v32, %v2356_v6  ;;  %v2827_v31 = vpack.c.bf16 %v2374_v45, %v2373_v44  ;;  %v2828_v55 = vpack.c.bf16 %v2376_v56, %v2375_v7 }
 0x312   :  { %v2829_v57 = vpack.c.bf16 %v2378_v11, %v2377_v8  ;;  %v2830_v58 = vpack.c.bf16 %v2380_v41, %v2379_v9  ;;  %v2831_v27 = vpack.c.bf16 %v2382_v43, %v2381_v12  ;;  %v2832_v30 = vpack.c.bf16 %v2384_v17, %v2383_v13 }
 0x313   :  { %v2833_v35 = vpack.c.bf16 %v2386_v49, %v2385_v19  ;;  %v2834_v14 = vpack.c.bf16 %v2388_v24, %v2387_v52  ;;  %2501 = vst [vmem:[%s3949_s4] sm:$0xff] %v2827_v31  ;;  %2502 = vst [vmem:[%s3949_s4 + $0x8] sm:$0xff] %v2828_v55  ;;  %v2295_v59 = vadd.f32 %v3821_v26, %v3793_v15  ;;  %vm2325_vm1 = vcmp.gt.f32.partialorder %v3824_v10, 0.0 }
 0x314   :  { %v2296_v16 = vadd.f32 %v3821_v26, %v3795_v34  ;;  %2503 = vst [vmem:[%s3949_s4 + $0x10] sm:$0xff] %v2829_v57  ;;  %2504 = vst [vmem:[%s3949_s4 + $0x18] sm:$0xff] %v2830_v58  ;;  %v2297_v15 = vadd.f32 %v3821_v26, %v3797_v18  ;;  %v2298_v34 = vadd.f32 %v3821_v26, %v3799_v46  ;;  %vm2326_vm2 = vcmp.gt.f32.partialorder %v3827_v38, 0.0 }
 0x315   :  { %2505 = vst [vmem:[%s3949_s4 + $0x20] sm:$0xff] %v2831_v27  ;;  %2506 = vst [vmem:[%s3949_s4 + $0x28] sm:$0xff] %v2832_v30  ;;  %v2299_v60 = vadd.f32 %v3821_v26, %v3801_v47  ;;  %v2300_v21 = vadd.f32 %v3821_v26, %v3803_v23  ;;  %v2301_v18 = vadd.f32 %v3821_v26, %v3805_v48  ;;  %vm2327_vm3 = vcmp.gt.f32.partialorder %v2295_v59, 0.0 }
 0x316   :  { %2507 = vst [vmem:[%s3949_s4 + $0x30] sm:$0xff] %v2833_v35  ;;  %2508 = vst [vmem:[%s3949_s4 + $0x38] sm:$0xff] %v2834_v14  ;;  %v2302_v46 = vadd.f32 %v3821_v26, %v3807_v20  ;;  %v2303_v47 = vadd.f32 %v3821_v26, %v3809_v50  ;;  %v2304_v23 = vadd.f32 %v3821_v26, %v3811_v51  ;;  %vm2328_vm4 = vcmp.gt.f32.partialorder %v2296_v16, 0.0 }
 0x317   :  { %v2305_v61 = vadd.f32 %v3821_v26, %v3813_v25  ;;  %v2306_v22 = vadd.f32 %v3821_v26, %v3815_v29  ;;  %v2307_v32 = vadd.f32 %v3821_v26, %v3817_v53  ;;  %v2308_v48 = vadd.f32 %v3821_v26, %v3819_v54 }
 0x318   :  { %vm2329_vm5 = vcmp.gt.f32.partialorder %v2297_v15, 0.0  ;;  %vm2330_vm6 = vcmp.gt.f32.partialorder %v2298_v34, 0.0  ;;  %vm2331_vm7 = vcmp.gt.f32.partialorder %v2299_v60, 0.0  ;;  %vm2332_vm8 = vcmp.gt.f32.partialorder %v2300_v21, 0.0 }
 0x319   :  { %vm2333_vm9 = vcmp.gt.f32.partialorder %v2301_v18, 0.0  ;;  %vm2334_vm10 = vcmp.gt.f32.partialorder %v2302_v46, 0.0  ;;  %vm2335_vm11 = vcmp.gt.f32.partialorder %v2303_v47, 0.0  ;;  %vm2336_vm12 = vcmp.gt.f32.partialorder %v2304_v23, 0.0 }
 0x31a   :  { %vm2337_vm13 = vcmp.gt.f32.partialorder %v2305_v61, 0.0  ;;  %vm2338_vm14 = vcmp.gt.f32.partialorder %v2306_v22, 0.0  ;;  %vm2339_vm15 = vcmp.gt.f32.partialorder %v2307_v32, 0.0  ;;  %vm2340_vm0 = vcmp.gt.f32.partialorder %v2308_v48, 0.0 }
 0x31b   :  { %v2357_v20 = vmul.f32 0.2, %v3824_v10  ;;  %v2358_v50 = vmul.f32 0.2, %v3827_v38  ;;  %v2359_v51 = vmul.f32 0.2, %v2295_v59 }
 0x31c   :  { %v2360_v25 = vmul.f32 0.2, %v2296_v16  ;;  %v2361_v29 = vmul.f32 0.2, %v2297_v15  ;;  %v2362_v53 = vmul.f32 0.2, %v2298_v34 }
 0x31d   :  { %v2363_v54 = vmul.f32 0.2, %v2299_v60  ;;  %v2364_v26 = vmul.f32 0.2, %v2300_v21  ;;  %v2365_v62 = vmul.f32 0.2, %v2301_v18  ;;  %v2389_v28 = vsel %vm2325_vm1, %v3824_v10, %v2357_v20 }
 0x31e   :  { %v2366_v37 = vmul.f32 0.2, %v2302_v46  ;;  %v2367_v40 = vmul.f32 0.2, %v2303_v47  ;;  %v2368_v33 = vmul.f32 0.2, %v2304_v23  ;;  %v2390_v63 = vsel %vm2326_vm2, %v3827_v38, %v2358_v50 }
 0x31f   :  { %v2369_v0 = vmul.f32 0.2, %v2305_v61  ;;  %v2370_v39 = vmul.f32 0.2, %v2306_v22  ;;  %v2371_v1 = vmul.f32 0.2, %v2307_v32  ;;  %v2391_v44 = vsel %vm2327_vm3, %v2295_v59, %v2359_v51 }
 0x320   :  { %v2372_v2 = vmul.f32 0.2, %v2308_v48  ;;  %v2392_v3 = vsel %vm2328_vm4, %v2296_v16, %v2360_v25  ;;  %v2393_v4 = vsel %vm2329_vm5, %v2297_v15, %v2361_v29  ;;  %v2394_v45 = vsel %vm2330_vm6, %v2298_v34, %v2362_v53 }
 0x321   :  { %v2395_v10 = vsel %vm2331_vm7, %v2299_v60, %v2363_v54  ;;  %v2396_v36 = vsel %vm2332_vm8, %v2300_v21, %v2364_v26  ;;  %v2397_v42 = vsel %vm2333_vm9, %v2301_v18, %v2365_v62  ;;  %v2398_v38 = vsel %vm2334_vm10, %v2302_v46, %v2366_v37 }
 0x322   :  { %v2399_v5 = vsel %vm2335_vm11, %v2303_v47, %v2367_v40  ;;  %v2400_v7 = vsel %vm2336_vm12, %v2304_v23, %v2368_v33  ;;  %v2401_v6 = vsel %vm2337_vm13, %v2305_v61, %v2369_v0  ;;  %v2402_v56 = vsel %vm2338_vm14, %v2306_v22, %v2370_v39 }
 0x323   :  { %v2403_v8 = vsel %vm2339_vm15, %v2307_v32, %v2371_v1  ;;  %v2404_v11 = vsel %vm2340_vm0, %v2308_v48, %v2372_v2  ;;  %v2835_v9 = vpack.c.bf16 %v2390_v63, %v2389_v28  ;;  %v2836_v41 = vpack.c.bf16 %v2392_v3, %v2391_v44 }
 0x324   :  { %v2837_v12 = vpack.c.bf16 %v2394_v45, %v2393_v4  ;;  %v2838_v43 = vpack.c.bf16 %v2396_v36, %v2395_v10  ;;  %v2839_v13 = vpack.c.bf16 %v2398_v38, %v2397_v42  ;;  %v2840_v17 = vpack.c.bf16 %v2400_v7, %v2399_v5 }
 0x325   :  { %v2841_v19 = vpack.c.bf16 %v2402_v56, %v2401_v6  ;;  %v2842_v49 = vpack.c.bf16 %v2404_v11, %v2403_v8  ;;  %2509 = vst [vmem:[%s3949_s4 + $0x40] sm:$0xff] %v2835_v9  ;;  %2510 = vst [vmem:[%s3949_s4 + $0x48] sm:$0xff] %v2836_v41 }
 0x326   :  { %2511 = vst [vmem:[%s3949_s4 + $0x50] sm:$0xff] %v2837_v12  ;;  %2512 = vst [vmem:[%s3949_s4 + $0x58] sm:$0xff] %v2838_v43 }
 0x327   :  { %2513 = vst [vmem:[%s3949_s4 + $0x60] sm:$0xff] %v2839_v13  ;;  %2514 = vst [vmem:[%s3949_s4 + $0x68] sm:$0xff] %v2840_v17 }
 0x328   :  { %2515 = vst [vmem:[%s3949_s4 + $0x70] sm:$0xff] %v2841_v19  ;;  %2516 = vst [vmem:[%s3949_s4 + $0x78] sm:$0xff] %v2842_v49 }

// kernel: discriminator_forward.7
= control target key start
LH: loop header
LB: loop body
LE: loop exit
PB: predicated region body
PF: predicated region fallthrough
CT: control target
= control target key end

     0   :  { %vm21_vm0 = vcmask 7168   ;;  %s1490_s0 = inlined_call_operand.vmem [shape: bf16[256,512], index: 0, kind: input, shape index: {}]   ;;  %s1491_s1 = inlined_call_operand.vmem [shape: bf16[32,256], index: 1, kind: input, shape index: {}]   ;;  %s1492_s2 = inlined_call_operand.vmem [shape: f32[32,1], index: 2, kind: input, shape index: {}]   ;;  %s1493_s3 = inlined_call_operand.vmem [shape: f32[32,1], index: 3, kind: input, shape index: {}]   ;;  %s1494_s4 = inlined_call_operand.vmem [shape: bf16[1,32,512], index: 4, kind: output, shape index: {}]  }
   0x1   :  { %v1051_v0 = vld [vmem:[%s1490_s0 + $0xe4] ss:$16 sps:$4 sm:$0xff]   ;;  %v1053_v1 = vld [vmem:[%s1490_s0 + $0xec] ss:$16 sps:$4 sm:$0xff]   ;;  %v1055_v2 = vld [vmem:[%s1490_s0 + $0xe0] ss:$16 sps:$4 sm:$0xff]  }
   0x2   :  { %438 = vmatprep.subr.bf16.mxu0 %v1051_v0  ;;  %v1056_v3 = vld [vmem:[%s1490_s0 + $0xe8] ss:$16 sps:$4 sm:$0xff]   ;;  %491 = vmatprep.subr.bf16.mxu1 %v1053_v1  ;;  %v1057_v4 = vld [vmem:[%s1490_s0 + $0xc4] ss:$16 sps:$4 sm:$0xff]   ;;  %v1059_v5 = vld [vmem:[%s1490_s0 + $0xcc] ss:$16 sps:$4 sm:$0xff]  }
   0x3   :  { %439 = vmatpush1.bf16.msra.mxu0 %v1055_v2  ;;  %492 = vmatpush1.bf16.msra.mxu1 %v1056_v3  ;;  %v1061_v6 = vld [vmem:[%s1490_s0 + $0xc0] ss:$16 sps:$4 sm:$0xff]   ;;  %v1062_v7 = vld [vmem:[%s1490_s0 + $0xc8] ss:$16 sps:$4 sm:$0xff]   ;;  %v1063_v8 = vld [vmem:[%s1490_s0 + $0xa4] ss:$16 sps:$4 sm:$0xff]  }
   0x4   :  { %440 = vmatprep.subr.bf16.mxu0 %v1057_v4  ;;  %493 = vmatprep.subr.bf16.mxu1 %v1059_v5  ;;  %v1065_v9 = vld [vmem:[%s1490_s0 + $0xac] ss:$16 sps:$4 sm:$0xff]   ;;  %v1067_v10 = vld [vmem:[%s1490_s0 + $0xa0] ss:$16 sps:$4 sm:$0xff]   ;;  %v1068_v11 = vld [vmem:[%s1490_s0 + $0xa8] ss:$16 sps:$4 sm:$0xff]  }
   0x5   :  { %v1069_v12 = vld [vmem:[%s1490_s0 + $0x84] ss:$16 sps:$4 sm:$0xff]   ;;  %v1071_v13 = vld [vmem:[%s1490_s0 + $0x8c] ss:$16 sps:$4 sm:$0xff]   ;;  %v1073_v14 = vld [vmem:[%s1490_s0 + $0x80] ss:$16 sps:$4 sm:$0xff]  }
   0x6   :  { %v1074_v15 = vld [vmem:[%s1490_s0 + $0x88] ss:$16 sps:$4 sm:$0xff]   ;;  %v1075_v16 = vld [vmem:[%s1490_s0 + $0x64] ss:$16 sps:$4 sm:$0xff]   ;;  %v1077_v17 = vld [vmem:[%s1490_s0 + $0x6c] ss:$16 sps:$4 sm:$0xff]  }
   0x7   :  { %441 = vmatpush1.bf16.msra.mxu0 %v1061_v6  ;;  %494 = vmatpush1.bf16.msra.mxu1 %v1062_v7  ;;  %v1079_v18 = vld [vmem:[%s1490_s0 + $0x60] ss:$16 sps:$4 sm:$0xff]   ;;  %v1080_v19 = vld [vmem:[%s1490_s0 + $0x68] ss:$16 sps:$4 sm:$0xff]   ;;  %v1081_v20 = vld [vmem:[%s1490_s0 + $0x44] ss:$16 sps:$4 sm:$0xff]  }
   0x8   :  { %442 = vmatprep.subr.bf16.mxu0 %v1063_v8  ;;  %495 = vmatprep.subr.bf16.mxu1 %v1065_v9  ;;  %v1083_v21 = vld [vmem:[%s1490_s0 + $0x4c] ss:$16 sps:$4 sm:$0xff]   ;;  %v1085_v22 = vld [vmem:[%s1490_s0 + $0x40] ss:$16 sps:$4 sm:$0xff]   ;;  %v1086_v23 = vld [vmem:[%s1490_s0 + $0x48] ss:$16 sps:$4 sm:$0xff]  }
   0x9   :  { %v1087_v24 = vld [vmem:[%s1490_s0 + $0x24] ss:$16 sps:$4 sm:$0xff]   ;;  %v1089_v25 = vld [vmem:[%s1490_s0 + $0x2c] ss:$16 sps:$4 sm:$0xff]   ;;  %v1091_v26 = vld [vmem:[%s1490_s0 + $0x20] ss:$16 sps:$4 sm:$0xff]  }
   0xa   :  { %v1092_v27 = vld [vmem:[%s1490_s0 + $0x28] ss:$16 sps:$4 sm:$0xff]   ;;  %v1093_v28 = vld [vmem:[%s1490_s0 + $0x4] ss:$16 sps:$4 sm:$0xff]   ;;  %v1095_v29 = vld [vmem:[%s1490_s0 + $0xc] ss:$16 sps:$4 sm:$0xff]  }
   0xb   :  { %443 = vmatpush1.bf16.msra.mxu0 %v1067_v10  ;;  %496 = vmatpush1.bf16.msra.mxu1 %v1068_v11  ;;  %v1097_v30 = vld [vmem:[%s1490_s0] ss:$16 sps:$4 sm:$0xff]   ;;  %v1098_v31 = vld [vmem:[%s1490_s0 + $0x8] ss:$16 sps:$4 sm:$0xff]   ;;  %v1099_v32 = vld [vmem:[%s1490_s0 + $0x1e4] ss:$16 sps:$4 sm:$0xff]  }
   0xc   :  { %444 = vmatprep.subr.bf16.mxu0 %v1069_v12  ;;  %497 = vmatprep.subr.bf16.mxu1 %v1071_v13  ;;  %v1101_v33 = vld [vmem:[%s1490_s0 + $0x1ec] ss:$16 sps:$4 sm:$0xff]   ;;  %v1103_v34 = vld [vmem:[%s1490_s0 + $0x1e0] ss:$16 sps:$4 sm:$0xff]   ;;  %v1104_v35 = vld [vmem:[%s1490_s0 + $0x1e8] ss:$16 sps:$4 sm:$0xff]  }
   0xd   :  { %v1105_v36 = vld [vmem:[%s1490_s0 + $0x1c4] ss:$16 sps:$4 sm:$0xff]   ;;  %v1107_v37 = vld [vmem:[%s1490_s0 + $0x1cc] ss:$16 sps:$4 sm:$0xff]   ;;  %v1109_v38 = vld [vmem:[%s1490_s0 + $0x1c0] ss:$16 sps:$4 sm:$0xff]  }
   0xe   :  { %v1110_v39 = vld [vmem:[%s1490_s0 + $0x1c8] ss:$16 sps:$4 sm:$0xff]   ;;  %v1111_v40 = vld [vmem:[%s1490_s0 + $0x1a4] ss:$16 sps:$4 sm:$0xff]   ;;  %v1113_v41 = vld [vmem:[%s1490_s0 + $0x1ac] ss:$16 sps:$4 sm:$0xff]  }
   0xf   :  { %445 = vmatpush1.bf16.msra.mxu0 %v1073_v14  ;;  %498 = vmatpush1.bf16.msra.mxu1 %v1074_v15  ;;  %v1115_v42 = vld [vmem:[%s1490_s0 + $0x1a0] ss:$16 sps:$4 sm:$0xff]   ;;  %v1116_v43 = vld [vmem:[%s1490_s0 + $0x1a8] ss:$16 sps:$4 sm:$0xff]   ;;  %v1117_v44 = vld [vmem:[%s1490_s0 + $0x184] ss:$16 sps:$4 sm:$0xff]  }
  0x10   :  { %446 = vmatprep.subr.bf16.mxu0 %v1075_v16  ;;  %499 = vmatprep.subr.bf16.mxu1 %v1077_v17  ;;  %v1119_v45 = vld [vmem:[%s1490_s0 + $0x18c] ss:$16 sps:$4 sm:$0xff]   ;;  %v1121_v46 = vld [vmem:[%s1490_s0 + $0x180] ss:$16 sps:$4 sm:$0xff]   ;;  %v1122_v48 = vld [vmem:[%s1490_s0 + $0x188] ss:$16 sps:$4 sm:$0xff]  }
  0x11   :  { %v1149_v47 = vld [vmem:[%s1491_s1 + $0x4] ss:$8 sps:$4 sm:$0xff]   ;;  %v1127_v51 = vld [vmem:[%s1490_s0 + $0x160] ss:$16 sps:$4 sm:$0xff]   ;;  %v1128_v52 = vld [vmem:[%s1490_s0 + $0x168] ss:$16 sps:$4 sm:$0xff]  }
  0x12   :  { %v1123_v49 = vld [vmem:[%s1490_s0 + $0x164] ss:$16 sps:$4 sm:$0xff]   ;;  %v1125_v50 = vld [vmem:[%s1490_s0 + $0x16c] ss:$16 sps:$4 sm:$0xff]   ;;  %470 = vmatprep.mubr.bf16.mxu0 %v1149_v47  ;;  %523 = vmatprep.mubr.bf16.mxu1 %v1149_v47  ;;  %v1133_v55 = vld [vmem:[%s1490_s0 + $0x140] ss:$16 sps:$4 sm:$0xff]  }
  0x13   :  { %447 = vmatpush1.bf16.msra.mxu0 %v1079_v18  ;;  %500 = vmatpush1.bf16.msra.mxu1 %v1080_v19  ;;  %v1129_v53 = vld [vmem:[%s1490_s0 + $0x144] ss:$16 sps:$4 sm:$0xff]   ;;  %v1131_v54 = vld [vmem:[%s1490_s0 + $0x14c] ss:$16 sps:$4 sm:$0xff]   ;;  %v1134_v56 = vld [vmem:[%s1490_s0 + $0x148] ss:$16 sps:$4 sm:$0xff]  }
  0x14   :  { %448 = vmatprep.subr.bf16.mxu0 %v1081_v20  ;;  %501 = vmatprep.subr.bf16.mxu1 %v1083_v21  ;;  %v1135_v57 = vld [vmem:[%s1490_s0 + $0x124] ss:$16 sps:$4 sm:$0xff]   ;;  %v1137_v58 = vld [vmem:[%s1490_s0 + $0x12c] ss:$16 sps:$4 sm:$0xff]   ;;  %v1139_v59 = vld [vmem:[%s1490_s0 + $0x120] ss:$16 sps:$4 sm:$0xff]  }
  0x15   :  { %v1140_v60 = vld [vmem:[%s1490_s0 + $0x128] ss:$16 sps:$4 sm:$0xff]   ;;  %v1141_v61 = vld [vmem:[%s1490_s0 + $0x104] ss:$16 sps:$4 sm:$0xff]   ;;  %v1143_v62 = vld [vmem:[%s1490_s0 + $0x10c] ss:$16 sps:$4 sm:$0xff]  }
  0x16   :  { %v1145_v63 = vld [vmem:[%s1490_s0 + $0x100] ss:$16 sps:$4 sm:$0xff]   ;;  %v1146_v0 = vld [vmem:[%s1490_s0 + $0x108] ss:$16 sps:$4 sm:$0xff]   ;;  %v1150_v2 = vld [vmem:[%s1491_s1 + $0x14] ss:$8 sps:$4 sm:$0xff]  }
  0x17   :  { %449 = vmatpush1.bf16.msra.mxu0 %v1085_v22  ;;  %502 = vmatpush1.bf16.msra.mxu1 %v1086_v23  ;;  %v1147_v1 = vld [vmem:[%s1491_s1] ss:$8 sps:$4 sm:$0xff]   ;;  %v1152_v3 = vld [vmem:[%s1491_s1 + $0x10] ss:$8 sps:$4 sm:$0xff]   ;;  %v1161_v4 = vmov 0.0  }
  0x18   :  { %450 = vmatprep.subr.bf16.mxu0 %v1087_v24  ;;  %503 = vmatprep.subr.bf16.mxu1 %v1089_v25  ;;  %22 = vst.msk [vmem:[#allocation2] sm:$0xff] %vm21_vm0, %v1161_v4  ;;  %23 = vst.msk [vmem:[#allocation2 + $0x8] sm:$0xff] %vm21_vm0, %v1161_v4 }
  0x19   :  { %24 = vst.msk [vmem:[#allocation2 + $0x10] sm:$0xff] %vm21_vm0, %v1161_v4  ;;  %25 = vst.msk [vmem:[#allocation2 + $0x18] sm:$0xff] %vm21_vm0, %v1161_v4 }
  0x1a   :  { %26 = vst.msk [vmem:[#allocation3] sm:$0xff] %vm21_vm0, %v1161_v4  ;;  %27 = vst.msk [vmem:[#allocation3 + $0x8] sm:$0xff] %vm21_vm0, %v1161_v4 }
  0x1b   :  { %451 = vmatpush1.bf16.msra.mxu0 %v1091_v26  ;;  %504 = vmatpush1.bf16.msra.mxu1 %v1092_v27  ;;  %28 = vst.msk [vmem:[#allocation3 + $0x10] sm:$0xff] %vm21_vm0, %v1161_v4  ;;  %29 = vst.msk [vmem:[#allocation3 + $0x18] sm:$0xff] %vm21_vm0, %v1161_v4 }
  0x1c   :  { %452 = vmatprep.subr.bf16.mxu0 %v1093_v28  ;;  %505 = vmatprep.subr.bf16.mxu1 %v1095_v29 }
  0x1f   :  { %453 = vmatpush1.bf16.msra.mxu0 %v1097_v30  ;;  %506 = vmatpush1.bf16.msra.mxu1 %v1098_v31 }
  0x20   :  { %454 = vmatprep.subr.bf16.mxu0 %v1099_v32  ;;  %507 = vmatprep.subr.bf16.mxu1 %v1101_v33 }
  0x23   :  { %455 = vmatpush2.bf16.msra.mxu0 %v1103_v34  ;;  %508 = vmatpush2.bf16.msra.mxu1 %v1104_v35 }
  0x24   :  { %456 = vmatprep.subr.bf16.mxu0 %v1105_v36  ;;  %509 = vmatprep.subr.bf16.mxu1 %v1107_v37 }
  0x27   :  { %457 = vmatpush2.bf16.msra.mxu0 %v1109_v38  ;;  %510 = vmatpush2.bf16.msra.mxu1 %v1110_v39 }
  0x28   :  { %458 = vmatprep.subr.bf16.mxu0 %v1111_v40  ;;  %511 = vmatprep.subr.bf16.mxu1 %v1113_v41 }
  0x2b   :  { %459 = vmatpush2.bf16.msra.mxu0 %v1115_v42  ;;  %512 = vmatpush2.bf16.msra.mxu1 %v1116_v43 }
  0x2c   :  { %460 = vmatprep.subr.bf16.mxu0 %v1117_v44  ;;  %513 = vmatprep.subr.bf16.mxu1 %v1119_v45 }
  0x2f   :  { %461 = vmatpush2.bf16.msra.mxu0 %v1121_v46  ;;  %514 = vmatpush2.bf16.msra.mxu1 %v1122_v48 }
  0x30   :  { %462 = vmatprep.subr.bf16.mxu0 %v1123_v49  ;;  %515 = vmatprep.subr.bf16.mxu1 %v1125_v50 }
  0x33   :  { %463 = vmatpush2.bf16.msra.mxu0 %v1127_v51  ;;  %516 = vmatpush2.bf16.msra.mxu1 %v1128_v52 }
  0x34   :  { %464 = vmatprep.subr.bf16.mxu0 %v1129_v53  ;;  %517 = vmatprep.subr.bf16.mxu1 %v1131_v54 }
  0x37   :  { %465 = vmatpush2.bf16.msra.mxu0 %v1133_v55  ;;  %518 = vmatpush2.bf16.msra.mxu1 %v1134_v56 }
  0x38   :  { %466 = vmatprep.subr.bf16.mxu0 %v1135_v57  ;;  %519 = vmatprep.subr.bf16.mxu1 %v1137_v58 }
  0x3b   :  { %467 = vmatpush2.bf16.msra.mxu0 %v1139_v59  ;;  %520 = vmatpush2.bf16.msra.mxu1 %v1140_v60 }
  0x3c   :  { %468 = vmatprep.subr.bf16.mxu0 %v1141_v61  ;;  %521 = vmatprep.subr.bf16.mxu1 %v1143_v62 }
  0x3f   :  { %469 = vmatpush2.bf16.msra.mxu0 %v1145_v63  ;;  %522 = vmatpush2.bf16.msra.mxu1 %v1146_v0 }
  0x42   :  { %471 = vmatmul.mubr.bf16.vlgmr.msra.gmra.mxu0 %v1147_v1  ;;  %524 = vmatmul.mubr.bf16.vlgmr.msra.gmra.mxu1 %v1147_v1 }
  0x43   :  { %480 = vmatprep.mubr.bf16.mxu0 %v1150_v2  ;;  %533 = vmatprep.mubr.bf16.mxu1 %v1150_v2 }
  0x4a   :  { %481 = vmatmul.mubr.bf16.gmra.mxu0 %v1152_v3  ;;  %534 = vmatmul.mubr.bf16.gmra.mxu1 %v1152_v3 }
 0x102   :  { %v472_v5 = vpop.f32.mrf.mxu0  ;;  %v525_v6 = vpop.f32.mrf.mxu1 }
 0x103   :  { %v581_v7 = vmul.f32 %v472_v5, %v472_v5  ;;  %v583_v14 = vmul.f32 %v525_v6, %v525_v6 }
 0x104   :  { %v474_v8 = vpop.f32.mrf.mxu0  ;;  %v527_v9 = vpop.f32.mrf.mxu1 }
 0x105   :  { %v548_v10 = vadd.f32 %v474_v8, %v472_v5  ;;  %v582_v11 = vmul.f32 %v474_v8, %v474_v8  ;;  %v1400_v12 = vpack.c.bf16 %v474_v8, %v472_v5  ;;  %v1402_v13 = vpack.c.bf16 %v527_v9, %v525_v6 }
 0x106   :  { %v476_v15 = vpop.f32.mrf.mxu0  ;;  %v529_v16 = vpop.f32.mrf.mxu1  ;;  %v584_v34 = vmul.f32 %v527_v9, %v527_v9  ;;  %v1162_v5 = vmov 0  }
 0x107   :  { %v549_v17 = vadd.f32 %v548_v10, %v525_v6  ;;  %v597_v18 = vadd.f32 %v582_v11, %v581_v7  ;;  %v585_v21 = vmul.f32 %v476_v15, %v476_v15  ;;  %v587_v30 = vmul.f32 %v529_v16, %v529_v16  ;;  %1049 = vset.pattern.permute.xlu0 %v1162_v5  ;;  %v544_v6 = vld [vmem:[#allocation2] sm:$0xff]  ;;  %v578_v10 = vld [vmem:[#allocation3 + $0x8] sm:$0xff] }
 0x108   :  { %v478_v19 = vpop.f32.mrf.mxu0  ;;  %v531_v20 = vpop.f32.mrf.mxu1  ;;  %1050 = vset.pattern.permute.xlu1 %v1162_v5 }
 0x109   :  { %v586_v22 = vmul.f32 %v478_v19, %v478_v19  ;;  %v1404_v23 = vpack.c.bf16 %v478_v19, %v476_v15  ;;  %v1406_v24 = vpack.c.bf16 %v531_v20, %v529_v16  ;;  %v553_v25 = vadd.f32 %v478_v19, %v476_v15 }
 0x10a   :  { %v550_v26 = vadd.f32 %v549_v17, %v527_v9  ;;  %v482_v27 = vpop.f32.mrf.mxu0  ;;  %v598_v28 = vadd.f32 %v597_v18, %v583_v14  ;;  %v535_v29 = vpop.f32.mrf.mxu1  ;;  %v588_v35 = vmul.f32 %v531_v20, %v531_v20  ;;  %v577_v9 = vld [vmem:[#allocation3] sm:$0xff]  ;;  %v545_v17 = vld [vmem:[#allocation2 + $0x8] sm:$0xff]  ;;  %v546_v18 = vld [vmem:[#allocation2 + $0x10] sm:$0xff] }
 0x10b   :  { %v602_v31 = vadd.f32 %v586_v22, %v585_v21  ;;  %v589_v32 = vmul.f32 %v482_v27, %v482_v27  ;;  %v591_v43 = vmul.f32 %v535_v29, %v535_v29  ;;  %v554_v45 = vadd.f32 %v553_v25, %v529_v16  ;;  %v579_v25 = vld [vmem:[#allocation3 + $0x10] sm:$0xff] }
 0x10c   :  { %551 = vadd.xlane.f32.xlu0 %v550_v26  ;;  %v484_v33 = vpop.f32.mrf.mxu0  ;;  %v537_v36 = vpop.f32.mrf.mxu1  ;;  %v599_v41 = vadd.f32 %v598_v28, %v584_v34  ;;  %v580_v34 = vld [vmem:[#allocation3 + $0x18] sm:$0xff] }
 0x10d   :  { %v558_v37 = vadd.f32 %v484_v33, %v482_v27  ;;  %v590_v38 = vmul.f32 %v484_v33, %v484_v33  ;;  %v1408_v39 = vpack.c.bf16 %v484_v33, %v482_v27  ;;  %v603_v40 = vadd.f32 %v602_v31, %v587_v30  ;;  %v547_v27 = vld [vmem:[#allocation2 + $0x18] sm:$0xff] }
 0x10e   :  { %v486_v42 = vpop.f32.mrf.mxu0  ;;  %v1410_v44 = vpack.c.bf16 %v537_v36, %v535_v29  ;;  %v539_v46 = vpop.f32.mrf.mxu1  ;;  %v592_v52 = vmul.f32 %v537_v36, %v537_v36  ;;  %v555_v58 = vadd.f32 %v554_v45, %v531_v20 }
 0x10f   :  { %v593_v47 = vmul.f32 %v486_v42, %v486_v42  ;;  %v604_v48 = vadd.f32 %v603_v40, %v588_v35  ;;  %v559_v49 = vadd.f32 %v558_v37, %v535_v29  ;;  %v607_v53 = vadd.f32 %v590_v38, %v589_v32 }
 0x110   :  { %600 = vadd.xlane.f32.xlu0 %v599_v41  ;;  %v488_v50 = vpop.f32.mrf.mxu0  ;;  %v541_v51 = vpop.f32.mrf.mxu1  ;;  %v595_v62 = vmul.f32 %v539_v46, %v539_v46 }
 0x111   :  { %605 = vadd.xlane.f32.xlu1 %v604_v48  ;;  %v563_v54 = vadd.f32 %v488_v50, %v486_v42  ;;  %v594_v55 = vmul.f32 %v488_v50, %v488_v50  ;;  %v1412_v56 = vpack.c.bf16 %v488_v50, %v486_v42  ;;  %v560_v57 = vadd.f32 %v559_v49, %v537_v36 }
 0x112   :  { %v1414_v59 = vpack.c.bf16 %v541_v51, %v539_v46  ;;  %v608_v60 = vadd.f32 %v607_v53, %v591_v43  ;;  %v596_v2 = vmul.f32 %v541_v51, %v541_v51 }
 0x113   :  { %v612_v61 = vadd.f32 %v594_v55, %v593_v47  ;;  %v564_v63 = vadd.f32 %v563_v54, %v539_v46 }
 0x114   :  { %556 = vadd.xlane.f32.xlu0 %v555_v58  ;;  %v609_v0 = vadd.f32 %v608_v60, %v592_v52 }
 0x115   :  { %561 = vadd.xlane.f32.xlu1 %v560_v57  ;;  %v565_v1 = vadd.f32 %v564_v63, %v541_v51  ;;  %v613_v3 = vadd.f32 %v612_v61, %v595_v62 }
 0x117   :  { %v614_v4 = vadd.f32 %v613_v3, %v596_v2 }
 0x118   :  { %610 = vadd.xlane.f32.xlu0 %v609_v0 }
 0x119   :  { %566 = vadd.xlane.f32.xlu1 %v565_v1 }
 0x11d   :  { %615 = vadd.xlane.f32.xlu1 %v614_v4  ;;  %v715_v4 = vld [vmem:[%s1492_s2] sm:$0xff] }
 0x195   :  { %v552_v7 = vpop.xlane.xlu0 %551 }
 0x196   :  { %v568_v8 = vadd.f32 %v552_v7, %v544_v6 }
 0x198   :  { %573 = vst.msk [vmem:[#allocation2] sm:$0xff] %vm21_vm0, %v568_v8 }
 0x199   :  { %v601_v11 = vpop.xlane.xlu0 %600 }
 0x19a   :  { %v617_v14 = vadd.f32 %v601_v11, %v577_v9  ;;  %v606_v15 = vpop.xlane.xlu1 %605  ;;  %v716_v9 = vld [vmem:[%s1492_s2 + $0x8] sm:$0xff] }
 0x19b   :  { %v618_v16 = vadd.f32 %v606_v15, %v578_v10  ;;  %v731_v15 = vld [vmem:[%s1493_s3] sm:$0xff] }
 0x19c   :  { %621 = vst.msk [vmem:[#allocation3] sm:$0xff] %vm21_vm0, %v617_v14 }
 0x19d   :  { %622 = vst.msk [vmem:[#allocation3 + $0x8] sm:$0xff] %vm21_vm0, %v618_v16  ;;  %v557_v19 = vpop.xlane.xlu0 %556 }
 0x19e   :  { %v569_v20 = vadd.f32 %v557_v19, %v545_v17  ;;  %v562_v21 = vpop.xlane.xlu1 %561 }
 0x19f   :  { %v570_v22 = vadd.f32 %v562_v21, %v546_v18  ;;  %v687_v26 = vld [vmem:[#allocation2] sm:$0xff]  ;;  %v717_v18 = vld [vmem:[%s1492_s2 + $0x10] sm:$0xff]  ;;  %v732_v21 = vld [vmem:[%s1493_s3 + $0x8] sm:$0xff] }
 0x1a0   :  { %574 = vst.msk [vmem:[#allocation2 + $0x8] sm:$0xff] %vm21_vm0, %v569_v20  ;;  %v691_v28 = vmul.f32 0.001953125, %v687_v26  ;;  %v718_v26 = vld [vmem:[%s1492_s2 + $0x18] sm:$0xff] }
 0x1a1   :  { %575 = vst.msk [vmem:[#allocation2 + $0x10] sm:$0xff] %vm21_vm0, %v570_v22  ;;  %v611_v29 = vpop.xlane.xlu0 %610 }
 0x1a2   :  { %v619_v30 = vadd.f32 %v611_v29, %v579_v25  ;;  %v567_v31 = vpop.xlane.xlu1 %566  ;;  %v703_v36 = vmul.f32 %v691_v28, %v691_v28  ;;  %v733_v29 = vld [vmem:[%s1493_s3 + $0x10] sm:$0xff] }
 0x1a3   :  { %v571_v32 = vadd.f32 %v567_v31, %v547_v27  ;;  %v695_v33 = vld [vmem:[#allocation3] sm:$0xff] }
 0x1a4   :  { %623 = vst.msk [vmem:[#allocation3 + $0x10] sm:$0xff] %vm21_vm0, %v619_v30  ;;  %v699_v35 = vmul.f32 0.001953125, %v695_v33  ;;  %v696_v42 = vld [vmem:[#allocation3 + $0x8] sm:$0xff] }
 0x1a5   :  { %576 = vst.msk [vmem:[#allocation2 + $0x18] sm:$0xff] %vm21_vm0, %v571_v32  ;;  %v700_v49 = vmul.f32 0.001953125, %v696_v42  ;;  %v734_v32 = vld [vmem:[%s1493_s3 + $0x18] sm:$0xff] }
 0x1a6   :  { %v616_v37 = vpop.xlane.xlu1 %615  ;;  %v707_v38 = vsub.f32 %v699_v35, %v703_v36  ;;  %v751_v36 = vunpack.c.l.bf16 %v1400_v12 }
 0x1a7   :  { %v620_v40 = vadd.f32 %v616_v37, %v580_v34  ;;  %v688_v41 = vld [vmem:[#allocation2 + $0x8] sm:$0xff]  ;;  %v752_v37 = vunpack.c.h.bf16 %v1400_v12  ;;  %v756_v12 = vunpack.c.h.bf16 %v1404_v23 }
 0x1a8   :  { %v711_v43 = vmax.f32 %v707_v38, 0.0  ;;  %v692_v45 = vmul.f32 0.001953125, %v688_v41  ;;  %v689_v46 = vld [vmem:[#allocation2 + $0x10] sm:$0xff]  ;;  %v753_v38 = vunpack.c.l.bf16 %v1402_v13 }
 0x1a9   :  { %624 = vst.msk [vmem:[#allocation3 + $0x18] sm:$0xff] %vm21_vm0, %v620_v40  ;;  %v693_v47 = vmul.f32 0.001953125, %v689_v46  ;;  %v754_v40 = vunpack.c.h.bf16 %v1402_v13 }
 0x1aa   :  { %v719_v48 = vadd.f32 1e-05, %v711_v43  ;;  %v704_v50 = vmul.f32 %v692_v45, %v692_v45 }
 0x1ab   :  { %v697_v51 = vld [vmem:[#allocation3 + $0x10] sm:$0xff]  ;;  %v705_v52 = vmul.f32 %v693_v47, %v693_v47 }
 0x1ac   :  { %1153 = vrsqrt.f32 %v719_v48  ;;  %v708_v53 = vsub.f32 %v700_v49, %v704_v50  ;;  %v701_v54 = vmul.f32 0.001953125, %v697_v51  ;;  %v690_v55 = vld [vmem:[#allocation2 + $0x18] sm:$0xff]  ;;  %v755_v51 = vunpack.c.l.bf16 %v1404_v23 }
 0x1ad   :  { %v694_v60 = vmul.f32 0.001953125, %v690_v55  ;;  %v757_v55 = vunpack.c.l.bf16 %v1406_v24 }
 0x1ae   :  { %v712_v57 = vmax.f32 %v708_v53, 0.0  ;;  %v709_v58 = vsub.f32 %v701_v54, %v705_v52 }
 0x1af   :  { %v706_v1 = vmul.f32 %v694_v60, %v694_v60 }
 0x1b0   :  { %v720_v61 = vadd.f32 1e-05, %v712_v57  ;;  %v713_v62 = vmax.f32 %v709_v58, 0.0  ;;  %v698_v63 = vld [vmem:[#allocation3 + $0x18] sm:$0xff]  ;;  %v758_v57 = vunpack.c.h.bf16 %v1406_v24 }
 0x1b1   :  { %v702_v0 = vmul.f32 0.001953125, %v698_v63 }
 0x1b2   :  { %1155 = vrsqrt.f32 %v720_v61  ;;  %v721_v2 = vadd.f32 1e-05, %v713_v62 }
 0x1b3   :  { %v710_v3 = vsub.f32 %v702_v0, %v706_v1 }
 0x1b4   :  { %1157 = vrsqrt.f32 %v721_v2 }
 0x1b5   :  { %v714_v5 = vmax.f32 %v710_v3, 0.0 }
 0x1b7   :  { %v722_v8 = vadd.f32 1e-05, %v714_v5 }
 0x1b9   :  { %v1154_v6 = vpop.eup %1153  ;;  %1159 = vrsqrt.f32 %v722_v8 }
 0x1ba   :  { %v727_v7 = vmul.f32 %v1154_v6, %v715_v4 }
 0x1bc   :  { %769 = vperm.xlu0 %1049, %v727_v7   ;;  %v735_v14 = vmul.f32 %v727_v7, %v691_v28 }
 0x1be   :  { %v739_v16 = vsub.f32 %v731_v15, %v735_v14 }
 0x1bf   :  { %v1156_v10 = vpop.eup %1155 }
 0x1c0   :  { %v728_v11 = vmul.f32 %v1156_v10, %v716_v9  ;;  %v759_v9 = vunpack.c.l.bf16 %v1408_v39  ;;  %v760_v10 = vunpack.c.h.bf16 %v1408_v39 }
 0x1c1   :  { %v1158_v17 = vpop.eup %1157 }
 0x1c2   :  { %774 = vperm.xlu1 %1050, %v728_v11   ;;  %v729_v19 = vmul.f32 %v1158_v17, %v717_v18  ;;  %v736_v20 = vmul.f32 %v728_v11, %v692_v45  ;;  %v761_v17 = vunpack.c.l.bf16 %v1410_v44  ;;  %v762_v18 = vunpack.c.h.bf16 %v1410_v44 }
 0x1c4   :  { %v740_v22 = vsub.f32 %v732_v21, %v736_v20  ;;  %v737_v28 = vmul.f32 %v729_v19, %v693_v47 }
 0x1c6   :  { %805 = vperm.xlu1 %1050, %v739_v16   ;;  %v1160_v25 = vpop.eup %1159  ;;  %v741_v30 = vsub.f32 %v733_v29, %v737_v28 }
 0x1c7   :  { %v730_v27 = vmul.f32 %v1160_v25, %v718_v26 }
 0x1c9   :  { %v738_v31 = vmul.f32 %v730_v27, %v694_v60 }
 0x1ca   :  { %779 = vperm.xlu1 %1050, %v729_v19  }
 0x1cb   :  { %v742_v33 = vsub.f32 %v734_v32, %v738_v31  ;;  %v763_v32 = vunpack.c.l.bf16 %v1412_v56 }
 0x1ce   :  { %810 = vperm.xlu1 %1050, %v740_v22  }
 0x1d2   :  { %784 = vperm.xlu1 %1050, %v730_v27  }
 0x1d6   :  { %815 = vperm.xlu1 %1050, %v741_v30  }
 0x1da   :  { %820 = vperm.xlu1 %1050, %v742_v33   ;;  %v764_v33 = vunpack.c.h.bf16 %v1412_v56 }
 0x237   :  { %v770_v34 = vpop.permute.xlu0 %769 }
 0x238   :  { %v787_v41 = vmul.f32 %v770_v34, %v751_v36  ;;  %v788_v42 = vmul.f32 %v770_v34, %v752_v37  ;;  %v789_v43 = vmul.f32 %v770_v34, %v753_v38  ;;  %v790_v45 = vmul.f32 %v770_v34, %v754_v40 }
 0x239   :  { %v765_v34 = vunpack.c.l.bf16 %v1414_v59  ;;  %v766_v38 = vunpack.c.h.bf16 %v1414_v59 }
 0x23d   :  { %v775_v35 = vpop.permute.xlu1 %774 }
 0x23e   :  { %v791_v58 = vmul.f32 %v775_v35, %v755_v51  ;;  %v792_v61 = vmul.f32 %v775_v35, %v756_v12  ;;  %v793_v1 = vmul.f32 %v775_v35, %v757_v55  ;;  %v794_v2 = vmul.f32 %v775_v35, %v758_v57 }
 0x241   :  { %v806_v46 = vpop.permute.xlu1 %805 }
 0x242   :  { %v823_v47 = vadd.f32 %v806_v46, %v787_v41  ;;  %v824_v48 = vadd.f32 %v806_v46, %v788_v42  ;;  %v825_v49 = vadd.f32 %v806_v46, %v789_v43  ;;  %v826_v50 = vadd.f32 %v806_v46, %v790_v45 }
 0x244   :  { %vm839_vm1 = vcmp.gt.f32.partialorder %v823_v47, 0.0  ;;  %vm840_vm2 = vcmp.gt.f32.partialorder %v824_v48, 0.0  ;;  %vm841_vm3 = vcmp.gt.f32.partialorder %v825_v49, 0.0  ;;  %vm842_vm4 = vcmp.gt.f32.partialorder %v826_v50, 0.0 }
 0x245   :  { %v855_v52 = vmul.f32 0.2, %v823_v47  ;;  %v856_v53 = vmul.f32 0.2, %v824_v48  ;;  %v857_v13 = vmul.f32 0.2, %v825_v49  ;;  %v780_v54 = vpop.permute.xlu1 %779 }
 0x246   :  { %v858_v60 = vmul.f32 0.2, %v826_v50  ;;  %v795_v19 = vmul.f32 %v780_v54, %v759_v9  ;;  %v796_v21 = vmul.f32 %v780_v54, %v760_v10  ;;  %v797_v27 = vmul.f32 %v780_v54, %v761_v17 }
 0x247   :  { %v871_v62 = vsel %vm839_vm1, %v823_v47, %v855_v52  ;;  %v872_v63 = vsel %vm840_vm2, %v824_v48, %v856_v53  ;;  %v873_v0 = vsel %vm841_vm3, %v825_v49, %v857_v13  ;;  %v798_v28 = vmul.f32 %v780_v54, %v762_v18 }
 0x248   :  { %v874_v3 = vsel %vm842_vm4, %v826_v50, %v858_v60  ;;  %v1039_v4 = vpack.c.bf16 %v872_v63, %v871_v62 }
 0x249   :  { %v1040_v23 = vpack.c.bf16 %v874_v3, %v873_v0  ;;  %v811_v5 = vpop.permute.xlu1 %810 }
 0x24a   :  { %935 = vst [vmem:[%s1494_s4] sm:$0xff] %v1039_v4  ;;  %v827_v6 = vadd.f32 %v811_v5, %v791_v58  ;;  %v828_v7 = vadd.f32 %v811_v5, %v792_v61  ;;  %v829_v24 = vadd.f32 %v811_v5, %v793_v1  ;;  %v830_v8 = vadd.f32 %v811_v5, %v794_v2 }
 0x24b   :  { %936 = vst [vmem:[%s1494_s4 + $0x8] sm:$0xff] %v1040_v23 }
 0x24c   :  { %vm843_vm5 = vcmp.gt.f32.partialorder %v827_v6, 0.0  ;;  %vm844_vm6 = vcmp.gt.f32.partialorder %v828_v7, 0.0  ;;  %vm845_vm7 = vcmp.gt.f32.partialorder %v829_v24, 0.0  ;;  %vm846_vm8 = vcmp.gt.f32.partialorder %v830_v8, 0.0 }
 0x24d   :  { %v859_v11 = vmul.f32 0.2, %v827_v6  ;;  %v860_v14 = vmul.f32 0.2, %v828_v7  ;;  %v861_v15 = vmul.f32 0.2, %v829_v24  ;;  %v785_v16 = vpop.permute.xlu1 %784 }
 0x24e   :  { %v862_v20 = vmul.f32 0.2, %v830_v8  ;;  %v799_v40 = vmul.f32 %v785_v16, %v763_v32  ;;  %v800_v41 = vmul.f32 %v785_v16, %v764_v33  ;;  %v801_v42 = vmul.f32 %v785_v16, %v765_v34 }
 0x24f   :  { %v875_v22 = vsel %vm843_vm5, %v827_v6, %v859_v11  ;;  %v876_v25 = vsel %vm844_vm6, %v828_v7, %v860_v14  ;;  %v877_v26 = vsel %vm845_vm7, %v829_v24, %v861_v15  ;;  %v802_v46 = vmul.f32 %v785_v16, %v766_v38 }
 0x250   :  { %v878_v29 = vsel %vm846_vm8, %v830_v8, %v862_v20  ;;  %v1041_v30 = vpack.c.bf16 %v876_v25, %v875_v22 }
 0x251   :  { %v1042_v39 = vpack.c.bf16 %v878_v29, %v877_v26  ;;  %v816_v31 = vpop.permute.xlu1 %815 }
 0x252   :  { %937 = vst [vmem:[%s1494_s4 + $0x10] sm:$0xff] %v1041_v30  ;;  %v831_v44 = vadd.f32 %v816_v31, %v795_v19  ;;  %v832_v35 = vadd.f32 %v816_v31, %v796_v21  ;;  %v833_v36 = vadd.f32 %v816_v31, %v797_v27  ;;  %v834_v37 = vadd.f32 %v816_v31, %v798_v28 }
 0x253   :  { %938 = vst [vmem:[%s1494_s4 + $0x18] sm:$0xff] %v1042_v39 }
 0x254   :  { %vm847_vm9 = vcmp.gt.f32.partialorder %v831_v44, 0.0  ;;  %vm848_vm10 = vcmp.gt.f32.partialorder %v832_v35, 0.0  ;;  %vm849_vm11 = vcmp.gt.f32.partialorder %v833_v36, 0.0  ;;  %vm850_vm12 = vcmp.gt.f32.partialorder %v834_v37, 0.0 }
 0x255   :  { %v863_v56 = vmul.f32 0.2, %v831_v44  ;;  %v864_v43 = vmul.f32 0.2, %v832_v35  ;;  %v865_v45 = vmul.f32 0.2, %v833_v36  ;;  %v821_v47 = vpop.permute.xlu1 %820 }
 0x256   :  { %v866_v48 = vmul.f32 0.2, %v834_v37  ;;  %v835_v49 = vadd.f32 %v821_v47, %v799_v40  ;;  %v836_v50 = vadd.f32 %v821_v47, %v800_v41  ;;  %v837_v51 = vadd.f32 %v821_v47, %v801_v42 }
 0x257   :  { %v879_v12 = vsel %vm847_vm9, %v831_v44, %v863_v56  ;;  %v880_v52 = vsel %vm848_vm10, %v832_v35, %v864_v43  ;;  %v881_v53 = vsel %vm849_vm11, %v833_v36, %v865_v45  ;;  %v838_v59 = vadd.f32 %v821_v47, %v802_v46 }
 0x258   :  { %v882_v13 = vsel %vm850_vm12, %v834_v37, %v866_v48  ;;  %v1043_v54 = vpack.c.bf16 %v880_v52, %v879_v12  ;;  %vm851_vm13 = vcmp.gt.f32.partialorder %v835_v49, 0.0  ;;  %vm852_vm14 = vcmp.gt.f32.partialorder %v836_v50, 0.0 }
 0x259   :  { %v1044_v55 = vpack.c.bf16 %v882_v13, %v881_v53  ;;  %vm853_vm15 = vcmp.gt.f32.partialorder %v837_v51, 0.0  ;;  %vm854_vm0 = vcmp.gt.f32.partialorder %v838_v59, 0.0  ;;  %v867_v57 = vmul.f32 0.2, %v835_v49 }
 0x25a   :  { %939 = vst [vmem:[%s1494_s4 + $0x20] sm:$0xff] %v1043_v54  ;;  %v868_v58 = vmul.f32 0.2, %v836_v50  ;;  %v869_v60 = vmul.f32 0.2, %v837_v51 }
 0x25b   :  { %v870_v61 = vmul.f32 0.2, %v838_v59  ;;  %940 = vst [vmem:[%s1494_s4 + $0x28] sm:$0xff] %v1044_v55  ;;  %v883_v62 = vsel %vm851_vm13, %v835_v49, %v867_v57 }
 0x25c   :  { %v884_v63 = vsel %vm852_vm14, %v836_v50, %v868_v58  ;;  %v885_v0 = vsel %vm853_vm15, %v837_v51, %v869_v60 }
 0x25d   :  { %v886_v1 = vsel %vm854_vm0, %v838_v59, %v870_v61  ;;  %v1045_v2 = vpack.c.bf16 %v884_v63, %v883_v62 }
 0x25e   :  { %v1046_v3 = vpack.c.bf16 %v886_v1, %v885_v0 }
 0x25f   :  { %941 = vst [vmem:[%s1494_s4 + $0x30] sm:$0xff] %v1045_v2 }
 0x260   :  { %942 = vst [vmem:[%s1494_s4 + $0x38] sm:$0xff] %v1046_v3 }

// kernel: discriminator_forward.8
= control target key start
LH: loop header
LB: loop body
LE: loop exit
PB: predicated region body
PF: predicated region fallthrough
CT: control target
= control target key end

     0   :  { %vm22_vm0 = vcmask 7168   ;;  %v851_v40 = vmov 0.0   ;;  %s1052_s0 = inlined_call_operand.vmem [shape: bf16[512,128], index: 0, kind: input, shape index: {}]   ;;  %s1053_s1 = inlined_call_operand.vmem [shape: bf16[32,512], index: 1, kind: input, shape index: {}]   ;;  %s1054_s2 = inlined_call_operand.vmem [shape: f32[32,1], index: 2, kind: input, shape index: {}]   ;;  %s1055_s3 = inlined_call_operand.vmem [shape: f32[32,1], index: 3, kind: input, shape index: {}]   ;;  %s1056_s4 = inlined_call_operand.vmem [shape: bf16[1,32,128], index: 4, kind: output, shape index: {}]  }
   0x1   :  { %v799_v0 = vld [vmem:[%s1052_s0 + $0x78] sm:$0xff]   ;;  %v803_v4 = vld [vmem:[%s1052_s0 + $0x70] sm:$0xff]   ;;  %v807_v8 = vld [vmem:[%s1052_s0 + $0x68] sm:$0xff]   ;;  %23 = vst.msk [vmem:[#allocation2] sm:$0xff] %vm22_vm0, %v851_v40 }
   0x2   :  { %v800_v1 = vld [vmem:[%s1052_s0 + $0xf8] sm:$0xff]   ;;  %739 = vmatprep.subr.bf16.mxu0 %v799_v0  ;;  %v804_v5 = vld [vmem:[%s1052_s0 + $0xf0] sm:$0xff]   ;;  %v808_v9 = vld [vmem:[%s1052_s0 + $0xe8] sm:$0xff]   ;;  %24 = vst.msk [vmem:[#allocation2 + $0x8] sm:$0xff] %vm22_vm0, %v851_v40 }
   0x3   :  { %v801_v2 = vld [vmem:[%s1052_s0 + $0x38] sm:$0xff]   ;;  %767 = vmatprep.subr.bf16.mxu1 %v800_v1  ;;  %v805_v6 = vld [vmem:[%s1052_s0 + $0x30] sm:$0xff]   ;;  %v809_v10 = vld [vmem:[%s1052_s0 + $0x28] sm:$0xff]   ;;  %25 = vst.msk [vmem:[#allocation2 + $0x10] sm:$0xff] %vm22_vm0, %v851_v40 }
   0x4   :  { %v802_v3 = vld [vmem:[%s1052_s0 + $0xb8] sm:$0xff]   ;;  %740 = vmatpush3.bf16.msra.mxu0 %v801_v2  ;;  %v806_v7 = vld [vmem:[%s1052_s0 + $0xb0] sm:$0xff]   ;;  %v810_v11 = vld [vmem:[%s1052_s0 + $0xa8] sm:$0xff]   ;;  %26 = vst.msk [vmem:[#allocation2 + $0x18] sm:$0xff] %vm22_vm0, %v851_v40 }
   0x5   :  { %768 = vmatpush3.bf16.msra.mxu1 %v802_v3  ;;  %741 = vmatprep.subr.bf16.mxu0 %v803_v4  ;;  %v811_v12 = vld [vmem:[%s1052_s0 + $0x60] sm:$0xff]   ;;  %v815_v16 = vld [vmem:[%s1052_s0 + $0x58] sm:$0xff]   ;;  %v819_v20 = vld [vmem:[%s1052_s0 + $0x50] sm:$0xff]   ;;  %27 = vst.msk [vmem:[#allocation3] sm:$0xff] %vm22_vm0, %v851_v40 }
   0x6   :  { %769 = vmatprep.subr.bf16.mxu1 %v804_v5  ;;  %v812_v13 = vld [vmem:[%s1052_s0 + $0xe0] sm:$0xff]   ;;  %v816_v17 = vld [vmem:[%s1052_s0 + $0xd8] sm:$0xff]   ;;  %v820_v21 = vld [vmem:[%s1052_s0 + $0xd0] sm:$0xff]   ;;  %28 = vst.msk [vmem:[#allocation3 + $0x8] sm:$0xff] %vm22_vm0, %v851_v40 }
   0x7   :  { %v813_v14 = vld [vmem:[%s1052_s0 + $0x20] sm:$0xff]   ;;  %v817_v18 = vld [vmem:[%s1052_s0 + $0x18] sm:$0xff]   ;;  %v821_v22 = vld [vmem:[%s1052_s0 + $0x10] sm:$0xff]   ;;  %29 = vst.msk [vmem:[#allocation3 + $0x10] sm:$0xff] %vm22_vm0, %v851_v40 }
   0x8   :  { %742 = vmatpush3.bf16.msra.mxu0 %v805_v6  ;;  %v814_v15 = vld [vmem:[%s1052_s0 + $0xa0] sm:$0xff]   ;;  %v818_v19 = vld [vmem:[%s1052_s0 + $0x98] sm:$0xff]   ;;  %v822_v23 = vld [vmem:[%s1052_s0 + $0x90] sm:$0xff]   ;;  %30 = vst.msk [vmem:[#allocation3 + $0x18] sm:$0xff] %vm22_vm0, %v851_v40 }
   0x9   :  { %770 = vmatpush3.bf16.msra.mxu1 %v806_v7  ;;  %743 = vmatprep.subr.bf16.mxu0 %v807_v8  ;;  %v823_v24 = vld [vmem:[%s1052_s0 + $0x48] sm:$0xff]   ;;  %v827_v28 = vld [vmem:[%s1052_s0 + $0x40] sm:$0xff]  }
   0xa   :  { %771 = vmatprep.subr.bf16.mxu1 %v808_v9  ;;  %v824_v25 = vld [vmem:[%s1052_s0 + $0xc8] sm:$0xff]   ;;  %v828_v29 = vld [vmem:[%s1052_s0 + $0xc0] sm:$0xff]  }
   0xb   :  { %v825_v26 = vld [vmem:[%s1052_s0 + $0x8] sm:$0xff]   ;;  %v829_v30 = vld [vmem:[%s1052_s0] sm:$0xff]  }
   0xc   :  { %744 = vmatpush3.bf16.msra.mxu0 %v809_v10  ;;  %v826_v27 = vld [vmem:[%s1052_s0 + $0x88] sm:$0xff]   ;;  %v830_v31 = vld [vmem:[%s1052_s0 + $0x80] sm:$0xff]  }
   0xd   :  { %772 = vmatpush3.bf16.msra.mxu1 %v810_v11  ;;  %745 = vmatprep.subr.bf16.mxu0 %v811_v12  ;;  %v831_v32 = vld [vmem:[%s1053_s1] ss:$16 sps:$4 sm:$0xff]   ;;  %v833_v33 = vld [vmem:[%s1053_s1 + $0x4] ss:$16 sps:$4 sm:$0xff]   ;;  %v834_v34 = vld [vmem:[%s1053_s1 + $0x8] ss:$16 sps:$4 sm:$0xff]  }
   0xe   :  { %773 = vmatprep.subr.bf16.mxu1 %v812_v13  ;;  %v836_v35 = vld [vmem:[%s1053_s1 + $0xc] ss:$16 sps:$4 sm:$0xff]   ;;  %367 = vmatprep.mubr.bf16.mxu0 %v833_v33  ;;  %v837_v36 = vld [vmem:[%s1053_s1 + $0x24] ss:$16 sps:$4 sm:$0xff]   ;;  %v841_v38 = vld [vmem:[%s1053_s1 + $0x20] ss:$16 sps:$4 sm:$0xff]  }
   0xf   :  { %416 = vmatprep.mubr.bf16.mxu1 %v836_v35  ;;  %v839_v37 = vld [vmem:[%s1053_s1 + $0x2c] ss:$16 sps:$4 sm:$0xff]   ;;  %v842_v39 = vld [vmem:[%s1053_s1 + $0x28] ss:$16 sps:$4 sm:$0xff]   ;;  %v852_v11 = vmov 0   ;;  %v433_v12 = vld [vmem:[#allocation2] sm:$0xff] }
  0x10   :  { %746 = vmatpush3.bf16.msra.mxu0 %v813_v14  ;;  %797 = vset.pattern.permute.xlu0 %v852_v11 }
  0x11   :  { %774 = vmatpush3.bf16.msra.mxu1 %v814_v15  ;;  %747 = vmatprep.subr.bf16.mxu0 %v815_v16  ;;  %v454_v15 = vld [vmem:[#allocation3] sm:$0xff] }
  0x12   :  { %775 = vmatprep.subr.bf16.mxu1 %v816_v17  ;;  %798 = vset.pattern.permute.xlu1 %v852_v11  ;;  %v455_v17 = vld [vmem:[#allocation3 + $0x8] sm:$0xff] }
  0x14   :  { %748 = vmatpush3.bf16.msra.mxu0 %v817_v18 }
  0x15   :  { %776 = vmatpush3.bf16.msra.mxu1 %v818_v19  ;;  %749 = vmatprep.subr.bf16.mxu0 %v819_v20  ;;  %v434_v20 = vld [vmem:[#allocation2 + $0x8] sm:$0xff] }
  0x16   :  { %777 = vmatprep.subr.bf16.mxu1 %v820_v21 }
  0x18   :  { %750 = vmatpush3.bf16.msra.mxu0 %v821_v22 }
  0x19   :  { %778 = vmatpush3.bf16.msra.mxu1 %v822_v23  ;;  %751 = vmatprep.subr.bf16.mxu0 %v823_v24  ;;  %v435_v23 = vld [vmem:[#allocation2 + $0x10] sm:$0xff] }
  0x1a   :  { %779 = vmatprep.subr.bf16.mxu1 %v824_v25 }
  0x1c   :  { %752 = vmatpush3.bf16.msra.mxu0 %v825_v26  ;;  %v456_v26 = vld [vmem:[#allocation3 + $0x10] sm:$0xff] }
  0x1d   :  { %780 = vmatpush3.bf16.msra.mxu1 %v826_v27  ;;  %753 = vmatprep.subr.bf16.mxu0 %v827_v28 }
  0x1e   :  { %781 = vmatprep.subr.bf16.mxu1 %v828_v29 }
  0x20   :  { %754 = vmatpush3.bf16.msra.mxu0 %v829_v30 }
  0x21   :  { %782 = vmatpush3.bf16.msra.mxu1 %v830_v31  ;;  %v436_v31 = vld [vmem:[#allocation2 + $0x18] sm:$0xff] }
  0x23   :  { %368 = vmatmul.mubr.bf16.vlgmr.msra.gmra.mxu0 %v831_v32 }
  0x24   :  { %417 = vmatmul.mubr.bf16.vlgmr.msra.gmra.mxu1 %v834_v34  ;;  %375 = vmatprep.mubr.bf16.mxu0 %v837_v36 }
  0x25   :  { %424 = vmatprep.mubr.bf16.mxu1 %v839_v37 }
  0x2b   :  { %376 = vmatmul.mubr.bf16.gmra.mxu0 %v841_v38  ;;  %v457_v38 = vld [vmem:[#allocation3 + $0x18] sm:$0xff] }
  0x2c   :  { %425 = vmatmul.mubr.bf16.gmra.mxu1 %v842_v39 }
  0xe3   :  { %v755_v41 = vpop.f32.mrf.mxu0 }
  0xe4   :  { %v783_v42 = vpop.f32.mrf.mxu1 }
  0xe5   :  { %v756_v43 = vpop.f32.mrf.mxu0 }
  0xe6   :  { %v757_v44 = vadd.f32 %v756_v43, %v755_v41  ;;  %v784_v45 = vpop.f32.mrf.mxu1 }
  0xe7   :  { %v785_v46 = vadd.f32 %v784_v45, %v783_v42  ;;  %v758_v47 = vpop.f32.mrf.mxu0 }
  0xe8   :  { %v786_v48 = vpop.f32.mrf.mxu1 }
  0xe9   :  { %v419_v49 = vadd.f32 %v785_v46, %v757_v44  ;;  %v759_v50 = vpop.f32.mrf.mxu0 }
  0xea   :  { %v760_v51 = vadd.f32 %v759_v50, %v758_v47  ;;  %v787_v52 = vpop.f32.mrf.mxu1 }
  0xeb   :  { %v788_v53 = vadd.f32 %v787_v52, %v786_v48  ;;  %437 = vadd.xlane.f32.xlu0 %v419_v49  ;;  %v761_v54 = vpop.f32.mrf.mxu0  ;;  %v458_v57 = vmul.f32 %v419_v49, %v419_v49 }
  0xec   :  { %v789_v55 = vpop.f32.mrf.mxu1 }
  0xed   :  { %v422_v56 = vadd.f32 %v788_v53, %v760_v51  ;;  %v762_v58 = vpop.f32.mrf.mxu0 }
  0xee   :  { %v763_v59 = vadd.f32 %v762_v58, %v761_v54  ;;  %v790_v60 = vpop.f32.mrf.mxu1 }
  0xef   :  { %v1006_v61 = vpack.c.bf16 %v422_v56, %v419_v49  ;;  %462 = vadd.xlane.f32.xlu0 %v458_v57  ;;  %v791_v62 = vadd.f32 %v790_v60, %v789_v55  ;;  %v459_v63 = vmul.f32 %v422_v56, %v422_v56  ;;  %v764_v0 = vpop.f32.mrf.mxu0 }
  0xf0   :  { %v792_v1 = vpop.f32.mrf.mxu1 }
  0xf1   :  { %v427_v2 = vadd.f32 %v791_v62, %v763_v59  ;;  %464 = vadd.xlane.f32.xlu1 %v459_v63  ;;  %v765_v3 = vpop.f32.mrf.mxu0 }
  0xf2   :  { %v766_v4 = vadd.f32 %v765_v3, %v764_v0  ;;  %v793_v5 = vpop.f32.mrf.mxu1  ;;  %v532_v3 = vld [vmem:[%s1054_s2] sm:$0xff] }
  0xf3   :  { %439 = vadd.xlane.f32.xlu0 %v422_v56  ;;  %v794_v6 = vadd.f32 %v793_v5, %v792_v1  ;;  %v460_v7 = vmul.f32 %v427_v2, %v427_v2 }
  0xf5   :  { %v430_v8 = vadd.f32 %v794_v6, %v766_v4  ;;  %441 = vadd.xlane.f32.xlu1 %v427_v2 }
  0xf7   :  { %v1008_v9 = vpack.c.bf16 %v430_v8, %v427_v2  ;;  %466 = vadd.xlane.f32.xlu0 %v460_v7  ;;  %v461_v10 = vmul.f32 %v430_v8, %v430_v8 }
  0xf9   :  { %443 = vadd.xlane.f32.xlu1 %v430_v8  ;;  %v533_v8 = vld [vmem:[%s1054_s2 + $0x8] sm:$0xff] }
  0xfd   :  { %468 = vadd.xlane.f32.xlu1 %v461_v10 }
 0x174   :  { %v438_v13 = vpop.xlane.xlu0 %437 }
 0x175   :  { %v445_v14 = vadd.f32 %v438_v13, %v433_v12  ;;  %v548_v13 = vld [vmem:[%s1055_s3] sm:$0xff] }
 0x177   :  { %450 = vst.msk [vmem:[#allocation2] sm:$0xff] %vm22_vm0, %v445_v14 }
 0x178   :  { %v463_v16 = vpop.xlane.xlu0 %462 }
 0x179   :  { %v470_v18 = vadd.f32 %v463_v16, %v454_v15  ;;  %v534_v16 = vld [vmem:[%s1054_s2 + $0x10] sm:$0xff] }
 0x17a   :  { %v465_v19 = vpop.xlane.xlu1 %464 }
 0x17b   :  { %474 = vst.msk [vmem:[#allocation3] sm:$0xff] %vm22_vm0, %v470_v18  ;;  %v471_v21 = vadd.f32 %v465_v19, %v455_v17  ;;  %v549_v19 = vld [vmem:[%s1055_s3 + $0x8] sm:$0xff] }
 0x17c   :  { %v440_v22 = vpop.xlane.xlu0 %439 }
 0x17d   :  { %475 = vst.msk [vmem:[#allocation3 + $0x8] sm:$0xff] %vm22_vm0, %v471_v21  ;;  %v446_v24 = vadd.f32 %v440_v22, %v434_v20  ;;  %v535_v22 = vld [vmem:[%s1054_s2 + $0x18] sm:$0xff] }
 0x17e   :  { %v442_v25 = vpop.xlane.xlu1 %441  ;;  %v504_v27 = vld [vmem:[#allocation2] sm:$0xff] }
 0x17f   :  { %451 = vst.msk [vmem:[#allocation2 + $0x8] sm:$0xff] %vm22_vm0, %v446_v24  ;;  %v447_v28 = vadd.f32 %v442_v25, %v435_v23  ;;  %v508_v29 = vmul.f32 0.0078125, %v504_v27  ;;  %v550_v25 = vld [vmem:[%s1055_s3 + $0x10] sm:$0xff] }
 0x180   :  { %v467_v30 = vpop.xlane.xlu0 %466 }
 0x181   :  { %452 = vst.msk [vmem:[#allocation2 + $0x10] sm:$0xff] %vm22_vm0, %v447_v28  ;;  %v472_v32 = vadd.f32 %v467_v30, %v456_v26  ;;  %v520_v37 = vmul.f32 %v508_v29, %v508_v29  ;;  %v551_v28 = vld [vmem:[%s1055_s3 + $0x18] sm:$0xff] }
 0x182   :  { %v444_v33 = vpop.xlane.xlu1 %443  ;;  %v512_v34 = vld [vmem:[#allocation3] sm:$0xff] }
 0x183   :  { %476 = vst.msk [vmem:[#allocation3 + $0x10] sm:$0xff] %vm22_vm0, %v472_v32  ;;  %v448_v35 = vadd.f32 %v444_v33, %v436_v31  ;;  %v516_v36 = vmul.f32 0.0078125, %v512_v34  ;;  %v720_v33 = vunpack.c.l.bf16 %v1006_v61 }
 0x184   :  { %v513_v42 = vld [vmem:[#allocation3 + $0x8] sm:$0xff] }
 0x185   :  { %453 = vst.msk [vmem:[#allocation2 + $0x18] sm:$0xff] %vm22_vm0, %v448_v35  ;;  %v524_v39 = vsub.f32 %v516_v36, %v520_v37  ;;  %v517_v48 = vmul.f32 0.0078125, %v513_v42  ;;  %v721_v36 = vunpack.c.h.bf16 %v1006_v61 }
 0x186   :  { %v469_v40 = vpop.xlane.xlu1 %468  ;;  %v505_v41 = vld [vmem:[#allocation2 + $0x8] sm:$0xff] }
 0x187   :  { %v473_v43 = vadd.f32 %v469_v40, %v457_v38  ;;  %v528_v44 = vmax.f32 %v524_v39, 0.0  ;;  %v509_v45 = vmul.f32 0.0078125, %v505_v41 }
 0x188   :  { %v506_v46 = vld [vmem:[#allocation2 + $0x10] sm:$0xff] }
 0x189   :  { %477 = vst.msk [vmem:[#allocation3 + $0x18] sm:$0xff] %vm22_vm0, %v473_v43  ;;  %v536_v47 = vadd.f32 1e-05, %v528_v44  ;;  %v521_v49 = vmul.f32 %v509_v45, %v509_v45  ;;  %v510_v50 = vmul.f32 0.0078125, %v506_v46 }
 0x18a   :  { %v514_v51 = vld [vmem:[#allocation3 + $0x10] sm:$0xff] }
 0x18b   :  { %843 = vrsqrt.f32 %v536_v47  ;;  %v525_v52 = vsub.f32 %v517_v48, %v521_v49  ;;  %v518_v53 = vmul.f32 0.0078125, %v514_v51  ;;  %v522_v54 = vmul.f32 %v510_v50, %v510_v50 }
 0x18c   :  { %v507_v55 = vld [vmem:[#allocation2 + $0x18] sm:$0xff]  ;;  %v725_v49 = vunpack.c.h.bf16 %v1008_v9 }
 0x18d   :  { %v529_v56 = vmax.f32 %v525_v52, 0.0  ;;  %v526_v57 = vsub.f32 %v518_v53, %v522_v54  ;;  %v511_v58 = vmul.f32 0.0078125, %v507_v55 }
 0x18f   :  { %v537_v59 = vadd.f32 1e-05, %v529_v56  ;;  %v530_v60 = vmax.f32 %v526_v57, 0.0  ;;  %v523_v0 = vmul.f32 %v511_v58, %v511_v58 }
 0x190   :  { %v515_v62 = vld [vmem:[#allocation3 + $0x18] sm:$0xff] }
 0x191   :  { %845 = vrsqrt.f32 %v537_v59  ;;  %v519_v63 = vmul.f32 0.0078125, %v515_v62  ;;  %v538_v1 = vadd.f32 1e-05, %v530_v60 }
 0x193   :  { %v527_v2 = vsub.f32 %v519_v63, %v523_v0  ;;  %847 = vrsqrt.f32 %v538_v1 }
 0x195   :  { %v531_v4 = vmax.f32 %v527_v2, 0.0 }
 0x197   :  { %v539_v7 = vadd.f32 1e-05, %v531_v4 }
 0x198   :  { %v844_v5 = vpop.eup %843 }
 0x199   :  { %v544_v6 = vmul.f32 %v844_v5, %v532_v3  ;;  %849 = vrsqrt.f32 %v539_v7 }
 0x19b   :  { %570 = vperm.xlu0 %797, %v544_v6   ;;  %v552_v12 = vmul.f32 %v544_v6, %v508_v29 }
 0x19d   :  { %v556_v14 = vsub.f32 %v548_v13, %v552_v12 }
 0x19e   :  { %v846_v10 = vpop.eup %845 }
 0x19f   :  { %v545_v11 = vmul.f32 %v846_v10, %v533_v8 }
 0x1a0   :  { %v848_v15 = vpop.eup %847 }
 0x1a1   :  { %575 = vperm.xlu1 %798, %v545_v11   ;;  %v546_v17 = vmul.f32 %v848_v15, %v534_v16  ;;  %v553_v18 = vmul.f32 %v545_v11, %v509_v45  ;;  %v724_v45 = vunpack.c.l.bf16 %v1008_v9 }
 0x1a3   :  { %v557_v20 = vsub.f32 %v549_v19, %v553_v18  ;;  %v554_v24 = vmul.f32 %v546_v17, %v510_v50 }
 0x1a5   :  { %594 = vperm.xlu1 %798, %v556_v14   ;;  %v558_v26 = vsub.f32 %v550_v25, %v554_v24 }
 0x1a6   :  { %v850_v21 = vpop.eup %849 }
 0x1a7   :  { %v547_v23 = vmul.f32 %v850_v21, %v535_v22 }
 0x1a9   :  { %580 = vperm.xlu1 %798, %v546_v17   ;;  %v555_v27 = vmul.f32 %v547_v23, %v511_v58 }
 0x1ab   :  { %v559_v29 = vsub.f32 %v551_v28, %v555_v27 }
 0x1ad   :  { %599 = vperm.xlu1 %798, %v557_v20  }
 0x1b1   :  { %585 = vperm.xlu1 %798, %v547_v23  }
 0x1b5   :  { %604 = vperm.xlu1 %798, %v558_v26  }
 0x1b9   :  { %609 = vperm.xlu1 %798, %v559_v29  }
 0x216   :  { %v571_v31 = vpop.permute.xlu0 %570 }
 0x217   :  { %v588_v34 = vmul.f32 %v720_v33, %v571_v31 }
 0x21c   :  { %v576_v30 = vpop.permute.xlu1 %575 }
 0x21d   :  { %v589_v38 = vmul.f32 %v721_v36, %v576_v30 }
 0x220   :  { %v595_v32 = vpop.permute.xlu1 %594 }
 0x221   :  { %v612_v37 = vadd.f32 %v595_v32, %v588_v34 }
 0x223   :  { %v620_v40 = vmul.f32 0.2, %v612_v37  ;;  %vm616_vm1 = vcmp.gt.f32.partialorder %v612_v37, 0.0 }
 0x224   :  { %v581_v35 = vpop.permute.xlu1 %580 }
 0x225   :  { %v624_v44 = vsel %vm616_vm1, %v612_v37, %v620_v40  ;;  %v590_v48 = vmul.f32 %v724_v45, %v581_v35 }
 0x228   :  { %v600_v39 = vpop.permute.xlu1 %599 }
 0x229   :  { %v613_v41 = vadd.f32 %v600_v39, %v589_v38 }
 0x22b   :  { %vm617_vm2 = vcmp.gt.f32.partialorder %v613_v41, 0.0  ;;  %v621_v42 = vmul.f32 0.2, %v613_v41 }
 0x22c   :  { %v586_v43 = vpop.permute.xlu1 %585 }
 0x22d   :  { %v625_v46 = vsel %vm617_vm2, %v613_v41, %v621_v42  ;;  %v591_v51 = vmul.f32 %v725_v49, %v586_v43 }
 0x22e   :  { %v729_v47 = vpack.c.bf16 %v625_v46, %v624_v44 }
 0x230   :  { %730 = vst [vmem:[%s1056_s4] sm:$0xff] %v729_v47   ;;  %v605_v61 = vpop.permute.xlu1 %604 }
 0x231   :  { %v614_v50 = vadd.f32 %v605_v61, %v590_v48 }
 0x233   :  { %v622_v53 = vmul.f32 0.2, %v614_v50  ;;  %vm618_vm3 = vcmp.gt.f32.partialorder %v614_v50, 0.0 }
 0x234   :  { %v610_v52 = vpop.permute.xlu1 %609 }
 0x235   :  { %v615_v54 = vadd.f32 %v610_v52, %v591_v51  ;;  %v626_v56 = vsel %vm618_vm3, %v614_v50, %v622_v53 }
 0x237   :  { %vm619_vm4 = vcmp.gt.f32.partialorder %v615_v54, 0.0  ;;  %v623_v55 = vmul.f32 0.2, %v615_v54 }
 0x239   :  { %v627_v57 = vsel %vm619_vm4, %v615_v54, %v623_v55 }
 0x23a   :  { %v734_v58 = vpack.c.bf16 %v627_v57, %v626_v56 }
 0x23c   :  { %738 = vst [vmem:[%s1056_s4 + $0x8] sm:$0xff] %v734_v58  }

// kernel: discriminator_forward.9
= control target key start
LH: loop header
LB: loop body
LE: loop exit
PB: predicated region body
PF: predicated region fallthrough
CT: control target
= control target key end

     0   :  { %vm22_vm0 = vcmask 7168   ;;  %v1249_v48 = vmov 0.0   ;;  %s1568_s0 = inlined_call_operand.vmem [shape: bf16[512,128], index: 0, kind: input, shape index: {}]   ;;  %s1569_s1 = inlined_call_operand.vmem [shape: bf16[64,512], index: 1, kind: input, shape index: {}]   ;;  %s1570_s2 = inlined_call_operand.vmem [shape: f32[64,1], index: 2, kind: input, shape index: {}]   ;;  %s1571_s3 = inlined_call_operand.vmem [shape: f32[64,1], index: 3, kind: input, shape index: {}]   ;;  %s1572_s4 = inlined_call_operand.vmem [shape: bf16[1,64,128], index: 4, kind: output, shape index: {}]  }
   0x1   :  { %v1177_v0 = vld [vmem:[%s1568_s0 + $0x78] sm:$0xff]   ;;  %v1181_v4 = vld [vmem:[%s1568_s0 + $0x70] sm:$0xff]   ;;  %v1185_v8 = vld [vmem:[%s1568_s0 + $0x68] sm:$0xff]   ;;  %23 = vst.msk [vmem:[#allocation2] sm:$0xff] %vm22_vm0, %v1249_v48 }
   0x2   :  { %v1178_v1 = vld [vmem:[%s1568_s0 + $0xf8] sm:$0xff]   ;;  %1093 = vmatprep.subr.bf16.mxu0 %v1177_v0  ;;  %v1182_v5 = vld [vmem:[%s1568_s0 + $0xf0] sm:$0xff]   ;;  %v1186_v9 = vld [vmem:[%s1568_s0 + $0xe8] sm:$0xff]   ;;  %24 = vst.msk [vmem:[#allocation2 + $0x8] sm:$0xff] %vm22_vm0, %v1249_v48 }
   0x3   :  { %v1179_v2 = vld [vmem:[%s1568_s0 + $0x38] sm:$0xff]   ;;  %1133 = vmatprep.subr.bf16.mxu1 %v1178_v1  ;;  %v1183_v6 = vld [vmem:[%s1568_s0 + $0x30] sm:$0xff]   ;;  %v1187_v10 = vld [vmem:[%s1568_s0 + $0x28] sm:$0xff]   ;;  %25 = vst.msk [vmem:[#allocation2 + $0x10] sm:$0xff] %vm22_vm0, %v1249_v48 }
   0x4   :  { %v1180_v3 = vld [vmem:[%s1568_s0 + $0xb8] sm:$0xff]   ;;  %1094 = vmatpush3.bf16.msra.mxu0 %v1179_v2  ;;  %v1184_v7 = vld [vmem:[%s1568_s0 + $0xb0] sm:$0xff]   ;;  %v1188_v11 = vld [vmem:[%s1568_s0 + $0xa8] sm:$0xff]   ;;  %26 = vst.msk [vmem:[#allocation2 + $0x18] sm:$0xff] %vm22_vm0, %v1249_v48 }
   0x5   :  { %1134 = vmatpush3.bf16.msra.mxu1 %v1180_v3  ;;  %1095 = vmatprep.subr.bf16.mxu0 %v1181_v4  ;;  %v1189_v12 = vld [vmem:[%s1568_s0 + $0x60] sm:$0xff]   ;;  %v1193_v16 = vld [vmem:[%s1568_s0 + $0x58] sm:$0xff]   ;;  %v1197_v20 = vld [vmem:[%s1568_s0 + $0x50] sm:$0xff]   ;;  %27 = vst.msk [vmem:[#allocation2 + $0x20] sm:$0xff] %vm22_vm0, %v1249_v48 }
   0x6   :  { %1135 = vmatprep.subr.bf16.mxu1 %v1182_v5  ;;  %v1190_v13 = vld [vmem:[%s1568_s0 + $0xe0] sm:$0xff]   ;;  %v1194_v17 = vld [vmem:[%s1568_s0 + $0xd8] sm:$0xff]   ;;  %v1198_v21 = vld [vmem:[%s1568_s0 + $0xd0] sm:$0xff]   ;;  %28 = vst.msk [vmem:[#allocation2 + $0x28] sm:$0xff] %vm22_vm0, %v1249_v48 }
   0x7   :  { %v1191_v14 = vld [vmem:[%s1568_s0 + $0x20] sm:$0xff]   ;;  %v1195_v18 = vld [vmem:[%s1568_s0 + $0x18] sm:$0xff]   ;;  %v1199_v22 = vld [vmem:[%s1568_s0 + $0x10] sm:$0xff]   ;;  %29 = vst.msk [vmem:[#allocation2 + $0x30] sm:$0xff] %vm22_vm0, %v1249_v48 }
   0x8   :  { %1096 = vmatpush3.bf16.msra.mxu0 %v1183_v6  ;;  %v1192_v15 = vld [vmem:[%s1568_s0 + $0xa0] sm:$0xff]   ;;  %v1196_v19 = vld [vmem:[%s1568_s0 + $0x98] sm:$0xff]   ;;  %v1200_v23 = vld [vmem:[%s1568_s0 + $0x90] sm:$0xff]   ;;  %30 = vst.msk [vmem:[#allocation2 + $0x38] sm:$0xff] %vm22_vm0, %v1249_v48 }
   0x9   :  { %1136 = vmatpush3.bf16.msra.mxu1 %v1184_v7  ;;  %1097 = vmatprep.subr.bf16.mxu0 %v1185_v8  ;;  %v1201_v24 = vld [vmem:[%s1568_s0 + $0x48] sm:$0xff]   ;;  %v1205_v28 = vld [vmem:[%s1568_s0 + $0x40] sm:$0xff]   ;;  %31 = vst.msk [vmem:[#allocation3] sm:$0xff] %vm22_vm0, %v1249_v48  ;;  %32 = vst.msk [vmem:[#allocation3 + $0x8] sm:$0xff] %vm22_vm0, %v1249_v48 }
   0xa   :  { %1137 = vmatprep.subr.bf16.mxu1 %v1186_v9  ;;  %v1202_v25 = vld [vmem:[%s1568_s0 + $0xc8] sm:$0xff]   ;;  %v1206_v29 = vld [vmem:[%s1568_s0 + $0xc0] sm:$0xff]   ;;  %33 = vst.msk [vmem:[#allocation3 + $0x10] sm:$0xff] %vm22_vm0, %v1249_v48  ;;  %34 = vst.msk [vmem:[#allocation3 + $0x18] sm:$0xff] %vm22_vm0, %v1249_v48 }
   0xb   :  { %v1203_v26 = vld [vmem:[%s1568_s0 + $0x8] sm:$0xff]   ;;  %v1207_v30 = vld [vmem:[%s1568_s0] sm:$0xff]   ;;  %35 = vst.msk [vmem:[#allocation3 + $0x20] sm:$0xff] %vm22_vm0, %v1249_v48  ;;  %36 = vst.msk [vmem:[#allocation3 + $0x28] sm:$0xff] %vm22_vm0, %v1249_v48 }
   0xc   :  { %1098 = vmatpush3.bf16.msra.mxu0 %v1187_v10  ;;  %v1204_v27 = vld [vmem:[%s1568_s0 + $0x88] sm:$0xff]   ;;  %v1208_v31 = vld [vmem:[%s1568_s0 + $0x80] sm:$0xff]   ;;  %37 = vst.msk [vmem:[#allocation3 + $0x30] sm:$0xff] %vm22_vm0, %v1249_v48  ;;  %38 = vst.msk [vmem:[#allocation3 + $0x38] sm:$0xff] %vm22_vm0, %v1249_v48 }
   0xd   :  { %1138 = vmatpush3.bf16.msra.mxu1 %v1188_v11  ;;  %1099 = vmatprep.subr.bf16.mxu0 %v1189_v12  ;;  %v1209_v32 = vld [vmem:[%s1569_s1] ss:$16 sps:$4 sm:$0xff]   ;;  %v1211_v33 = vld [vmem:[%s1569_s1 + $0x4] ss:$16 sps:$4 sm:$0xff]   ;;  %v1212_v34 = vld [vmem:[%s1569_s1 + $0x8] ss:$16 sps:$4 sm:$0xff]  }
   0xe   :  { %1139 = vmatprep.subr.bf16.mxu1 %v1190_v13  ;;  %v1214_v35 = vld [vmem:[%s1569_s1 + $0xc] ss:$16 sps:$4 sm:$0xff]   ;;  %423 = vmatprep.mubr.bf16.mxu0 %v1211_v33  ;;  %v1215_v36 = vld [vmem:[%s1569_s1 + $0x24] ss:$16 sps:$4 sm:$0xff]   ;;  %v1219_v38 = vld [vmem:[%s1569_s1 + $0x20] ss:$16 sps:$4 sm:$0xff]  }
   0xf   :  { %488 = vmatprep.mubr.bf16.mxu1 %v1214_v35  ;;  %v1217_v37 = vld [vmem:[%s1569_s1 + $0x2c] ss:$16 sps:$4 sm:$0xff]   ;;  %v1220_v39 = vld [vmem:[%s1569_s1 + $0x28] ss:$16 sps:$4 sm:$0xff]   ;;  %v1221_v40 = vld [vmem:[%s1569_s1 + $0x44] ss:$16 sps:$4 sm:$0xff]  }
  0x10   :  { %1100 = vmatpush3.bf16.msra.mxu0 %v1191_v14  ;;  %v1223_v41 = vld [vmem:[%s1569_s1 + $0x4c] ss:$16 sps:$4 sm:$0xff]   ;;  %v1225_v42 = vld [vmem:[%s1569_s1 + $0x40] ss:$16 sps:$4 sm:$0xff]   ;;  %v1226_v43 = vld [vmem:[%s1569_s1 + $0x48] ss:$16 sps:$4 sm:$0xff]  }
  0x11   :  { %1140 = vmatpush3.bf16.msra.mxu1 %v1192_v15  ;;  %1101 = vmatprep.subr.bf16.mxu0 %v1193_v16  ;;  %v1227_v44 = vld [vmem:[%s1569_s1 + $0x64] ss:$16 sps:$4 sm:$0xff]   ;;  %v1229_v45 = vld [vmem:[%s1569_s1 + $0x6c] ss:$16 sps:$4 sm:$0xff]   ;;  %v1231_v46 = vld [vmem:[%s1569_s1 + $0x60] ss:$16 sps:$4 sm:$0xff]  }
  0x12   :  { %1141 = vmatprep.subr.bf16.mxu1 %v1194_v17  ;;  %v1232_v47 = vld [vmem:[%s1569_s1 + $0x68] ss:$16 sps:$4 sm:$0xff]  }
  0x14   :  { %1102 = vmatpush3.bf16.msra.mxu0 %v1195_v18 }
  0x15   :  { %1142 = vmatpush3.bf16.msra.mxu1 %v1196_v19  ;;  %1103 = vmatprep.subr.bf16.mxu0 %v1197_v20 }
  0x16   :  { %1143 = vmatprep.subr.bf16.mxu1 %v1198_v21 }
  0x18   :  { %1104 = vmatpush3.bf16.msra.mxu0 %v1199_v22 }
  0x19   :  { %1144 = vmatpush3.bf16.msra.mxu1 %v1200_v23  ;;  %1105 = vmatprep.subr.bf16.mxu0 %v1201_v24 }
  0x1a   :  { %1145 = vmatprep.subr.bf16.mxu1 %v1202_v25 }
  0x1c   :  { %1106 = vmatpush3.bf16.msra.mxu0 %v1203_v26 }
  0x1d   :  { %1146 = vmatpush3.bf16.msra.mxu1 %v1204_v27  ;;  %1107 = vmatprep.subr.bf16.mxu0 %v1205_v28 }
  0x1e   :  { %1147 = vmatprep.subr.bf16.mxu1 %v1206_v29 }
  0x20   :  { %1108 = vmatpush3.bf16.msra.mxu0 %v1207_v30 }
  0x21   :  { %1148 = vmatpush3.bf16.msra.mxu1 %v1208_v31 }
  0x23   :  { %424 = vmatmul.mubr.bf16.vlgmr.msra.gmra.mxu0 %v1209_v32 }
  0x24   :  { %489 = vmatmul.mubr.bf16.vlgmr.msra.gmra.mxu1 %v1212_v34  ;;  %431 = vmatprep.mubr.bf16.mxu0 %v1215_v36 }
  0x25   :  { %496 = vmatprep.mubr.bf16.mxu1 %v1217_v37 }
  0x2b   :  { %432 = vmatmul.mubr.bf16.gmra.mxu0 %v1219_v38 }
  0x2c   :  { %497 = vmatmul.mubr.bf16.gmra.mxu1 %v1220_v39  ;;  %439 = vmatprep.mubr.bf16.mxu0 %v1221_v40 }
  0x2d   :  { %504 = vmatprep.mubr.bf16.mxu1 %v1223_v41 }
  0x33   :  { %440 = vmatmul.mubr.bf16.gmra.mxu0 %v1225_v42 }
  0x34   :  { %505 = vmatmul.mubr.bf16.gmra.mxu1 %v1226_v43  ;;  %447 = vmatprep.mubr.bf16.mxu0 %v1227_v44 }
  0x35   :  { %512 = vmatprep.mubr.bf16.mxu1 %v1229_v45 }
  0x3b   :  { %448 = vmatmul.mubr.bf16.gmra.mxu0 %v1231_v46 }
  0x3c   :  { %513 = vmatmul.mubr.bf16.gmra.mxu1 %v1232_v47 }
  0xe3   :  { %v1109_v49 = vpop.f32.mrf.mxu0 }
  0xe4   :  { %v1149_v50 = vpop.f32.mrf.mxu1 }
  0xe5   :  { %v1110_v51 = vpop.f32.mrf.mxu0 }
  0xe6   :  { %v1111_v52 = vadd.f32 %v1110_v51, %v1109_v49  ;;  %v1150_v53 = vpop.f32.mrf.mxu1 }
  0xe7   :  { %v1151_v54 = vadd.f32 %v1150_v53, %v1149_v50  ;;  %v1112_v55 = vpop.f32.mrf.mxu0  ;;  %v1250_v53 = vmov 0  }
  0xe8   :  { %v1152_v56 = vpop.f32.mrf.mxu1  ;;  %1175 = vset.pattern.permute.xlu0 %v1250_v53  ;;  %1176 = vset.pattern.permute.xlu1 %v1250_v53 }
  0xe9   :  { %v491_v57 = vadd.f32 %v1151_v54, %v1111_v52  ;;  %v1113_v58 = vpop.f32.mrf.mxu0  ;;  %v521_v54 = vld [vmem:[#allocation2] sm:$0xff] }
  0xea   :  { %v1114_v59 = vadd.f32 %v1113_v58, %v1112_v55  ;;  %v1153_v60 = vpop.f32.mrf.mxu1 }
  0xeb   :  { %v1154_v61 = vadd.f32 %v1153_v60, %v1152_v56  ;;  %529 = vadd.xlane.f32.xlu0 %v491_v57  ;;  %v1115_v62 = vpop.f32.mrf.mxu0  ;;  %v570_v2 = vmul.f32 %v491_v57, %v491_v57 }
  0xec   :  { %v1155_v63 = vpop.f32.mrf.mxu1 }
  0xed   :  { %v494_v0 = vadd.f32 %v1154_v61, %v1114_v59  ;;  %v1116_v1 = vpop.f32.mrf.mxu0  ;;  %v563_v59 = vld [vmem:[#allocation3 + $0x8] sm:$0xff] }
  0xee   :  { %v1117_v3 = vadd.f32 %v1116_v1, %v1115_v62  ;;  %v1156_v4 = vpop.f32.mrf.mxu1  ;;  %v522_v62 = vld [vmem:[#allocation2 + $0x8] sm:$0xff]  ;;  %v523_v1 = vld [vmem:[#allocation2 + $0x10] sm:$0xff] }
  0xef   :  { %v1436_v5 = vpack.c.bf16 %v494_v0, %v491_v57  ;;  %v1157_v6 = vadd.f32 %v1156_v4, %v1155_v63  ;;  %578 = vadd.xlane.f32.xlu0 %v570_v2  ;;  %v1118_v7 = vpop.f32.mrf.mxu0  ;;  %v571_v8 = vmul.f32 %v494_v0, %v494_v0  ;;  %v562_v57 = vld [vmem:[#allocation3] sm:$0xff]  ;;  %v564_v4 = vld [vmem:[#allocation3 + $0x10] sm:$0xff] }
  0xf0   :  { %v1158_v9 = vpop.f32.mrf.mxu1 }
  0xf1   :  { %v499_v10 = vadd.f32 %v1157_v6, %v1117_v3  ;;  %580 = vadd.xlane.f32.xlu1 %v571_v8  ;;  %v1119_v11 = vpop.f32.mrf.mxu0 }
  0xf2   :  { %v1120_v12 = vadd.f32 %v1119_v11, %v1118_v7  ;;  %v1159_v13 = vpop.f32.mrf.mxu1 }
  0xf3   :  { %v1160_v14 = vadd.f32 %v1159_v13, %v1158_v9  ;;  %531 = vadd.xlane.f32.xlu0 %v494_v0  ;;  %v1121_v15 = vpop.f32.mrf.mxu0  ;;  %v572_v16 = vmul.f32 %v499_v10, %v499_v10  ;;  %v525_v13 = vld [vmem:[#allocation2 + $0x20] sm:$0xff] }
  0xf4   :  { %v1161_v17 = vpop.f32.mrf.mxu1 }
  0xf5   :  { %v502_v18 = vadd.f32 %v1160_v14, %v1120_v12  ;;  %533 = vadd.xlane.f32.xlu1 %v499_v10  ;;  %v1122_v19 = vpop.f32.mrf.mxu0 }
  0xf6   :  { %v1123_v20 = vadd.f32 %v1122_v19, %v1121_v15  ;;  %v1162_v21 = vpop.f32.mrf.mxu1  ;;  %v565_v19 = vld [vmem:[#allocation3 + $0x18] sm:$0xff] }
  0xf7   :  { %v1438_v22 = vpack.c.bf16 %v502_v18, %v499_v10  ;;  %v1163_v23 = vadd.f32 %v1162_v21, %v1161_v17  ;;  %582 = vadd.xlane.f32.xlu0 %v572_v16  ;;  %v1124_v24 = vpop.f32.mrf.mxu0  ;;  %v573_v32 = vmul.f32 %v502_v18, %v502_v18  ;;  %v524_v10 = vld [vmem:[#allocation2 + $0x18] sm:$0xff] }
  0xf8   :  { %v1164_v25 = vpop.f32.mrf.mxu1 }
  0xf9   :  { %v507_v26 = vadd.f32 %v1163_v23, %v1123_v20  ;;  %535 = vadd.xlane.f32.xlu1 %v502_v18  ;;  %v1125_v27 = vpop.f32.mrf.mxu0 }
  0xfa   :  { %v1126_v28 = vadd.f32 %v1125_v27, %v1124_v24  ;;  %v1165_v29 = vpop.f32.mrf.mxu1 }
  0xfb   :  { %v1166_v30 = vadd.f32 %v1165_v29, %v1164_v25  ;;  %537 = vadd.xlane.f32.xlu0 %v507_v26  ;;  %v1127_v31 = vpop.f32.mrf.mxu0  ;;  %v574_v33 = vmul.f32 %v507_v26, %v507_v26  ;;  %v566_v25 = vld [vmem:[#allocation3 + $0x20] sm:$0xff] }
  0xfc   :  { %v1167_v34 = vpop.f32.mrf.mxu1 }
  0xfd   :  { %v510_v35 = vadd.f32 %v1166_v30, %v1126_v28  ;;  %584 = vadd.xlane.f32.xlu1 %v573_v32  ;;  %v1128_v36 = vpop.f32.mrf.mxu0 }
  0xfe   :  { %v1129_v37 = vadd.f32 %v1128_v36, %v1127_v31  ;;  %v1168_v38 = vpop.f32.mrf.mxu1  ;;  %v526_v31 = vld [vmem:[#allocation2 + $0x28] sm:$0xff] }
  0xff   :  { %v1440_v39 = vpack.c.bf16 %v510_v35, %v507_v26  ;;  %v1169_v40 = vadd.f32 %v1168_v38, %v1167_v34  ;;  %586 = vadd.xlane.f32.xlu0 %v574_v33  ;;  %v1130_v41 = vpop.f32.mrf.mxu0  ;;  %v575_v45 = vmul.f32 %v510_v35, %v510_v35 }
 0x100   :  { %v1170_v42 = vpop.f32.mrf.mxu1 }
 0x101   :  { %v515_v43 = vadd.f32 %v1169_v40, %v1129_v37  ;;  %539 = vadd.xlane.f32.xlu1 %v510_v35  ;;  %v1131_v44 = vpop.f32.mrf.mxu0  ;;  %v527_v40 = vld [vmem:[#allocation2 + $0x30] sm:$0xff] }
 0x102   :  { %v1132_v46 = vadd.f32 %v1131_v44, %v1130_v41  ;;  %v1171_v47 = vpop.f32.mrf.mxu1 }
 0x103   :  { %541 = vadd.xlane.f32.xlu0 %v515_v43  ;;  %v1172_v48 = vadd.f32 %v1171_v47, %v1170_v42  ;;  %v576_v49 = vmul.f32 %v515_v43, %v515_v43 }
 0x105   :  { %v518_v50 = vadd.f32 %v1172_v48, %v1132_v46  ;;  %588 = vadd.xlane.f32.xlu1 %v575_v45  ;;  %v567_v46 = vld [vmem:[#allocation3 + $0x28] sm:$0xff] }
 0x107   :  { %v1442_v51 = vpack.c.bf16 %v518_v50, %v515_v43  ;;  %590 = vadd.xlane.f32.xlu0 %v576_v49  ;;  %v577_v52 = vmul.f32 %v518_v50, %v518_v50 }
 0x109   :  { %543 = vadd.xlane.f32.xlu1 %v518_v50 }
 0x10d   :  { %592 = vadd.xlane.f32.xlu1 %v577_v52 }
 0x174   :  { %v530_v55 = vpop.xlane.xlu0 %529 }
 0x175   :  { %v545_v56 = vadd.f32 %v530_v55, %v521_v54  ;;  %v568_v54 = vld [vmem:[#allocation3 + $0x30] sm:$0xff] }
 0x177   :  { %554 = vst.msk [vmem:[#allocation2] sm:$0xff] %vm22_vm0, %v545_v56 }
 0x178   :  { %v579_v58 = vpop.xlane.xlu0 %578 }
 0x179   :  { %v594_v60 = vadd.f32 %v579_v58, %v562_v57 }
 0x17a   :  { %v581_v61 = vpop.xlane.xlu1 %580 }
 0x17b   :  { %602 = vst.msk [vmem:[#allocation3] sm:$0xff] %vm22_vm0, %v594_v60  ;;  %v595_v63 = vadd.f32 %v581_v61, %v563_v59  ;;  %v528_v61 = vld [vmem:[#allocation2 + $0x38] sm:$0xff] }
 0x17c   :  { %v532_v0 = vpop.xlane.xlu0 %531 }
 0x17d   :  { %603 = vst.msk [vmem:[#allocation3 + $0x8] sm:$0xff] %vm22_vm0, %v595_v63  ;;  %v546_v2 = vadd.f32 %v532_v0, %v522_v62 }
 0x17e   :  { %v534_v3 = vpop.xlane.xlu1 %533  ;;  %v656_v6 = vld [vmem:[#allocation2] sm:$0xff] }
 0x17f   :  { %555 = vst.msk [vmem:[#allocation2 + $0x8] sm:$0xff] %vm22_vm0, %v546_v2  ;;  %v547_v7 = vadd.f32 %v534_v3, %v523_v1  ;;  %v1448_v8 = vmul.f32 0.03125, %v656_v6 }
 0x180   :  { %v583_v9 = vpop.xlane.xlu0 %582 }
 0x181   :  { %556 = vst.msk [vmem:[#allocation2 + $0x10] sm:$0xff] %vm22_vm0, %v547_v7  ;;  %v596_v11 = vadd.f32 %v583_v9, %v564_v4  ;;  %v688_v17 = vmul.f32 %v1448_v8, %v1448_v8 }
 0x182   :  { %v536_v12 = vpop.xlane.xlu1 %535  ;;  %v672_v14 = vld [vmem:[#allocation3] sm:$0xff] }
 0x183   :  { %604 = vst.msk [vmem:[#allocation3 + $0x10] sm:$0xff] %vm22_vm0, %v596_v11  ;;  %v548_v15 = vadd.f32 %v536_v12, %v524_v10  ;;  %v680_v16 = vmul.f32 0.03125, %v672_v14  ;;  %v569_v12 = vld [vmem:[#allocation3 + $0x38] sm:$0xff] }
 0x184   :  { %v538_v18 = vpop.xlane.xlu0 %537  ;;  %v673_v23 = vld [vmem:[#allocation3 + $0x8] sm:$0xff] }
 0x185   :  { %557 = vst.msk [vmem:[#allocation2 + $0x18] sm:$0xff] %vm22_vm0, %v548_v15  ;;  %v549_v20 = vadd.f32 %v538_v18, %v525_v13  ;;  %v696_v21 = vsub.f32 %v680_v16, %v688_v17  ;;  %v681_v32 = vmul.f32 0.03125, %v673_v23  ;;  %v712_v17 = vld [vmem:[%s1570_s2] sm:$0xff] }
 0x186   :  { %v585_v24 = vpop.xlane.xlu1 %584  ;;  %v657_v26 = vld [vmem:[#allocation2 + $0x8] sm:$0xff] }
 0x187   :  { %558 = vst.msk [vmem:[#allocation2 + $0x20] sm:$0xff] %vm22_vm0, %v549_v20  ;;  %v597_v27 = vadd.f32 %v585_v24, %v565_v19  ;;  %v704_v28 = vmax.f32 %v696_v21, 0.0  ;;  %v1456_v29 = vmul.f32 0.03125, %v657_v26 }
 0x188   :  { %v587_v30 = vpop.xlane.xlu0 %586  ;;  %v658_v33 = vld [vmem:[#allocation2 + $0x10] sm:$0xff] }
 0x189   :  { %605 = vst.msk [vmem:[#allocation3 + $0x18] sm:$0xff] %vm22_vm0, %v597_v27  ;;  %v598_v34 = vadd.f32 %v587_v30, %v566_v25  ;;  %v720_v35 = vadd.f32 1e-05, %v704_v28  ;;  %v689_v36 = vmul.f32 %v1456_v29, %v1456_v29  ;;  %v1461_v37 = vmul.f32 0.03125, %v658_v33 }
 0x18a   :  { %v540_v38 = vpop.xlane.xlu1 %539  ;;  %v674_v41 = vld [vmem:[#allocation3 + $0x10] sm:$0xff] }
 0x18b   :  { %606 = vst.msk [vmem:[#allocation3 + $0x20] sm:$0xff] %vm22_vm0, %v598_v34  ;;  %v550_v42 = vadd.f32 %v540_v38, %v526_v31  ;;  %1233 = vrsqrt.f32 %v720_v35  ;;  %v697_v43 = vsub.f32 %v681_v32, %v689_v36  ;;  %v682_v44 = vmul.f32 0.03125, %v674_v41  ;;  %v713_v32 = vld [vmem:[%s1570_s2 + $0x8] sm:$0xff] }
 0x18c   :  { %v542_v45 = vpop.xlane.xlu0 %541  ;;  %v690_v47 = vmul.f32 %v1461_v37, %v1461_v37  ;;  %v659_v48 = vld [vmem:[#allocation2 + $0x18] sm:$0xff] }
 0x18d   :  { %559 = vst.msk [vmem:[#allocation2 + $0x28] sm:$0xff] %vm22_vm0, %v550_v42  ;;  %v551_v49 = vadd.f32 %v542_v45, %v527_v40  ;;  %v705_v50 = vmax.f32 %v697_v43, 0.0  ;;  %v1467_v52 = vmul.f32 0.03125, %v659_v48  ;;  %v745_v48 = vld [vmem:[%s1571_s3 + $0x8] sm:$0xff] }
 0x18e   :  { %v589_v53 = vpop.xlane.xlu1 %588  ;;  %v698_v55 = vsub.f32 %v682_v44, %v690_v47  ;;  %v660_v56 = vld [vmem:[#allocation2 + $0x20] sm:$0xff] }
 0x18f   :  { %560 = vst.msk [vmem:[#allocation2 + $0x30] sm:$0xff] %vm22_vm0, %v551_v49  ;;  %v599_v57 = vadd.f32 %v589_v53, %v567_v46  ;;  %v721_v58 = vadd.f32 1e-05, %v705_v50  ;;  %v1470_v59 = vmul.f32 0.03125, %v660_v56  ;;  %v691_v2 = vmul.f32 %v1467_v52, %v1467_v52  ;;  %v744_v47 = vld [vmem:[%s1571_s3] sm:$0xff] }
 0x190   :  { %v591_v60 = vpop.xlane.xlu0 %590  ;;  %v706_v62 = vmax.f32 %v698_v55, 0.0  ;;  %v675_v63 = vld [vmem:[#allocation3 + $0x18] sm:$0xff] }
 0x191   :  { %607 = vst.msk [vmem:[#allocation3 + $0x28] sm:$0xff] %vm22_vm0, %v599_v57  ;;  %v600_v0 = vadd.f32 %v591_v60, %v568_v54  ;;  %1235 = vrsqrt.f32 %v721_v58  ;;  %v683_v1 = vmul.f32 0.03125, %v675_v63  ;;  %v692_v6 = vmul.f32 %v1470_v59, %v1470_v59  ;;  %v714_v58 = vld [vmem:[%s1570_s2 + $0x10] sm:$0xff]  ;;  %v715_v60 = vld [vmem:[%s1570_s2 + $0x18] sm:$0xff] }
 0x192   :  { %v544_v3 = vpop.xlane.xlu1 %543  ;;  %v676_v4 = vld [vmem:[#allocation3 + $0x20] sm:$0xff]  ;;  %v722_v9 = vadd.f32 1e-05, %v706_v62 }
 0x193   :  { %608 = vst.msk [vmem:[#allocation3 + $0x30] sm:$0xff] %vm22_vm0, %v600_v0  ;;  %v552_v7 = vadd.f32 %v544_v3, %v528_v61  ;;  %v699_v10 = vsub.f32 %v683_v1, %v691_v2  ;;  %v684_v11 = vmul.f32 0.03125, %v676_v4  ;;  %v747_v2 = vld [vmem:[%s1571_s3 + $0x18] sm:$0xff] }
 0x194   :  { %v661_v13 = vld [vmem:[#allocation2 + $0x28] sm:$0xff]  ;;  %1237 = vrsqrt.f32 %v722_v9  ;;  %v746_v9 = vld [vmem:[%s1571_s3 + $0x10] sm:$0xff] }
 0x195   :  { %561 = vst.msk [vmem:[#allocation2 + $0x38] sm:$0xff] %vm22_vm0, %v552_v7  ;;  %v707_v14 = vmax.f32 %v699_v10, 0.0  ;;  %v1479_v15 = vmul.f32 0.03125, %v661_v13  ;;  %v700_v18 = vsub.f32 %v684_v11, %v692_v6  ;;  %v717_v10 = vld [vmem:[%s1570_s2 + $0x28] sm:$0xff] }
 0x196   :  { %v593_v16 = vpop.xlane.xlu1 %592  ;;  %v662_v23 = vld [vmem:[#allocation2 + $0x30] sm:$0xff] }
 0x197   :  { %v601_v19 = vadd.f32 %v593_v16, %v569_v12  ;;  %v723_v20 = vadd.f32 1e-05, %v707_v14  ;;  %v693_v21 = vmul.f32 %v1479_v15, %v1479_v15  ;;  %v708_v28 = vmax.f32 %v700_v18, 0.0 }
 0x198   :  { %v1234_v24 = vpop.eup %1233  ;;  %v677_v25 = vld [vmem:[#allocation3 + $0x28] sm:$0xff]  ;;  %v1487_v30 = vmul.f32 0.03125, %v662_v23 }
 0x199   :  { %609 = vst.msk [vmem:[#allocation3 + $0x38] sm:$0xff] %vm22_vm0, %v601_v19  ;;  %v736_v26 = vmul.f32 %v1234_v24, %v712_v17  ;;  %1239 = vrsqrt.f32 %v723_v20  ;;  %v685_v27 = vmul.f32 0.03125, %v677_v25  ;;  %v724_v41 = vadd.f32 1e-05, %v708_v28  ;;  %v719_v19 = vld [vmem:[%s1570_s2 + $0x38] sm:$0xff] }
 0x19a   :  { %v678_v34 = vld [vmem:[#allocation3 + $0x30] sm:$0xff]  ;;  %v694_v42 = vmul.f32 %v1487_v30, %v1487_v30  ;;  %v751_v24 = vld [vmem:[%s1571_s3 + $0x38] sm:$0xff] }
 0x19b   :  { %786 = vperm.xlu0 %1175, %v736_v26   ;;  %v701_v31 = vsub.f32 %v685_v27, %v693_v21  ;;  %v752_v40 = vmul.f32 %v736_v26, %v1448_v8  ;;  %v686_v46 = vmul.f32 0.03125, %v678_v34 }
 0x19c   :  { %v663_v33 = vld [vmem:[#allocation2 + $0x38] sm:$0xff] }
 0x19d   :  { %v709_v35 = vmax.f32 %v701_v31, 0.0  ;;  %v1492_v36 = vmul.f32 0.03125, %v663_v33  ;;  %v760_v53 = vsub.f32 %v744_v47, %v752_v40  ;;  %v702_v56 = vsub.f32 %v686_v46, %v694_v42  ;;  %v718_v31 = vld [vmem:[%s1570_s2 + $0x30] sm:$0xff] }
 0x19e   :  { %v1236_v38 = vpop.eup %1235  ;;  %v750_v33 = vld [vmem:[%s1571_s3 + $0x30] sm:$0xff]  ;;  %v1051_v40 = vunpack.c.h.bf16 %v1436_v5 }
 0x19f   :  { %v737_v43 = vmul.f32 %v1236_v38, %v713_v32  ;;  %v725_v44 = vadd.f32 1e-05, %v709_v35  ;;  %v695_v45 = vmul.f32 %v1492_v36, %v1492_v36  ;;  %v710_v1 = vmax.f32 %v702_v56, 0.0 }
 0x1a0   :  { %v679_v49 = vld [vmem:[#allocation3 + $0x38] sm:$0xff]  ;;  %v1050_v38 = vunpack.c.l.bf16 %v1436_v5 }
 0x1a1   :  { %791 = vperm.xlu1 %1176, %v737_v43   ;;  %v753_v8 = vmul.f32 %v737_v43, %v1456_v29  ;;  %1241 = vrsqrt.f32 %v725_v44  ;;  %v687_v50 = vmul.f32 0.03125, %v679_v49  ;;  %v1238_v57 = vpop.eup %1237  ;;  %v726_v7 = vadd.f32 1e-05, %v710_v1 }
 0x1a2   :  { %1243 = vrsqrt.f32 %v724_v41  ;;  %v738_v62 = vmul.f32 %v1238_v57, %v714_v58 }
 0x1a3   :  { %v761_v54 = vsub.f32 %v745_v48, %v753_v8  ;;  %v703_v55 = vsub.f32 %v687_v50, %v695_v45 }
 0x1a4   :  { %v754_v6 = vmul.f32 %v738_v62, %v1461_v37  ;;  %v749_v37 = vld [vmem:[%s1571_s3 + $0x28] sm:$0xff] }
 0x1a5   :  { %834 = vperm.xlu1 %1176, %v760_v53   ;;  %839 = vperm.xlu0 %1175, %v761_v54   ;;  %v711_v61 = vmax.f32 %v703_v55, 0.0  ;;  %v1055_v53 = vunpack.c.h.bf16 %v1438_v22  ;;  %v1054_v54 = vunpack.c.l.bf16 %v1438_v22 }
 0x1a6   :  { %v1240_v29 = vpop.eup %1239  ;;  %v762_v13 = vsub.f32 %v746_v9, %v754_v6 }
 0x1a7   :  { %v739_v63 = vmul.f32 %v1240_v29, %v715_v60  ;;  %v727_v0 = vadd.f32 1e-05, %v711_v61 }
 0x1a9   :  { %796 = vperm.xlu1 %1176, %v738_v62   ;;  %v755_v3 = vmul.f32 %v739_v63, %v1467_v52  ;;  %1245 = vrsqrt.f32 %v727_v0  ;;  %v716_v52 = vld [vmem:[%s1570_s2 + $0x20] sm:$0xff] }
 0x1aa   :  { %1247 = vrsqrt.f32 %v726_v7 }
 0x1ab   :  { %v763_v4 = vsub.f32 %v747_v2, %v755_v3  ;;  %v1059_v3 = vunpack.c.h.bf16 %v1440_v39 }
 0x1ad   :  { %849 = vperm.xlu0 %1175, %v763_v4   ;;  %801 = vperm.xlu1 %1176, %v739_v63   ;;  %v1058_v4 = vunpack.c.l.bf16 %v1440_v39 }
 0x1ae   :  { %v1242_v11 = vpop.eup %1241 }
 0x1af   :  { %v1244_v12 = vpop.eup %1243  ;;  %v741_v14 = vmul.f32 %v1242_v11, %v717_v10 }
 0x1b0   :  { %v740_v18 = vmul.f32 %v1244_v12, %v716_v52 }
 0x1b1   :  { %844 = vperm.xlu1 %1176, %v762_v13   ;;  %v757_v16 = vmul.f32 %v741_v14, %v1479_v15  ;;  %v748_v15 = vld [vmem:[%s1571_s3 + $0x20] sm:$0xff] }
 0x1b2   :  { %v756_v23 = vmul.f32 %v740_v18, %v1470_v59 }
 0x1b3   :  { %v765_v17 = vsub.f32 %v749_v37, %v757_v16 }
 0x1b4   :  { %v764_v27 = vsub.f32 %v748_v15, %v756_v23 }
 0x1b5   :  { %859 = vperm.xlu0 %1175, %v765_v17   ;;  %806 = vperm.xlu1 %1176, %v740_v18   ;;  %v1063_v18 = vunpack.c.h.bf16 %v1442_v51 }
 0x1b6   :  { %v1246_v20 = vpop.eup %1245 }
 0x1b7   :  { %v743_v21 = vmul.f32 %v1246_v20, %v719_v19  ;;  %v1248_v28 = vpop.eup %1247  ;;  %v1062_v19 = vunpack.c.l.bf16 %v1442_v51 }
 0x1b8   :  { %v742_v59 = vmul.f32 %v1248_v28, %v718_v31 }
 0x1b9   :  { %811 = vperm.xlu1 %1176, %v741_v14   ;;  %v759_v25 = vmul.f32 %v743_v21, %v1492_v36 }
 0x1ba   :  { %v758_v32 = vmul.f32 %v742_v59, %v1487_v30 }
 0x1bb   :  { %v767_v26 = vsub.f32 %v751_v24, %v759_v25 }
 0x1bc   :  { %v766_v34 = vsub.f32 %v750_v33, %v758_v32 }
 0x1bd   :  { %869 = vperm.xlu0 %1175, %v767_v26   ;;  %854 = vperm.xlu1 %1176, %v764_v27  }
 0x1c1   :  { %816 = vperm.xlu1 %1176, %v742_v59  }
 0x1c5   :  { %821 = vperm.xlu1 %1176, %v743_v21  }
 0x1c9   :  { %864 = vperm.xlu1 %1176, %v766_v34  }
 0x216   :  { %v787_v35 = vpop.permute.xlu0 %786 }
 0x217   :  { %v824_v41 = vmul.f32 %v1050_v38, %v787_v35 }
 0x21c   :  { %v792_v36 = vpop.permute.xlu1 %791 }
 0x21d   :  { %v825_v42 = vmul.f32 %v1051_v40, %v792_v36 }
 0x220   :  { %v835_v43 = vpop.permute.xlu1 %834  ;;  %v840_v44 = vpop.permute.xlu0 %839 }
 0x221   :  { %v872_v45 = vadd.f32 %v835_v43, %v824_v41  ;;  %v873_v46 = vadd.f32 %v840_v44, %v825_v42 }
 0x223   :  { %vm880_vm1 = vcmp.gt.f32.partialorder %v872_v45, 0.0  ;;  %v888_v30 = vmul.f32 0.2, %v872_v45  ;;  %vm881_vm2 = vcmp.gt.f32.partialorder %v873_v46, 0.0  ;;  %v889_v47 = vmul.f32 0.2, %v873_v46 }
 0x224   :  { %v797_v48 = vpop.permute.xlu1 %796 }
 0x225   :  { %v896_v49 = vsel %vm880_vm1, %v872_v45, %v888_v30  ;;  %v897_v8 = vsel %vm881_vm2, %v873_v46, %v889_v47  ;;  %v826_v57 = vmul.f32 %v1054_v54, %v797_v48 }
 0x226   :  { %v1067_v50 = vpack.c.bf16 %v897_v8, %v896_v49 }
 0x228   :  { %1068 = vst [vmem:[%s1572_s4] sm:$0xff] %v1067_v50   ;;  %v802_v5 = vpop.permute.xlu1 %801  ;;  %v850_v56 = vpop.permute.xlu0 %849 }
 0x229   :  { %v827_v55 = vmul.f32 %v1055_v53, %v802_v5 }
 0x22b   :  { %v875_v58 = vadd.f32 %v850_v56, %v827_v55 }
 0x22c   :  { %v845_v60 = vpop.permute.xlu1 %844 }
 0x22d   :  { %v891_v61 = vmul.f32 0.2, %v875_v58  ;;  %v874_v29 = vadd.f32 %v845_v60, %v826_v57  ;;  %vm883_vm3 = vcmp.gt.f32.partialorder %v875_v58, 0.0 }
 0x22f   :  { %vm882_vm4 = vcmp.gt.f32.partialorder %v874_v29, 0.0  ;;  %v890_v62 = vmul.f32 0.2, %v874_v29  ;;  %v899_v0 = vsel %vm883_vm3, %v875_v58, %v891_v61 }
 0x230   :  { %v807_v63 = vpop.permute.xlu1 %806  ;;  %v860_v7 = vpop.permute.xlu0 %859 }
 0x231   :  { %v898_v1 = vsel %vm882_vm4, %v874_v29, %v890_v62  ;;  %v828_v9 = vmul.f32 %v1058_v4, %v807_v63 }
 0x232   :  { %v1072_v2 = vpack.c.bf16 %v899_v0, %v898_v1 }
 0x234   :  { %1090 = vst [vmem:[%s1572_s4 + $0x8] sm:$0xff] %v1072_v2   ;;  %v812_v22 = vpop.permute.xlu1 %811 }
 0x235   :  { %v829_v6 = vmul.f32 %v1059_v3, %v812_v22 }
 0x237   :  { %v877_v10 = vadd.f32 %v860_v7, %v829_v6 }
 0x238   :  { %v855_v11 = vpop.permute.xlu1 %854  ;;  %v870_v21 = vpop.permute.xlu0 %869 }
 0x239   :  { %v893_v12 = vmul.f32 0.2, %v877_v10  ;;  %v876_v13 = vadd.f32 %v855_v11, %v828_v9  ;;  %vm885_vm5 = vcmp.gt.f32.partialorder %v877_v10, 0.0 }
 0x23b   :  { %vm884_vm6 = vcmp.gt.f32.partialorder %v876_v13, 0.0  ;;  %v892_v14 = vmul.f32 0.2, %v876_v13  ;;  %v901_v16 = vsel %vm885_vm5, %v877_v10, %v893_v12 }
 0x23c   :  { %v817_v37 = vpop.permute.xlu1 %816 }
 0x23d   :  { %v900_v52 = vsel %vm884_vm6, %v876_v13, %v892_v14  ;;  %v830_v23 = vmul.f32 %v1062_v19, %v817_v37 }
 0x23e   :  { %v1077_v17 = vpack.c.bf16 %v901_v16, %v900_v52 }
 0x240   :  { %1091 = vst [vmem:[%s1572_s4 + $0x10] sm:$0xff] %v1077_v17   ;;  %v822_v39 = vpop.permute.xlu1 %821 }
 0x241   :  { %v831_v20 = vmul.f32 %v1063_v18, %v822_v39 }
 0x243   :  { %v879_v24 = vadd.f32 %v870_v21, %v831_v20 }
 0x244   :  { %v865_v15 = vpop.permute.xlu1 %864 }
 0x245   :  { %v895_v25 = vmul.f32 0.2, %v879_v24  ;;  %v878_v26 = vadd.f32 %v865_v15, %v830_v23  ;;  %vm887_vm7 = vcmp.gt.f32.partialorder %v879_v24, 0.0 }
 0x247   :  { %vm886_vm8 = vcmp.gt.f32.partialorder %v878_v26, 0.0  ;;  %v894_v27 = vmul.f32 0.2, %v878_v26  ;;  %v903_v31 = vsel %vm887_vm7, %v879_v24, %v895_v25 }
 0x249   :  { %v902_v28 = vsel %vm886_vm8, %v878_v26, %v894_v27 }
 0x24a   :  { %v1082_v59 = vpack.c.bf16 %v903_v31, %v902_v28 }
 0x24c   :  { %1092 = vst [vmem:[%s1572_s4 + $0x18] sm:$0xff] %v1082_v59  }

</bundles_post_ra>
